<compile_context>
chip_gen: v5e
topology: v5e:2x2
jax: 0.10.0
libtpu: 0.0.40
codegen_flags: <defaults>
</compile_context>

<pallas_src>
import functools

import jax
import jax.numpy as jnp
from jax import lax
from jax.experimental import pallas as pl
from jax.experimental.pallas import tpu as pltpu


# -----------------------------------------------------------------------------
# Pallas kernel: gather + GRU recurrence + hoisted output projection, per chunk
# -----------------------------------------------------------------------------
def gru_encoder_kernel(
    ids_ref,      # SMEM (S*T*Bs,) int32  scalar-prefetched token ids [shard, t, b]
    table_ref,    # VMEM (V, 1, 3H) f32   pre-projected embedding table, resident
    whh_ref,      # VMEM (H, 3H)   bf16   fused [W_hr | W_hz | W_hn], resident
    bhn_ref,      # VMEM (1, H)    f32    hidden-side bias of the n gate
    wout_ref,     # VMEM (H, H)    bf16   output Linear weight, resident
    bout_ref,     # VMEM (1, H)    f32    output Linear bias
    out_ref,      # VMEM (Bs, Tc*H) f32   batch-first output block for (shard, chunk)
    h_ref,        # scratch (Bs, H) f32       persistent GRU state across T-chunks
    gi_ref,       # scratch (Tc*Bs, 3H) f32   gathered input-side gate pre-activations
    hs_ref,       # scratch (Tc*Bs, H) bf16   chunk hidden states (MXU input)
):
    Bs, H = h_ref.shape
    Tc = hs_ref.shape[0] // Bs
    T = Tc * pl.num_programs(1)

    # New batch shard -> reset the recurrent state (h0 = 0, PyTorch default).
    @pl.when(pl.program_id(1) == 0)
    def _():
        h_ref[...] = jnp.zeros_like(h_ref)

    # ---- In-kernel embedding gather (replaces host gather + input projection).
    # Each row of the projected table already is gi = x @ W_ih + b_i.
    base = (pl.program_id(0) * T + pl.program_id(1) * Tc) * Bs
    for j in range(Tc * Bs):                         # static unroll: all offsets static
        tok = ids_ref[base + j]                      # dynamic SMEM scalar read
        gi_ref[pl.ds(j, 1), :] = table_ref[tok]      # (1, 3H) VMEM->VMEM row copy

    # ---- GRU recurrence (serial over time).  h carried in registers; the live
    # set per step is a handful of vregs, so full static unroll is safe here.
    # (For much larger Tc, switch to lax.fori_loop with a bounded unroll.)
    whh = whh_ref[...]
    bhn = bhn_ref[...]
    h = h_ref[...]
    for t in range(Tc):
        gi = gi_ref[pl.ds(t * Bs, Bs), :]                              # (Bs, 3H) f32
        gh = jnp.dot(h.astype(jnp.bfloat16), whh,
                     preferred_element_type=jnp.float32)               # (Bs, 3H) f32
        r = jax.nn.sigmoid(gi[:, :H] + gh[:, :H])
        z = jax.nn.sigmoid(gi[:, H:2 * H] + gh[:, H:2 * H])
        n = jnp.tanh(gi[:, 2 * H:] + r * (gh[:, 2 * H:] + bhn))
        h = (1.0 - z) * n + z * h
        hs_ref[pl.ds(t * Bs, Bs), :] = h.astype(jnp.bfloat16)
    h_ref[...] = h

    # ---- Hoisted output projection: one (Tc*Bs, H) @ (H, H) bf16 MXU matmul.
    proj = jnp.dot(hs_ref[...], wout_ref[...],
                   preferred_element_type=jnp.float32) + bout_ref[...]

    # Scatter time-major rows into the batch-first (Bs, Tc*H) output slab.
    # Every store is lane-aligned (offsets are static multiples of H=128) and
    # unmasked; the wrapper's reshape to (B, T, H) is then free.
    for t in range(Tc):
        out_ref[:, pl.ds(t * H, H)] = proj[t * Bs:(t + 1) * Bs, :]


# -----------------------------------------------------------------------------
# Wrapper
# -----------------------------------------------------------------------------
@functools.partial(jax.jit, static_argnames=("t_chunk", "batch_shards"))
def simple_text_encoder(token_ids, params, *, t_chunk=16, batch_shards=1):
    """token_ids: (B, T) int32 -> (B, T, H) float32 (batch_first, like PyTorch)."""
    V, E = params["embedding"].shape
    H = params["w_out"].shape[1]
    B, T = token_ids.shape

    Tc = min(t_chunk, T)
    S = batch_shards
    assert T % Tc == 0, "T must be divisible by the chunk size"
    assert B % S == 0, "B must be divisible by the number of batch shards"
    Bs = B // S
    assert Bs % 8 == 0 and H % 128 == 0, "need sublane/lane-aligned Bs and H"
    # TODO(synk): general (unaligned) Bs/H/T would need padding + masking.

    # Pre-project the embedding table once (project-then-gather == gather-then-
    # project).  Kept f32: it only feeds elementwise gate math, not the MXU.
    table = (params["embedding"] @ params["w_ih"] + params["b_i"])        # (V, 3H)
    table = table.reshape(V, 1, 3 * H)

    # bf16 weights for the MXU matmuls (f32 accumulation inside the kernel).
    w_hh = params["w_hh"].astype(jnp.bfloat16)                            # (H, 3H)
    w_out = params["w_out"].astype(jnp.bfloat16)                          # (H, H)

    # Token ids in [shard, time, batch-within-shard] order, flat for SMEM prefetch.
    ids = (token_ids.reshape(S, Bs, T).transpose(0, 2, 1)
           .reshape(S * T * Bs).astype(jnp.int32))

    grid = (S, T // Tc)

    out = pl.pallas_call(
        gru_encoder_kernel,
        out_shape=jax.ShapeDtypeStruct((B, T * H), jnp.float32),
        grid_spec=pltpu.PrefetchScalarGridSpec(
            num_scalar_prefetch=1,                       # token ids -> SMEM
            grid=grid,
            in_specs=[
                # Resident constants: single-buffered (no pointless double buffer).
                pl.BlockSpec((V, 1, 3 * H), lambda s, c, ids: (0, 0, 0),
                             pipeline_mode=pl.Buffered(1)),   # projected table
                pl.BlockSpec((H, 3 * H), lambda s, c, ids: (0, 0),
                             pipeline_mode=pl.Buffered(1)),   # W_hh (bf16)
                pl.BlockSpec((1, H), lambda s, c, ids: (0, 0),
                             pipeline_mode=pl.Buffered(1)),   # b_hn
                pl.BlockSpec((H, H), lambda s, c, ids: (0, 0),
                             pipeline_mode=pl.Buffered(1)),   # W_out (bf16)
                pl.BlockSpec((1, H), lambda s, c, ids: (0, 0),
                             pipeline_mode=pl.Buffered(1)),   # b_out
            ],
            # Lane-dense batch-first output slab: (Bs, Tc*H) block of (B, T*H).
            out_specs=pl.BlockSpec((Bs, Tc * H), lambda s, c, ids: (s, c)),
            scratch_shapes=[
                pltpu.VMEM((Bs, H), jnp.float32),            # GRU state h
                pltpu.VMEM((Tc * Bs, 3 * H), jnp.float32),   # gathered gi chunk
                pltpu.VMEM((Tc * Bs, H), jnp.bfloat16),      # chunk hidden states
            ],
        ),
        compiler_params=pltpu.CompilerParams(
            # batch shards independent (v7x: 2 TCs); time chunks strictly serial.
            dimension_semantics=("parallel", "arbitrary"),
            # Under v7x's 64 MiB physical VMEM, above v5e's 16 MiB scoped default.
            vmem_limit_bytes=48 * 1024 * 1024,
        ),
    )(ids, table, w_hh, params["b_hn"], w_out, params["b_out"])

    # Free metadata reshape: (B, T*H) row-major == (B, T, H). No HBM transpose.
    return out.reshape(B, T, H)


# -----------------------------------------------------------------------------
# Pure-JAX reference (PyTorch-GRU math, mimicking the kernel's bf16 matmuls)
# -----------------------------------------------------------------------------
def reference_encoder(token_ids, params):
    H = params["w_out"].shape[0]
    B = token_ids.shape[0]
    table = params["embedding"] @ params["w_ih"] + params["b_i"]       # (V, 3H) f32
    gi_all = table[token_ids]                                          # (B, T, 3H)
    w_hh = params["w_hh"].astype(jnp.bfloat16)
    w_out = params["w_out"].astype(jnp.bfloat16)
    b_hn = params["b_hn"]
    h0 = jnp.zeros((B, H), jnp.float32)

    def step(h, gi_t):
        gh = jnp.dot(h.astype(jnp.bfloat16), w_hh,
                     preferred_element_type=jnp.float32)
        r = jax.nn.sigmoid(gi_t[:, :H] + gh[:, :H])
        z = jax.nn.sigmoid(gi_t[:, H:2 * H] + gh[:, H:2 * H])
        n = jnp.tanh(gi_t[:, 2 * H:] + r * (gh[:, 2 * H:] + b_hn))
        h_new = (1.0 - z) * n + z * h
        return h_new, h_new

    _, hs = lax.scan(step, h0, jnp.transpose(gi_all, (1, 0, 2)))
    hs = jnp.transpose(hs, (1, 0, 2))                                  # (B, T, H)
    return jnp.dot(hs.astype(jnp.bfloat16), w_out,
                   preferred_element_type=jnp.float32) + params["b_out"]


# -----------------------------------------------------------------------------
# Deterministic parameter init (mirrors nn.Embedding / nn.GRU / nn.Linear, fused)
# -----------------------------------------------------------------------------
def init_params(key, vocab_size, embed_dim, hidden_dim):
    ks = jax.random.split(key, 16)
    scale = 1.0 / jnp.sqrt(hidden_dim)
    u = lambda k, shape: jax.random.uniform(k, shape, jnp.float32, -scale, scale)

    wir, wiz, win = (u(ks[i], (embed_dim, hidden_dim)) for i in (1, 2, 3))
    whr, whz, whn = (u(ks[i], (hidden_dim, hidden_dim)) for i in (4, 5, 6))
    bir, biz, bin_ = (u(ks[i], (1, hidden_dim)) for i in (7, 8, 9))
    bhr, bhz, bhn = (u(ks[i], (1, hidden_dim)) for i in (10, 11, 12))

    return {
        "embedding": jax.random.normal(ks[0], (vocab_size, embed_dim), jnp.float32),
        "w_ih": jnp.concatenate([wir, wiz, win], axis=1),              # (E, 3H)
        "w_hh": jnp.concatenate([whr, whz, whn], axis=1),              # (H, 3H)
        # r/z biases pre-summed; b_in on the input side; b_hn stays separate
        # because r multiplies only the hidden-side n term.
        "b_i": jnp.concatenate([bir + bhr, biz + bhz, bin_], axis=1),  # (1, 3H)
        "b_hn": bhn,                                                   # (1, H)
        "w_out": u(ks[13], (hidden_dim, hidden_dim)),                  # (H, H)
        "b_out": u(ks[14], (1, hidden_dim)),                           # (1, H)
    }


if __name__ == "__main__":
    # Small example shapes: lane-dense hidden width, Tc*Bs = 128 chunk rows.
    VOCAB, EMBED, HIDDEN = 64, 32, 128
    B, T = 16, 32

    key = jax.random.PRNGKey(0)
    k_params, k_tokens = jax.random.split(key)
    params = init_params(k_params, VOCAB, EMBED, HIDDEN)
    token_ids = jax.random.randint(k_tokens, (B, T), 0, VOCAB, jnp.int32)

    out = simple_text_encoder(token_ids, params, t_chunk=16, batch_shards=2)
    out = jax.block_until_ready(out)

    ref = reference_encoder(token_ids, params)
    assert out.shape == (B, T, HIDDEN), out.shape
    err = float(jnp.max(jnp.abs(out - ref)))
    assert jnp.allclose(out, ref, atol=1e-2, rtol=1e-2), err

    print("KERNEL_OK")
</pallas_src>

<mosaic_0001>
module attributes {stable_mosaic.version = 11 : i64} {
  func.func @gru_encoder_kernel(%arg0: i32, %arg1: i32, %arg2: memref<512xi32, #tpu.memory_space<smem>>, %arg3: memref<64x1x384xf32, #tpu.memory_space<vmem>>, %arg4: memref<128x384xbf16, #tpu.memory_space<vmem>>, %arg5: memref<1x128xf32, #tpu.memory_space<vmem>>, %arg6: memref<128x128xbf16, #tpu.memory_space<vmem>>, %arg7: memref<1x128xf32, #tpu.memory_space<vmem>>, %arg8: memref<8x2048xf32, #tpu.memory_space<vmem>>, %arg9: memref<8x128xf32, #tpu.memory_space<vmem>>, %arg10: memref<128x384xf32, #tpu.memory_space<vmem>>, %arg11: memref<128x128xbf16, #tpu.memory_space<vmem>>) attributes {dimension_semantics = [#tpu.dimension_semantics<parallel>, #tpu.dimension_semantics<arbitrary>], iteration_bounds = array<i64: 2, 2>, scalar_prefetch = 1 : i64, scratch_operands = 3 : i64, tpu.core_type = #tpu.core_type<tc>, window_params = [{pipeline_mode = #tpu.pipeline_mode<synchronous>, transform_indices = @transform_0, window_bounds = array<i64: 64, 1, 384>}, {pipeline_mode = #tpu.pipeline_mode<synchronous>, transform_indices = @transform_1, window_bounds = array<i64: 128, 384>}, {pipeline_mode = #tpu.pipeline_mode<synchronous>, transform_indices = @transform_2, window_bounds = array<i64: 1, 128>}, {pipeline_mode = #tpu.pipeline_mode<synchronous>, transform_indices = @transform_3, window_bounds = array<i64: 128, 128>}, {pipeline_mode = #tpu.pipeline_mode<synchronous>, transform_indices = @transform_4, window_bounds = array<i64: 1, 128>}, {transform_indices = @transform_5, window_bounds = array<i64: 8, 2048>}]} {
    %c0_i32 = arith.constant 0 : i32
    %0 = arith.cmpi eq, %arg1, %c0_i32 : i32
    %1 = arith.extui %0 : i1 to i32
    %c0_i32_0 = arith.constant 0 : i32
    %2 = arith.cmpi ne, %1, %c0_i32_0 : i32
    scf.if %2 {
      %cst_548 = arith.constant 0.000000e+00 : f32
      %1473 = vector.broadcast %cst_548 : f32 to vector<8x128xf32>
      %c0_549 = arith.constant 0 : index
      %c0_550 = arith.constant 0 : index
      %1474 = vector.load %arg9[%c0_549, %c0_550] : memref<8x128xf32, #tpu.memory_space<vmem>>, vector<8x128xf32>
      tpu.vector_store %arg9[%c0_549, %c0_550], %1473 {strides = array<i32>} : memref<8x128xf32, #tpu.memory_space<vmem>>, vector<8x128xf32>,
    } else {
    }
    %c32_i32 = arith.constant 32 : i32
    %3 = arith.muli %arg0, %c32_i32 : i32
    %c16_i32 = arith.constant 16 : i32
    %4 = arith.muli %arg1, %c16_i32 : i32
    %5 = arith.addi %3, %4 : i32
    %c8_i32 = arith.constant 8 : i32
    %6 = arith.muli %5, %c8_i32 : i32
    %c0_i32_1 = arith.constant 0 : i32
    %7 = arith.addi %6, %c0_i32_1 : i32
    %8 = arith.index_cast %7 : i32 to index
    %9 = memref.load %arg2[%8] : memref<512xi32, #tpu.memory_space<smem>>
    %10 = arith.index_cast %9 : i32 to index
    %c0 = arith.constant 0 : index
    %c0_2 = arith.constant 0 : index
    %11 = vector.load %arg3[%10, %c0, %c0_2] : memref<64x1x384xf32, #tpu.memory_space<vmem>>, vector<1x1x384xf32>
    %12 = vector.shape_cast %11 : vector<1x1x384xf32> to vector<1x384xf32>
    %c0_3 = arith.constant 0 : index
    %c0_4 = arith.constant 0 : index
    %13 = vector.load %arg10[%c0_3, %c0_4] : memref<128x384xf32, #tpu.memory_space<vmem>>, vector<1x384xf32>
    tpu.vector_store %arg10[%c0_3, %c0_4], %12 {strides = array<i32>} : memref<128x384xf32, #tpu.memory_space<vmem>>, vector<1x384xf32>,
    %c1_i32 = arith.constant 1 : i32
    %14 = arith.addi %6, %c1_i32 : i32
    %15 = arith.index_cast %14 : i32 to index
    %16 = memref.load %arg2[%15] : memref<512xi32, #tpu.memory_space<smem>>
    %17 = arith.index_cast %16 : i32 to index
    %c0_5 = arith.constant 0 : index
    %c0_6 = arith.constant 0 : index
    %18 = vector.load %arg3[%17, %c0_5, %c0_6] : memref<64x1x384xf32, #tpu.memory_space<vmem>>, vector<1x1x384xf32>
    %19 = vector.shape_cast %18 : vector<1x1x384xf32> to vector<1x384xf32>
    %c1 = arith.constant 1 : index
    %c0_7 = arith.constant 0 : index
    %20 = vector.load %arg10[%c1, %c0_7] : memref<128x384xf32, #tpu.memory_space<vmem>>, vector<1x384xf32>
    tpu.vector_store %arg10[%c1, %c0_7], %19 {strides = array<i32>} : memref<128x384xf32, #tpu.memory_space<vmem>>, vector<1x384xf32>,
    %c2_i32 = arith.constant 2 : i32
    %21 = arith.addi %6, %c2_i32 : i32
    %22 = arith.index_cast %21 : i32 to index
    %23 = memref.load %arg2[%22] : memref<512xi32, #tpu.memory_space<smem>>
    %24 = arith.index_cast %23 : i32 to index
    %c0_8 = arith.constant 0 : index
    %c0_9 = arith.constant 0 : index
    %25 = vector.load %arg3[%24, %c0_8, %c0_9] : memref<64x1x384xf32, #tpu.memory_space<vmem>>, vector<1x1x384xf32>
    %26 = vector.shape_cast %25 : vector<1x1x384xf32> to vector<1x384xf32>
    %c2 = arith.constant 2 : index
    %c0_10 = arith.constant 0 : index
    %27 = vector.load %arg10[%c2, %c0_10] : memref<128x384xf32, #tpu.memory_space<vmem>>, vector<1x384xf32>
    tpu.vector_store %arg10[%c2, %c0_10], %26 {strides = array<i32>} : memref<128x384xf32, #tpu.memory_space<vmem>>, vector<1x384xf32>,
    %c3_i32 = arith.constant 3 : i32
    %28 = arith.addi %6, %c3_i32 : i32
    %29 = arith.index_cast %28 : i32 to index
    %30 = memref.load %arg2[%29] : memref<512xi32, #tpu.memory_space<smem>>
    %31 = arith.index_cast %30 : i32 to index
    %c0_11 = arith.constant 0 : index
    %c0_12 = arith.constant 0 : index
    %32 = vector.load %arg3[%31, %c0_11, %c0_12] : memref<64x1x384xf32, #tpu.memory_space<vmem>>, vector<1x1x384xf32>
    %33 = vector.shape_cast %32 : vector<1x1x384xf32> to vector<1x384xf32>
    %c3 = arith.constant 3 : index
    %c0_13 = arith.constant 0 : index
    %34 = vector.load %arg10[%c3, %c0_13] : memref<128x384xf32, #tpu.memory_space<vmem>>, vector<1x384xf32>
    tpu.vector_store %arg10[%c3, %c0_13], %33 {strides = array<i32>} : memref<128x384xf32, #tpu.memory_space<vmem>>, vector<1x384xf32>,
    %c4_i32 = arith.constant 4 : i32
    %35 = arith.addi %6, %c4_i32 : i32
    %36 = arith.index_cast %35 : i32 to index
    %37 = memref.load %arg2[%36] : memref<512xi32, #tpu.memory_space<smem>>
    %38 = arith.index_cast %37 : i32 to index
    %c0_14 = arith.constant 0 : index
    %c0_15 = arith.constant 0 : index
    %39 = vector.load %arg3[%38, %c0_14, %c0_15] : memref<64x1x384xf32, #tpu.memory_space<vmem>>, vector<1x1x384xf32>
    %40 = vector.shape_cast %39 : vector<1x1x384xf32> to vector<1x384xf32>
    %c4 = arith.constant 4 : index
    %c0_16 = arith.constant 0 : index
    %41 = vector.load %arg10[%c4, %c0_16] : memref<128x384xf32, #tpu.memory_space<vmem>>, vector<1x384xf32>
    tpu.vector_store %arg10[%c4, %c0_16], %40 {strides = array<i32>} : memref<128x384xf32, #tpu.memory_space<vmem>>, vector<1x384xf32>,
    %c5_i32 = arith.constant 5 : i32
    %42 = arith.addi %6, %c5_i32 : i32
    %43 = arith.index_cast %42 : i32 to index
    %44 = memref.load %arg2[%43] : memref<512xi32, #tpu.memory_space<smem>>
    %45 = arith.index_cast %44 : i32 to index
    %c0_17 = arith.constant 0 : index
    %c0_18 = arith.constant 0 : index
    %46 = vector.load %arg3[%45, %c0_17, %c0_18] : memref<64x1x384xf32, #tpu.memory_space<vmem>>, vector<1x1x384xf32>
    %47 = vector.shape_cast %46 : vector<1x1x384xf32> to vector<1x384xf32>
    %c5 = arith.constant 5 : index
    %c0_19 = arith.constant 0 : index
    %48 = vector.load %arg10[%c5, %c0_19] : memref<128x384xf32, #tpu.memory_space<vmem>>, vector<1x384xf32>
    tpu.vector_store %arg10[%c5, %c0_19], %47 {strides = array<i32>} : memref<128x384xf32, #tpu.memory_space<vmem>>, vector<1x384xf32>,
    %c6_i32 = arith.constant 6 : i32
    %49 = arith.addi %6, %c6_i32 : i32
    %50 = arith.index_cast %49 : i32 to index
    %51 = memref.load %arg2[%50] : memref<512xi32, #tpu.memory_space<smem>>
    %52 = arith.index_cast %51 : i32 to index
    %c0_20 = arith.constant 0 : index
    %c0_21 = arith.constant 0 : index
    %53 = vector.load %arg3[%52, %c0_20, %c0_21] : memref<64x1x384xf32, #tpu.memory_space<vmem>>, vector<1x1x384xf32>
    %54 = vector.shape_cast %53 : vector<1x1x384xf32> to vector<1x384xf32>
    %c6 = arith.constant 6 : index
    %c0_22 = arith.constant 0 : index
    %55 = vector.load %arg10[%c6, %c0_22] : memref<128x384xf32, #tpu.memory_space<vmem>>, vector<1x384xf32>
    tpu.vector_store %arg10[%c6, %c0_22], %54 {strides = array<i32>} : memref<128x384xf32, #tpu.memory_space<vmem>>, vector<1x384xf32>,
    %c7_i32 = arith.constant 7 : i32
    %56 = arith.addi %6, %c7_i32 : i32
    %57 = arith.index_cast %56 : i32 to index
    %58 = memref.load %arg2[%57] : memref<512xi32, #tpu.memory_space<smem>>
    %59 = arith.index_cast %58 : i32 to index
    %c0_23 = arith.constant 0 : index
    %c0_24 = arith.constant 0 : index
    %60 = vector.load %arg3[%59, %c0_23, %c0_24] : memref<64x1x384xf32, #tpu.memory_space<vmem>>, vector<1x1x384xf32>
    %61 = vector.shape_cast %60 : vector<1x1x384xf32> to vector<1x384xf32>
    %c7 = arith.constant 7 : index
    %c0_25 = arith.constant 0 : index
    %62 = vector.load %arg10[%c7, %c0_25] : memref<128x384xf32, #tpu.memory_space<vmem>>, vector<1x384xf32>
    tpu.vector_store %arg10[%c7, %c0_25], %61 {strides = array<i32>} : memref<128x384xf32, #tpu.memory_space<vmem>>, vector<1x384xf32>,
    %c8_i32_26 = arith.constant 8 : i32
    %63 = arith.addi %6, %c8_i32_26 : i32
    %64 = arith.index_cast %63 : i32 to index
    %65 = memref.load %arg2[%64] : memref<512xi32, #tpu.memory_space<smem>>
    %66 = arith.index_cast %65 : i32 to index
    %c0_27 = arith.constant 0 : index
    %c0_28 = arith.constant 0 : index
    %67 = vector.load %arg3[%66, %c0_27, %c0_28] : memref<64x1x384xf32, #tpu.memory_space<vmem>>, vector<1x1x384xf32>
    %68 = vector.shape_cast %67 : vector<1x1x384xf32> to vector<1x384xf32>
    %c8 = arith.constant 8 : index
    %c0_29 = arith.constant 0 : index
    %69 = vector.load %arg10[%c8, %c0_29] : memref<128x384xf32, #tpu.memory_space<vmem>>, vector<1x384xf32>
    tpu.vector_store %arg10[%c8, %c0_29], %68 {strides = array<i32>} : memref<128x384xf32, #tpu.memory_space<vmem>>, vector<1x384xf32>,
    %c9_i32 = arith.constant 9 : i32
    %70 = arith.addi %6, %c9_i32 : i32
    %71 = arith.index_cast %70 : i32 to index
    %72 = memref.load %arg2[%71] : memref<512xi32, #tpu.memory_space<smem>>
    %73 = arith.index_cast %72 : i32 to index
    %c0_30 = arith.constant 0 : index
    %c0_31 = arith.constant 0 : index
    %74 = vector.load %arg3[%73, %c0_30, %c0_31] : memref<64x1x384xf32, #tpu.memory_space<vmem>>, vector<1x1x384xf32>
    %75 = vector.shape_cast %74 : vector<1x1x384xf32> to vector<1x384xf32>
    %c9 = arith.constant 9 : index
    %c0_32 = arith.constant 0 : index
    %76 = vector.load %arg10[%c9, %c0_32] : memref<128x384xf32, #tpu.memory_space<vmem>>, vector<1x384xf32>
    tpu.vector_store %arg10[%c9, %c0_32], %75 {strides = array<i32>} : memref<128x384xf32, #tpu.memory_space<vmem>>, vector<1x384xf32>,
    %c10_i32 = arith.constant 10 : i32
    %77 = arith.addi %6, %c10_i32 : i32
    %78 = arith.index_cast %77 : i32 to index
    %79 = memref.load %arg2[%78] : memref<512xi32, #tpu.memory_space<smem>>
    %80 = arith.index_cast %79 : i32 to index
    %c0_33 = arith.constant 0 : index
    %c0_34 = arith.constant 0 : index
    %81 = vector.load %arg3[%80, %c0_33, %c0_34] : memref<64x1x384xf32, #tpu.memory_space<vmem>>, vector<1x1x384xf32>
    %82 = vector.shape_cast %81 : vector<1x1x384xf32> to vector<1x384xf32>
    %c10 = arith.constant 10 : index
    %c0_35 = arith.constant 0 : index
    %83 = vector.load %arg10[%c10, %c0_35] : memref<128x384xf32, #tpu.memory_space<vmem>>, vector<1x384xf32>
    tpu.vector_store %arg10[%c10, %c0_35], %82 {strides = array<i32>} : memref<128x384xf32, #tpu.memory_space<vmem>>, vector<1x384xf32>,
    %c11_i32 = arith.constant 11 : i32
    %84 = arith.addi %6, %c11_i32 : i32
    %85 = arith.index_cast %84 : i32 to index
    %86 = memref.load %arg2[%85] : memref<512xi32, #tpu.memory_space<smem>>
    %87 = arith.index_cast %86 : i32 to index
    %c0_36 = arith.constant 0 : index
    %c0_37 = arith.constant 0 : index
    %88 = vector.load %arg3[%87, %c0_36, %c0_37] : memref<64x1x384xf32, #tpu.memory_space<vmem>>, vector<1x1x384xf32>
    %89 = vector.shape_cast %88 : vector<1x1x384xf32> to vector<1x384xf32>
    %c11 = arith.constant 11 : index
    %c0_38 = arith.constant 0 : index
    %90 = vector.load %arg10[%c11, %c0_38] : memref<128x384xf32, #tpu.memory_space<vmem>>, vector<1x384xf32>
    tpu.vector_store %arg10[%c11, %c0_38], %89 {strides = array<i32>} : memref<128x384xf32, #tpu.memory_space<vmem>>, vector<1x384xf32>,
    %c12_i32 = arith.constant 12 : i32
    %91 = arith.addi %6, %c12_i32 : i32
    %92 = arith.index_cast %91 : i32 to index
    %93 = memref.load %arg2[%92] : memref<512xi32, #tpu.memory_space<smem>>
    %94 = arith.index_cast %93 : i32 to index
    %c0_39 = arith.constant 0 : index
    %c0_40 = arith.constant 0 : index
    %95 = vector.load %arg3[%94, %c0_39, %c0_40] : memref<64x1x384xf32, #tpu.memory_space<vmem>>, vector<1x1x384xf32>
    %96 = vector.shape_cast %95 : vector<1x1x384xf32> to vector<1x384xf32>
    %c12 = arith.constant 12 : index
    %c0_41 = arith.constant 0 : index
    %97 = vector.load %arg10[%c12, %c0_41] : memref<128x384xf32, #tpu.memory_space<vmem>>, vector<1x384xf32>
    tpu.vector_store %arg10[%c12, %c0_41], %96 {strides = array<i32>} : memref<128x384xf32, #tpu.memory_space<vmem>>, vector<1x384xf32>,
    %c13_i32 = arith.constant 13 : i32
    %98 = arith.addi %6, %c13_i32 : i32
    %99 = arith.index_cast %98 : i32 to index
    %100 = memref.load %arg2[%99] : memref<512xi32, #tpu.memory_space<smem>>
    %101 = arith.index_cast %100 : i32 to index
    %c0_42 = arith.constant 0 : index
    %c0_43 = arith.constant 0 : index
    %102 = vector.load %arg3[%101, %c0_42, %c0_43] : memref<64x1x384xf32, #tpu.memory_space<vmem>>, vector<1x1x384xf32>
    %103 = vector.shape_cast %102 : vector<1x1x384xf32> to vector<1x384xf32>
    %c13 = arith.constant 13 : index
    %c0_44 = arith.constant 0 : index
    %104 = vector.load %arg10[%c13, %c0_44] : memref<128x384xf32, #tpu.memory_space<vmem>>, vector<1x384xf32>
    tpu.vector_store %arg10[%c13, %c0_44], %103 {strides = array<i32>} : memref<128x384xf32, #tpu.memory_space<vmem>>, vector<1x384xf32>,
    %c14_i32 = arith.constant 14 : i32
    %105 = arith.addi %6, %c14_i32 : i32
    %106 = arith.index_cast %105 : i32 to index
    %107 = memref.load %arg2[%106] : memref<512xi32, #tpu.memory_space<smem>>
    %108 = arith.index_cast %107 : i32 to index
    %c0_45 = arith.constant 0 : index
    %c0_46 = arith.constant 0 : index
    %109 = vector.load %arg3[%108, %c0_45, %c0_46] : memref<64x1x384xf32, #tpu.memory_space<vmem>>, vector<1x1x384xf32>
    %110 = vector.shape_cast %109 : vector<1x1x384xf32> to vector<1x384xf32>
    %c14 = arith.constant 14 : index
    %c0_47 = arith.constant 0 : index
    %111 = vector.load %arg10[%c14, %c0_47] : memref<128x384xf32, #tpu.memory_space<vmem>>, vector<1x384xf32>
    tpu.vector_store %arg10[%c14, %c0_47], %110 {strides = array<i32>} : memref<128x384xf32, #tpu.memory_space<vmem>>, vector<1x384xf32>,
    %c15_i32 = arith.constant 15 : i32
    %112 = arith.addi %6, %c15_i32 : i32
    %113 = arith.index_cast %112 : i32 to index
    %114 = memref.load %arg2[%113] : memref<512xi32, #tpu.memory_space<smem>>
    %115 = arith.index_cast %114 : i32 to index
    %c0_48 = arith.constant 0 : index
    %c0_49 = arith.constant 0 : index
    %116 = vector.load %arg3[%115, %c0_48, %c0_49] : memref<64x1x384xf32, #tpu.memory_space<vmem>>, vector<1x1x384xf32>
    %117 = vector.shape_cast %116 : vector<1x1x384xf32> to vector<1x384xf32>
    %c15 = arith.constant 15 : index
    %c0_50 = arith.constant 0 : index
    %118 = vector.load %arg10[%c15, %c0_50] : memref<128x384xf32, #tpu.memory_space<vmem>>, vector<1x384xf32>
    tpu.vector_store %arg10[%c15, %c0_50], %117 {strides = array<i32>} : memref<128x384xf32, #tpu.memory_space<vmem>>, vector<1x384xf32>,
    %c16_i32_51 = arith.constant 16 : i32
    %119 = arith.addi %6, %c16_i32_51 : i32
    %120 = arith.index_cast %119 : i32 to index
    %121 = memref.load %arg2[%120] : memref<512xi32, #tpu.memory_space<smem>>
    %122 = arith.index_cast %121 : i32 to index
    %c0_52 = arith.constant 0 : index
    %c0_53 = arith.constant 0 : index
    %123 = vector.load %arg3[%122, %c0_52, %c0_53] : memref<64x1x384xf32, #tpu.memory_space<vmem>>, vector<1x1x384xf32>
    %124 = vector.shape_cast %123 : vector<1x1x384xf32> to vector<1x384xf32>
    %c16 = arith.constant 16 : index
    %c0_54 = arith.constant 0 : index
    %125 = vector.load %arg10[%c16, %c0_54] : memref<128x384xf32, #tpu.memory_space<vmem>>, vector<1x384xf32>
    tpu.vector_store %arg10[%c16, %c0_54], %124 {strides = array<i32>} : memref<128x384xf32, #tpu.memory_space<vmem>>, vector<1x384xf32>,
    %c17_i32 = arith.constant 17 : i32
    %126 = arith.addi %6, %c17_i32 : i32
    %127 = arith.index_cast %126 : i32 to index
    %128 = memref.load %arg2[%127] : memref<512xi32, #tpu.memory_space<smem>>
    %129 = arith.index_cast %128 : i32 to index
    %c0_55 = arith.constant 0 : index
    %c0_56 = arith.constant 0 : index
    %130 = vector.load %arg3[%129, %c0_55, %c0_56] : memref<64x1x384xf32, #tpu.memory_space<vmem>>, vector<1x1x384xf32>
    %131 = vector.shape_cast %130 : vector<1x1x384xf32> to vector<1x384xf32>
    %c17 = arith.constant 17 : index
    %c0_57 = arith.constant 0 : index
    %132 = vector.load %arg10[%c17, %c0_57] : memref<128x384xf32, #tpu.memory_space<vmem>>, vector<1x384xf32>
    tpu.vector_store %arg10[%c17, %c0_57], %131 {strides = array<i32>} : memref<128x384xf32, #tpu.memory_space<vmem>>, vector<1x384xf32>,
    %c18_i32 = arith.constant 18 : i32
    %133 = arith.addi %6, %c18_i32 : i32
    %134 = arith.index_cast %133 : i32 to index
    %135 = memref.load %arg2[%134] : memref<512xi32, #tpu.memory_space<smem>>
    %136 = arith.index_cast %135 : i32 to index
    %c0_58 = arith.constant 0 : index
    %c0_59 = arith.constant 0 : index
    %137 = vector.load %arg3[%136, %c0_58, %c0_59] : memref<64x1x384xf32, #tpu.memory_space<vmem>>, vector<1x1x384xf32>
    %138 = vector.shape_cast %137 : vector<1x1x384xf32> to vector<1x384xf32>
    %c18 = arith.constant 18 : index
    %c0_60 = arith.constant 0 : index
    %139 = vector.load %arg10[%c18, %c0_60] : memref<128x384xf32, #tpu.memory_space<vmem>>, vector<1x384xf32>
    tpu.vector_store %arg10[%c18, %c0_60], %138 {strides = array<i32>} : memref<128x384xf32, #tpu.memory_space<vmem>>, vector<1x384xf32>,
    %c19_i32 = arith.constant 19 : i32
    %140 = arith.addi %6, %c19_i32 : i32
    %141 = arith.index_cast %140 : i32 to index
    %142 = memref.load %arg2[%141] : memref<512xi32, #tpu.memory_space<smem>>
    %143 = arith.index_cast %142 : i32 to index
    %c0_61 = arith.constant 0 : index
    %c0_62 = arith.constant 0 : index
    %144 = vector.load %arg3[%143, %c0_61, %c0_62] : memref<64x1x384xf32, #tpu.memory_space<vmem>>, vector<1x1x384xf32>
    %145 = vector.shape_cast %144 : vector<1x1x384xf32> to vector<1x384xf32>
    %c19 = arith.constant 19 : index
    %c0_63 = arith.constant 0 : index
    %146 = vector.load %arg10[%c19, %c0_63] : memref<128x384xf32, #tpu.memory_space<vmem>>, vector<1x384xf32>
    tpu.vector_store %arg10[%c19, %c0_63], %145 {strides = array<i32>} : memref<128x384xf32, #tpu.memory_space<vmem>>, vector<1x384xf32>,
    %c20_i32 = arith.constant 20 : i32
    %147 = arith.addi %6, %c20_i32 : i32
    %148 = arith.index_cast %147 : i32 to index
    %149 = memref.load %arg2[%148] : memref<512xi32, #tpu.memory_space<smem>>
    %150 = arith.index_cast %149 : i32 to index
    %c0_64 = arith.constant 0 : index
    %c0_65 = arith.constant 0 : index
    %151 = vector.load %arg3[%150, %c0_64, %c0_65] : memref<64x1x384xf32, #tpu.memory_space<vmem>>, vector<1x1x384xf32>
    %152 = vector.shape_cast %151 : vector<1x1x384xf32> to vector<1x384xf32>
    %c20 = arith.constant 20 : index
    %c0_66 = arith.constant 0 : index
    %153 = vector.load %arg10[%c20, %c0_66] : memref<128x384xf32, #tpu.memory_space<vmem>>, vector<1x384xf32>
    tpu.vector_store %arg10[%c20, %c0_66], %152 {strides = array<i32>} : memref<128x384xf32, #tpu.memory_space<vmem>>, vector<1x384xf32>,
    %c21_i32 = arith.constant 21 : i32
    %154 = arith.addi %6, %c21_i32 : i32
    %155 = arith.index_cast %154 : i32 to index
    %156 = memref.load %arg2[%155] : memref<512xi32, #tpu.memory_space<smem>>
    %157 = arith.index_cast %156 : i32 to index
    %c0_67 = arith.constant 0 : index
    %c0_68 = arith.constant 0 : index
    %158 = vector.load %arg3[%157, %c0_67, %c0_68] : memref<64x1x384xf32, #tpu.memory_space<vmem>>, vector<1x1x384xf32>
    %159 = vector.shape_cast %158 : vector<1x1x384xf32> to vector<1x384xf32>
    %c21 = arith.constant 21 : index
    %c0_69 = arith.constant 0 : index
    %160 = vector.load %arg10[%c21, %c0_69] : memref<128x384xf32, #tpu.memory_space<vmem>>, vector<1x384xf32>
    tpu.vector_store %arg10[%c21, %c0_69], %159 {strides = array<i32>} : memref<128x384xf32, #tpu.memory_space<vmem>>, vector<1x384xf32>,
    %c22_i32 = arith.constant 22 : i32
    %161 = arith.addi %6, %c22_i32 : i32
    %162 = arith.index_cast %161 : i32 to index
    %163 = memref.load %arg2[%162] : memref<512xi32, #tpu.memory_space<smem>>
    %164 = arith.index_cast %163 : i32 to index
    %c0_70 = arith.constant 0 : index
    %c0_71 = arith.constant 0 : index
    %165 = vector.load %arg3[%164, %c0_70, %c0_71] : memref<64x1x384xf32, #tpu.memory_space<vmem>>, vector<1x1x384xf32>
    %166 = vector.shape_cast %165 : vector<1x1x384xf32> to vector<1x384xf32>
    %c22 = arith.constant 22 : index
    %c0_72 = arith.constant 0 : index
    %167 = vector.load %arg10[%c22, %c0_72] : memref<128x384xf32, #tpu.memory_space<vmem>>, vector<1x384xf32>
    tpu.vector_store %arg10[%c22, %c0_72], %166 {strides = array<i32>} : memref<128x384xf32, #tpu.memory_space<vmem>>, vector<1x384xf32>,
    %c23_i32 = arith.constant 23 : i32
    %168 = arith.addi %6, %c23_i32 : i32
    %169 = arith.index_cast %168 : i32 to index
    %170 = memref.load %arg2[%169] : memref<512xi32, #tpu.memory_space<smem>>
    %171 = arith.index_cast %170 : i32 to index
    %c0_73 = arith.constant 0 : index
    %c0_74 = arith.constant 0 : index
    %172 = vector.load %arg3[%171, %c0_73, %c0_74] : memref<64x1x384xf32, #tpu.memory_space<vmem>>, vector<1x1x384xf32>
    %173 = vector.shape_cast %172 : vector<1x1x384xf32> to vector<1x384xf32>
    %c23 = arith.constant 23 : index
    %c0_75 = arith.constant 0 : index
    %174 = vector.load %arg10[%c23, %c0_75] : memref<128x384xf32, #tpu.memory_space<vmem>>, vector<1x384xf32>
    tpu.vector_store %arg10[%c23, %c0_75], %173 {strides = array<i32>} : memref<128x384xf32, #tpu.memory_space<vmem>>, vector<1x384xf32>,
    %c24_i32 = arith.constant 24 : i32
    %175 = arith.addi %6, %c24_i32 : i32
    %176 = arith.index_cast %175 : i32 to index
    %177 = memref.load %arg2[%176] : memref<512xi32, #tpu.memory_space<smem>>
    %178 = arith.index_cast %177 : i32 to index
    %c0_76 = arith.constant 0 : index
    %c0_77 = arith.constant 0 : index
    %179 = vector.load %arg3[%178, %c0_76, %c0_77] : memref<64x1x384xf32, #tpu.memory_space<vmem>>, vector<1x1x384xf32>
    %180 = vector.shape_cast %179 : vector<1x1x384xf32> to vector<1x384xf32>
    %c24 = arith.constant 24 : index
    %c0_78 = arith.constant 0 : index
    %181 = vector.load %arg10[%c24, %c0_78] : memref<128x384xf32, #tpu.memory_space<vmem>>, vector<1x384xf32>
    tpu.vector_store %arg10[%c24, %c0_78], %180 {strides = array<i32>} : memref<128x384xf32, #tpu.memory_space<vmem>>, vector<1x384xf32>,
    %c25_i32 = arith.constant 25 : i32
    %182 = arith.addi %6, %c25_i32 : i32
    %183 = arith.index_cast %182 : i32 to index
    %184 = memref.load %arg2[%183] : memref<512xi32, #tpu.memory_space<smem>>
    %185 = arith.index_cast %184 : i32 to index
    %c0_79 = arith.constant 0 : index
    %c0_80 = arith.constant 0 : index
    %186 = vector.load %arg3[%185, %c0_79, %c0_80] : memref<64x1x384xf32, #tpu.memory_space<vmem>>, vector<1x1x384xf32>
    %187 = vector.shape_cast %186 : vector<1x1x384xf32> to vector<1x384xf32>
    %c25 = arith.constant 25 : index
    %c0_81 = arith.constant 0 : index
    %188 = vector.load %arg10[%c25, %c0_81] : memref<128x384xf32, #tpu.memory_space<vmem>>, vector<1x384xf32>
    tpu.vector_store %arg10[%c25, %c0_81], %187 {strides = array<i32>} : memref<128x384xf32, #tpu.memory_space<vmem>>, vector<1x384xf32>,
    %c26_i32 = arith.constant 26 : i32
    %189 = arith.addi %6, %c26_i32 : i32
    %190 = arith.index_cast %189 : i32 to index
    %191 = memref.load %arg2[%190] : memref<512xi32, #tpu.memory_space<smem>>
    %192 = arith.index_cast %191 : i32 to index
    %c0_82 = arith.constant 0 : index
    %c0_83 = arith.constant 0 : index
    %193 = vector.load %arg3[%192, %c0_82, %c0_83] : memref<64x1x384xf32, #tpu.memory_space<vmem>>, vector<1x1x384xf32>
    %194 = vector.shape_cast %193 : vector<1x1x384xf32> to vector<1x384xf32>
    %c26 = arith.constant 26 : index
    %c0_84 = arith.constant 0 : index
    %195 = vector.load %arg10[%c26, %c0_84] : memref<128x384xf32, #tpu.memory_space<vmem>>, vector<1x384xf32>
    tpu.vector_store %arg10[%c26, %c0_84], %194 {strides = array<i32>} : memref<128x384xf32, #tpu.memory_space<vmem>>, vector<1x384xf32>,
    %c27_i32 = arith.constant 27 : i32
    %196 = arith.addi %6, %c27_i32 : i32
    %197 = arith.index_cast %196 : i32 to index
    %198 = memref.load %arg2[%197] : memref<512xi32, #tpu.memory_space<smem>>
    %199 = arith.index_cast %198 : i32 to index
    %c0_85 = arith.constant 0 : index
    %c0_86 = arith.constant 0 : index
    %200 = vector.load %arg3[%199, %c0_85, %c0_86] : memref<64x1x384xf32, #tpu.memory_space<vmem>>, vector<1x1x384xf32>
    %201 = vector.shape_cast %200 : vector<1x1x384xf32> to vector<1x384xf32>
    %c27 = arith.constant 27 : index
    %c0_87 = arith.constant 0 : index
    %202 = vector.load %arg10[%c27, %c0_87] : memref<128x384xf32, #tpu.memory_space<vmem>>, vector<1x384xf32>
    tpu.vector_store %arg10[%c27, %c0_87], %201 {strides = array<i32>} : memref<128x384xf32, #tpu.memory_space<vmem>>, vector<1x384xf32>,
    %c28_i32 = arith.constant 28 : i32
    %203 = arith.addi %6, %c28_i32 : i32
    %204 = arith.index_cast %203 : i32 to index
    %205 = memref.load %arg2[%204] : memref<512xi32, #tpu.memory_space<smem>>
    %206 = arith.index_cast %205 : i32 to index
    %c0_88 = arith.constant 0 : index
    %c0_89 = arith.constant 0 : index
    %207 = vector.load %arg3[%206, %c0_88, %c0_89] : memref<64x1x384xf32, #tpu.memory_space<vmem>>, vector<1x1x384xf32>
    %208 = vector.shape_cast %207 : vector<1x1x384xf32> to vector<1x384xf32>
    %c28 = arith.constant 28 : index
    %c0_90 = arith.constant 0 : index
    %209 = vector.load %arg10[%c28, %c0_90] : memref<128x384xf32, #tpu.memory_space<vmem>>, vector<1x384xf32>
    tpu.vector_store %arg10[%c28, %c0_90], %208 {strides = array<i32>} : memref<128x384xf32, #tpu.memory_space<vmem>>, vector<1x384xf32>,
    %c29_i32 = arith.constant 29 : i32
    %210 = arith.addi %6, %c29_i32 : i32
    %211 = arith.index_cast %210 : i32 to index
    %212 = memref.load %arg2[%211] : memref<512xi32, #tpu.memory_space<smem>>
    %213 = arith.index_cast %212 : i32 to index
    %c0_91 = arith.constant 0 : index
    %c0_92 = arith.constant 0 : index
    %214 = vector.load %arg3[%213, %c0_91, %c0_92] : memref<64x1x384xf32, #tpu.memory_space<vmem>>, vector<1x1x384xf32>
    %215 = vector.shape_cast %214 : vector<1x1x384xf32> to vector<1x384xf32>
    %c29 = arith.constant 29 : index
    %c0_93 = arith.constant 0 : index
    %216 = vector.load %arg10[%c29, %c0_93] : memref<128x384xf32, #tpu.memory_space<vmem>>, vector<1x384xf32>
    tpu.vector_store %arg10[%c29, %c0_93], %215 {strides = array<i32>} : memref<128x384xf32, #tpu.memory_space<vmem>>, vector<1x384xf32>,
    %c30_i32 = arith.constant 30 : i32
    %217 = arith.addi %6, %c30_i32 : i32
    %218 = arith.index_cast %217 : i32 to index
    %219 = memref.load %arg2[%218] : memref<512xi32, #tpu.memory_space<smem>>
    %220 = arith.index_cast %219 : i32 to index
    %c0_94 = arith.constant 0 : index
    %c0_95 = arith.constant 0 : index
    %221 = vector.load %arg3[%220, %c0_94, %c0_95] : memref<64x1x384xf32, #tpu.memory_space<vmem>>, vector<1x1x384xf32>
    %222 = vector.shape_cast %221 : vector<1x1x384xf32> to vector<1x384xf32>
    %c30 = arith.constant 30 : index
    %c0_96 = arith.constant 0 : index
    %223 = vector.load %arg10[%c30, %c0_96] : memref<128x384xf32, #tpu.memory_space<vmem>>, vector<1x384xf32>
    tpu.vector_store %arg10[%c30, %c0_96], %222 {strides = array<i32>} : memref<128x384xf32, #tpu.memory_space<vmem>>, vector<1x384xf32>,
    %c31_i32 = arith.constant 31 : i32
    %224 = arith.addi %6, %c31_i32 : i32
    %225 = arith.index_cast %224 : i32 to index
    %226 = memref.load %arg2[%225] : memref<512xi32, #tpu.memory_space<smem>>
    %227 = arith.index_cast %226 : i32 to index
    %c0_97 = arith.constant 0 : index
    %c0_98 = arith.constant 0 : index
    %228 = vector.load %arg3[%227, %c0_97, %c0_98] : memref<64x1x384xf32, #tpu.memory_space<vmem>>, vector<1x1x384xf32>
    %229 = vector.shape_cast %228 : vector<1x1x384xf32> to vector<1x384xf32>
    %c31 = arith.constant 31 : index
    %c0_99 = arith.constant 0 : index
    %230 = vector.load %arg10[%c31, %c0_99] : memref<128x384xf32, #tpu.memory_space<vmem>>, vector<1x384xf32>
    tpu.vector_store %arg10[%c31, %c0_99], %229 {strides = array<i32>} : memref<128x384xf32, #tpu.memory_space<vmem>>, vector<1x384xf32>,
    %c32_i32_100 = arith.constant 32 : i32
    %231 = arith.addi %6, %c32_i32_100 : i32
    %232 = arith.index_cast %231 : i32 to index
    %233 = memref.load %arg2[%232] : memref<512xi32, #tpu.memory_space<smem>>
    %234 = arith.index_cast %233 : i32 to index
    %c0_101 = arith.constant 0 : index
    %c0_102 = arith.constant 0 : index
    %235 = vector.load %arg3[%234, %c0_101, %c0_102] : memref<64x1x384xf32, #tpu.memory_space<vmem>>, vector<1x1x384xf32>
    %236 = vector.shape_cast %235 : vector<1x1x384xf32> to vector<1x384xf32>
    %c32 = arith.constant 32 : index
    %c0_103 = arith.constant 0 : index
    %237 = vector.load %arg10[%c32, %c0_103] : memref<128x384xf32, #tpu.memory_space<vmem>>, vector<1x384xf32>
    tpu.vector_store %arg10[%c32, %c0_103], %236 {strides = array<i32>} : memref<128x384xf32, #tpu.memory_space<vmem>>, vector<1x384xf32>,
    %c33_i32 = arith.constant 33 : i32
    %238 = arith.addi %6, %c33_i32 : i32
    %239 = arith.index_cast %238 : i32 to index
    %240 = memref.load %arg2[%239] : memref<512xi32, #tpu.memory_space<smem>>
    %241 = arith.index_cast %240 : i32 to index
    %c0_104 = arith.constant 0 : index
    %c0_105 = arith.constant 0 : index
    %242 = vector.load %arg3[%241, %c0_104, %c0_105] : memref<64x1x384xf32, #tpu.memory_space<vmem>>, vector<1x1x384xf32>
    %243 = vector.shape_cast %242 : vector<1x1x384xf32> to vector<1x384xf32>
    %c33 = arith.constant 33 : index
    %c0_106 = arith.constant 0 : index
    %244 = vector.load %arg10[%c33, %c0_106] : memref<128x384xf32, #tpu.memory_space<vmem>>, vector<1x384xf32>
    tpu.vector_store %arg10[%c33, %c0_106], %243 {strides = array<i32>} : memref<128x384xf32, #tpu.memory_space<vmem>>, vector<1x384xf32>,
    %c34_i32 = arith.constant 34 : i32
    %245 = arith.addi %6, %c34_i32 : i32
    %246 = arith.index_cast %245 : i32 to index
    %247 = memref.load %arg2[%246] : memref<512xi32, #tpu.memory_space<smem>>
    %248 = arith.index_cast %247 : i32 to index
    %c0_107 = arith.constant 0 : index
    %c0_108 = arith.constant 0 : index
    %249 = vector.load %arg3[%248, %c0_107, %c0_108] : memref<64x1x384xf32, #tpu.memory_space<vmem>>, vector<1x1x384xf32>
    %250 = vector.shape_cast %249 : vector<1x1x384xf32> to vector<1x384xf32>
    %c34 = arith.constant 34 : index
    %c0_109 = arith.constant 0 : index
    %251 = vector.load %arg10[%c34, %c0_109] : memref<128x384xf32, #tpu.memory_space<vmem>>, vector<1x384xf32>
    tpu.vector_store %arg10[%c34, %c0_109], %250 {strides = array<i32>} : memref<128x384xf32, #tpu.memory_space<vmem>>, vector<1x384xf32>,
    %c35_i32 = arith.constant 35 : i32
    %252 = arith.addi %6, %c35_i32 : i32
    %253 = arith.index_cast %252 : i32 to index
    %254 = memref.load %arg2[%253] : memref<512xi32, #tpu.memory_space<smem>>
    %255 = arith.index_cast %254 : i32 to index
    %c0_110 = arith.constant 0 : index
    %c0_111 = arith.constant 0 : index
    %256 = vector.load %arg3[%255, %c0_110, %c0_111] : memref<64x1x384xf32, #tpu.memory_space<vmem>>, vector<1x1x384xf32>
    %257 = vector.shape_cast %256 : vector<1x1x384xf32> to vector<1x384xf32>
    %c35 = arith.constant 35 : index
    %c0_112 = arith.constant 0 : index
    %258 = vector.load %arg10[%c35, %c0_112] : memref<128x384xf32, #tpu.memory_space<vmem>>, vector<1x384xf32>
    tpu.vector_store %arg10[%c35, %c0_112], %257 {strides = array<i32>} : memref<128x384xf32, #tpu.memory_space<vmem>>, vector<1x384xf32>,
    %c36_i32 = arith.constant 36 : i32
    %259 = arith.addi %6, %c36_i32 : i32
    %260 = arith.index_cast %259 : i32 to index
    %261 = memref.load %arg2[%260] : memref<512xi32, #tpu.memory_space<smem>>
    %262 = arith.index_cast %261 : i32 to index
    %c0_113 = arith.constant 0 : index
    %c0_114 = arith.constant 0 : index
    %263 = vector.load %arg3[%262, %c0_113, %c0_114] : memref<64x1x384xf32, #tpu.memory_space<vmem>>, vector<1x1x384xf32>
    %264 = vector.shape_cast %263 : vector<1x1x384xf32> to vector<1x384xf32>
    %c36 = arith.constant 36 : index
    %c0_115 = arith.constant 0 : index
    %265 = vector.load %arg10[%c36, %c0_115] : memref<128x384xf32, #tpu.memory_space<vmem>>, vector<1x384xf32>
    tpu.vector_store %arg10[%c36, %c0_115], %264 {strides = array<i32>} : memref<128x384xf32, #tpu.memory_space<vmem>>, vector<1x384xf32>,
    %c37_i32 = arith.constant 37 : i32
    %266 = arith.addi %6, %c37_i32 : i32
    %267 = arith.index_cast %266 : i32 to index
    %268 = memref.load %arg2[%267] : memref<512xi32, #tpu.memory_space<smem>>
    %269 = arith.index_cast %268 : i32 to index
    %c0_116 = arith.constant 0 : index
    %c0_117 = arith.constant 0 : index
    %270 = vector.load %arg3[%269, %c0_116, %c0_117] : memref<64x1x384xf32, #tpu.memory_space<vmem>>, vector<1x1x384xf32>
    %271 = vector.shape_cast %270 : vector<1x1x384xf32> to vector<1x384xf32>
    %c37 = arith.constant 37 : index
    %c0_118 = arith.constant 0 : index
    %272 = vector.load %arg10[%c37, %c0_118] : memref<128x384xf32, #tpu.memory_space<vmem>>, vector<1x384xf32>
    tpu.vector_store %arg10[%c37, %c0_118], %271 {strides = array<i32>} : memref<128x384xf32, #tpu.memory_space<vmem>>, vector<1x384xf32>,
    %c38_i32 = arith.constant 38 : i32
    %273 = arith.addi %6, %c38_i32 : i32
    %274 = arith.index_cast %273 : i32 to index
    %275 = memref.load %arg2[%274] : memref<512xi32, #tpu.memory_space<smem>>
    %276 = arith.index_cast %275 : i32 to index
    %c0_119 = arith.constant 0 : index
    %c0_120 = arith.constant 0 : index
    %277 = vector.load %arg3[%276, %c0_119, %c0_120] : memref<64x1x384xf32, #tpu.memory_space<vmem>>, vector<1x1x384xf32>
    %278 = vector.shape_cast %277 : vector<1x1x384xf32> to vector<1x384xf32>
    %c38 = arith.constant 38 : index
    %c0_121 = arith.constant 0 : index
    %279 = vector.load %arg10[%c38, %c0_121] : memref<128x384xf32, #tpu.memory_space<vmem>>, vector<1x384xf32>
    tpu.vector_store %arg10[%c38, %c0_121], %278 {strides = array<i32>} : memref<128x384xf32, #tpu.memory_space<vmem>>, vector<1x384xf32>,
    %c39_i32 = arith.constant 39 : i32
    %280 = arith.addi %6, %c39_i32 : i32
    %281 = arith.index_cast %280 : i32 to index
    %282 = memref.load %arg2[%281] : memref<512xi32, #tpu.memory_space<smem>>
    %283 = arith.index_cast %282 : i32 to index
    %c0_122 = arith.constant 0 : index
    %c0_123 = arith.constant 0 : index
    %284 = vector.load %arg3[%283, %c0_122, %c0_123] : memref<64x1x384xf32, #tpu.memory_space<vmem>>, vector<1x1x384xf32>
    %285 = vector.shape_cast %284 : vector<1x1x384xf32> to vector<1x384xf32>
    %c39 = arith.constant 39 : index
    %c0_124 = arith.constant 0 : index
    %286 = vector.load %arg10[%c39, %c0_124] : memref<128x384xf32, #tpu.memory_space<vmem>>, vector<1x384xf32>
    tpu.vector_store %arg10[%c39, %c0_124], %285 {strides = array<i32>} : memref<128x384xf32, #tpu.memory_space<vmem>>, vector<1x384xf32>,
    %c40_i32 = arith.constant 40 : i32
    %287 = arith.addi %6, %c40_i32 : i32
    %288 = arith.index_cast %287 : i32 to index
    %289 = memref.load %arg2[%288] : memref<512xi32, #tpu.memory_space<smem>>
    %290 = arith.index_cast %289 : i32 to index
    %c0_125 = arith.constant 0 : index
    %c0_126 = arith.constant 0 : index
    %291 = vector.load %arg3[%290, %c0_125, %c0_126] : memref<64x1x384xf32, #tpu.memory_space<vmem>>, vector<1x1x384xf32>
    %292 = vector.shape_cast %291 : vector<1x1x384xf32> to vector<1x384xf32>
    %c40 = arith.constant 40 : index
    %c0_127 = arith.constant 0 : index
    %293 = vector.load %arg10[%c40, %c0_127] : memref<128x384xf32, #tpu.memory_space<vmem>>, vector<1x384xf32>
    tpu.vector_store %arg10[%c40, %c0_127], %292 {strides = array<i32>} : memref<128x384xf32, #tpu.memory_space<vmem>>, vector<1x384xf32>,
    %c41_i32 = arith.constant 41 : i32
    %294 = arith.addi %6, %c41_i32 : i32
    %295 = arith.index_cast %294 : i32 to index
    %296 = memref.load %arg2[%295] : memref<512xi32, #tpu.memory_space<smem>>
    %297 = arith.index_cast %296 : i32 to index
    %c0_128 = arith.constant 0 : index
    %c0_129 = arith.constant 0 : index
    %298 = vector.load %arg3[%297, %c0_128, %c0_129] : memref<64x1x384xf32, #tpu.memory_space<vmem>>, vector<1x1x384xf32>
    %299 = vector.shape_cast %298 : vector<1x1x384xf32> to vector<1x384xf32>
    %c41 = arith.constant 41 : index
    %c0_130 = arith.constant 0 : index
    %300 = vector.load %arg10[%c41, %c0_130] : memref<128x384xf32, #tpu.memory_space<vmem>>, vector<1x384xf32>
    tpu.vector_store %arg10[%c41, %c0_130], %299 {strides = array<i32>} : memref<128x384xf32, #tpu.memory_space<vmem>>, vector<1x384xf32>,
    %c42_i32 = arith.constant 42 : i32
    %301 = arith.addi %6, %c42_i32 : i32
    %302 = arith.index_cast %301 : i32 to index
    %303 = memref.load %arg2[%302] : memref<512xi32, #tpu.memory_space<smem>>
    %304 = arith.index_cast %303 : i32 to index
    %c0_131 = arith.constant 0 : index
    %c0_132 = arith.constant 0 : index
    %305 = vector.load %arg3[%304, %c0_131, %c0_132] : memref<64x1x384xf32, #tpu.memory_space<vmem>>, vector<1x1x384xf32>
    %306 = vector.shape_cast %305 : vector<1x1x384xf32> to vector<1x384xf32>
    %c42 = arith.constant 42 : index
    %c0_133 = arith.constant 0 : index
    %307 = vector.load %arg10[%c42, %c0_133] : memref<128x384xf32, #tpu.memory_space<vmem>>, vector<1x384xf32>
    tpu.vector_store %arg10[%c42, %c0_133], %306 {strides = array<i32>} : memref<128x384xf32, #tpu.memory_space<vmem>>, vector<1x384xf32>,
    %c43_i32 = arith.constant 43 : i32
    %308 = arith.addi %6, %c43_i32 : i32
    %309 = arith.index_cast %308 : i32 to index
    %310 = memref.load %arg2[%309] : memref<512xi32, #tpu.memory_space<smem>>
    %311 = arith.index_cast %310 : i32 to index
    %c0_134 = arith.constant 0 : index
    %c0_135 = arith.constant 0 : index
    %312 = vector.load %arg3[%311, %c0_134, %c0_135] : memref<64x1x384xf32, #tpu.memory_space<vmem>>, vector<1x1x384xf32>
    %313 = vector.shape_cast %312 : vector<1x1x384xf32> to vector<1x384xf32>
    %c43 = arith.constant 43 : index
    %c0_136 = arith.constant 0 : index
    %314 = vector.load %arg10[%c43, %c0_136] : memref<128x384xf32, #tpu.memory_space<vmem>>, vector<1x384xf32>
    tpu.vector_store %arg10[%c43, %c0_136], %313 {strides = array<i32>} : memref<128x384xf32, #tpu.memory_space<vmem>>, vector<1x384xf32>,
    %c44_i32 = arith.constant 44 : i32
    %315 = arith.addi %6, %c44_i32 : i32
    %316 = arith.index_cast %315 : i32 to index
    %317 = memref.load %arg2[%316] : memref<512xi32, #tpu.memory_space<smem>>
    %318 = arith.index_cast %317 : i32 to index
    %c0_137 = arith.constant 0 : index
    %c0_138 = arith.constant 0 : index
    %319 = vector.load %arg3[%318, %c0_137, %c0_138] : memref<64x1x384xf32, #tpu.memory_space<vmem>>, vector<1x1x384xf32>
    %320 = vector.shape_cast %319 : vector<1x1x384xf32> to vector<1x384xf32>
    %c44 = arith.constant 44 : index
    %c0_139 = arith.constant 0 : index
    %321 = vector.load %arg10[%c44, %c0_139] : memref<128x384xf32, #tpu.memory_space<vmem>>, vector<1x384xf32>
    tpu.vector_store %arg10[%c44, %c0_139], %320 {strides = array<i32>} : memref<128x384xf32, #tpu.memory_space<vmem>>, vector<1x384xf32>,
    %c45_i32 = arith.constant 45 : i32
    %322 = arith.addi %6, %c45_i32 : i32
    %323 = arith.index_cast %322 : i32 to index
    %324 = memref.load %arg2[%323] : memref<512xi32, #tpu.memory_space<smem>>
    %325 = arith.index_cast %324 : i32 to index
    %c0_140 = arith.constant 0 : index
    %c0_141 = arith.constant 0 : index
    %326 = vector.load %arg3[%325, %c0_140, %c0_141] : memref<64x1x384xf32, #tpu.memory_space<vmem>>, vector<1x1x384xf32>
    %327 = vector.shape_cast %326 : vector<1x1x384xf32> to vector<1x384xf32>
    %c45 = arith.constant 45 : index
    %c0_142 = arith.constant 0 : index
    %328 = vector.load %arg10[%c45, %c0_142] : memref<128x384xf32, #tpu.memory_space<vmem>>, vector<1x384xf32>
    tpu.vector_store %arg10[%c45, %c0_142], %327 {strides = array<i32>} : memref<128x384xf32, #tpu.memory_space<vmem>>, vector<1x384xf32>,
    %c46_i32 = arith.constant 46 : i32
    %329 = arith.addi %6, %c46_i32 : i32
    %330 = arith.index_cast %329 : i32 to index
    %331 = memref.load %arg2[%330] : memref<512xi32, #tpu.memory_space<smem>>
    %332 = arith.index_cast %331 : i32 to index
    %c0_143 = arith.constant 0 : index
    %c0_144 = arith.constant 0 : index
    %333 = vector.load %arg3[%332, %c0_143, %c0_144] : memref<64x1x384xf32, #tpu.memory_space<vmem>>, vector<1x1x384xf32>
    %334 = vector.shape_cast %333 : vector<1x1x384xf32> to vector<1x384xf32>
    %c46 = arith.constant 46 : index
    %c0_145 = arith.constant 0 : index
    %335 = vector.load %arg10[%c46, %c0_145] : memref<128x384xf32, #tpu.memory_space<vmem>>, vector<1x384xf32>
    tpu.vector_store %arg10[%c46, %c0_145], %334 {strides = array<i32>} : memref<128x384xf32, #tpu.memory_space<vmem>>, vector<1x384xf32>,
    %c47_i32 = arith.constant 47 : i32
    %336 = arith.addi %6, %c47_i32 : i32
    %337 = arith.index_cast %336 : i32 to index
    %338 = memref.load %arg2[%337] : memref<512xi32, #tpu.memory_space<smem>>
    %339 = arith.index_cast %338 : i32 to index
    %c0_146 = arith.constant 0 : index
    %c0_147 = arith.constant 0 : index
    %340 = vector.load %arg3[%339, %c0_146, %c0_147] : memref<64x1x384xf32, #tpu.memory_space<vmem>>, vector<1x1x384xf32>
    %341 = vector.shape_cast %340 : vector<1x1x384xf32> to vector<1x384xf32>
    %c47 = arith.constant 47 : index
    %c0_148 = arith.constant 0 : index
    %342 = vector.load %arg10[%c47, %c0_148] : memref<128x384xf32, #tpu.memory_space<vmem>>, vector<1x384xf32>
    tpu.vector_store %arg10[%c47, %c0_148], %341 {strides = array<i32>} : memref<128x384xf32, #tpu.memory_space<vmem>>, vector<1x384xf32>,
    %c48_i32 = arith.constant 48 : i32
    %343 = arith.addi %6, %c48_i32 : i32
    %344 = arith.index_cast %343 : i32 to index
    %345 = memref.load %arg2[%344] : memref<512xi32, #tpu.memory_space<smem>>
    %346 = arith.index_cast %345 : i32 to index
    %c0_149 = arith.constant 0 : index
    %c0_150 = arith.constant 0 : index
    %347 = vector.load %arg3[%346, %c0_149, %c0_150] : memref<64x1x384xf32, #tpu.memory_space<vmem>>, vector<1x1x384xf32>
    %348 = vector.shape_cast %347 : vector<1x1x384xf32> to vector<1x384xf32>
    %c48 = arith.constant 48 : index
    %c0_151 = arith.constant 0 : index
    %349 = vector.load %arg10[%c48, %c0_151] : memref<128x384xf32, #tpu.memory_space<vmem>>, vector<1x384xf32>
    tpu.vector_store %arg10[%c48, %c0_151], %348 {strides = array<i32>} : memref<128x384xf32, #tpu.memory_space<vmem>>, vector<1x384xf32>,
    %c49_i32 = arith.constant 49 : i32
    %350 = arith.addi %6, %c49_i32 : i32
    %351 = arith.index_cast %350 : i32 to index
    %352 = memref.load %arg2[%351] : memref<512xi32, #tpu.memory_space<smem>>
    %353 = arith.index_cast %352 : i32 to index
    %c0_152 = arith.constant 0 : index
    %c0_153 = arith.constant 0 : index
    %354 = vector.load %arg3[%353, %c0_152, %c0_153] : memref<64x1x384xf32, #tpu.memory_space<vmem>>, vector<1x1x384xf32>
    %355 = vector.shape_cast %354 : vector<1x1x384xf32> to vector<1x384xf32>
    %c49 = arith.constant 49 : index
    %c0_154 = arith.constant 0 : index
    %356 = vector.load %arg10[%c49, %c0_154] : memref<128x384xf32, #tpu.memory_space<vmem>>, vector<1x384xf32>
    tpu.vector_store %arg10[%c49, %c0_154], %355 {strides = array<i32>} : memref<128x384xf32, #tpu.memory_space<vmem>>, vector<1x384xf32>,
    %c50_i32 = arith.constant 50 : i32
    %357 = arith.addi %6, %c50_i32 : i32
    %358 = arith.index_cast %357 : i32 to index
    %359 = memref.load %arg2[%358] : memref<512xi32, #tpu.memory_space<smem>>
    %360 = arith.index_cast %359 : i32 to index
    %c0_155 = arith.constant 0 : index
    %c0_156 = arith.constant 0 : index
    %361 = vector.load %arg3[%360, %c0_155, %c0_156] : memref<64x1x384xf32, #tpu.memory_space<vmem>>, vector<1x1x384xf32>
    %362 = vector.shape_cast %361 : vector<1x1x384xf32> to vector<1x384xf32>
    %c50 = arith.constant 50 : index
    %c0_157 = arith.constant 0 : index
    %363 = vector.load %arg10[%c50, %c0_157] : memref<128x384xf32, #tpu.memory_space<vmem>>, vector<1x384xf32>
    tpu.vector_store %arg10[%c50, %c0_157], %362 {strides = array<i32>} : memref<128x384xf32, #tpu.memory_space<vmem>>, vector<1x384xf32>,
    %c51_i32 = arith.constant 51 : i32
    %364 = arith.addi %6, %c51_i32 : i32
    %365 = arith.index_cast %364 : i32 to index
    %366 = memref.load %arg2[%365] : memref<512xi32, #tpu.memory_space<smem>>
    %367 = arith.index_cast %366 : i32 to index
    %c0_158 = arith.constant 0 : index
    %c0_159 = arith.constant 0 : index
    %368 = vector.load %arg3[%367, %c0_158, %c0_159] : memref<64x1x384xf32, #tpu.memory_space<vmem>>, vector<1x1x384xf32>
    %369 = vector.shape_cast %368 : vector<1x1x384xf32> to vector<1x384xf32>
    %c51 = arith.constant 51 : index
    %c0_160 = arith.constant 0 : index
    %370 = vector.load %arg10[%c51, %c0_160] : memref<128x384xf32, #tpu.memory_space<vmem>>, vector<1x384xf32>
    tpu.vector_store %arg10[%c51, %c0_160], %369 {strides = array<i32>} : memref<128x384xf32, #tpu.memory_space<vmem>>, vector<1x384xf32>,
    %c52_i32 = arith.constant 52 : i32
    %371 = arith.addi %6, %c52_i32 : i32
    %372 = arith.index_cast %371 : i32 to index
    %373 = memref.load %arg2[%372] : memref<512xi32, #tpu.memory_space<smem>>
    %374 = arith.index_cast %373 : i32 to index
    %c0_161 = arith.constant 0 : index
    %c0_162 = arith.constant 0 : index
    %375 = vector.load %arg3[%374, %c0_161, %c0_162] : memref<64x1x384xf32, #tpu.memory_space<vmem>>, vector<1x1x384xf32>
    %376 = vector.shape_cast %375 : vector<1x1x384xf32> to vector<1x384xf32>
    %c52 = arith.constant 52 : index
    %c0_163 = arith.constant 0 : index
    %377 = vector.load %arg10[%c52, %c0_163] : memref<128x384xf32, #tpu.memory_space<vmem>>, vector<1x384xf32>
    tpu.vector_store %arg10[%c52, %c0_163], %376 {strides = array<i32>} : memref<128x384xf32, #tpu.memory_space<vmem>>, vector<1x384xf32>,
    %c53_i32 = arith.constant 53 : i32
    %378 = arith.addi %6, %c53_i32 : i32
    %379 = arith.index_cast %378 : i32 to index
    %380 = memref.load %arg2[%379] : memref<512xi32, #tpu.memory_space<smem>>
    %381 = arith.index_cast %380 : i32 to index
    %c0_164 = arith.constant 0 : index
    %c0_165 = arith.constant 0 : index
    %382 = vector.load %arg3[%381, %c0_164, %c0_165] : memref<64x1x384xf32, #tpu.memory_space<vmem>>, vector<1x1x384xf32>
    %383 = vector.shape_cast %382 : vector<1x1x384xf32> to vector<1x384xf32>
    %c53 = arith.constant 53 : index
    %c0_166 = arith.constant 0 : index
    %384 = vector.load %arg10[%c53, %c0_166] : memref<128x384xf32, #tpu.memory_space<vmem>>, vector<1x384xf32>
    tpu.vector_store %arg10[%c53, %c0_166], %383 {strides = array<i32>} : memref<128x384xf32, #tpu.memory_space<vmem>>, vector<1x384xf32>,
    %c54_i32 = arith.constant 54 : i32
    %385 = arith.addi %6, %c54_i32 : i32
    %386 = arith.index_cast %385 : i32 to index
    %387 = memref.load %arg2[%386] : memref<512xi32, #tpu.memory_space<smem>>
    %388 = arith.index_cast %387 : i32 to index
    %c0_167 = arith.constant 0 : index
    %c0_168 = arith.constant 0 : index
    %389 = vector.load %arg3[%388, %c0_167, %c0_168] : memref<64x1x384xf32, #tpu.memory_space<vmem>>, vector<1x1x384xf32>
    %390 = vector.shape_cast %389 : vector<1x1x384xf32> to vector<1x384xf32>
    %c54 = arith.constant 54 : index
    %c0_169 = arith.constant 0 : index
    %391 = vector.load %arg10[%c54, %c0_169] : memref<128x384xf32, #tpu.memory_space<vmem>>, vector<1x384xf32>
    tpu.vector_store %arg10[%c54, %c0_169], %390 {strides = array<i32>} : memref<128x384xf32, #tpu.memory_space<vmem>>, vector<1x384xf32>,
    %c55_i32 = arith.constant 55 : i32
    %392 = arith.addi %6, %c55_i32 : i32
    %393 = arith.index_cast %392 : i32 to index
    %394 = memref.load %arg2[%393] : memref<512xi32, #tpu.memory_space<smem>>
    %395 = arith.index_cast %394 : i32 to index
    %c0_170 = arith.constant 0 : index
    %c0_171 = arith.constant 0 : index
    %396 = vector.load %arg3[%395, %c0_170, %c0_171] : memref<64x1x384xf32, #tpu.memory_space<vmem>>, vector<1x1x384xf32>
    %397 = vector.shape_cast %396 : vector<1x1x384xf32> to vector<1x384xf32>
    %c55 = arith.constant 55 : index
    %c0_172 = arith.constant 0 : index
    %398 = vector.load %arg10[%c55, %c0_172] : memref<128x384xf32, #tpu.memory_space<vmem>>, vector<1x384xf32>
    tpu.vector_store %arg10[%c55, %c0_172], %397 {strides = array<i32>} : memref<128x384xf32, #tpu.memory_space<vmem>>, vector<1x384xf32>,
    %c56_i32 = arith.constant 56 : i32
    %399 = arith.addi %6, %c56_i32 : i32
    %400 = arith.index_cast %399 : i32 to index
    %401 = memref.load %arg2[%400] : memref<512xi32, #tpu.memory_space<smem>>
    %402 = arith.index_cast %401 : i32 to index
    %c0_173 = arith.constant 0 : index
    %c0_174 = arith.constant 0 : index
    %403 = vector.load %arg3[%402, %c0_173, %c0_174] : memref<64x1x384xf32, #tpu.memory_space<vmem>>, vector<1x1x384xf32>
    %404 = vector.shape_cast %403 : vector<1x1x384xf32> to vector<1x384xf32>
    %c56 = arith.constant 56 : index
    %c0_175 = arith.constant 0 : index
    %405 = vector.load %arg10[%c56, %c0_175] : memref<128x384xf32, #tpu.memory_space<vmem>>, vector<1x384xf32>
    tpu.vector_store %arg10[%c56, %c0_175], %404 {strides = array<i32>} : memref<128x384xf32, #tpu.memory_space<vmem>>, vector<1x384xf32>,
    %c57_i32 = arith.constant 57 : i32
    %406 = arith.addi %6, %c57_i32 : i32
    %407 = arith.index_cast %406 : i32 to index
    %408 = memref.load %arg2[%407] : memref<512xi32, #tpu.memory_space<smem>>
    %409 = arith.index_cast %408 : i32 to index
    %c0_176 = arith.constant 0 : index
    %c0_177 = arith.constant 0 : index
    %410 = vector.load %arg3[%409, %c0_176, %c0_177] : memref<64x1x384xf32, #tpu.memory_space<vmem>>, vector<1x1x384xf32>
    %411 = vector.shape_cast %410 : vector<1x1x384xf32> to vector<1x384xf32>
    %c57 = arith.constant 57 : index
    %c0_178 = arith.constant 0 : index
    %412 = vector.load %arg10[%c57, %c0_178] : memref<128x384xf32, #tpu.memory_space<vmem>>, vector<1x384xf32>
    tpu.vector_store %arg10[%c57, %c0_178], %411 {strides = array<i32>} : memref<128x384xf32, #tpu.memory_space<vmem>>, vector<1x384xf32>,
    %c58_i32 = arith.constant 58 : i32
    %413 = arith.addi %6, %c58_i32 : i32
    %414 = arith.index_cast %413 : i32 to index
    %415 = memref.load %arg2[%414] : memref<512xi32, #tpu.memory_space<smem>>
    %416 = arith.index_cast %415 : i32 to index
    %c0_179 = arith.constant 0 : index
    %c0_180 = arith.constant 0 : index
    %417 = vector.load %arg3[%416, %c0_179, %c0_180] : memref<64x1x384xf32, #tpu.memory_space<vmem>>, vector<1x1x384xf32>
    %418 = vector.shape_cast %417 : vector<1x1x384xf32> to vector<1x384xf32>
    %c58 = arith.constant 58 : index
    %c0_181 = arith.constant 0 : index
    %419 = vector.load %arg10[%c58, %c0_181] : memref<128x384xf32, #tpu.memory_space<vmem>>, vector<1x384xf32>
    tpu.vector_store %arg10[%c58, %c0_181], %418 {strides = array<i32>} : memref<128x384xf32, #tpu.memory_space<vmem>>, vector<1x384xf32>,
    %c59_i32 = arith.constant 59 : i32
    %420 = arith.addi %6, %c59_i32 : i32
    %421 = arith.index_cast %420 : i32 to index
    %422 = memref.load %arg2[%421] : memref<512xi32, #tpu.memory_space<smem>>
    %423 = arith.index_cast %422 : i32 to index
    %c0_182 = arith.constant 0 : index
    %c0_183 = arith.constant 0 : index
    %424 = vector.load %arg3[%423, %c0_182, %c0_183] : memref<64x1x384xf32, #tpu.memory_space<vmem>>, vector<1x1x384xf32>
    %425 = vector.shape_cast %424 : vector<1x1x384xf32> to vector<1x384xf32>
    %c59 = arith.constant 59 : index
    %c0_184 = arith.constant 0 : index
    %426 = vector.load %arg10[%c59, %c0_184] : memref<128x384xf32, #tpu.memory_space<vmem>>, vector<1x384xf32>
    tpu.vector_store %arg10[%c59, %c0_184], %425 {strides = array<i32>} : memref<128x384xf32, #tpu.memory_space<vmem>>, vector<1x384xf32>,
    %c60_i32 = arith.constant 60 : i32
    %427 = arith.addi %6, %c60_i32 : i32
    %428 = arith.index_cast %427 : i32 to index
    %429 = memref.load %arg2[%428] : memref<512xi32, #tpu.memory_space<smem>>
    %430 = arith.index_cast %429 : i32 to index
    %c0_185 = arith.constant 0 : index
    %c0_186 = arith.constant 0 : index
    %431 = vector.load %arg3[%430, %c0_185, %c0_186] : memref<64x1x384xf32, #tpu.memory_space<vmem>>, vector<1x1x384xf32>
    %432 = vector.shape_cast %431 : vector<1x1x384xf32> to vector<1x384xf32>
    %c60 = arith.constant 60 : index
    %c0_187 = arith.constant 0 : index
    %433 = vector.load %arg10[%c60, %c0_187] : memref<128x384xf32, #tpu.memory_space<vmem>>, vector<1x384xf32>
    tpu.vector_store %arg10[%c60, %c0_187], %432 {strides = array<i32>} : memref<128x384xf32, #tpu.memory_space<vmem>>, vector<1x384xf32>,
    %c61_i32 = arith.constant 61 : i32
    %434 = arith.addi %6, %c61_i32 : i32
    %435 = arith.index_cast %434 : i32 to index
    %436 = memref.load %arg2[%435] : memref<512xi32, #tpu.memory_space<smem>>
    %437 = arith.index_cast %436 : i32 to index
    %c0_188 = arith.constant 0 : index
    %c0_189 = arith.constant 0 : index
    %438 = vector.load %arg3[%437, %c0_188, %c0_189] : memref<64x1x384xf32, #tpu.memory_space<vmem>>, vector<1x1x384xf32>
    %439 = vector.shape_cast %438 : vector<1x1x384xf32> to vector<1x384xf32>
    %c61 = arith.constant 61 : index
    %c0_190 = arith.constant 0 : index
    %440 = vector.load %arg10[%c61, %c0_190] : memref<128x384xf32, #tpu.memory_space<vmem>>, vector<1x384xf32>
    tpu.vector_store %arg10[%c61, %c0_190], %439 {strides = array<i32>} : memref<128x384xf32, #tpu.memory_space<vmem>>, vector<1x384xf32>,
    %c62_i32 = arith.constant 62 : i32
    %441 = arith.addi %6, %c62_i32 : i32
    %442 = arith.index_cast %441 : i32 to index
    %443 = memref.load %arg2[%442] : memref<512xi32, #tpu.memory_space<smem>>
    %444 = arith.index_cast %443 : i32 to index
    %c0_191 = arith.constant 0 : index
    %c0_192 = arith.constant 0 : index
    %445 = vector.load %arg3[%444, %c0_191, %c0_192] : memref<64x1x384xf32, #tpu.memory_space<vmem>>, vector<1x1x384xf32>
    %446 = vector.shape_cast %445 : vector<1x1x384xf32> to vector<1x384xf32>
    %c62 = arith.constant 62 : index
    %c0_193 = arith.constant 0 : index
    %447 = vector.load %arg10[%c62, %c0_193] : memref<128x384xf32, #tpu.memory_space<vmem>>, vector<1x384xf32>
    tpu.vector_store %arg10[%c62, %c0_193], %446 {strides = array<i32>} : memref<128x384xf32, #tpu.memory_space<vmem>>, vector<1x384xf32>,
    %c63_i32 = arith.constant 63 : i32
    %448 = arith.addi %6, %c63_i32 : i32
    %449 = arith.index_cast %448 : i32 to index
    %450 = memref.load %arg2[%449] : memref<512xi32, #tpu.memory_space<smem>>
    %451 = arith.index_cast %450 : i32 to index
    %c0_194 = arith.constant 0 : index
    %c0_195 = arith.constant 0 : index
    %452 = vector.load %arg3[%451, %c0_194, %c0_195] : memref<64x1x384xf32, #tpu.memory_space<vmem>>, vector<1x1x384xf32>
    %453 = vector.shape_cast %452 : vector<1x1x384xf32> to vector<1x384xf32>
    %c63 = arith.constant 63 : index
    %c0_196 = arith.constant 0 : index
    %454 = vector.load %arg10[%c63, %c0_196] : memref<128x384xf32, #tpu.memory_space<vmem>>, vector<1x384xf32>
    tpu.vector_store %arg10[%c63, %c0_196], %453 {strides = array<i32>} : memref<128x384xf32, #tpu.memory_space<vmem>>, vector<1x384xf32>,
    %c64_i32 = arith.constant 64 : i32
    %455 = arith.addi %6, %c64_i32 : i32
    %456 = arith.index_cast %455 : i32 to index
    %457 = memref.load %arg2[%456] : memref<512xi32, #tpu.memory_space<smem>>
    %458 = arith.index_cast %457 : i32 to index
    %c0_197 = arith.constant 0 : index
    %c0_198 = arith.constant 0 : index
    %459 = vector.load %arg3[%458, %c0_197, %c0_198] : memref<64x1x384xf32, #tpu.memory_space<vmem>>, vector<1x1x384xf32>
    %460 = vector.shape_cast %459 : vector<1x1x384xf32> to vector<1x384xf32>
    %c64 = arith.constant 64 : index
    %c0_199 = arith.constant 0 : index
    %461 = vector.load %arg10[%c64, %c0_199] : memref<128x384xf32, #tpu.memory_space<vmem>>, vector<1x384xf32>
    tpu.vector_store %arg10[%c64, %c0_199], %460 {strides = array<i32>} : memref<128x384xf32, #tpu.memory_space<vmem>>, vector<1x384xf32>,
    %c65_i32 = arith.constant 65 : i32
    %462 = arith.addi %6, %c65_i32 : i32
    %463 = arith.index_cast %462 : i32 to index
    %464 = memref.load %arg2[%463] : memref<512xi32, #tpu.memory_space<smem>>
    %465 = arith.index_cast %464 : i32 to index
    %c0_200 = arith.constant 0 : index
    %c0_201 = arith.constant 0 : index
    %466 = vector.load %arg3[%465, %c0_200, %c0_201] : memref<64x1x384xf32, #tpu.memory_space<vmem>>, vector<1x1x384xf32>
    %467 = vector.shape_cast %466 : vector<1x1x384xf32> to vector<1x384xf32>
    %c65 = arith.constant 65 : index
    %c0_202 = arith.constant 0 : index
    %468 = vector.load %arg10[%c65, %c0_202] : memref<128x384xf32, #tpu.memory_space<vmem>>, vector<1x384xf32>
    tpu.vector_store %arg10[%c65, %c0_202], %467 {strides = array<i32>} : memref<128x384xf32, #tpu.memory_space<vmem>>, vector<1x384xf32>,
    %c66_i32 = arith.constant 66 : i32
    %469 = arith.addi %6, %c66_i32 : i32
    %470 = arith.index_cast %469 : i32 to index
    %471 = memref.load %arg2[%470] : memref<512xi32, #tpu.memory_space<smem>>
    %472 = arith.index_cast %471 : i32 to index
    %c0_203 = arith.constant 0 : index
    %c0_204 = arith.constant 0 : index
    %473 = vector.load %arg3[%472, %c0_203, %c0_204] : memref<64x1x384xf32, #tpu.memory_space<vmem>>, vector<1x1x384xf32>
    %474 = vector.shape_cast %473 : vector<1x1x384xf32> to vector<1x384xf32>
    %c66 = arith.constant 66 : index
    %c0_205 = arith.constant 0 : index
    %475 = vector.load %arg10[%c66, %c0_205] : memref<128x384xf32, #tpu.memory_space<vmem>>, vector<1x384xf32>
    tpu.vector_store %arg10[%c66, %c0_205], %474 {strides = array<i32>} : memref<128x384xf32, #tpu.memory_space<vmem>>, vector<1x384xf32>,
    %c67_i32 = arith.constant 67 : i32
    %476 = arith.addi %6, %c67_i32 : i32
    %477 = arith.index_cast %476 : i32 to index
    %478 = memref.load %arg2[%477] : memref<512xi32, #tpu.memory_space<smem>>
    %479 = arith.index_cast %478 : i32 to index
    %c0_206 = arith.constant 0 : index
    %c0_207 = arith.constant 0 : index
    %480 = vector.load %arg3[%479, %c0_206, %c0_207] : memref<64x1x384xf32, #tpu.memory_space<vmem>>, vector<1x1x384xf32>
    %481 = vector.shape_cast %480 : vector<1x1x384xf32> to vector<1x384xf32>
    %c67 = arith.constant 67 : index
    %c0_208 = arith.constant 0 : index
    %482 = vector.load %arg10[%c67, %c0_208] : memref<128x384xf32, #tpu.memory_space<vmem>>, vector<1x384xf32>
    tpu.vector_store %arg10[%c67, %c0_208], %481 {strides = array<i32>} : memref<128x384xf32, #tpu.memory_space<vmem>>, vector<1x384xf32>,
    %c68_i32 = arith.constant 68 : i32
    %483 = arith.addi %6, %c68_i32 : i32
    %484 = arith.index_cast %483 : i32 to index
    %485 = memref.load %arg2[%484] : memref<512xi32, #tpu.memory_space<smem>>
    %486 = arith.index_cast %485 : i32 to index
    %c0_209 = arith.constant 0 : index
    %c0_210 = arith.constant 0 : index
    %487 = vector.load %arg3[%486, %c0_209, %c0_210] : memref<64x1x384xf32, #tpu.memory_space<vmem>>, vector<1x1x384xf32>
    %488 = vector.shape_cast %487 : vector<1x1x384xf32> to vector<1x384xf32>
    %c68 = arith.constant 68 : index
    %c0_211 = arith.constant 0 : index
    %489 = vector.load %arg10[%c68, %c0_211] : memref<128x384xf32, #tpu.memory_space<vmem>>, vector<1x384xf32>
    tpu.vector_store %arg10[%c68, %c0_211], %488 {strides = array<i32>} : memref<128x384xf32, #tpu.memory_space<vmem>>, vector<1x384xf32>,
    %c69_i32 = arith.constant 69 : i32
    %490 = arith.addi %6, %c69_i32 : i32
    %491 = arith.index_cast %490 : i32 to index
    %492 = memref.load %arg2[%491] : memref<512xi32, #tpu.memory_space<smem>>
    %493 = arith.index_cast %492 : i32 to index
    %c0_212 = arith.constant 0 : index
    %c0_213 = arith.constant 0 : index
    %494 = vector.load %arg3[%493, %c0_212, %c0_213] : memref<64x1x384xf32, #tpu.memory_space<vmem>>, vector<1x1x384xf32>
    %495 = vector.shape_cast %494 : vector<1x1x384xf32> to vector<1x384xf32>
    %c69 = arith.constant 69 : index
    %c0_214 = arith.constant 0 : index
    %496 = vector.load %arg10[%c69, %c0_214] : memref<128x384xf32, #tpu.memory_space<vmem>>, vector<1x384xf32>
    tpu.vector_store %arg10[%c69, %c0_214], %495 {strides = array<i32>} : memref<128x384xf32, #tpu.memory_space<vmem>>, vector<1x384xf32>,
    %c70_i32 = arith.constant 70 : i32
    %497 = arith.addi %6, %c70_i32 : i32
    %498 = arith.index_cast %497 : i32 to index
    %499 = memref.load %arg2[%498] : memref<512xi32, #tpu.memory_space<smem>>
    %500 = arith.index_cast %499 : i32 to index
    %c0_215 = arith.constant 0 : index
    %c0_216 = arith.constant 0 : index
    %501 = vector.load %arg3[%500, %c0_215, %c0_216] : memref<64x1x384xf32, #tpu.memory_space<vmem>>, vector<1x1x384xf32>
    %502 = vector.shape_cast %501 : vector<1x1x384xf32> to vector<1x384xf32>
    %c70 = arith.constant 70 : index
    %c0_217 = arith.constant 0 : index
    %503 = vector.load %arg10[%c70, %c0_217] : memref<128x384xf32, #tpu.memory_space<vmem>>, vector<1x384xf32>
    tpu.vector_store %arg10[%c70, %c0_217], %502 {strides = array<i32>} : memref<128x384xf32, #tpu.memory_space<vmem>>, vector<1x384xf32>,
    %c71_i32 = arith.constant 71 : i32
    %504 = arith.addi %6, %c71_i32 : i32
    %505 = arith.index_cast %504 : i32 to index
    %506 = memref.load %arg2[%505] : memref<512xi32, #tpu.memory_space<smem>>
    %507 = arith.index_cast %506 : i32 to index
    %c0_218 = arith.constant 0 : index
    %c0_219 = arith.constant 0 : index
    %508 = vector.load %arg3[%507, %c0_218, %c0_219] : memref<64x1x384xf32, #tpu.memory_space<vmem>>, vector<1x1x384xf32>
    %509 = vector.shape_cast %508 : vector<1x1x384xf32> to vector<1x384xf32>
    %c71 = arith.constant 71 : index
    %c0_220 = arith.constant 0 : index
    %510 = vector.load %arg10[%c71, %c0_220] : memref<128x384xf32, #tpu.memory_space<vmem>>, vector<1x384xf32>
    tpu.vector_store %arg10[%c71, %c0_220], %509 {strides = array<i32>} : memref<128x384xf32, #tpu.memory_space<vmem>>, vector<1x384xf32>,
    %c72_i32 = arith.constant 72 : i32
    %511 = arith.addi %6, %c72_i32 : i32
    %512 = arith.index_cast %511 : i32 to index
    %513 = memref.load %arg2[%512] : memref<512xi32, #tpu.memory_space<smem>>
    %514 = arith.index_cast %513 : i32 to index
    %c0_221 = arith.constant 0 : index
    %c0_222 = arith.constant 0 : index
    %515 = vector.load %arg3[%514, %c0_221, %c0_222] : memref<64x1x384xf32, #tpu.memory_space<vmem>>, vector<1x1x384xf32>
    %516 = vector.shape_cast %515 : vector<1x1x384xf32> to vector<1x384xf32>
    %c72 = arith.constant 72 : index
    %c0_223 = arith.constant 0 : index
    %517 = vector.load %arg10[%c72, %c0_223] : memref<128x384xf32, #tpu.memory_space<vmem>>, vector<1x384xf32>
    tpu.vector_store %arg10[%c72, %c0_223], %516 {strides = array<i32>} : memref<128x384xf32, #tpu.memory_space<vmem>>, vector<1x384xf32>,
    %c73_i32 = arith.constant 73 : i32
    %518 = arith.addi %6, %c73_i32 : i32
    %519 = arith.index_cast %518 : i32 to index
    %520 = memref.load %arg2[%519] : memref<512xi32, #tpu.memory_space<smem>>
    %521 = arith.index_cast %520 : i32 to index
    %c0_224 = arith.constant 0 : index
    %c0_225 = arith.constant 0 : index
    %522 = vector.load %arg3[%521, %c0_224, %c0_225] : memref<64x1x384xf32, #tpu.memory_space<vmem>>, vector<1x1x384xf32>
    %523 = vector.shape_cast %522 : vector<1x1x384xf32> to vector<1x384xf32>
    %c73 = arith.constant 73 : index
    %c0_226 = arith.constant 0 : index
    %524 = vector.load %arg10[%c73, %c0_226] : memref<128x384xf32, #tpu.memory_space<vmem>>, vector<1x384xf32>
    tpu.vector_store %arg10[%c73, %c0_226], %523 {strides = array<i32>} : memref<128x384xf32, #tpu.memory_space<vmem>>, vector<1x384xf32>,
    %c74_i32 = arith.constant 74 : i32
    %525 = arith.addi %6, %c74_i32 : i32
    %526 = arith.index_cast %525 : i32 to index
    %527 = memref.load %arg2[%526] : memref<512xi32, #tpu.memory_space<smem>>
    %528 = arith.index_cast %527 : i32 to index
    %c0_227 = arith.constant 0 : index
    %c0_228 = arith.constant 0 : index
    %529 = vector.load %arg3[%528, %c0_227, %c0_228] : memref<64x1x384xf32, #tpu.memory_space<vmem>>, vector<1x1x384xf32>
    %530 = vector.shape_cast %529 : vector<1x1x384xf32> to vector<1x384xf32>
    %c74 = arith.constant 74 : index
    %c0_229 = arith.constant 0 : index
    %531 = vector.load %arg10[%c74, %c0_229] : memref<128x384xf32, #tpu.memory_space<vmem>>, vector<1x384xf32>
    tpu.vector_store %arg10[%c74, %c0_229], %530 {strides = array<i32>} : memref<128x384xf32, #tpu.memory_space<vmem>>, vector<1x384xf32>,
    %c75_i32 = arith.constant 75 : i32
    %532 = arith.addi %6, %c75_i32 : i32
    %533 = arith.index_cast %532 : i32 to index
    %534 = memref.load %arg2[%533] : memref<512xi32, #tpu.memory_space<smem>>
    %535 = arith.index_cast %534 : i32 to index
    %c0_230 = arith.constant 0 : index
    %c0_231 = arith.constant 0 : index
    %536 = vector.load %arg3[%535, %c0_230, %c0_231] : memref<64x1x384xf32, #tpu.memory_space<vmem>>, vector<1x1x384xf32>
    %537 = vector.shape_cast %536 : vector<1x1x384xf32> to vector<1x384xf32>
    %c75 = arith.constant 75 : index
    %c0_232 = arith.constant 0 : index
    %538 = vector.load %arg10[%c75, %c0_232] : memref<128x384xf32, #tpu.memory_space<vmem>>, vector<1x384xf32>
    tpu.vector_store %arg10[%c75, %c0_232], %537 {strides = array<i32>} : memref<128x384xf32, #tpu.memory_space<vmem>>, vector<1x384xf32>,
    %c76_i32 = arith.constant 76 : i32
    %539 = arith.addi %6, %c76_i32 : i32
    %540 = arith.index_cast %539 : i32 to index
    %541 = memref.load %arg2[%540] : memref<512xi32, #tpu.memory_space<smem>>
    %542 = arith.index_cast %541 : i32 to index
    %c0_233 = arith.constant 0 : index
    %c0_234 = arith.constant 0 : index
    %543 = vector.load %arg3[%542, %c0_233, %c0_234] : memref<64x1x384xf32, #tpu.memory_space<vmem>>, vector<1x1x384xf32>
    %544 = vector.shape_cast %543 : vector<1x1x384xf32> to vector<1x384xf32>
    %c76 = arith.constant 76 : index
    %c0_235 = arith.constant 0 : index
    %545 = vector.load %arg10[%c76, %c0_235] : memref<128x384xf32, #tpu.memory_space<vmem>>, vector<1x384xf32>
    tpu.vector_store %arg10[%c76, %c0_235], %544 {strides = array<i32>} : memref<128x384xf32, #tpu.memory_space<vmem>>, vector<1x384xf32>,
    %c77_i32 = arith.constant 77 : i32
    %546 = arith.addi %6, %c77_i32 : i32
    %547 = arith.index_cast %546 : i32 to index
    %548 = memref.load %arg2[%547] : memref<512xi32, #tpu.memory_space<smem>>
    %549 = arith.index_cast %548 : i32 to index
    %c0_236 = arith.constant 0 : index
    %c0_237 = arith.constant 0 : index
    %550 = vector.load %arg3[%549, %c0_236, %c0_237] : memref<64x1x384xf32, #tpu.memory_space<vmem>>, vector<1x1x384xf32>
    %551 = vector.shape_cast %550 : vector<1x1x384xf32> to vector<1x384xf32>
    %c77 = arith.constant 77 : index
    %c0_238 = arith.constant 0 : index
    %552 = vector.load %arg10[%c77, %c0_238] : memref<128x384xf32, #tpu.memory_space<vmem>>, vector<1x384xf32>
    tpu.vector_store %arg10[%c77, %c0_238], %551 {strides = array<i32>} : memref<128x384xf32, #tpu.memory_space<vmem>>, vector<1x384xf32>,
    %c78_i32 = arith.constant 78 : i32
    %553 = arith.addi %6, %c78_i32 : i32
    %554 = arith.index_cast %553 : i32 to index
    %555 = memref.load %arg2[%554] : memref<512xi32, #tpu.memory_space<smem>>
    %556 = arith.index_cast %555 : i32 to index
    %c0_239 = arith.constant 0 : index
    %c0_240 = arith.constant 0 : index
    %557 = vector.load %arg3[%556, %c0_239, %c0_240] : memref<64x1x384xf32, #tpu.memory_space<vmem>>, vector<1x1x384xf32>
    %558 = vector.shape_cast %557 : vector<1x1x384xf32> to vector<1x384xf32>
    %c78 = arith.constant 78 : index
    %c0_241 = arith.constant 0 : index
    %559 = vector.load %arg10[%c78, %c0_241] : memref<128x384xf32, #tpu.memory_space<vmem>>, vector<1x384xf32>
    tpu.vector_store %arg10[%c78, %c0_241], %558 {strides = array<i32>} : memref<128x384xf32, #tpu.memory_space<vmem>>, vector<1x384xf32>,
    %c79_i32 = arith.constant 79 : i32
    %560 = arith.addi %6, %c79_i32 : i32
    %561 = arith.index_cast %560 : i32 to index
    %562 = memref.load %arg2[%561] : memref<512xi32, #tpu.memory_space<smem>>
    %563 = arith.index_cast %562 : i32 to index
    %c0_242 = arith.constant 0 : index
    %c0_243 = arith.constant 0 : index
    %564 = vector.load %arg3[%563, %c0_242, %c0_243] : memref<64x1x384xf32, #tpu.memory_space<vmem>>, vector<1x1x384xf32>
    %565 = vector.shape_cast %564 : vector<1x1x384xf32> to vector<1x384xf32>
    %c79 = arith.constant 79 : index
    %c0_244 = arith.constant 0 : index
    %566 = vector.load %arg10[%c79, %c0_244] : memref<128x384xf32, #tpu.memory_space<vmem>>, vector<1x384xf32>
    tpu.vector_store %arg10[%c79, %c0_244], %565 {strides = array<i32>} : memref<128x384xf32, #tpu.memory_space<vmem>>, vector<1x384xf32>,
    %c80_i32 = arith.constant 80 : i32
    %567 = arith.addi %6, %c80_i32 : i32
    %568 = arith.index_cast %567 : i32 to index
    %569 = memref.load %arg2[%568] : memref<512xi32, #tpu.memory_space<smem>>
    %570 = arith.index_cast %569 : i32 to index
    %c0_245 = arith.constant 0 : index
    %c0_246 = arith.constant 0 : index
    %571 = vector.load %arg3[%570, %c0_245, %c0_246] : memref<64x1x384xf32, #tpu.memory_space<vmem>>, vector<1x1x384xf32>
    %572 = vector.shape_cast %571 : vector<1x1x384xf32> to vector<1x384xf32>
    %c80 = arith.constant 80 : index
    %c0_247 = arith.constant 0 : index
    %573 = vector.load %arg10[%c80, %c0_247] : memref<128x384xf32, #tpu.memory_space<vmem>>, vector<1x384xf32>
    tpu.vector_store %arg10[%c80, %c0_247], %572 {strides = array<i32>} : memref<128x384xf32, #tpu.memory_space<vmem>>, vector<1x384xf32>,
    %c81_i32 = arith.constant 81 : i32
    %574 = arith.addi %6, %c81_i32 : i32
    %575 = arith.index_cast %574 : i32 to index
    %576 = memref.load %arg2[%575] : memref<512xi32, #tpu.memory_space<smem>>
    %577 = arith.index_cast %576 : i32 to index
    %c0_248 = arith.constant 0 : index
    %c0_249 = arith.constant 0 : index
    %578 = vector.load %arg3[%577, %c0_248, %c0_249] : memref<64x1x384xf32, #tpu.memory_space<vmem>>, vector<1x1x384xf32>
    %579 = vector.shape_cast %578 : vector<1x1x384xf32> to vector<1x384xf32>
    %c81 = arith.constant 81 : index
    %c0_250 = arith.constant 0 : index
    %580 = vector.load %arg10[%c81, %c0_250] : memref<128x384xf32, #tpu.memory_space<vmem>>, vector<1x384xf32>
    tpu.vector_store %arg10[%c81, %c0_250], %579 {strides = array<i32>} : memref<128x384xf32, #tpu.memory_space<vmem>>, vector<1x384xf32>,
    %c82_i32 = arith.constant 82 : i32
    %581 = arith.addi %6, %c82_i32 : i32
    %582 = arith.index_cast %581 : i32 to index
    %583 = memref.load %arg2[%582] : memref<512xi32, #tpu.memory_space<smem>>
    %584 = arith.index_cast %583 : i32 to index
    %c0_251 = arith.constant 0 : index
    %c0_252 = arith.constant 0 : index
    %585 = vector.load %arg3[%584, %c0_251, %c0_252] : memref<64x1x384xf32, #tpu.memory_space<vmem>>, vector<1x1x384xf32>
    %586 = vector.shape_cast %585 : vector<1x1x384xf32> to vector<1x384xf32>
    %c82 = arith.constant 82 : index
    %c0_253 = arith.constant 0 : index
    %587 = vector.load %arg10[%c82, %c0_253] : memref<128x384xf32, #tpu.memory_space<vmem>>, vector<1x384xf32>
    tpu.vector_store %arg10[%c82, %c0_253], %586 {strides = array<i32>} : memref<128x384xf32, #tpu.memory_space<vmem>>, vector<1x384xf32>,
    %c83_i32 = arith.constant 83 : i32
    %588 = arith.addi %6, %c83_i32 : i32
    %589 = arith.index_cast %588 : i32 to index
    %590 = memref.load %arg2[%589] : memref<512xi32, #tpu.memory_space<smem>>
    %591 = arith.index_cast %590 : i32 to index
    %c0_254 = arith.constant 0 : index
    %c0_255 = arith.constant 0 : index
    %592 = vector.load %arg3[%591, %c0_254, %c0_255] : memref<64x1x384xf32, #tpu.memory_space<vmem>>, vector<1x1x384xf32>
    %593 = vector.shape_cast %592 : vector<1x1x384xf32> to vector<1x384xf32>
    %c83 = arith.constant 83 : index
    %c0_256 = arith.constant 0 : index
    %594 = vector.load %arg10[%c83, %c0_256] : memref<128x384xf32, #tpu.memory_space<vmem>>, vector<1x384xf32>
    tpu.vector_store %arg10[%c83, %c0_256], %593 {strides = array<i32>} : memref<128x384xf32, #tpu.memory_space<vmem>>, vector<1x384xf32>,
    %c84_i32 = arith.constant 84 : i32
    %595 = arith.addi %6, %c84_i32 : i32
    %596 = arith.index_cast %595 : i32 to index
    %597 = memref.load %arg2[%596] : memref<512xi32, #tpu.memory_space<smem>>
    %598 = arith.index_cast %597 : i32 to index
    %c0_257 = arith.constant 0 : index
    %c0_258 = arith.constant 0 : index
    %599 = vector.load %arg3[%598, %c0_257, %c0_258] : memref<64x1x384xf32, #tpu.memory_space<vmem>>, vector<1x1x384xf32>
    %600 = vector.shape_cast %599 : vector<1x1x384xf32> to vector<1x384xf32>
    %c84 = arith.constant 84 : index
    %c0_259 = arith.constant 0 : index
    %601 = vector.load %arg10[%c84, %c0_259] : memref<128x384xf32, #tpu.memory_space<vmem>>, vector<1x384xf32>
    tpu.vector_store %arg10[%c84, %c0_259], %600 {strides = array<i32>} : memref<128x384xf32, #tpu.memory_space<vmem>>, vector<1x384xf32>,
    %c85_i32 = arith.constant 85 : i32
    %602 = arith.addi %6, %c85_i32 : i32
    %603 = arith.index_cast %602 : i32 to index
    %604 = memref.load %arg2[%603] : memref<512xi32, #tpu.memory_space<smem>>
    %605 = arith.index_cast %604 : i32 to index
    %c0_260 = arith.constant 0 : index
    %c0_261 = arith.constant 0 : index
    %606 = vector.load %arg3[%605, %c0_260, %c0_261] : memref<64x1x384xf32, #tpu.memory_space<vmem>>, vector<1x1x384xf32>
    %607 = vector.shape_cast %606 : vector<1x1x384xf32> to vector<1x384xf32>
    %c85 = arith.constant 85 : index
    %c0_262 = arith.constant 0 : index
    %608 = vector.load %arg10[%c85, %c0_262] : memref<128x384xf32, #tpu.memory_space<vmem>>, vector<1x384xf32>
    tpu.vector_store %arg10[%c85, %c0_262], %607 {strides = array<i32>} : memref<128x384xf32, #tpu.memory_space<vmem>>, vector<1x384xf32>,
    %c86_i32 = arith.constant 86 : i32
    %609 = arith.addi %6, %c86_i32 : i32
    %610 = arith.index_cast %609 : i32 to index
    %611 = memref.load %arg2[%610] : memref<512xi32, #tpu.memory_space<smem>>
    %612 = arith.index_cast %611 : i32 to index
    %c0_263 = arith.constant 0 : index
    %c0_264 = arith.constant 0 : index
    %613 = vector.load %arg3[%612, %c0_263, %c0_264] : memref<64x1x384xf32, #tpu.memory_space<vmem>>, vector<1x1x384xf32>
    %614 = vector.shape_cast %613 : vector<1x1x384xf32> to vector<1x384xf32>
    %c86 = arith.constant 86 : index
    %c0_265 = arith.constant 0 : index
    %615 = vector.load %arg10[%c86, %c0_265] : memref<128x384xf32, #tpu.memory_space<vmem>>, vector<1x384xf32>
    tpu.vector_store %arg10[%c86, %c0_265], %614 {strides = array<i32>} : memref<128x384xf32, #tpu.memory_space<vmem>>, vector<1x384xf32>,
    %c87_i32 = arith.constant 87 : i32
    %616 = arith.addi %6, %c87_i32 : i32
    %617 = arith.index_cast %616 : i32 to index
    %618 = memref.load %arg2[%617] : memref<512xi32, #tpu.memory_space<smem>>
    %619 = arith.index_cast %618 : i32 to index
    %c0_266 = arith.constant 0 : index
    %c0_267 = arith.constant 0 : index
    %620 = vector.load %arg3[%619, %c0_266, %c0_267] : memref<64x1x384xf32, #tpu.memory_space<vmem>>, vector<1x1x384xf32>
    %621 = vector.shape_cast %620 : vector<1x1x384xf32> to vector<1x384xf32>
    %c87 = arith.constant 87 : index
    %c0_268 = arith.constant 0 : index
    %622 = vector.load %arg10[%c87, %c0_268] : memref<128x384xf32, #tpu.memory_space<vmem>>, vector<1x384xf32>
    tpu.vector_store %arg10[%c87, %c0_268], %621 {strides = array<i32>} : memref<128x384xf32, #tpu.memory_space<vmem>>, vector<1x384xf32>,
    %c88_i32 = arith.constant 88 : i32
    %623 = arith.addi %6, %c88_i32 : i32
    %624 = arith.index_cast %623 : i32 to index
    %625 = memref.load %arg2[%624] : memref<512xi32, #tpu.memory_space<smem>>
    %626 = arith.index_cast %625 : i32 to index
    %c0_269 = arith.constant 0 : index
    %c0_270 = arith.constant 0 : index
    %627 = vector.load %arg3[%626, %c0_269, %c0_270] : memref<64x1x384xf32, #tpu.memory_space<vmem>>, vector<1x1x384xf32>
    %628 = vector.shape_cast %627 : vector<1x1x384xf32> to vector<1x384xf32>
    %c88 = arith.constant 88 : index
    %c0_271 = arith.constant 0 : index
    %629 = vector.load %arg10[%c88, %c0_271] : memref<128x384xf32, #tpu.memory_space<vmem>>, vector<1x384xf32>
    tpu.vector_store %arg10[%c88, %c0_271], %628 {strides = array<i32>} : memref<128x384xf32, #tpu.memory_space<vmem>>, vector<1x384xf32>,
    %c89_i32 = arith.constant 89 : i32
    %630 = arith.addi %6, %c89_i32 : i32
    %631 = arith.index_cast %630 : i32 to index
    %632 = memref.load %arg2[%631] : memref<512xi32, #tpu.memory_space<smem>>
    %633 = arith.index_cast %632 : i32 to index
    %c0_272 = arith.constant 0 : index
    %c0_273 = arith.constant 0 : index
    %634 = vector.load %arg3[%633, %c0_272, %c0_273] : memref<64x1x384xf32, #tpu.memory_space<vmem>>, vector<1x1x384xf32>
    %635 = vector.shape_cast %634 : vector<1x1x384xf32> to vector<1x384xf32>
    %c89 = arith.constant 89 : index
    %c0_274 = arith.constant 0 : index
    %636 = vector.load %arg10[%c89, %c0_274] : memref<128x384xf32, #tpu.memory_space<vmem>>, vector<1x384xf32>
    tpu.vector_store %arg10[%c89, %c0_274], %635 {strides = array<i32>} : memref<128x384xf32, #tpu.memory_space<vmem>>, vector<1x384xf32>,
    %c90_i32 = arith.constant 90 : i32
    %637 = arith.addi %6, %c90_i32 : i32
    %638 = arith.index_cast %637 : i32 to index
    %639 = memref.load %arg2[%638] : memref<512xi32, #tpu.memory_space<smem>>
    %640 = arith.index_cast %639 : i32 to index
    %c0_275 = arith.constant 0 : index
    %c0_276 = arith.constant 0 : index
    %641 = vector.load %arg3[%640, %c0_275, %c0_276] : memref<64x1x384xf32, #tpu.memory_space<vmem>>, vector<1x1x384xf32>
    %642 = vector.shape_cast %641 : vector<1x1x384xf32> to vector<1x384xf32>
    %c90 = arith.constant 90 : index
    %c0_277 = arith.constant 0 : index
    %643 = vector.load %arg10[%c90, %c0_277] : memref<128x384xf32, #tpu.memory_space<vmem>>, vector<1x384xf32>
    tpu.vector_store %arg10[%c90, %c0_277], %642 {strides = array<i32>} : memref<128x384xf32, #tpu.memory_space<vmem>>, vector<1x384xf32>,
    %c91_i32 = arith.constant 91 : i32
    %644 = arith.addi %6, %c91_i32 : i32
    %645 = arith.index_cast %644 : i32 to index
    %646 = memref.load %arg2[%645] : memref<512xi32, #tpu.memory_space<smem>>
    %647 = arith.index_cast %646 : i32 to index
    %c0_278 = arith.constant 0 : index
    %c0_279 = arith.constant 0 : index
    %648 = vector.load %arg3[%647, %c0_278, %c0_279] : memref<64x1x384xf32, #tpu.memory_space<vmem>>, vector<1x1x384xf32>
    %649 = vector.shape_cast %648 : vector<1x1x384xf32> to vector<1x384xf32>
    %c91 = arith.constant 91 : index
    %c0_280 = arith.constant 0 : index
    %650 = vector.load %arg10[%c91, %c0_280] : memref<128x384xf32, #tpu.memory_space<vmem>>, vector<1x384xf32>
    tpu.vector_store %arg10[%c91, %c0_280], %649 {strides = array<i32>} : memref<128x384xf32, #tpu.memory_space<vmem>>, vector<1x384xf32>,
    %c92_i32 = arith.constant 92 : i32
    %651 = arith.addi %6, %c92_i32 : i32
    %652 = arith.index_cast %651 : i32 to index
    %653 = memref.load %arg2[%652] : memref<512xi32, #tpu.memory_space<smem>>
    %654 = arith.index_cast %653 : i32 to index
    %c0_281 = arith.constant 0 : index
    %c0_282 = arith.constant 0 : index
    %655 = vector.load %arg3[%654, %c0_281, %c0_282] : memref<64x1x384xf32, #tpu.memory_space<vmem>>, vector<1x1x384xf32>
    %656 = vector.shape_cast %655 : vector<1x1x384xf32> to vector<1x384xf32>
    %c92 = arith.constant 92 : index
    %c0_283 = arith.constant 0 : index
    %657 = vector.load %arg10[%c92, %c0_283] : memref<128x384xf32, #tpu.memory_space<vmem>>, vector<1x384xf32>
    tpu.vector_store %arg10[%c92, %c0_283], %656 {strides = array<i32>} : memref<128x384xf32, #tpu.memory_space<vmem>>, vector<1x384xf32>,
    %c93_i32 = arith.constant 93 : i32
    %658 = arith.addi %6, %c93_i32 : i32
    %659 = arith.index_cast %658 : i32 to index
    %660 = memref.load %arg2[%659] : memref<512xi32, #tpu.memory_space<smem>>
    %661 = arith.index_cast %660 : i32 to index
    %c0_284 = arith.constant 0 : index
    %c0_285 = arith.constant 0 : index
    %662 = vector.load %arg3[%661, %c0_284, %c0_285] : memref<64x1x384xf32, #tpu.memory_space<vmem>>, vector<1x1x384xf32>
    %663 = vector.shape_cast %662 : vector<1x1x384xf32> to vector<1x384xf32>
    %c93 = arith.constant 93 : index
    %c0_286 = arith.constant 0 : index
    %664 = vector.load %arg10[%c93, %c0_286] : memref<128x384xf32, #tpu.memory_space<vmem>>, vector<1x384xf32>
    tpu.vector_store %arg10[%c93, %c0_286], %663 {strides = array<i32>} : memref<128x384xf32, #tpu.memory_space<vmem>>, vector<1x384xf32>,
    %c94_i32 = arith.constant 94 : i32
    %665 = arith.addi %6, %c94_i32 : i32
    %666 = arith.index_cast %665 : i32 to index
    %667 = memref.load %arg2[%666] : memref<512xi32, #tpu.memory_space<smem>>
    %668 = arith.index_cast %667 : i32 to index
    %c0_287 = arith.constant 0 : index
    %c0_288 = arith.constant 0 : index
    %669 = vector.load %arg3[%668, %c0_287, %c0_288] : memref<64x1x384xf32, #tpu.memory_space<vmem>>, vector<1x1x384xf32>
    %670 = vector.shape_cast %669 : vector<1x1x384xf32> to vector<1x384xf32>
    %c94 = arith.constant 94 : index
    %c0_289 = arith.constant 0 : index
    %671 = vector.load %arg10[%c94, %c0_289] : memref<128x384xf32, #tpu.memory_space<vmem>>, vector<1x384xf32>
    tpu.vector_store %arg10[%c94, %c0_289], %670 {strides = array<i32>} : memref<128x384xf32, #tpu.memory_space<vmem>>, vector<1x384xf32>,
    %c95_i32 = arith.constant 95 : i32
    %672 = arith.addi %6, %c95_i32 : i32
    %673 = arith.index_cast %672 : i32 to index
    %674 = memref.load %arg2[%673] : memref<512xi32, #tpu.memory_space<smem>>
    %675 = arith.index_cast %674 : i32 to index
    %c0_290 = arith.constant 0 : index
    %c0_291 = arith.constant 0 : index
    %676 = vector.load %arg3[%675, %c0_290, %c0_291] : memref<64x1x384xf32, #tpu.memory_space<vmem>>, vector<1x1x384xf32>
    %677 = vector.shape_cast %676 : vector<1x1x384xf32> to vector<1x384xf32>
    %c95 = arith.constant 95 : index
    %c0_292 = arith.constant 0 : index
    %678 = vector.load %arg10[%c95, %c0_292] : memref<128x384xf32, #tpu.memory_space<vmem>>, vector<1x384xf32>
    tpu.vector_store %arg10[%c95, %c0_292], %677 {strides = array<i32>} : memref<128x384xf32, #tpu.memory_space<vmem>>, vector<1x384xf32>,
    %c96_i32 = arith.constant 96 : i32
    %679 = arith.addi %6, %c96_i32 : i32
    %680 = arith.index_cast %679 : i32 to index
    %681 = memref.load %arg2[%680] : memref<512xi32, #tpu.memory_space<smem>>
    %682 = arith.index_cast %681 : i32 to index
    %c0_293 = arith.constant 0 : index
    %c0_294 = arith.constant 0 : index
    %683 = vector.load %arg3[%682, %c0_293, %c0_294] : memref<64x1x384xf32, #tpu.memory_space<vmem>>, vector<1x1x384xf32>
    %684 = vector.shape_cast %683 : vector<1x1x384xf32> to vector<1x384xf32>
    %c96 = arith.constant 96 : index
    %c0_295 = arith.constant 0 : index
    %685 = vector.load %arg10[%c96, %c0_295] : memref<128x384xf32, #tpu.memory_space<vmem>>, vector<1x384xf32>
    tpu.vector_store %arg10[%c96, %c0_295], %684 {strides = array<i32>} : memref<128x384xf32, #tpu.memory_space<vmem>>, vector<1x384xf32>,
    %c97_i32 = arith.constant 97 : i32
    %686 = arith.addi %6, %c97_i32 : i32
    %687 = arith.index_cast %686 : i32 to index
    %688 = memref.load %arg2[%687] : memref<512xi32, #tpu.memory_space<smem>>
    %689 = arith.index_cast %688 : i32 to index
    %c0_296 = arith.constant 0 : index
    %c0_297 = arith.constant 0 : index
    %690 = vector.load %arg3[%689, %c0_296, %c0_297] : memref<64x1x384xf32, #tpu.memory_space<vmem>>, vector<1x1x384xf32>
    %691 = vector.shape_cast %690 : vector<1x1x384xf32> to vector<1x384xf32>
    %c97 = arith.constant 97 : index
    %c0_298 = arith.constant 0 : index
    %692 = vector.load %arg10[%c97, %c0_298] : memref<128x384xf32, #tpu.memory_space<vmem>>, vector<1x384xf32>
    tpu.vector_store %arg10[%c97, %c0_298], %691 {strides = array<i32>} : memref<128x384xf32, #tpu.memory_space<vmem>>, vector<1x384xf32>,
    %c98_i32 = arith.constant 98 : i32
    %693 = arith.addi %6, %c98_i32 : i32
    %694 = arith.index_cast %693 : i32 to index
    %695 = memref.load %arg2[%694] : memref<512xi32, #tpu.memory_space<smem>>
    %696 = arith.index_cast %695 : i32 to index
    %c0_299 = arith.constant 0 : index
    %c0_300 = arith.constant 0 : index
    %697 = vector.load %arg3[%696, %c0_299, %c0_300] : memref<64x1x384xf32, #tpu.memory_space<vmem>>, vector<1x1x384xf32>
    %698 = vector.shape_cast %697 : vector<1x1x384xf32> to vector<1x384xf32>
    %c98 = arith.constant 98 : index
    %c0_301 = arith.constant 0 : index
    %699 = vector.load %arg10[%c98, %c0_301] : memref<128x384xf32, #tpu.memory_space<vmem>>, vector<1x384xf32>
    tpu.vector_store %arg10[%c98, %c0_301], %698 {strides = array<i32>} : memref<128x384xf32, #tpu.memory_space<vmem>>, vector<1x384xf32>,
    %c99_i32 = arith.constant 99 : i32
    %700 = arith.addi %6, %c99_i32 : i32
    %701 = arith.index_cast %700 : i32 to index
    %702 = memref.load %arg2[%701] : memref<512xi32, #tpu.memory_space<smem>>
    %703 = arith.index_cast %702 : i32 to index
    %c0_302 = arith.constant 0 : index
    %c0_303 = arith.constant 0 : index
    %704 = vector.load %arg3[%703, %c0_302, %c0_303] : memref<64x1x384xf32, #tpu.memory_space<vmem>>, vector<1x1x384xf32>
    %705 = vector.shape_cast %704 : vector<1x1x384xf32> to vector<1x384xf32>
    %c99 = arith.constant 99 : index
    %c0_304 = arith.constant 0 : index
    %706 = vector.load %arg10[%c99, %c0_304] : memref<128x384xf32, #tpu.memory_space<vmem>>, vector<1x384xf32>
    tpu.vector_store %arg10[%c99, %c0_304], %705 {strides = array<i32>} : memref<128x384xf32, #tpu.memory_space<vmem>>, vector<1x384xf32>,
    %c100_i32 = arith.constant 100 : i32
    %707 = arith.addi %6, %c100_i32 : i32
    %708 = arith.index_cast %707 : i32 to index
    %709 = memref.load %arg2[%708] : memref<512xi32, #tpu.memory_space<smem>>
    %710 = arith.index_cast %709 : i32 to index
    %c0_305 = arith.constant 0 : index
    %c0_306 = arith.constant 0 : index
    %711 = vector.load %arg3[%710, %c0_305, %c0_306] : memref<64x1x384xf32, #tpu.memory_space<vmem>>, vector<1x1x384xf32>
    %712 = vector.shape_cast %711 : vector<1x1x384xf32> to vector<1x384xf32>
    %c100 = arith.constant 100 : index
    %c0_307 = arith.constant 0 : index
    %713 = vector.load %arg10[%c100, %c0_307] : memref<128x384xf32, #tpu.memory_space<vmem>>, vector<1x384xf32>
    tpu.vector_store %arg10[%c100, %c0_307], %712 {strides = array<i32>} : memref<128x384xf32, #tpu.memory_space<vmem>>, vector<1x384xf32>,
    %c101_i32 = arith.constant 101 : i32
    %714 = arith.addi %6, %c101_i32 : i32
    %715 = arith.index_cast %714 : i32 to index
    %716 = memref.load %arg2[%715] : memref<512xi32, #tpu.memory_space<smem>>
    %717 = arith.index_cast %716 : i32 to index
    %c0_308 = arith.constant 0 : index
    %c0_309 = arith.constant 0 : index
    %718 = vector.load %arg3[%717, %c0_308, %c0_309] : memref<64x1x384xf32, #tpu.memory_space<vmem>>, vector<1x1x384xf32>
    %719 = vector.shape_cast %718 : vector<1x1x384xf32> to vector<1x384xf32>
    %c101 = arith.constant 101 : index
    %c0_310 = arith.constant 0 : index
    %720 = vector.load %arg10[%c101, %c0_310] : memref<128x384xf32, #tpu.memory_space<vmem>>, vector<1x384xf32>
    tpu.vector_store %arg10[%c101, %c0_310], %719 {strides = array<i32>} : memref<128x384xf32, #tpu.memory_space<vmem>>, vector<1x384xf32>,
    %c102_i32 = arith.constant 102 : i32
    %721 = arith.addi %6, %c102_i32 : i32
    %722 = arith.index_cast %721 : i32 to index
    %723 = memref.load %arg2[%722] : memref<512xi32, #tpu.memory_space<smem>>
    %724 = arith.index_cast %723 : i32 to index
    %c0_311 = arith.constant 0 : index
    %c0_312 = arith.constant 0 : index
    %725 = vector.load %arg3[%724, %c0_311, %c0_312] : memref<64x1x384xf32, #tpu.memory_space<vmem>>, vector<1x1x384xf32>
    %726 = vector.shape_cast %725 : vector<1x1x384xf32> to vector<1x384xf32>
    %c102 = arith.constant 102 : index
    %c0_313 = arith.constant 0 : index
    %727 = vector.load %arg10[%c102, %c0_313] : memref<128x384xf32, #tpu.memory_space<vmem>>, vector<1x384xf32>
    tpu.vector_store %arg10[%c102, %c0_313], %726 {strides = array<i32>} : memref<128x384xf32, #tpu.memory_space<vmem>>, vector<1x384xf32>,
    %c103_i32 = arith.constant 103 : i32
    %728 = arith.addi %6, %c103_i32 : i32
    %729 = arith.index_cast %728 : i32 to index
    %730 = memref.load %arg2[%729] : memref<512xi32, #tpu.memory_space<smem>>
    %731 = arith.index_cast %730 : i32 to index
    %c0_314 = arith.constant 0 : index
    %c0_315 = arith.constant 0 : index
    %732 = vector.load %arg3[%731, %c0_314, %c0_315] : memref<64x1x384xf32, #tpu.memory_space<vmem>>, vector<1x1x384xf32>
    %733 = vector.shape_cast %732 : vector<1x1x384xf32> to vector<1x384xf32>
    %c103 = arith.constant 103 : index
    %c0_316 = arith.constant 0 : index
    %734 = vector.load %arg10[%c103, %c0_316] : memref<128x384xf32, #tpu.memory_space<vmem>>, vector<1x384xf32>
    tpu.vector_store %arg10[%c103, %c0_316], %733 {strides = array<i32>} : memref<128x384xf32, #tpu.memory_space<vmem>>, vector<1x384xf32>,
    %c104_i32 = arith.constant 104 : i32
    %735 = arith.addi %6, %c104_i32 : i32
    %736 = arith.index_cast %735 : i32 to index
    %737 = memref.load %arg2[%736] : memref<512xi32, #tpu.memory_space<smem>>
    %738 = arith.index_cast %737 : i32 to index
    %c0_317 = arith.constant 0 : index
    %c0_318 = arith.constant 0 : index
    %739 = vector.load %arg3[%738, %c0_317, %c0_318] : memref<64x1x384xf32, #tpu.memory_space<vmem>>, vector<1x1x384xf32>
    %740 = vector.shape_cast %739 : vector<1x1x384xf32> to vector<1x384xf32>
    %c104 = arith.constant 104 : index
    %c0_319 = arith.constant 0 : index
    %741 = vector.load %arg10[%c104, %c0_319] : memref<128x384xf32, #tpu.memory_space<vmem>>, vector<1x384xf32>
    tpu.vector_store %arg10[%c104, %c0_319], %740 {strides = array<i32>} : memref<128x384xf32, #tpu.memory_space<vmem>>, vector<1x384xf32>,
    %c105_i32 = arith.constant 105 : i32
    %742 = arith.addi %6, %c105_i32 : i32
    %743 = arith.index_cast %742 : i32 to index
    %744 = memref.load %arg2[%743] : memref<512xi32, #tpu.memory_space<smem>>
    %745 = arith.index_cast %744 : i32 to index
    %c0_320 = arith.constant 0 : index
    %c0_321 = arith.constant 0 : index
    %746 = vector.load %arg3[%745, %c0_320, %c0_321] : memref<64x1x384xf32, #tpu.memory_space<vmem>>, vector<1x1x384xf32>
    %747 = vector.shape_cast %746 : vector<1x1x384xf32> to vector<1x384xf32>
    %c105 = arith.constant 105 : index
    %c0_322 = arith.constant 0 : index
    %748 = vector.load %arg10[%c105, %c0_322] : memref<128x384xf32, #tpu.memory_space<vmem>>, vector<1x384xf32>
    tpu.vector_store %arg10[%c105, %c0_322], %747 {strides = array<i32>} : memref<128x384xf32, #tpu.memory_space<vmem>>, vector<1x384xf32>,
    %c106_i32 = arith.constant 106 : i32
    %749 = arith.addi %6, %c106_i32 : i32
    %750 = arith.index_cast %749 : i32 to index
    %751 = memref.load %arg2[%750] : memref<512xi32, #tpu.memory_space<smem>>
    %752 = arith.index_cast %751 : i32 to index
    %c0_323 = arith.constant 0 : index
    %c0_324 = arith.constant 0 : index
    %753 = vector.load %arg3[%752, %c0_323, %c0_324] : memref<64x1x384xf32, #tpu.memory_space<vmem>>, vector<1x1x384xf32>
    %754 = vector.shape_cast %753 : vector<1x1x384xf32> to vector<1x384xf32>
    %c106 = arith.constant 106 : index
    %c0_325 = arith.constant 0 : index
    %755 = vector.load %arg10[%c106, %c0_325] : memref<128x384xf32, #tpu.memory_space<vmem>>, vector<1x384xf32>
    tpu.vector_store %arg10[%c106, %c0_325], %754 {strides = array<i32>} : memref<128x384xf32, #tpu.memory_space<vmem>>, vector<1x384xf32>,
    %c107_i32 = arith.constant 107 : i32
    %756 = arith.addi %6, %c107_i32 : i32
    %757 = arith.index_cast %756 : i32 to index
    %758 = memref.load %arg2[%757] : memref<512xi32, #tpu.memory_space<smem>>
    %759 = arith.index_cast %758 : i32 to index
    %c0_326 = arith.constant 0 : index
    %c0_327 = arith.constant 0 : index
    %760 = vector.load %arg3[%759, %c0_326, %c0_327] : memref<64x1x384xf32, #tpu.memory_space<vmem>>, vector<1x1x384xf32>
    %761 = vector.shape_cast %760 : vector<1x1x384xf32> to vector<1x384xf32>
    %c107 = arith.constant 107 : index
    %c0_328 = arith.constant 0 : index
    %762 = vector.load %arg10[%c107, %c0_328] : memref<128x384xf32, #tpu.memory_space<vmem>>, vector<1x384xf32>
    tpu.vector_store %arg10[%c107, %c0_328], %761 {strides = array<i32>} : memref<128x384xf32, #tpu.memory_space<vmem>>, vector<1x384xf32>,
    %c108_i32 = arith.constant 108 : i32
    %763 = arith.addi %6, %c108_i32 : i32
    %764 = arith.index_cast %763 : i32 to index
    %765 = memref.load %arg2[%764] : memref<512xi32, #tpu.memory_space<smem>>
    %766 = arith.index_cast %765 : i32 to index
    %c0_329 = arith.constant 0 : index
    %c0_330 = arith.constant 0 : index
    %767 = vector.load %arg3[%766, %c0_329, %c0_330] : memref<64x1x384xf32, #tpu.memory_space<vmem>>, vector<1x1x384xf32>
    %768 = vector.shape_cast %767 : vector<1x1x384xf32> to vector<1x384xf32>
    %c108 = arith.constant 108 : index
    %c0_331 = arith.constant 0 : index
    %769 = vector.load %arg10[%c108, %c0_331] : memref<128x384xf32, #tpu.memory_space<vmem>>, vector<1x384xf32>
    tpu.vector_store %arg10[%c108, %c0_331], %768 {strides = array<i32>} : memref<128x384xf32, #tpu.memory_space<vmem>>, vector<1x384xf32>,
    %c109_i32 = arith.constant 109 : i32
    %770 = arith.addi %6, %c109_i32 : i32
    %771 = arith.index_cast %770 : i32 to index
    %772 = memref.load %arg2[%771] : memref<512xi32, #tpu.memory_space<smem>>
    %773 = arith.index_cast %772 : i32 to index
    %c0_332 = arith.constant 0 : index
    %c0_333 = arith.constant 0 : index
    %774 = vector.load %arg3[%773, %c0_332, %c0_333] : memref<64x1x384xf32, #tpu.memory_space<vmem>>, vector<1x1x384xf32>
    %775 = vector.shape_cast %774 : vector<1x1x384xf32> to vector<1x384xf32>
    %c109 = arith.constant 109 : index
    %c0_334 = arith.constant 0 : index
    %776 = vector.load %arg10[%c109, %c0_334] : memref<128x384xf32, #tpu.memory_space<vmem>>, vector<1x384xf32>
    tpu.vector_store %arg10[%c109, %c0_334], %775 {strides = array<i32>} : memref<128x384xf32, #tpu.memory_space<vmem>>, vector<1x384xf32>,
    %c110_i32 = arith.constant 110 : i32
    %777 = arith.addi %6, %c110_i32 : i32
    %778 = arith.index_cast %777 : i32 to index
    %779 = memref.load %arg2[%778] : memref<512xi32, #tpu.memory_space<smem>>
    %780 = arith.index_cast %779 : i32 to index
    %c0_335 = arith.constant 0 : index
    %c0_336 = arith.constant 0 : index
    %781 = vector.load %arg3[%780, %c0_335, %c0_336] : memref<64x1x384xf32, #tpu.memory_space<vmem>>, vector<1x1x384xf32>
    %782 = vector.shape_cast %781 : vector<1x1x384xf32> to vector<1x384xf32>
    %c110 = arith.constant 110 : index
    %c0_337 = arith.constant 0 : index
    %783 = vector.load %arg10[%c110, %c0_337] : memref<128x384xf32, #tpu.memory_space<vmem>>, vector<1x384xf32>
    tpu.vector_store %arg10[%c110, %c0_337], %782 {strides = array<i32>} : memref<128x384xf32, #tpu.memory_space<vmem>>, vector<1x384xf32>,
    %c111_i32 = arith.constant 111 : i32
    %784 = arith.addi %6, %c111_i32 : i32
    %785 = arith.index_cast %784 : i32 to index
    %786 = memref.load %arg2[%785] : memref<512xi32, #tpu.memory_space<smem>>
    %787 = arith.index_cast %786 : i32 to index
    %c0_338 = arith.constant 0 : index
    %c0_339 = arith.constant 0 : index
    %788 = vector.load %arg3[%787, %c0_338, %c0_339] : memref<64x1x384xf32, #tpu.memory_space<vmem>>, vector<1x1x384xf32>
    %789 = vector.shape_cast %788 : vector<1x1x384xf32> to vector<1x384xf32>
    %c111 = arith.constant 111 : index
    %c0_340 = arith.constant 0 : index
    %790 = vector.load %arg10[%c111, %c0_340] : memref<128x384xf32, #tpu.memory_space<vmem>>, vector<1x384xf32>
    tpu.vector_store %arg10[%c111, %c0_340], %789 {strides = array<i32>} : memref<128x384xf32, #tpu.memory_space<vmem>>, vector<1x384xf32>,
    %c112_i32 = arith.constant 112 : i32
    %791 = arith.addi %6, %c112_i32 : i32
    %792 = arith.index_cast %791 : i32 to index
    %793 = memref.load %arg2[%792] : memref<512xi32, #tpu.memory_space<smem>>
    %794 = arith.index_cast %793 : i32 to index
    %c0_341 = arith.constant 0 : index
    %c0_342 = arith.constant 0 : index
    %795 = vector.load %arg3[%794, %c0_341, %c0_342] : memref<64x1x384xf32, #tpu.memory_space<vmem>>, vector<1x1x384xf32>
    %796 = vector.shape_cast %795 : vector<1x1x384xf32> to vector<1x384xf32>
    %c112 = arith.constant 112 : index
    %c0_343 = arith.constant 0 : index
    %797 = vector.load %arg10[%c112, %c0_343] : memref<128x384xf32, #tpu.memory_space<vmem>>, vector<1x384xf32>
    tpu.vector_store %arg10[%c112, %c0_343], %796 {strides = array<i32>} : memref<128x384xf32, #tpu.memory_space<vmem>>, vector<1x384xf32>,
    %c113_i32 = arith.constant 113 : i32
    %798 = arith.addi %6, %c113_i32 : i32
    %799 = arith.index_cast %798 : i32 to index
    %800 = memref.load %arg2[%799] : memref<512xi32, #tpu.memory_space<smem>>
    %801 = arith.index_cast %800 : i32 to index
    %c0_344 = arith.constant 0 : index
    %c0_345 = arith.constant 0 : index
    %802 = vector.load %arg3[%801, %c0_344, %c0_345] : memref<64x1x384xf32, #tpu.memory_space<vmem>>, vector<1x1x384xf32>
    %803 = vector.shape_cast %802 : vector<1x1x384xf32> to vector<1x384xf32>
    %c113 = arith.constant 113 : index
    %c0_346 = arith.constant 0 : index
    %804 = vector.load %arg10[%c113, %c0_346] : memref<128x384xf32, #tpu.memory_space<vmem>>, vector<1x384xf32>
    tpu.vector_store %arg10[%c113, %c0_346], %803 {strides = array<i32>} : memref<128x384xf32, #tpu.memory_space<vmem>>, vector<1x384xf32>,
    %c114_i32 = arith.constant 114 : i32
    %805 = arith.addi %6, %c114_i32 : i32
    %806 = arith.index_cast %805 : i32 to index
    %807 = memref.load %arg2[%806] : memref<512xi32, #tpu.memory_space<smem>>
    %808 = arith.index_cast %807 : i32 to index
    %c0_347 = arith.constant 0 : index
    %c0_348 = arith.constant 0 : index
    %809 = vector.load %arg3[%808, %c0_347, %c0_348] : memref<64x1x384xf32, #tpu.memory_space<vmem>>, vector<1x1x384xf32>
    %810 = vector.shape_cast %809 : vector<1x1x384xf32> to vector<1x384xf32>
    %c114 = arith.constant 114 : index
    %c0_349 = arith.constant 0 : index
    %811 = vector.load %arg10[%c114, %c0_349] : memref<128x384xf32, #tpu.memory_space<vmem>>, vector<1x384xf32>
    tpu.vector_store %arg10[%c114, %c0_349], %810 {strides = array<i32>} : memref<128x384xf32, #tpu.memory_space<vmem>>, vector<1x384xf32>,
    %c115_i32 = arith.constant 115 : i32
    %812 = arith.addi %6, %c115_i32 : i32
    %813 = arith.index_cast %812 : i32 to index
    %814 = memref.load %arg2[%813] : memref<512xi32, #tpu.memory_space<smem>>
    %815 = arith.index_cast %814 : i32 to index
    %c0_350 = arith.constant 0 : index
    %c0_351 = arith.constant 0 : index
    %816 = vector.load %arg3[%815, %c0_350, %c0_351] : memref<64x1x384xf32, #tpu.memory_space<vmem>>, vector<1x1x384xf32>
    %817 = vector.shape_cast %816 : vector<1x1x384xf32> to vector<1x384xf32>
    %c115 = arith.constant 115 : index
    %c0_352 = arith.constant 0 : index
    %818 = vector.load %arg10[%c115, %c0_352] : memref<128x384xf32, #tpu.memory_space<vmem>>, vector<1x384xf32>
    tpu.vector_store %arg10[%c115, %c0_352], %817 {strides = array<i32>} : memref<128x384xf32, #tpu.memory_space<vmem>>, vector<1x384xf32>,
    %c116_i32 = arith.constant 116 : i32
    %819 = arith.addi %6, %c116_i32 : i32
    %820 = arith.index_cast %819 : i32 to index
    %821 = memref.load %arg2[%820] : memref<512xi32, #tpu.memory_space<smem>>
    %822 = arith.index_cast %821 : i32 to index
    %c0_353 = arith.constant 0 : index
    %c0_354 = arith.constant 0 : index
    %823 = vector.load %arg3[%822, %c0_353, %c0_354] : memref<64x1x384xf32, #tpu.memory_space<vmem>>, vector<1x1x384xf32>
    %824 = vector.shape_cast %823 : vector<1x1x384xf32> to vector<1x384xf32>
    %c116 = arith.constant 116 : index
    %c0_355 = arith.constant 0 : index
    %825 = vector.load %arg10[%c116, %c0_355] : memref<128x384xf32, #tpu.memory_space<vmem>>, vector<1x384xf32>
    tpu.vector_store %arg10[%c116, %c0_355], %824 {strides = array<i32>} : memref<128x384xf32, #tpu.memory_space<vmem>>, vector<1x384xf32>,
    %c117_i32 = arith.constant 117 : i32
    %826 = arith.addi %6, %c117_i32 : i32
    %827 = arith.index_cast %826 : i32 to index
    %828 = memref.load %arg2[%827] : memref<512xi32, #tpu.memory_space<smem>>
    %829 = arith.index_cast %828 : i32 to index
    %c0_356 = arith.constant 0 : index
    %c0_357 = arith.constant 0 : index
    %830 = vector.load %arg3[%829, %c0_356, %c0_357] : memref<64x1x384xf32, #tpu.memory_space<vmem>>, vector<1x1x384xf32>
    %831 = vector.shape_cast %830 : vector<1x1x384xf32> to vector<1x384xf32>
    %c117 = arith.constant 117 : index
    %c0_358 = arith.constant 0 : index
    %832 = vector.load %arg10[%c117, %c0_358] : memref<128x384xf32, #tpu.memory_space<vmem>>, vector<1x384xf32>
    tpu.vector_store %arg10[%c117, %c0_358], %831 {strides = array<i32>} : memref<128x384xf32, #tpu.memory_space<vmem>>, vector<1x384xf32>,
    %c118_i32 = arith.constant 118 : i32
    %833 = arith.addi %6, %c118_i32 : i32
    %834 = arith.index_cast %833 : i32 to index
    %835 = memref.load %arg2[%834] : memref<512xi32, #tpu.memory_space<smem>>
    %836 = arith.index_cast %835 : i32 to index
    %c0_359 = arith.constant 0 : index
    %c0_360 = arith.constant 0 : index
    %837 = vector.load %arg3[%836, %c0_359, %c0_360] : memref<64x1x384xf32, #tpu.memory_space<vmem>>, vector<1x1x384xf32>
    %838 = vector.shape_cast %837 : vector<1x1x384xf32> to vector<1x384xf32>
    %c118 = arith.constant 118 : index
    %c0_361 = arith.constant 0 : index
    %839 = vector.load %arg10[%c118, %c0_361] : memref<128x384xf32, #tpu.memory_space<vmem>>, vector<1x384xf32>
    tpu.vector_store %arg10[%c118, %c0_361], %838 {strides = array<i32>} : memref<128x384xf32, #tpu.memory_space<vmem>>, vector<1x384xf32>,
    %c119_i32 = arith.constant 119 : i32
    %840 = arith.addi %6, %c119_i32 : i32
    %841 = arith.index_cast %840 : i32 to index
    %842 = memref.load %arg2[%841] : memref<512xi32, #tpu.memory_space<smem>>
    %843 = arith.index_cast %842 : i32 to index
    %c0_362 = arith.constant 0 : index
    %c0_363 = arith.constant 0 : index
    %844 = vector.load %arg3[%843, %c0_362, %c0_363] : memref<64x1x384xf32, #tpu.memory_space<vmem>>, vector<1x1x384xf32>
    %845 = vector.shape_cast %844 : vector<1x1x384xf32> to vector<1x384xf32>
    %c119 = arith.constant 119 : index
    %c0_364 = arith.constant 0 : index
    %846 = vector.load %arg10[%c119, %c0_364] : memref<128x384xf32, #tpu.memory_space<vmem>>, vector<1x384xf32>
    tpu.vector_store %arg10[%c119, %c0_364], %845 {strides = array<i32>} : memref<128x384xf32, #tpu.memory_space<vmem>>, vector<1x384xf32>,
    %c120_i32 = arith.constant 120 : i32
    %847 = arith.addi %6, %c120_i32 : i32
    %848 = arith.index_cast %847 : i32 to index
    %849 = memref.load %arg2[%848] : memref<512xi32, #tpu.memory_space<smem>>
    %850 = arith.index_cast %849 : i32 to index
    %c0_365 = arith.constant 0 : index
    %c0_366 = arith.constant 0 : index
    %851 = vector.load %arg3[%850, %c0_365, %c0_366] : memref<64x1x384xf32, #tpu.memory_space<vmem>>, vector<1x1x384xf32>
    %852 = vector.shape_cast %851 : vector<1x1x384xf32> to vector<1x384xf32>
    %c120 = arith.constant 120 : index
    %c0_367 = arith.constant 0 : index
    %853 = vector.load %arg10[%c120, %c0_367] : memref<128x384xf32, #tpu.memory_space<vmem>>, vector<1x384xf32>
    tpu.vector_store %arg10[%c120, %c0_367], %852 {strides = array<i32>} : memref<128x384xf32, #tpu.memory_space<vmem>>, vector<1x384xf32>,
    %c121_i32 = arith.constant 121 : i32
    %854 = arith.addi %6, %c121_i32 : i32
    %855 = arith.index_cast %854 : i32 to index
    %856 = memref.load %arg2[%855] : memref<512xi32, #tpu.memory_space<smem>>
    %857 = arith.index_cast %856 : i32 to index
    %c0_368 = arith.constant 0 : index
    %c0_369 = arith.constant 0 : index
    %858 = vector.load %arg3[%857, %c0_368, %c0_369] : memref<64x1x384xf32, #tpu.memory_space<vmem>>, vector<1x1x384xf32>
    %859 = vector.shape_cast %858 : vector<1x1x384xf32> to vector<1x384xf32>
    %c121 = arith.constant 121 : index
    %c0_370 = arith.constant 0 : index
    %860 = vector.load %arg10[%c121, %c0_370] : memref<128x384xf32, #tpu.memory_space<vmem>>, vector<1x384xf32>
    tpu.vector_store %arg10[%c121, %c0_370], %859 {strides = array<i32>} : memref<128x384xf32, #tpu.memory_space<vmem>>, vector<1x384xf32>,
    %c122_i32 = arith.constant 122 : i32
    %861 = arith.addi %6, %c122_i32 : i32
    %862 = arith.index_cast %861 : i32 to index
    %863 = memref.load %arg2[%862] : memref<512xi32, #tpu.memory_space<smem>>
    %864 = arith.index_cast %863 : i32 to index
    %c0_371 = arith.constant 0 : index
    %c0_372 = arith.constant 0 : index
    %865 = vector.load %arg3[%864, %c0_371, %c0_372] : memref<64x1x384xf32, #tpu.memory_space<vmem>>, vector<1x1x384xf32>
    %866 = vector.shape_cast %865 : vector<1x1x384xf32> to vector<1x384xf32>
    %c122 = arith.constant 122 : index
    %c0_373 = arith.constant 0 : index
    %867 = vector.load %arg10[%c122, %c0_373] : memref<128x384xf32, #tpu.memory_space<vmem>>, vector<1x384xf32>
    tpu.vector_store %arg10[%c122, %c0_373], %866 {strides = array<i32>} : memref<128x384xf32, #tpu.memory_space<vmem>>, vector<1x384xf32>,
    %c123_i32 = arith.constant 123 : i32
    %868 = arith.addi %6, %c123_i32 : i32
    %869 = arith.index_cast %868 : i32 to index
    %870 = memref.load %arg2[%869] : memref<512xi32, #tpu.memory_space<smem>>
    %871 = arith.index_cast %870 : i32 to index
    %c0_374 = arith.constant 0 : index
    %c0_375 = arith.constant 0 : index
    %872 = vector.load %arg3[%871, %c0_374, %c0_375] : memref<64x1x384xf32, #tpu.memory_space<vmem>>, vector<1x1x384xf32>
    %873 = vector.shape_cast %872 : vector<1x1x384xf32> to vector<1x384xf32>
    %c123 = arith.constant 123 : index
    %c0_376 = arith.constant 0 : index
    %874 = vector.load %arg10[%c123, %c0_376] : memref<128x384xf32, #tpu.memory_space<vmem>>, vector<1x384xf32>
    tpu.vector_store %arg10[%c123, %c0_376], %873 {strides = array<i32>} : memref<128x384xf32, #tpu.memory_space<vmem>>, vector<1x384xf32>,
    %c124_i32 = arith.constant 124 : i32
    %875 = arith.addi %6, %c124_i32 : i32
    %876 = arith.index_cast %875 : i32 to index
    %877 = memref.load %arg2[%876] : memref<512xi32, #tpu.memory_space<smem>>
    %878 = arith.index_cast %877 : i32 to index
    %c0_377 = arith.constant 0 : index
    %c0_378 = arith.constant 0 : index
    %879 = vector.load %arg3[%878, %c0_377, %c0_378] : memref<64x1x384xf32, #tpu.memory_space<vmem>>, vector<1x1x384xf32>
    %880 = vector.shape_cast %879 : vector<1x1x384xf32> to vector<1x384xf32>
    %c124 = arith.constant 124 : index
    %c0_379 = arith.constant 0 : index
    %881 = vector.load %arg10[%c124, %c0_379] : memref<128x384xf32, #tpu.memory_space<vmem>>, vector<1x384xf32>
    tpu.vector_store %arg10[%c124, %c0_379], %880 {strides = array<i32>} : memref<128x384xf32, #tpu.memory_space<vmem>>, vector<1x384xf32>,
    %c125_i32 = arith.constant 125 : i32
    %882 = arith.addi %6, %c125_i32 : i32
    %883 = arith.index_cast %882 : i32 to index
    %884 = memref.load %arg2[%883] : memref<512xi32, #tpu.memory_space<smem>>
    %885 = arith.index_cast %884 : i32 to index
    %c0_380 = arith.constant 0 : index
    %c0_381 = arith.constant 0 : index
    %886 = vector.load %arg3[%885, %c0_380, %c0_381] : memref<64x1x384xf32, #tpu.memory_space<vmem>>, vector<1x1x384xf32>
    %887 = vector.shape_cast %886 : vector<1x1x384xf32> to vector<1x384xf32>
    %c125 = arith.constant 125 : index
    %c0_382 = arith.constant 0 : index
    %888 = vector.load %arg10[%c125, %c0_382] : memref<128x384xf32, #tpu.memory_space<vmem>>, vector<1x384xf32>
    tpu.vector_store %arg10[%c125, %c0_382], %887 {strides = array<i32>} : memref<128x384xf32, #tpu.memory_space<vmem>>, vector<1x384xf32>,
    %c126_i32 = arith.constant 126 : i32
    %889 = arith.addi %6, %c126_i32 : i32
    %890 = arith.index_cast %889 : i32 to index
    %891 = memref.load %arg2[%890] : memref<512xi32, #tpu.memory_space<smem>>
    %892 = arith.index_cast %891 : i32 to index
    %c0_383 = arith.constant 0 : index
    %c0_384 = arith.constant 0 : index
    %893 = vector.load %arg3[%892, %c0_383, %c0_384] : memref<64x1x384xf32, #tpu.memory_space<vmem>>, vector<1x1x384xf32>
    %894 = vector.shape_cast %893 : vector<1x1x384xf32> to vector<1x384xf32>
    %c126 = arith.constant 126 : index
    %c0_385 = arith.constant 0 : index
    %895 = vector.load %arg10[%c126, %c0_385] : memref<128x384xf32, #tpu.memory_space<vmem>>, vector<1x384xf32>
    tpu.vector_store %arg10[%c126, %c0_385], %894 {strides = array<i32>} : memref<128x384xf32, #tpu.memory_space<vmem>>, vector<1x384xf32>,
    %c127_i32 = arith.constant 127 : i32
    %896 = arith.addi %6, %c127_i32 : i32
    %897 = arith.index_cast %896 : i32 to index
    %898 = memref.load %arg2[%897] : memref<512xi32, #tpu.memory_space<smem>>
    %899 = arith.index_cast %898 : i32 to index
    %c0_386 = arith.constant 0 : index
    %c0_387 = arith.constant 0 : index
    %900 = vector.load %arg3[%899, %c0_386, %c0_387] : memref<64x1x384xf32, #tpu.memory_space<vmem>>, vector<1x1x384xf32>
    %901 = vector.shape_cast %900 : vector<1x1x384xf32> to vector<1x384xf32>
    %c127 = arith.constant 127 : index
    %c0_388 = arith.constant 0 : index
    %902 = vector.load %arg10[%c127, %c0_388] : memref<128x384xf32, #tpu.memory_space<vmem>>, vector<1x384xf32>
    tpu.vector_store %arg10[%c127, %c0_388], %901 {strides = array<i32>} : memref<128x384xf32, #tpu.memory_space<vmem>>, vector<1x384xf32>,
    %c0_389 = arith.constant 0 : index
    %c0_390 = arith.constant 0 : index
    %903 = vector.load %arg4[%c0_389, %c0_390] : memref<128x384xbf16, #tpu.memory_space<vmem>>, vector<128x384xbf16>
    %c0_391 = arith.constant 0 : index
    %c0_392 = arith.constant 0 : index
    %904 = vector.load %arg5[%c0_391, %c0_392] : memref<1x128xf32, #tpu.memory_space<vmem>>, vector<1x128xf32>
    %c0_393 = arith.constant 0 : index
    %c0_394 = arith.constant 0 : index
    %905 = vector.load %arg9[%c0_393, %c0_394] : memref<8x128xf32, #tpu.memory_space<vmem>>, vector<8x128xf32>
    %c0_395 = arith.constant 0 : index
    %c0_396 = arith.constant 0 : index
    %906 = vector.load %arg10[%c0_395, %c0_396] : memref<128x384xf32, #tpu.memory_space<vmem>>, vector<8x384xf32>
    %907 = arith.truncf %905 : vector<8x128xf32> to vector<8x128xbf16>
    %cst = arith.constant dense<0.000000e+00> : vector<8x384xf32>
    %908 = tpu.matmul %907, %903, %cst {dimension_numbers = #tpu.dot_dimension_numbers<[1], [0], [0], [1], [0, 0, 1, 1], [], []>} : vector<8x128xbf16>, vector<128x384xbf16>, vector<8x384xf32> -> vector<8x384xf32>
    %909 = vector.extract_strided_slice %906 {offsets = [0, 0], sizes = [8, 128], strides = [1, 1]} : vector<8x384xf32> to vector<8x128xf32>
    %910 = vector.extract_strided_slice %908 {offsets = [0, 0], sizes = [8, 128], strides = [1, 1]} : vector<8x384xf32> to vector<8x128xf32>
    %911 = arith.addf %909, %910 : vector<8x128xf32>
    %912 = arith.negf %911 : vector<8x128xf32>
    %913 = math.exp %912 : vector<8x128xf32>
    %cst_397 = arith.constant 1.000000e+00 : f32
    %914 = vector.broadcast %cst_397 : f32 to vector<8x128xf32>
    %915 = arith.addf %914, %913 : vector<8x128xf32>
    %916 = arith.divf %914, %915 : vector<8x128xf32>
    %917 = vector.extract_strided_slice %906 {offsets = [0, 128], sizes = [8, 128], strides = [1, 1]} : vector<8x384xf32> to vector<8x128xf32>
    %918 = vector.extract_strided_slice %908 {offsets = [0, 128], sizes = [8, 128], strides = [1, 1]} : vector<8x384xf32> to vector<8x128xf32>
    %919 = arith.addf %917, %918 : vector<8x128xf32>
    %920 = arith.negf %919 : vector<8x128xf32>
    %921 = math.exp %920 : vector<8x128xf32>
    %cst_398 = arith.constant 1.000000e+00 : f32
    %922 = vector.broadcast %cst_398 : f32 to vector<8x128xf32>
    %923 = arith.addf %922, %921 : vector<8x128xf32>
    %924 = arith.divf %922, %923 : vector<8x128xf32>
    %925 = vector.extract_strided_slice %906 {offsets = [0, 256], sizes = [8, 128], strides = [1, 1]} : vector<8x384xf32> to vector<8x128xf32>
    %926 = vector.extract_strided_slice %908 {offsets = [0, 256], sizes = [8, 128], strides = [1, 1]} : vector<8x384xf32> to vector<8x128xf32>
    %927 = vector.broadcast %904 : vector<1x128xf32> to vector<8x128xf32>
    %928 = arith.addf %926, %927 : vector<8x128xf32>
    %929 = arith.mulf %916, %928 : vector<8x128xf32>
    %930 = arith.addf %925, %929 : vector<8x128xf32>
    %931 = math.tanh %930 : vector<8x128xf32>
    %cst_399 = arith.constant 1.000000e+00 : f32
    %932 = vector.broadcast %cst_399 : f32 to vector<8x128xf32>
    %933 = arith.subf %932, %924 : vector<8x128xf32>
    %934 = arith.mulf %933, %931 : vector<8x128xf32>
    %935 = arith.mulf %924, %905 : vector<8x128xf32>
    %936 = arith.addf %934, %935 : vector<8x128xf32>
    %937 = arith.truncf %936 : vector<8x128xf32> to vector<8x128xbf16>
    %c0_400 = arith.constant 0 : index
    %c0_401 = arith.constant 0 : index
    %938 = vector.load %arg11[%c0_400, %c0_401] : memref<128x128xbf16, #tpu.memory_space<vmem>>, vector<8x128xbf16>
    tpu.vector_store %arg11[%c0_400, %c0_401], %937 {strides = array<i32>} : memref<128x128xbf16, #tpu.memory_space<vmem>>, vector<8x128xbf16>,
    %c8_402 = arith.constant 8 : index
    %c0_403 = arith.constant 0 : index
    %939 = vector.load %arg10[%c8_402, %c0_403] : memref<128x384xf32, #tpu.memory_space<vmem>>, vector<8x384xf32>
    %940 = arith.truncf %936 : vector<8x128xf32> to vector<8x128xbf16>
    %cst_404 = arith.constant dense<0.000000e+00> : vector<8x384xf32>
    %941 = tpu.matmul %940, %903, %cst_404 {dimension_numbers = #tpu.dot_dimension_numbers<[1], [0], [0], [1], [0, 0, 1, 1], [], []>} : vector<8x128xbf16>, vector<128x384xbf16>, vector<8x384xf32> -> vector<8x384xf32>
    %942 = vector.extract_strided_slice %939 {offsets = [0, 0], sizes = [8, 128], strides = [1, 1]} : vector<8x384xf32> to vector<8x128xf32>
    %943 = vector.extract_strided_slice %941 {offsets = [0, 0], sizes = [8, 128], strides = [1, 1]} : vector<8x384xf32> to vector<8x128xf32>
    %944 = arith.addf %942, %943 : vector<8x128xf32>
    %945 = arith.negf %944 : vector<8x128xf32>
    %946 = math.exp %945 : vector<8x128xf32>
    %cst_405 = arith.constant 1.000000e+00 : f32
    %947 = vector.broadcast %cst_405 : f32 to vector<8x128xf32>
    %948 = arith.addf %947, %946 : vector<8x128xf32>
    %949 = arith.divf %947, %948 : vector<8x128xf32>
    %950 = vector.extract_strided_slice %939 {offsets = [0, 128], sizes = [8, 128], strides = [1, 1]} : vector<8x384xf32> to vector<8x128xf32>
    %951 = vector.extract_strided_slice %941 {offsets = [0, 128], sizes = [8, 128], strides = [1, 1]} : vector<8x384xf32> to vector<8x128xf32>
    %952 = arith.addf %950, %951 : vector<8x128xf32>
    %953 = arith.negf %952 : vector<8x128xf32>
    %954 = math.exp %953 : vector<8x128xf32>
    %cst_406 = arith.constant 1.000000e+00 : f32
    %955 = vector.broadcast %cst_406 : f32 to vector<8x128xf32>
    %956 = arith.addf %955, %954 : vector<8x128xf32>
    %957 = arith.divf %955, %956 : vector<8x128xf32>
    %958 = vector.extract_strided_slice %939 {offsets = [0, 256], sizes = [8, 128], strides = [1, 1]} : vector<8x384xf32> to vector<8x128xf32>
    %959 = vector.extract_strided_slice %941 {offsets = [0, 256], sizes = [8, 128], strides = [1, 1]} : vector<8x384xf32> to vector<8x128xf32>
    %960 = vector.broadcast %904 : vector<1x128xf32> to vector<8x128xf32>
    %961 = arith.addf %959, %960 : vector<8x128xf32>
    %962 = arith.mulf %949, %961 : vector<8x128xf32>
    %963 = arith.addf %958, %962 : vector<8x128xf32>
    %964 = math.tanh %963 : vector<8x128xf32>
    %cst_407 = arith.constant 1.000000e+00 : f32
    %965 = vector.broadcast %cst_407 : f32 to vector<8x128xf32>
    %966 = arith.subf %965, %957 : vector<8x128xf32>
    %967 = arith.mulf %966, %964 : vector<8x128xf32>
    %968 = arith.mulf %957, %936 : vector<8x128xf32>
    %969 = arith.addf %967, %968 : vector<8x128xf32>
    %970 = arith.truncf %969 : vector<8x128xf32> to vector<8x128xbf16>
    %c8_408 = arith.constant 8 : index
    %c0_409 = arith.constant 0 : index
    %971 = vector.load %arg11[%c8_408, %c0_409] : memref<128x128xbf16, #tpu.memory_space<vmem>>, vector<8x128xbf16>
    tpu.vector_store %arg11[%c8_408, %c0_409], %970 {strides = array<i32>} : memref<128x128xbf16, #tpu.memory_space<vmem>>, vector<8x128xbf16>,
    %c16_410 = arith.constant 16 : index
    %c0_411 = arith.constant 0 : index
    %972 = vector.load %arg10[%c16_410, %c0_411] : memref<128x384xf32, #tpu.memory_space<vmem>>, vector<8x384xf32>
    %973 = arith.truncf %969 : vector<8x128xf32> to vector<8x128xbf16>
    %cst_412 = arith.constant dense<0.000000e+00> : vector<8x384xf32>
    %974 = tpu.matmul %973, %903, %cst_412 {dimension_numbers = #tpu.dot_dimension_numbers<[1], [0], [0], [1], [0, 0, 1, 1], [], []>} : vector<8x128xbf16>, vector<128x384xbf16>, vector<8x384xf32> -> vector<8x384xf32>
    %975 = vector.extract_strided_slice %972 {offsets = [0, 0], sizes = [8, 128], strides = [1, 1]} : vector<8x384xf32> to vector<8x128xf32>
    %976 = vector.extract_strided_slice %974 {offsets = [0, 0], sizes = [8, 128], strides = [1, 1]} : vector<8x384xf32> to vector<8x128xf32>
    %977 = arith.addf %975, %976 : vector<8x128xf32>
    %978 = arith.negf %977 : vector<8x128xf32>
    %979 = math.exp %978 : vector<8x128xf32>
    %cst_413 = arith.constant 1.000000e+00 : f32
    %980 = vector.broadcast %cst_413 : f32 to vector<8x128xf32>
    %981 = arith.addf %980, %979 : vector<8x128xf32>
    %982 = arith.divf %980, %981 : vector<8x128xf32>
    %983 = vector.extract_strided_slice %972 {offsets = [0, 128], sizes = [8, 128], strides = [1, 1]} : vector<8x384xf32> to vector<8x128xf32>
    %984 = vector.extract_strided_slice %974 {offsets = [0, 128], sizes = [8, 128], strides = [1, 1]} : vector<8x384xf32> to vector<8x128xf32>
    %985 = arith.addf %983, %984 : vector<8x128xf32>
    %986 = arith.negf %985 : vector<8x128xf32>
    %987 = math.exp %986 : vector<8x128xf32>
    %cst_414 = arith.constant 1.000000e+00 : f32
    %988 = vector.broadcast %cst_414 : f32 to vector<8x128xf32>
    %989 = arith.addf %988, %987 : vector<8x128xf32>
    %990 = arith.divf %988, %989 : vector<8x128xf32>
    %991 = vector.extract_strided_slice %972 {offsets = [0, 256], sizes = [8, 128], strides = [1, 1]} : vector<8x384xf32> to vector<8x128xf32>
    %992 = vector.extract_strided_slice %974 {offsets = [0, 256], sizes = [8, 128], strides = [1, 1]} : vector<8x384xf32> to vector<8x128xf32>
    %993 = vector.broadcast %904 : vector<1x128xf32> to vector<8x128xf32>
    %994 = arith.addf %992, %993 : vector<8x128xf32>
    %995 = arith.mulf %982, %994 : vector<8x128xf32>
    %996 = arith.addf %991, %995 : vector<8x128xf32>
    %997 = math.tanh %996 : vector<8x128xf32>
    %cst_415 = arith.constant 1.000000e+00 : f32
    %998 = vector.broadcast %cst_415 : f32 to vector<8x128xf32>
    %999 = arith.subf %998, %990 : vector<8x128xf32>
    %1000 = arith.mulf %999, %997 : vector<8x128xf32>
    %1001 = arith.mulf %990, %969 : vector<8x128xf32>
    %1002 = arith.addf %1000, %1001 : vector<8x128xf32>
    %1003 = arith.truncf %1002 : vector<8x128xf32> to vector<8x128xbf16>
    %c16_416 = arith.constant 16 : index
    %c0_417 = arith.constant 0 : index
    %1004 = vector.load %arg11[%c16_416, %c0_417] : memref<128x128xbf16, #tpu.memory_space<vmem>>, vector<8x128xbf16>
    tpu.vector_store %arg11[%c16_416, %c0_417], %1003 {strides = array<i32>} : memref<128x128xbf16, #tpu.memory_space<vmem>>, vector<8x128xbf16>,
    %c24_418 = arith.constant 24 : index
    %c0_419 = arith.constant 0 : index
    %1005 = vector.load %arg10[%c24_418, %c0_419] : memref<128x384xf32, #tpu.memory_space<vmem>>, vector<8x384xf32>
    %1006 = arith.truncf %1002 : vector<8x128xf32> to vector<8x128xbf16>
    %cst_420 = arith.constant dense<0.000000e+00> : vector<8x384xf32>
    %1007 = tpu.matmul %1006, %903, %cst_420 {dimension_numbers = #tpu.dot_dimension_numbers<[1], [0], [0], [1], [0, 0, 1, 1], [], []>} : vector<8x128xbf16>, vector<128x384xbf16>, vector<8x384xf32> -> vector<8x384xf32>
    %1008 = vector.extract_strided_slice %1005 {offsets = [0, 0], sizes = [8, 128], strides = [1, 1]} : vector<8x384xf32> to vector<8x128xf32>
    %1009 = vector.extract_strided_slice %1007 {offsets = [0, 0], sizes = [8, 128], strides = [1, 1]} : vector<8x384xf32> to vector<8x128xf32>
    %1010 = arith.addf %1008, %1009 : vector<8x128xf32>
    %1011 = arith.negf %1010 : vector<8x128xf32>
    %1012 = math.exp %1011 : vector<8x128xf32>
    %cst_421 = arith.constant 1.000000e+00 : f32
    %1013 = vector.broadcast %cst_421 : f32 to vector<8x128xf32>
    %1014 = arith.addf %1013, %1012 : vector<8x128xf32>
    %1015 = arith.divf %1013, %1014 : vector<8x128xf32>
    %1016 = vector.extract_strided_slice %1005 {offsets = [0, 128], sizes = [8, 128], strides = [1, 1]} : vector<8x384xf32> to vector<8x128xf32>
    %1017 = vector.extract_strided_slice %1007 {offsets = [0, 128], sizes = [8, 128], strides = [1, 1]} : vector<8x384xf32> to vector<8x128xf32>
    %1018 = arith.addf %1016, %1017 : vector<8x128xf32>
    %1019 = arith.negf %1018 : vector<8x128xf32>
    %1020 = math.exp %1019 : vector<8x128xf32>
    %cst_422 = arith.constant 1.000000e+00 : f32
    %1021 = vector.broadcast %cst_422 : f32 to vector<8x128xf32>
    %1022 = arith.addf %1021, %1020 : vector<8x128xf32>
    %1023 = arith.divf %1021, %1022 : vector<8x128xf32>
    %1024 = vector.extract_strided_slice %1005 {offsets = [0, 256], sizes = [8, 128], strides = [1, 1]} : vector<8x384xf32> to vector<8x128xf32>
    %1025 = vector.extract_strided_slice %1007 {offsets = [0, 256], sizes = [8, 128], strides = [1, 1]} : vector<8x384xf32> to vector<8x128xf32>
    %1026 = vector.broadcast %904 : vector<1x128xf32> to vector<8x128xf32>
    %1027 = arith.addf %1025, %1026 : vector<8x128xf32>
    %1028 = arith.mulf %1015, %1027 : vector<8x128xf32>
    %1029 = arith.addf %1024, %1028 : vector<8x128xf32>
    %1030 = math.tanh %1029 : vector<8x128xf32>
    %cst_423 = arith.constant 1.000000e+00 : f32
    %1031 = vector.broadcast %cst_423 : f32 to vector<8x128xf32>
    %1032 = arith.subf %1031, %1023 : vector<8x128xf32>
    %1033 = arith.mulf %1032, %1030 : vector<8x128xf32>
    %1034 = arith.mulf %1023, %1002 : vector<8x128xf32>
    %1035 = arith.addf %1033, %1034 : vector<8x128xf32>
    %1036 = arith.truncf %1035 : vector<8x128xf32> to vector<8x128xbf16>
    %c24_424 = arith.constant 24 : index
    %c0_425 = arith.constant 0 : index
    %1037 = vector.load %arg11[%c24_424, %c0_425] : memref<128x128xbf16, #tpu.memory_space<vmem>>, vector<8x128xbf16>
    tpu.vector_store %arg11[%c24_424, %c0_425], %1036 {strides = array<i32>} : memref<128x128xbf16, #tpu.memory_space<vmem>>, vector<8x128xbf16>,
    %c32_426 = arith.constant 32 : index
    %c0_427 = arith.constant 0 : index
    %1038 = vector.load %arg10[%c32_426, %c0_427] : memref<128x384xf32, #tpu.memory_space<vmem>>, vector<8x384xf32>
    %1039 = arith.truncf %1035 : vector<8x128xf32> to vector<8x128xbf16>
    %cst_428 = arith.constant dense<0.000000e+00> : vector<8x384xf32>
    %1040 = tpu.matmul %1039, %903, %cst_428 {dimension_numbers = #tpu.dot_dimension_numbers<[1], [0], [0], [1], [0, 0, 1, 1], [], []>} : vector<8x128xbf16>, vector<128x384xbf16>, vector<8x384xf32> -> vector<8x384xf32>
    %1041 = vector.extract_strided_slice %1038 {offsets = [0, 0], sizes = [8, 128], strides = [1, 1]} : vector<8x384xf32> to vector<8x128xf32>
    %1042 = vector.extract_strided_slice %1040 {offsets = [0, 0], sizes = [8, 128], strides = [1, 1]} : vector<8x384xf32> to vector<8x128xf32>
    %1043 = arith.addf %1041, %1042 : vector<8x128xf32>
    %1044 = arith.negf %1043 : vector<8x128xf32>
    %1045 = math.exp %1044 : vector<8x128xf32>
    %cst_429 = arith.constant 1.000000e+00 : f32
    %1046 = vector.broadcast %cst_429 : f32 to vector<8x128xf32>
    %1047 = arith.addf %1046, %1045 : vector<8x128xf32>
    %1048 = arith.divf %1046, %1047 : vector<8x128xf32>
    %1049 = vector.extract_strided_slice %1038 {offsets = [0, 128], sizes = [8, 128], strides = [1, 1]} : vector<8x384xf32> to vector<8x128xf32>
    %1050 = vector.extract_strided_slice %1040 {offsets = [0, 128], sizes = [8, 128], strides = [1, 1]} : vector<8x384xf32> to vector<8x128xf32>
    %1051 = arith.addf %1049, %1050 : vector<8x128xf32>
    %1052 = arith.negf %1051 : vector<8x128xf32>
    %1053 = math.exp %1052 : vector<8x128xf32>
    %cst_430 = arith.constant 1.000000e+00 : f32
    %1054 = vector.broadcast %cst_430 : f32 to vector<8x128xf32>
    %1055 = arith.addf %1054, %1053 : vector<8x128xf32>
    %1056 = arith.divf %1054, %1055 : vector<8x128xf32>
    %1057 = vector.extract_strided_slice %1038 {offsets = [0, 256], sizes = [8, 128], strides = [1, 1]} : vector<8x384xf32> to vector<8x128xf32>
    %1058 = vector.extract_strided_slice %1040 {offsets = [0, 256], sizes = [8, 128], strides = [1, 1]} : vector<8x384xf32> to vector<8x128xf32>
    %1059 = vector.broadcast %904 : vector<1x128xf32> to vector<8x128xf32>
    %1060 = arith.addf %1058, %1059 : vector<8x128xf32>
    %1061 = arith.mulf %1048, %1060 : vector<8x128xf32>
    %1062 = arith.addf %1057, %1061 : vector<8x128xf32>
    %1063 = math.tanh %1062 : vector<8x128xf32>
    %cst_431 = arith.constant 1.000000e+00 : f32
    %1064 = vector.broadcast %cst_431 : f32 to vector<8x128xf32>
    %1065 = arith.subf %1064, %1056 : vector<8x128xf32>
    %1066 = arith.mulf %1065, %1063 : vector<8x128xf32>
    %1067 = arith.mulf %1056, %1035 : vector<8x128xf32>
    %1068 = arith.addf %1066, %1067 : vector<8x128xf32>
    %1069 = arith.truncf %1068 : vector<8x128xf32> to vector<8x128xbf16>
    %c32_432 = arith.constant 32 : index
    %c0_433 = arith.constant 0 : index
    %1070 = vector.load %arg11[%c32_432, %c0_433] : memref<128x128xbf16, #tpu.memory_space<vmem>>, vector<8x128xbf16>
    tpu.vector_store %arg11[%c32_432, %c0_433], %1069 {strides = array<i32>} : memref<128x128xbf16, #tpu.memory_space<vmem>>, vector<8x128xbf16>,
    %c40_434 = arith.constant 40 : index
    %c0_435 = arith.constant 0 : index
    %1071 = vector.load %arg10[%c40_434, %c0_435] : memref<128x384xf32, #tpu.memory_space<vmem>>, vector<8x384xf32>
    %1072 = arith.truncf %1068 : vector<8x128xf32> to vector<8x128xbf16>
    %cst_436 = arith.constant dense<0.000000e+00> : vector<8x384xf32>
    %1073 = tpu.matmul %1072, %903, %cst_436 {dimension_numbers = #tpu.dot_dimension_numbers<[1], [0], [0], [1], [0, 0, 1, 1], [], []>} : vector<8x128xbf16>, vector<128x384xbf16>, vector<8x384xf32> -> vector<8x384xf32>
    %1074 = vector.extract_strided_slice %1071 {offsets = [0, 0], sizes = [8, 128], strides = [1, 1]} : vector<8x384xf32> to vector<8x128xf32>
    %1075 = vector.extract_strided_slice %1073 {offsets = [0, 0], sizes = [8, 128], strides = [1, 1]} : vector<8x384xf32> to vector<8x128xf32>
    %1076 = arith.addf %1074, %1075 : vector<8x128xf32>
    %1077 = arith.negf %1076 : vector<8x128xf32>
    %1078 = math.exp %1077 : vector<8x128xf32>
    %cst_437 = arith.constant 1.000000e+00 : f32
    %1079 = vector.broadcast %cst_437 : f32 to vector<8x128xf32>
    %1080 = arith.addf %1079, %1078 : vector<8x128xf32>
    %1081 = arith.divf %1079, %1080 : vector<8x128xf32>
    %1082 = vector.extract_strided_slice %1071 {offsets = [0, 128], sizes = [8, 128], strides = [1, 1]} : vector<8x384xf32> to vector<8x128xf32>
    %1083 = vector.extract_strided_slice %1073 {offsets = [0, 128], sizes = [8, 128], strides = [1, 1]} : vector<8x384xf32> to vector<8x128xf32>
    %1084 = arith.addf %1082, %1083 : vector<8x128xf32>
    %1085 = arith.negf %1084 : vector<8x128xf32>
    %1086 = math.exp %1085 : vector<8x128xf32>
    %cst_438 = arith.constant 1.000000e+00 : f32
    %1087 = vector.broadcast %cst_438 : f32 to vector<8x128xf32>
    %1088 = arith.addf %1087, %1086 : vector<8x128xf32>
    %1089 = arith.divf %1087, %1088 : vector<8x128xf32>
    %1090 = vector.extract_strided_slice %1071 {offsets = [0, 256], sizes = [8, 128], strides = [1, 1]} : vector<8x384xf32> to vector<8x128xf32>
    %1091 = vector.extract_strided_slice %1073 {offsets = [0, 256], sizes = [8, 128], strides = [1, 1]} : vector<8x384xf32> to vector<8x128xf32>
    %1092 = vector.broadcast %904 : vector<1x128xf32> to vector<8x128xf32>
    %1093 = arith.addf %1091, %1092 : vector<8x128xf32>
    %1094 = arith.mulf %1081, %1093 : vector<8x128xf32>
    %1095 = arith.addf %1090, %1094 : vector<8x128xf32>
    %1096 = math.tanh %1095 : vector<8x128xf32>
    %cst_439 = arith.constant 1.000000e+00 : f32
    %1097 = vector.broadcast %cst_439 : f32 to vector<8x128xf32>
    %1098 = arith.subf %1097, %1089 : vector<8x128xf32>
    %1099 = arith.mulf %1098, %1096 : vector<8x128xf32>
    %1100 = arith.mulf %1089, %1068 : vector<8x128xf32>
    %1101 = arith.addf %1099, %1100 : vector<8x128xf32>
    %1102 = arith.truncf %1101 : vector<8x128xf32> to vector<8x128xbf16>
    %c40_440 = arith.constant 40 : index
    %c0_441 = arith.constant 0 : index
    %1103 = vector.load %arg11[%c40_440, %c0_441] : memref<128x128xbf16, #tpu.memory_space<vmem>>, vector<8x128xbf16>
    tpu.vector_store %arg11[%c40_440, %c0_441], %1102 {strides = array<i32>} : memref<128x128xbf16, #tpu.memory_space<vmem>>, vector<8x128xbf16>,
    %c48_442 = arith.constant 48 : index
    %c0_443 = arith.constant 0 : index
    %1104 = vector.load %arg10[%c48_442, %c0_443] : memref<128x384xf32, #tpu.memory_space<vmem>>, vector<8x384xf32>
    %1105 = arith.truncf %1101 : vector<8x128xf32> to vector<8x128xbf16>
    %cst_444 = arith.constant dense<0.000000e+00> : vector<8x384xf32>
    %1106 = tpu.matmul %1105, %903, %cst_444 {dimension_numbers = #tpu.dot_dimension_numbers<[1], [0], [0], [1], [0, 0, 1, 1], [], []>} : vector<8x128xbf16>, vector<128x384xbf16>, vector<8x384xf32> -> vector<8x384xf32>
    %1107 = vector.extract_strided_slice %1104 {offsets = [0, 0], sizes = [8, 128], strides = [1, 1]} : vector<8x384xf32> to vector<8x128xf32>
    %1108 = vector.extract_strided_slice %1106 {offsets = [0, 0], sizes = [8, 128], strides = [1, 1]} : vector<8x384xf32> to vector<8x128xf32>
    %1109 = arith.addf %1107, %1108 : vector<8x128xf32>
    %1110 = arith.negf %1109 : vector<8x128xf32>
    %1111 = math.exp %1110 : vector<8x128xf32>
    %cst_445 = arith.constant 1.000000e+00 : f32
    %1112 = vector.broadcast %cst_445 : f32 to vector<8x128xf32>
    %1113 = arith.addf %1112, %1111 : vector<8x128xf32>
    %1114 = arith.divf %1112, %1113 : vector<8x128xf32>
    %1115 = vector.extract_strided_slice %1104 {offsets = [0, 128], sizes = [8, 128], strides = [1, 1]} : vector<8x384xf32> to vector<8x128xf32>
    %1116 = vector.extract_strided_slice %1106 {offsets = [0, 128], sizes = [8, 128], strides = [1, 1]} : vector<8x384xf32> to vector<8x128xf32>
    %1117 = arith.addf %1115, %1116 : vector<8x128xf32>
    %1118 = arith.negf %1117 : vector<8x128xf32>
    %1119 = math.exp %1118 : vector<8x128xf32>
    %cst_446 = arith.constant 1.000000e+00 : f32
    %1120 = vector.broadcast %cst_446 : f32 to vector<8x128xf32>
    %1121 = arith.addf %1120, %1119 : vector<8x128xf32>
    %1122 = arith.divf %1120, %1121 : vector<8x128xf32>
    %1123 = vector.extract_strided_slice %1104 {offsets = [0, 256], sizes = [8, 128], strides = [1, 1]} : vector<8x384xf32> to vector<8x128xf32>
    %1124 = vector.extract_strided_slice %1106 {offsets = [0, 256], sizes = [8, 128], strides = [1, 1]} : vector<8x384xf32> to vector<8x128xf32>
    %1125 = vector.broadcast %904 : vector<1x128xf32> to vector<8x128xf32>
    %1126 = arith.addf %1124, %1125 : vector<8x128xf32>
    %1127 = arith.mulf %1114, %1126 : vector<8x128xf32>
    %1128 = arith.addf %1123, %1127 : vector<8x128xf32>
    %1129 = math.tanh %1128 : vector<8x128xf32>
    %cst_447 = arith.constant 1.000000e+00 : f32
    %1130 = vector.broadcast %cst_447 : f32 to vector<8x128xf32>
    %1131 = arith.subf %1130, %1122 : vector<8x128xf32>
    %1132 = arith.mulf %1131, %1129 : vector<8x128xf32>
    %1133 = arith.mulf %1122, %1101 : vector<8x128xf32>
    %1134 = arith.addf %1132, %1133 : vector<8x128xf32>
    %1135 = arith.truncf %1134 : vector<8x128xf32> to vector<8x128xbf16>
    %c48_448 = arith.constant 48 : index
    %c0_449 = arith.constant 0 : index
    %1136 = vector.load %arg11[%c48_448, %c0_449] : memref<128x128xbf16, #tpu.memory_space<vmem>>, vector<8x128xbf16>
    tpu.vector_store %arg11[%c48_448, %c0_449], %1135 {strides = array<i32>} : memref<128x128xbf16, #tpu.memory_space<vmem>>, vector<8x128xbf16>,
    %c56_450 = arith.constant 56 : index
    %c0_451 = arith.constant 0 : index
    %1137 = vector.load %arg10[%c56_450, %c0_451] : memref<128x384xf32, #tpu.memory_space<vmem>>, vector<8x384xf32>
    %1138 = arith.truncf %1134 : vector<8x128xf32> to vector<8x128xbf16>
    %cst_452 = arith.constant dense<0.000000e+00> : vector<8x384xf32>
    %1139 = tpu.matmul %1138, %903, %cst_452 {dimension_numbers = #tpu.dot_dimension_numbers<[1], [0], [0], [1], [0, 0, 1, 1], [], []>} : vector<8x128xbf16>, vector<128x384xbf16>, vector<8x384xf32> -> vector<8x384xf32>
    %1140 = vector.extract_strided_slice %1137 {offsets = [0, 0], sizes = [8, 128], strides = [1, 1]} : vector<8x384xf32> to vector<8x128xf32>
    %1141 = vector.extract_strided_slice %1139 {offsets = [0, 0], sizes = [8, 128], strides = [1, 1]} : vector<8x384xf32> to vector<8x128xf32>
    %1142 = arith.addf %1140, %1141 : vector<8x128xf32>
    %1143 = arith.negf %1142 : vector<8x128xf32>
    %1144 = math.exp %1143 : vector<8x128xf32>
    %cst_453 = arith.constant 1.000000e+00 : f32
    %1145 = vector.broadcast %cst_453 : f32 to vector<8x128xf32>
    %1146 = arith.addf %1145, %1144 : vector<8x128xf32>
    %1147 = arith.divf %1145, %1146 : vector<8x128xf32>
    %1148 = vector.extract_strided_slice %1137 {offsets = [0, 128], sizes = [8, 128], strides = [1, 1]} : vector<8x384xf32> to vector<8x128xf32>
    %1149 = vector.extract_strided_slice %1139 {offsets = [0, 128], sizes = [8, 128], strides = [1, 1]} : vector<8x384xf32> to vector<8x128xf32>
    %1150 = arith.addf %1148, %1149 : vector<8x128xf32>
    %1151 = arith.negf %1150 : vector<8x128xf32>
    %1152 = math.exp %1151 : vector<8x128xf32>
    %cst_454 = arith.constant 1.000000e+00 : f32
    %1153 = vector.broadcast %cst_454 : f32 to vector<8x128xf32>
    %1154 = arith.addf %1153, %1152 : vector<8x128xf32>
    %1155 = arith.divf %1153, %1154 : vector<8x128xf32>
    %1156 = vector.extract_strided_slice %1137 {offsets = [0, 256], sizes = [8, 128], strides = [1, 1]} : vector<8x384xf32> to vector<8x128xf32>
    %1157 = vector.extract_strided_slice %1139 {offsets = [0, 256], sizes = [8, 128], strides = [1, 1]} : vector<8x384xf32> to vector<8x128xf32>
    %1158 = vector.broadcast %904 : vector<1x128xf32> to vector<8x128xf32>
    %1159 = arith.addf %1157, %1158 : vector<8x128xf32>
    %1160 = arith.mulf %1147, %1159 : vector<8x128xf32>
    %1161 = arith.addf %1156, %1160 : vector<8x128xf32>
    %1162 = math.tanh %1161 : vector<8x128xf32>
    %cst_455 = arith.constant 1.000000e+00 : f32
    %1163 = vector.broadcast %cst_455 : f32 to vector<8x128xf32>
    %1164 = arith.subf %1163, %1155 : vector<8x128xf32>
    %1165 = arith.mulf %1164, %1162 : vector<8x128xf32>
    %1166 = arith.mulf %1155, %1134 : vector<8x128xf32>
    %1167 = arith.addf %1165, %1166 : vector<8x128xf32>
    %1168 = arith.truncf %1167 : vector<8x128xf32> to vector<8x128xbf16>
    %c56_456 = arith.constant 56 : index
    %c0_457 = arith.constant 0 : index
    %1169 = vector.load %arg11[%c56_456, %c0_457] : memref<128x128xbf16, #tpu.memory_space<vmem>>, vector<8x128xbf16>
    tpu.vector_store %arg11[%c56_456, %c0_457], %1168 {strides = array<i32>} : memref<128x128xbf16, #tpu.memory_space<vmem>>, vector<8x128xbf16>,
    %c64_458 = arith.constant 64 : index
    %c0_459 = arith.constant 0 : index
    %1170 = vector.load %arg10[%c64_458, %c0_459] : memref<128x384xf32, #tpu.memory_space<vmem>>, vector<8x384xf32>
    %1171 = arith.truncf %1167 : vector<8x128xf32> to vector<8x128xbf16>
    %cst_460 = arith.constant dense<0.000000e+00> : vector<8x384xf32>
    %1172 = tpu.matmul %1171, %903, %cst_460 {dimension_numbers = #tpu.dot_dimension_numbers<[1], [0], [0], [1], [0, 0, 1, 1], [], []>} : vector<8x128xbf16>, vector<128x384xbf16>, vector<8x384xf32> -> vector<8x384xf32>
    %1173 = vector.extract_strided_slice %1170 {offsets = [0, 0], sizes = [8, 128], strides = [1, 1]} : vector<8x384xf32> to vector<8x128xf32>
    %1174 = vector.extract_strided_slice %1172 {offsets = [0, 0], sizes = [8, 128], strides = [1, 1]} : vector<8x384xf32> to vector<8x128xf32>
    %1175 = arith.addf %1173, %1174 : vector<8x128xf32>
    %1176 = arith.negf %1175 : vector<8x128xf32>
    %1177 = math.exp %1176 : vector<8x128xf32>
    %cst_461 = arith.constant 1.000000e+00 : f32
    %1178 = vector.broadcast %cst_461 : f32 to vector<8x128xf32>
    %1179 = arith.addf %1178, %1177 : vector<8x128xf32>
    %1180 = arith.divf %1178, %1179 : vector<8x128xf32>
    %1181 = vector.extract_strided_slice %1170 {offsets = [0, 128], sizes = [8, 128], strides = [1, 1]} : vector<8x384xf32> to vector<8x128xf32>
    %1182 = vector.extract_strided_slice %1172 {offsets = [0, 128], sizes = [8, 128], strides = [1, 1]} : vector<8x384xf32> to vector<8x128xf32>
    %1183 = arith.addf %1181, %1182 : vector<8x128xf32>
    %1184 = arith.negf %1183 : vector<8x128xf32>
    %1185 = math.exp %1184 : vector<8x128xf32>
    %cst_462 = arith.constant 1.000000e+00 : f32
    %1186 = vector.broadcast %cst_462 : f32 to vector<8x128xf32>
    %1187 = arith.addf %1186, %1185 : vector<8x128xf32>
    %1188 = arith.divf %1186, %1187 : vector<8x128xf32>
    %1189 = vector.extract_strided_slice %1170 {offsets = [0, 256], sizes = [8, 128], strides = [1, 1]} : vector<8x384xf32> to vector<8x128xf32>
    %1190 = vector.extract_strided_slice %1172 {offsets = [0, 256], sizes = [8, 128], strides = [1, 1]} : vector<8x384xf32> to vector<8x128xf32>
    %1191 = vector.broadcast %904 : vector<1x128xf32> to vector<8x128xf32>
    %1192 = arith.addf %1190, %1191 : vector<8x128xf32>
    %1193 = arith.mulf %1180, %1192 : vector<8x128xf32>
    %1194 = arith.addf %1189, %1193 : vector<8x128xf32>
    %1195 = math.tanh %1194 : vector<8x128xf32>
    %cst_463 = arith.constant 1.000000e+00 : f32
    %1196 = vector.broadcast %cst_463 : f32 to vector<8x128xf32>
    %1197 = arith.subf %1196, %1188 : vector<8x128xf32>
    %1198 = arith.mulf %1197, %1195 : vector<8x128xf32>
    %1199 = arith.mulf %1188, %1167 : vector<8x128xf32>
    %1200 = arith.addf %1198, %1199 : vector<8x128xf32>
    %1201 = arith.truncf %1200 : vector<8x128xf32> to vector<8x128xbf16>
    %c64_464 = arith.constant 64 : index
    %c0_465 = arith.constant 0 : index
    %1202 = vector.load %arg11[%c64_464, %c0_465] : memref<128x128xbf16, #tpu.memory_space<vmem>>, vector<8x128xbf16>
    tpu.vector_store %arg11[%c64_464, %c0_465], %1201 {strides = array<i32>} : memref<128x128xbf16, #tpu.memory_space<vmem>>, vector<8x128xbf16>,
    %c72_466 = arith.constant 72 : index
    %c0_467 = arith.constant 0 : index
    %1203 = vector.load %arg10[%c72_466, %c0_467] : memref<128x384xf32, #tpu.memory_space<vmem>>, vector<8x384xf32>
    %1204 = arith.truncf %1200 : vector<8x128xf32> to vector<8x128xbf16>
    %cst_468 = arith.constant dense<0.000000e+00> : vector<8x384xf32>
    %1205 = tpu.matmul %1204, %903, %cst_468 {dimension_numbers = #tpu.dot_dimension_numbers<[1], [0], [0], [1], [0, 0, 1, 1], [], []>} : vector<8x128xbf16>, vector<128x384xbf16>, vector<8x384xf32> -> vector<8x384xf32>
    %1206 = vector.extract_strided_slice %1203 {offsets = [0, 0], sizes = [8, 128], strides = [1, 1]} : vector<8x384xf32> to vector<8x128xf32>
    %1207 = vector.extract_strided_slice %1205 {offsets = [0, 0], sizes = [8, 128], strides = [1, 1]} : vector<8x384xf32> to vector<8x128xf32>
    %1208 = arith.addf %1206, %1207 : vector<8x128xf32>
    %1209 = arith.negf %1208 : vector<8x128xf32>
    %1210 = math.exp %1209 : vector<8x128xf32>
    %cst_469 = arith.constant 1.000000e+00 : f32
    %1211 = vector.broadcast %cst_469 : f32 to vector<8x128xf32>
    %1212 = arith.addf %1211, %1210 : vector<8x128xf32>
    %1213 = arith.divf %1211, %1212 : vector<8x128xf32>
    %1214 = vector.extract_strided_slice %1203 {offsets = [0, 128], sizes = [8, 128], strides = [1, 1]} : vector<8x384xf32> to vector<8x128xf32>
    %1215 = vector.extract_strided_slice %1205 {offsets = [0, 128], sizes = [8, 128], strides = [1, 1]} : vector<8x384xf32> to vector<8x128xf32>
    %1216 = arith.addf %1214, %1215 : vector<8x128xf32>
    %1217 = arith.negf %1216 : vector<8x128xf32>
    %1218 = math.exp %1217 : vector<8x128xf32>
    %cst_470 = arith.constant 1.000000e+00 : f32
    %1219 = vector.broadcast %cst_470 : f32 to vector<8x128xf32>
    %1220 = arith.addf %1219, %1218 : vector<8x128xf32>
    %1221 = arith.divf %1219, %1220 : vector<8x128xf32>
    %1222 = vector.extract_strided_slice %1203 {offsets = [0, 256], sizes = [8, 128], strides = [1, 1]} : vector<8x384xf32> to vector<8x128xf32>
    %1223 = vector.extract_strided_slice %1205 {offsets = [0, 256], sizes = [8, 128], strides = [1, 1]} : vector<8x384xf32> to vector<8x128xf32>
    %1224 = vector.broadcast %904 : vector<1x128xf32> to vector<8x128xf32>
    %1225 = arith.addf %1223, %1224 : vector<8x128xf32>
    %1226 = arith.mulf %1213, %1225 : vector<8x128xf32>
    %1227 = arith.addf %1222, %1226 : vector<8x128xf32>
    %1228 = math.tanh %1227 : vector<8x128xf32>
    %cst_471 = arith.constant 1.000000e+00 : f32
    %1229 = vector.broadcast %cst_471 : f32 to vector<8x128xf32>
    %1230 = arith.subf %1229, %1221 : vector<8x128xf32>
    %1231 = arith.mulf %1230, %1228 : vector<8x128xf32>
    %1232 = arith.mulf %1221, %1200 : vector<8x128xf32>
    %1233 = arith.addf %1231, %1232 : vector<8x128xf32>
    %1234 = arith.truncf %1233 : vector<8x128xf32> to vector<8x128xbf16>
    %c72_472 = arith.constant 72 : index
    %c0_473 = arith.constant 0 : index
    %1235 = vector.load %arg11[%c72_472, %c0_473] : memref<128x128xbf16, #tpu.memory_space<vmem>>, vector<8x128xbf16>
    tpu.vector_store %arg11[%c72_472, %c0_473], %1234 {strides = array<i32>} : memref<128x128xbf16, #tpu.memory_space<vmem>>, vector<8x128xbf16>,
    %c80_474 = arith.constant 80 : index
    %c0_475 = arith.constant 0 : index
    %1236 = vector.load %arg10[%c80_474, %c0_475] : memref<128x384xf32, #tpu.memory_space<vmem>>, vector<8x384xf32>
    %1237 = arith.truncf %1233 : vector<8x128xf32> to vector<8x128xbf16>
    %cst_476 = arith.constant dense<0.000000e+00> : vector<8x384xf32>
    %1238 = tpu.matmul %1237, %903, %cst_476 {dimension_numbers = #tpu.dot_dimension_numbers<[1], [0], [0], [1], [0, 0, 1, 1], [], []>} : vector<8x128xbf16>, vector<128x384xbf16>, vector<8x384xf32> -> vector<8x384xf32>
    %1239 = vector.extract_strided_slice %1236 {offsets = [0, 0], sizes = [8, 128], strides = [1, 1]} : vector<8x384xf32> to vector<8x128xf32>
    %1240 = vector.extract_strided_slice %1238 {offsets = [0, 0], sizes = [8, 128], strides = [1, 1]} : vector<8x384xf32> to vector<8x128xf32>
    %1241 = arith.addf %1239, %1240 : vector<8x128xf32>
    %1242 = arith.negf %1241 : vector<8x128xf32>
    %1243 = math.exp %1242 : vector<8x128xf32>
    %cst_477 = arith.constant 1.000000e+00 : f32
    %1244 = vector.broadcast %cst_477 : f32 to vector<8x128xf32>
    %1245 = arith.addf %1244, %1243 : vector<8x128xf32>
    %1246 = arith.divf %1244, %1245 : vector<8x128xf32>
    %1247 = vector.extract_strided_slice %1236 {offsets = [0, 128], sizes = [8, 128], strides = [1, 1]} : vector<8x384xf32> to vector<8x128xf32>
    %1248 = vector.extract_strided_slice %1238 {offsets = [0, 128], sizes = [8, 128], strides = [1, 1]} : vector<8x384xf32> to vector<8x128xf32>
    %1249 = arith.addf %1247, %1248 : vector<8x128xf32>
    %1250 = arith.negf %1249 : vector<8x128xf32>
    %1251 = math.exp %1250 : vector<8x128xf32>
    %cst_478 = arith.constant 1.000000e+00 : f32
    %1252 = vector.broadcast %cst_478 : f32 to vector<8x128xf32>
    %1253 = arith.addf %1252, %1251 : vector<8x128xf32>
    %1254 = arith.divf %1252, %1253 : vector<8x128xf32>
    %1255 = vector.extract_strided_slice %1236 {offsets = [0, 256], sizes = [8, 128], strides = [1, 1]} : vector<8x384xf32> to vector<8x128xf32>
    %1256 = vector.extract_strided_slice %1238 {offsets = [0, 256], sizes = [8, 128], strides = [1, 1]} : vector<8x384xf32> to vector<8x128xf32>
    %1257 = vector.broadcast %904 : vector<1x128xf32> to vector<8x128xf32>
    %1258 = arith.addf %1256, %1257 : vector<8x128xf32>
    %1259 = arith.mulf %1246, %1258 : vector<8x128xf32>
    %1260 = arith.addf %1255, %1259 : vector<8x128xf32>
    %1261 = math.tanh %1260 : vector<8x128xf32>
    %cst_479 = arith.constant 1.000000e+00 : f32
    %1262 = vector.broadcast %cst_479 : f32 to vector<8x128xf32>
    %1263 = arith.subf %1262, %1254 : vector<8x128xf32>
    %1264 = arith.mulf %1263, %1261 : vector<8x128xf32>
    %1265 = arith.mulf %1254, %1233 : vector<8x128xf32>
    %1266 = arith.addf %1264, %1265 : vector<8x128xf32>
    %1267 = arith.truncf %1266 : vector<8x128xf32> to vector<8x128xbf16>
    %c80_480 = arith.constant 80 : index
    %c0_481 = arith.constant 0 : index
    %1268 = vector.load %arg11[%c80_480, %c0_481] : memref<128x128xbf16, #tpu.memory_space<vmem>>, vector<8x128xbf16>
    tpu.vector_store %arg11[%c80_480, %c0_481], %1267 {strides = array<i32>} : memref<128x128xbf16, #tpu.memory_space<vmem>>, vector<8x128xbf16>,
    %c88_482 = arith.constant 88 : index
    %c0_483 = arith.constant 0 : index
    %1269 = vector.load %arg10[%c88_482, %c0_483] : memref<128x384xf32, #tpu.memory_space<vmem>>, vector<8x384xf32>
    %1270 = arith.truncf %1266 : vector<8x128xf32> to vector<8x128xbf16>
    %cst_484 = arith.constant dense<0.000000e+00> : vector<8x384xf32>
    %1271 = tpu.matmul %1270, %903, %cst_484 {dimension_numbers = #tpu.dot_dimension_numbers<[1], [0], [0], [1], [0, 0, 1, 1], [], []>} : vector<8x128xbf16>, vector<128x384xbf16>, vector<8x384xf32> -> vector<8x384xf32>
    %1272 = vector.extract_strided_slice %1269 {offsets = [0, 0], sizes = [8, 128], strides = [1, 1]} : vector<8x384xf32> to vector<8x128xf32>
    %1273 = vector.extract_strided_slice %1271 {offsets = [0, 0], sizes = [8, 128], strides = [1, 1]} : vector<8x384xf32> to vector<8x128xf32>
    %1274 = arith.addf %1272, %1273 : vector<8x128xf32>
    %1275 = arith.negf %1274 : vector<8x128xf32>
    %1276 = math.exp %1275 : vector<8x128xf32>
    %cst_485 = arith.constant 1.000000e+00 : f32
    %1277 = vector.broadcast %cst_485 : f32 to vector<8x128xf32>
    %1278 = arith.addf %1277, %1276 : vector<8x128xf32>
    %1279 = arith.divf %1277, %1278 : vector<8x128xf32>
    %1280 = vector.extract_strided_slice %1269 {offsets = [0, 128], sizes = [8, 128], strides = [1, 1]} : vector<8x384xf32> to vector<8x128xf32>
    %1281 = vector.extract_strided_slice %1271 {offsets = [0, 128], sizes = [8, 128], strides = [1, 1]} : vector<8x384xf32> to vector<8x128xf32>
    %1282 = arith.addf %1280, %1281 : vector<8x128xf32>
    %1283 = arith.negf %1282 : vector<8x128xf32>
    %1284 = math.exp %1283 : vector<8x128xf32>
    %cst_486 = arith.constant 1.000000e+00 : f32
    %1285 = vector.broadcast %cst_486 : f32 to vector<8x128xf32>
    %1286 = arith.addf %1285, %1284 : vector<8x128xf32>
    %1287 = arith.divf %1285, %1286 : vector<8x128xf32>
    %1288 = vector.extract_strided_slice %1269 {offsets = [0, 256], sizes = [8, 128], strides = [1, 1]} : vector<8x384xf32> to vector<8x128xf32>
    %1289 = vector.extract_strided_slice %1271 {offsets = [0, 256], sizes = [8, 128], strides = [1, 1]} : vector<8x384xf32> to vector<8x128xf32>
    %1290 = vector.broadcast %904 : vector<1x128xf32> to vector<8x128xf32>
    %1291 = arith.addf %1289, %1290 : vector<8x128xf32>
    %1292 = arith.mulf %1279, %1291 : vector<8x128xf32>
    %1293 = arith.addf %1288, %1292 : vector<8x128xf32>
    %1294 = math.tanh %1293 : vector<8x128xf32>
    %cst_487 = arith.constant 1.000000e+00 : f32
    %1295 = vector.broadcast %cst_487 : f32 to vector<8x128xf32>
    %1296 = arith.subf %1295, %1287 : vector<8x128xf32>
    %1297 = arith.mulf %1296, %1294 : vector<8x128xf32>
    %1298 = arith.mulf %1287, %1266 : vector<8x128xf32>
    %1299 = arith.addf %1297, %1298 : vector<8x128xf32>
    %1300 = arith.truncf %1299 : vector<8x128xf32> to vector<8x128xbf16>
    %c88_488 = arith.constant 88 : index
    %c0_489 = arith.constant 0 : index
    %1301 = vector.load %arg11[%c88_488, %c0_489] : memref<128x128xbf16, #tpu.memory_space<vmem>>, vector<8x128xbf16>
    tpu.vector_store %arg11[%c88_488, %c0_489], %1300 {strides = array<i32>} : memref<128x128xbf16, #tpu.memory_space<vmem>>, vector<8x128xbf16>,
    %c96_490 = arith.constant 96 : index
    %c0_491 = arith.constant 0 : index
    %1302 = vector.load %arg10[%c96_490, %c0_491] : memref<128x384xf32, #tpu.memory_space<vmem>>, vector<8x384xf32>
    %1303 = arith.truncf %1299 : vector<8x128xf32> to vector<8x128xbf16>
    %cst_492 = arith.constant dense<0.000000e+00> : vector<8x384xf32>
    %1304 = tpu.matmul %1303, %903, %cst_492 {dimension_numbers = #tpu.dot_dimension_numbers<[1], [0], [0], [1], [0, 0, 1, 1], [], []>} : vector<8x128xbf16>, vector<128x384xbf16>, vector<8x384xf32> -> vector<8x384xf32>
    %1305 = vector.extract_strided_slice %1302 {offsets = [0, 0], sizes = [8, 128], strides = [1, 1]} : vector<8x384xf32> to vector<8x128xf32>
    %1306 = vector.extract_strided_slice %1304 {offsets = [0, 0], sizes = [8, 128], strides = [1, 1]} : vector<8x384xf32> to vector<8x128xf32>
    %1307 = arith.addf %1305, %1306 : vector<8x128xf32>
    %1308 = arith.negf %1307 : vector<8x128xf32>
    %1309 = math.exp %1308 : vector<8x128xf32>
    %cst_493 = arith.constant 1.000000e+00 : f32
    %1310 = vector.broadcast %cst_493 : f32 to vector<8x128xf32>
    %1311 = arith.addf %1310, %1309 : vector<8x128xf32>
    %1312 = arith.divf %1310, %1311 : vector<8x128xf32>
    %1313 = vector.extract_strided_slice %1302 {offsets = [0, 128], sizes = [8, 128], strides = [1, 1]} : vector<8x384xf32> to vector<8x128xf32>
    %1314 = vector.extract_strided_slice %1304 {offsets = [0, 128], sizes = [8, 128], strides = [1, 1]} : vector<8x384xf32> to vector<8x128xf32>
    %1315 = arith.addf %1313, %1314 : vector<8x128xf32>
    %1316 = arith.negf %1315 : vector<8x128xf32>
    %1317 = math.exp %1316 : vector<8x128xf32>
    %cst_494 = arith.constant 1.000000e+00 : f32
    %1318 = vector.broadcast %cst_494 : f32 to vector<8x128xf32>
    %1319 = arith.addf %1318, %1317 : vector<8x128xf32>
    %1320 = arith.divf %1318, %1319 : vector<8x128xf32>
    %1321 = vector.extract_strided_slice %1302 {offsets = [0, 256], sizes = [8, 128], strides = [1, 1]} : vector<8x384xf32> to vector<8x128xf32>
    %1322 = vector.extract_strided_slice %1304 {offsets = [0, 256], sizes = [8, 128], strides = [1, 1]} : vector<8x384xf32> to vector<8x128xf32>
    %1323 = vector.broadcast %904 : vector<1x128xf32> to vector<8x128xf32>
    %1324 = arith.addf %1322, %1323 : vector<8x128xf32>
    %1325 = arith.mulf %1312, %1324 : vector<8x128xf32>
    %1326 = arith.addf %1321, %1325 : vector<8x128xf32>
    %1327 = math.tanh %1326 : vector<8x128xf32>
    %cst_495 = arith.constant 1.000000e+00 : f32
    %1328 = vector.broadcast %cst_495 : f32 to vector<8x128xf32>
    %1329 = arith.subf %1328, %1320 : vector<8x128xf32>
    %1330 = arith.mulf %1329, %1327 : vector<8x128xf32>
    %1331 = arith.mulf %1320, %1299 : vector<8x128xf32>
    %1332 = arith.addf %1330, %1331 : vector<8x128xf32>
    %1333 = arith.truncf %1332 : vector<8x128xf32> to vector<8x128xbf16>
    %c96_496 = arith.constant 96 : index
    %c0_497 = arith.constant 0 : index
    %1334 = vector.load %arg11[%c96_496, %c0_497] : memref<128x128xbf16, #tpu.memory_space<vmem>>, vector<8x128xbf16>
    tpu.vector_store %arg11[%c96_496, %c0_497], %1333 {strides = array<i32>} : memref<128x128xbf16, #tpu.memory_space<vmem>>, vector<8x128xbf16>,
    %c104_498 = arith.constant 104 : index
    %c0_499 = arith.constant 0 : index
    %1335 = vector.load %arg10[%c104_498, %c0_499] : memref<128x384xf32, #tpu.memory_space<vmem>>, vector<8x384xf32>
    %1336 = arith.truncf %1332 : vector<8x128xf32> to vector<8x128xbf16>
    %cst_500 = arith.constant dense<0.000000e+00> : vector<8x384xf32>
    %1337 = tpu.matmul %1336, %903, %cst_500 {dimension_numbers = #tpu.dot_dimension_numbers<[1], [0], [0], [1], [0, 0, 1, 1], [], []>} : vector<8x128xbf16>, vector<128x384xbf16>, vector<8x384xf32> -> vector<8x384xf32>
    %1338 = vector.extract_strided_slice %1335 {offsets = [0, 0], sizes = [8, 128], strides = [1, 1]} : vector<8x384xf32> to vector<8x128xf32>
    %1339 = vector.extract_strided_slice %1337 {offsets = [0, 0], sizes = [8, 128], strides = [1, 1]} : vector<8x384xf32> to vector<8x128xf32>
    %1340 = arith.addf %1338, %1339 : vector<8x128xf32>
    %1341 = arith.negf %1340 : vector<8x128xf32>
    %1342 = math.exp %1341 : vector<8x128xf32>
    %cst_501 = arith.constant 1.000000e+00 : f32
    %1343 = vector.broadcast %cst_501 : f32 to vector<8x128xf32>
    %1344 = arith.addf %1343, %1342 : vector<8x128xf32>
    %1345 = arith.divf %1343, %1344 : vector<8x128xf32>
    %1346 = vector.extract_strided_slice %1335 {offsets = [0, 128], sizes = [8, 128], strides = [1, 1]} : vector<8x384xf32> to vector<8x128xf32>
    %1347 = vector.extract_strided_slice %1337 {offsets = [0, 128], sizes = [8, 128], strides = [1, 1]} : vector<8x384xf32> to vector<8x128xf32>
    %1348 = arith.addf %1346, %1347 : vector<8x128xf32>
    %1349 = arith.negf %1348 : vector<8x128xf32>
    %1350 = math.exp %1349 : vector<8x128xf32>
    %cst_502 = arith.constant 1.000000e+00 : f32
    %1351 = vector.broadcast %cst_502 : f32 to vector<8x128xf32>
    %1352 = arith.addf %1351, %1350 : vector<8x128xf32>
    %1353 = arith.divf %1351, %1352 : vector<8x128xf32>
    %1354 = vector.extract_strided_slice %1335 {offsets = [0, 256], sizes = [8, 128], strides = [1, 1]} : vector<8x384xf32> to vector<8x128xf32>
    %1355 = vector.extract_strided_slice %1337 {offsets = [0, 256], sizes = [8, 128], strides = [1, 1]} : vector<8x384xf32> to vector<8x128xf32>
    %1356 = vector.broadcast %904 : vector<1x128xf32> to vector<8x128xf32>
    %1357 = arith.addf %1355, %1356 : vector<8x128xf32>
    %1358 = arith.mulf %1345, %1357 : vector<8x128xf32>
    %1359 = arith.addf %1354, %1358 : vector<8x128xf32>
    %1360 = math.tanh %1359 : vector<8x128xf32>
    %cst_503 = arith.constant 1.000000e+00 : f32
    %1361 = vector.broadcast %cst_503 : f32 to vector<8x128xf32>
    %1362 = arith.subf %1361, %1353 : vector<8x128xf32>
    %1363 = arith.mulf %1362, %1360 : vector<8x128xf32>
    %1364 = arith.mulf %1353, %1332 : vector<8x128xf32>
    %1365 = arith.addf %1363, %1364 : vector<8x128xf32>
    %1366 = arith.truncf %1365 : vector<8x128xf32> to vector<8x128xbf16>
    %c104_504 = arith.constant 104 : index
    %c0_505 = arith.constant 0 : index
    %1367 = vector.load %arg11[%c104_504, %c0_505] : memref<128x128xbf16, #tpu.memory_space<vmem>>, vector<8x128xbf16>
    tpu.vector_store %arg11[%c104_504, %c0_505], %1366 {strides = array<i32>} : memref<128x128xbf16, #tpu.memory_space<vmem>>, vector<8x128xbf16>,
    %c112_506 = arith.constant 112 : index
    %c0_507 = arith.constant 0 : index
    %1368 = vector.load %arg10[%c112_506, %c0_507] : memref<128x384xf32, #tpu.memory_space<vmem>>, vector<8x384xf32>
    %1369 = arith.truncf %1365 : vector<8x128xf32> to vector<8x128xbf16>
    %cst_508 = arith.constant dense<0.000000e+00> : vector<8x384xf32>
    %1370 = tpu.matmul %1369, %903, %cst_508 {dimension_numbers = #tpu.dot_dimension_numbers<[1], [0], [0], [1], [0, 0, 1, 1], [], []>} : vector<8x128xbf16>, vector<128x384xbf16>, vector<8x384xf32> -> vector<8x384xf32>
    %1371 = vector.extract_strided_slice %1368 {offsets = [0, 0], sizes = [8, 128], strides = [1, 1]} : vector<8x384xf32> to vector<8x128xf32>
    %1372 = vector.extract_strided_slice %1370 {offsets = [0, 0], sizes = [8, 128], strides = [1, 1]} : vector<8x384xf32> to vector<8x128xf32>
    %1373 = arith.addf %1371, %1372 : vector<8x128xf32>
    %1374 = arith.negf %1373 : vector<8x128xf32>
    %1375 = math.exp %1374 : vector<8x128xf32>
    %cst_509 = arith.constant 1.000000e+00 : f32
    %1376 = vector.broadcast %cst_509 : f32 to vector<8x128xf32>
    %1377 = arith.addf %1376, %1375 : vector<8x128xf32>
    %1378 = arith.divf %1376, %1377 : vector<8x128xf32>
    %1379 = vector.extract_strided_slice %1368 {offsets = [0, 128], sizes = [8, 128], strides = [1, 1]} : vector<8x384xf32> to vector<8x128xf32>
    %1380 = vector.extract_strided_slice %1370 {offsets = [0, 128], sizes = [8, 128], strides = [1, 1]} : vector<8x384xf32> to vector<8x128xf32>
    %1381 = arith.addf %1379, %1380 : vector<8x128xf32>
    %1382 = arith.negf %1381 : vector<8x128xf32>
    %1383 = math.exp %1382 : vector<8x128xf32>
    %cst_510 = arith.constant 1.000000e+00 : f32
    %1384 = vector.broadcast %cst_510 : f32 to vector<8x128xf32>
    %1385 = arith.addf %1384, %1383 : vector<8x128xf32>
    %1386 = arith.divf %1384, %1385 : vector<8x128xf32>
    %1387 = vector.extract_strided_slice %1368 {offsets = [0, 256], sizes = [8, 128], strides = [1, 1]} : vector<8x384xf32> to vector<8x128xf32>
    %1388 = vector.extract_strided_slice %1370 {offsets = [0, 256], sizes = [8, 128], strides = [1, 1]} : vector<8x384xf32> to vector<8x128xf32>
    %1389 = vector.broadcast %904 : vector<1x128xf32> to vector<8x128xf32>
    %1390 = arith.addf %1388, %1389 : vector<8x128xf32>
    %1391 = arith.mulf %1378, %1390 : vector<8x128xf32>
    %1392 = arith.addf %1387, %1391 : vector<8x128xf32>
    %1393 = math.tanh %1392 : vector<8x128xf32>
    %cst_511 = arith.constant 1.000000e+00 : f32
    %1394 = vector.broadcast %cst_511 : f32 to vector<8x128xf32>
    %1395 = arith.subf %1394, %1386 : vector<8x128xf32>
    %1396 = arith.mulf %1395, %1393 : vector<8x128xf32>
    %1397 = arith.mulf %1386, %1365 : vector<8x128xf32>
    %1398 = arith.addf %1396, %1397 : vector<8x128xf32>
    %1399 = arith.truncf %1398 : vector<8x128xf32> to vector<8x128xbf16>
    %c112_512 = arith.constant 112 : index
    %c0_513 = arith.constant 0 : index
    %1400 = vector.load %arg11[%c112_512, %c0_513] : memref<128x128xbf16, #tpu.memory_space<vmem>>, vector<8x128xbf16>
    tpu.vector_store %arg11[%c112_512, %c0_513], %1399 {strides = array<i32>} : memref<128x128xbf16, #tpu.memory_space<vmem>>, vector<8x128xbf16>,
    %c120_514 = arith.constant 120 : index
    %c0_515 = arith.constant 0 : index
    %1401 = vector.load %arg10[%c120_514, %c0_515] : memref<128x384xf32, #tpu.memory_space<vmem>>, vector<8x384xf32>
    %1402 = arith.truncf %1398 : vector<8x128xf32> to vector<8x128xbf16>
    %cst_516 = arith.constant dense<0.000000e+00> : vector<8x384xf32>
    %1403 = tpu.matmul %1402, %903, %cst_516 {dimension_numbers = #tpu.dot_dimension_numbers<[1], [0], [0], [1], [0, 0, 1, 1], [], []>} : vector<8x128xbf16>, vector<128x384xbf16>, vector<8x384xf32> -> vector<8x384xf32>
    %1404 = vector.extract_strided_slice %1401 {offsets = [0, 0], sizes = [8, 128], strides = [1, 1]} : vector<8x384xf32> to vector<8x128xf32>
    %1405 = vector.extract_strided_slice %1403 {offsets = [0, 0], sizes = [8, 128], strides = [1, 1]} : vector<8x384xf32> to vector<8x128xf32>
    %1406 = arith.addf %1404, %1405 : vector<8x128xf32>
    %1407 = arith.negf %1406 : vector<8x128xf32>
    %1408 = math.exp %1407 : vector<8x128xf32>
    %cst_517 = arith.constant 1.000000e+00 : f32
    %1409 = vector.broadcast %cst_517 : f32 to vector<8x128xf32>
    %1410 = arith.addf %1409, %1408 : vector<8x128xf32>
    %1411 = arith.divf %1409, %1410 : vector<8x128xf32>
    %1412 = vector.extract_strided_slice %1401 {offsets = [0, 128], sizes = [8, 128], strides = [1, 1]} : vector<8x384xf32> to vector<8x128xf32>
    %1413 = vector.extract_strided_slice %1403 {offsets = [0, 128], sizes = [8, 128], strides = [1, 1]} : vector<8x384xf32> to vector<8x128xf32>
    %1414 = arith.addf %1412, %1413 : vector<8x128xf32>
    %1415 = arith.negf %1414 : vector<8x128xf32>
    %1416 = math.exp %1415 : vector<8x128xf32>
    %cst_518 = arith.constant 1.000000e+00 : f32
    %1417 = vector.broadcast %cst_518 : f32 to vector<8x128xf32>
    %1418 = arith.addf %1417, %1416 : vector<8x128xf32>
    %1419 = arith.divf %1417, %1418 : vector<8x128xf32>
    %1420 = vector.extract_strided_slice %1401 {offsets = [0, 256], sizes = [8, 128], strides = [1, 1]} : vector<8x384xf32> to vector<8x128xf32>
    %1421 = vector.extract_strided_slice %1403 {offsets = [0, 256], sizes = [8, 128], strides = [1, 1]} : vector<8x384xf32> to vector<8x128xf32>
    %1422 = vector.broadcast %904 : vector<1x128xf32> to vector<8x128xf32>
    %1423 = arith.addf %1421, %1422 : vector<8x128xf32>
    %1424 = arith.mulf %1411, %1423 : vector<8x128xf32>
    %1425 = arith.addf %1420, %1424 : vector<8x128xf32>
    %1426 = math.tanh %1425 : vector<8x128xf32>
    %cst_519 = arith.constant 1.000000e+00 : f32
    %1427 = vector.broadcast %cst_519 : f32 to vector<8x128xf32>
    %1428 = arith.subf %1427, %1419 : vector<8x128xf32>
    %1429 = arith.mulf %1428, %1426 : vector<8x128xf32>
    %1430 = arith.mulf %1419, %1398 : vector<8x128xf32>
    %1431 = arith.addf %1429, %1430 : vector<8x128xf32>
    %1432 = arith.truncf %1431 : vector<8x128xf32> to vector<8x128xbf16>
    %c120_520 = arith.constant 120 : index
    %c0_521 = arith.constant 0 : index
    %1433 = vector.load %arg11[%c120_520, %c0_521] : memref<128x128xbf16, #tpu.memory_space<vmem>>, vector<8x128xbf16>
    tpu.vector_store %arg11[%c120_520, %c0_521], %1432 {strides = array<i32>} : memref<128x128xbf16, #tpu.memory_space<vmem>>, vector<8x128xbf16>,
    %c0_522 = arith.constant 0 : index
    %c0_523 = arith.constant 0 : index
    %1434 = vector.load %arg9[%c0_522, %c0_523] : memref<8x128xf32, #tpu.memory_space<vmem>>, vector<8x128xf32>
    tpu.vector_store %arg9[%c0_522, %c0_523], %1431 {strides = array<i32>} : memref<8x128xf32, #tpu.memory_space<vmem>>, vector<8x128xf32>,
    %c0_524 = arith.constant 0 : index
    %c0_525 = arith.constant 0 : index
    %1435 = vector.load %arg11[%c0_524, %c0_525] : memref<128x128xbf16, #tpu.memory_space<vmem>>, vector<128x128xbf16>
    %c0_526 = arith.constant 0 : index
    %c0_527 = arith.constant 0 : index
    %1436 = vector.load %arg6[%c0_526, %c0_527] : memref<128x128xbf16, #tpu.memory_space<vmem>>, vector<128x128xbf16>
    %cst_528 = arith.constant dense<0.000000e+00> : vector<128x128xf32>
    %1437 = tpu.matmul %1435, %1436, %cst_528 {dimension_numbers = #tpu.dot_dimension_numbers<[1], [0], [0], [1], [0, 0, 1, 1], [], []>} : vector<128x128xbf16>, vector<128x128xbf16>, vector<128x128xf32> -> vector<128x128xf32>
    %c0_529 = arith.constant 0 : index
    %c0_530 = arith.constant 0 : index
    %1438 = vector.load %arg7[%c0_529, %c0_530] : memref<1x128xf32, #tpu.memory_space<vmem>>, vector<1x128xf32>
    %1439 = vector.broadcast %1438 : vector<1x128xf32> to vector<128x128xf32>
    %1440 = arith.addf %1437, %1439 : vector<128x128xf32>
    %1441 = vector.extract_strided_slice %1440 {offsets = [0, 0], sizes = [8, 128], strides = [1, 1]} : vector<128x128xf32> to vector<8x128xf32>
    %c0_531 = arith.constant 0 : index
    %c0_532 = arith.constant 0 : index
    %1442 = vector.load %arg8[%c0_531, %c0_532] : memref<8x2048xf32, #tpu.memory_space<vmem>>, vector<8x128xf32>
    tpu.vector_store %arg8[%c0_531, %c0_532], %1441 {strides = array<i32>} : memref<8x2048xf32, #tpu.memory_space<vmem>>, vector<8x128xf32>,
    %1443 = vector.extract_strided_slice %1440 {offsets = [8, 0], sizes = [8, 128], strides = [1, 1]} : vector<128x128xf32> to vector<8x128xf32>
    %c0_533 = arith.constant 0 : index
    %c128 = arith.constant 128 : index
    %1444 = vector.load %arg8[%c0_533, %c128] : memref<8x2048xf32, #tpu.memory_space<vmem>>, vector<8x128xf32>
    tpu.vector_store %arg8[%c0_533, %c128], %1443 {strides = array<i32>} : memref<8x2048xf32, #tpu.memory_space<vmem>>, vector<8x128xf32>,
    %1445 = vector.extract_strided_slice %1440 {offsets = [16, 0], sizes = [8, 128], strides = [1, 1]} : vector<128x128xf32> to vector<8x128xf32>
    %c0_534 = arith.constant 0 : index
    %c256 = arith.constant 256 : index
    %1446 = vector.load %arg8[%c0_534, %c256] : memref<8x2048xf32, #tpu.memory_space<vmem>>, vector<8x128xf32>
    tpu.vector_store %arg8[%c0_534, %c256], %1445 {strides = array<i32>} : memref<8x2048xf32, #tpu.memory_space<vmem>>, vector<8x128xf32>,
    %1447 = vector.extract_strided_slice %1440 {offsets = [24, 0], sizes = [8, 128], strides = [1, 1]} : vector<128x128xf32> to vector<8x128xf32>
    %c0_535 = arith.constant 0 : index
    %c384 = arith.constant 384 : index
    %1448 = vector.load %arg8[%c0_535, %c384] : memref<8x2048xf32, #tpu.memory_space<vmem>>, vector<8x128xf32>
    tpu.vector_store %arg8[%c0_535, %c384], %1447 {strides = array<i32>} : memref<8x2048xf32, #tpu.memory_space<vmem>>, vector<8x128xf32>,
    %1449 = vector.extract_strided_slice %1440 {offsets = [32, 0], sizes = [8, 128], strides = [1, 1]} : vector<128x128xf32> to vector<8x128xf32>
    %c0_536 = arith.constant 0 : index
    %c512 = arith.constant 512 : index
    %1450 = vector.load %arg8[%c0_536, %c512] : memref<8x2048xf32, #tpu.memory_space<vmem>>, vector<8x128xf32>
    tpu.vector_store %arg8[%c0_536, %c512], %1449 {strides = array<i32>} : memref<8x2048xf32, #tpu.memory_space<vmem>>, vector<8x128xf32>,
    %1451 = vector.extract_strided_slice %1440 {offsets = [40, 0], sizes = [8, 128], strides = [1, 1]} : vector<128x128xf32> to vector<8x128xf32>
    %c0_537 = arith.constant 0 : index
    %c640 = arith.constant 640 : index
    %1452 = vector.load %arg8[%c0_537, %c640] : memref<8x2048xf32, #tpu.memory_space<vmem>>, vector<8x128xf32>
    tpu.vector_store %arg8[%c0_537, %c640], %1451 {strides = array<i32>} : memref<8x2048xf32, #tpu.memory_space<vmem>>, vector<8x128xf32>,
    %1453 = vector.extract_strided_slice %1440 {offsets = [48, 0], sizes = [8, 128], strides = [1, 1]} : vector<128x128xf32> to vector<8x128xf32>
    %c0_538 = arith.constant 0 : index
    %c768 = arith.constant 768 : index
    %1454 = vector.load %arg8[%c0_538, %c768] : memref<8x2048xf32, #tpu.memory_space<vmem>>, vector<8x128xf32>
    tpu.vector_store %arg8[%c0_538, %c768], %1453 {strides = array<i32>} : memref<8x2048xf32, #tpu.memory_space<vmem>>, vector<8x128xf32>,
    %1455 = vector.extract_strided_slice %1440 {offsets = [56, 0], sizes = [8, 128], strides = [1, 1]} : vector<128x128xf32> to vector<8x128xf32>
    %c0_539 = arith.constant 0 : index
    %c896 = arith.constant 896 : index
    %1456 = vector.load %arg8[%c0_539, %c896] : memref<8x2048xf32, #tpu.memory_space<vmem>>, vector<8x128xf32>
    tpu.vector_store %arg8[%c0_539, %c896], %1455 {strides = array<i32>} : memref<8x2048xf32, #tpu.memory_space<vmem>>, vector<8x128xf32>,
    %1457 = vector.extract_strided_slice %1440 {offsets = [64, 0], sizes = [8, 128], strides = [1, 1]} : vector<128x128xf32> to vector<8x128xf32>
    %c0_540 = arith.constant 0 : index
    %c1024 = arith.constant 1024 : index
    %1458 = vector.load %arg8[%c0_540, %c1024] : memref<8x2048xf32, #tpu.memory_space<vmem>>, vector<8x128xf32>
    tpu.vector_store %arg8[%c0_540, %c1024], %1457 {strides = array<i32>} : memref<8x2048xf32, #tpu.memory_space<vmem>>, vector<8x128xf32>,
    %1459 = vector.extract_strided_slice %1440 {offsets = [72, 0], sizes = [8, 128], strides = [1, 1]} : vector<128x128xf32> to vector<8x128xf32>
    %c0_541 = arith.constant 0 : index
    %c1152 = arith.constant 1152 : index
    %1460 = vector.load %arg8[%c0_541, %c1152] : memref<8x2048xf32, #tpu.memory_space<vmem>>, vector<8x128xf32>
    tpu.vector_store %arg8[%c0_541, %c1152], %1459 {strides = array<i32>} : memref<8x2048xf32, #tpu.memory_space<vmem>>, vector<8x128xf32>,
    %1461 = vector.extract_strided_slice %1440 {offsets = [80, 0], sizes = [8, 128], strides = [1, 1]} : vector<128x128xf32> to vector<8x128xf32>
    %c0_542 = arith.constant 0 : index
    %c1280 = arith.constant 1280 : index
    %1462 = vector.load %arg8[%c0_542, %c1280] : memref<8x2048xf32, #tpu.memory_space<vmem>>, vector<8x128xf32>
    tpu.vector_store %arg8[%c0_542, %c1280], %1461 {strides = array<i32>} : memref<8x2048xf32, #tpu.memory_space<vmem>>, vector<8x128xf32>,
    %1463 = vector.extract_strided_slice %1440 {offsets = [88, 0], sizes = [8, 128], strides = [1, 1]} : vector<128x128xf32> to vector<8x128xf32>
    %c0_543 = arith.constant 0 : index
    %c1408 = arith.constant 1408 : index
    %1464 = vector.load %arg8[%c0_543, %c1408] : memref<8x2048xf32, #tpu.memory_space<vmem>>, vector<8x128xf32>
    tpu.vector_store %arg8[%c0_543, %c1408], %1463 {strides = array<i32>} : memref<8x2048xf32, #tpu.memory_space<vmem>>, vector<8x128xf32>,
    %1465 = vector.extract_strided_slice %1440 {offsets = [96, 0], sizes = [8, 128], strides = [1, 1]} : vector<128x128xf32> to vector<8x128xf32>
    %c0_544 = arith.constant 0 : index
    %c1536 = arith.constant 1536 : index
    %1466 = vector.load %arg8[%c0_544, %c1536] : memref<8x2048xf32, #tpu.memory_space<vmem>>, vector<8x128xf32>
    tpu.vector_store %arg8[%c0_544, %c1536], %1465 {strides = array<i32>} : memref<8x2048xf32, #tpu.memory_space<vmem>>, vector<8x128xf32>,
    %1467 = vector.extract_strided_slice %1440 {offsets = [104, 0], sizes = [8, 128], strides = [1, 1]} : vector<128x128xf32> to vector<8x128xf32>
    %c0_545 = arith.constant 0 : index
    %c1664 = arith.constant 1664 : index
    %1468 = vector.load %arg8[%c0_545, %c1664] : memref<8x2048xf32, #tpu.memory_space<vmem>>, vector<8x128xf32>
    tpu.vector_store %arg8[%c0_545, %c1664], %1467 {strides = array<i32>} : memref<8x2048xf32, #tpu.memory_space<vmem>>, vector<8x128xf32>,
    %1469 = vector.extract_strided_slice %1440 {offsets = [112, 0], sizes = [8, 128], strides = [1, 1]} : vector<128x128xf32> to vector<8x128xf32>
    %c0_546 = arith.constant 0 : index
    %c1792 = arith.constant 1792 : index
    %1470 = vector.load %arg8[%c0_546, %c1792] : memref<8x2048xf32, #tpu.memory_space<vmem>>, vector<8x128xf32>
    tpu.vector_store %arg8[%c0_546, %c1792], %1469 {strides = array<i32>} : memref<8x2048xf32, #tpu.memory_space<vmem>>, vector<8x128xf32>,
    %1471 = vector.extract_strided_slice %1440 {offsets = [120, 0], sizes = [8, 128], strides = [1, 1]} : vector<128x128xf32> to vector<8x128xf32>
    %c0_547 = arith.constant 0 : index
    %c1920 = arith.constant 1920 : index
    %1472 = vector.load %arg8[%c0_547, %c1920] : memref<8x2048xf32, #tpu.memory_space<vmem>>, vector<8x128xf32>
    tpu.vector_store %arg8[%c0_547, %c1920], %1471 {strides = array<i32>} : memref<8x2048xf32, #tpu.memory_space<vmem>>, vector<8x128xf32>,
    return
  }
  func.func @transform_0(%arg0: i32, %arg1: i32, %arg2: memref<512xi32, #tpu.memory_space<smem>>) -> (i32, i32, i32) {
    %c0_i32 = arith.constant 0 : i32
    %c0_i32_0 = arith.constant 0 : i32
    %c0_i32_1 = arith.constant 0 : i32
    %c0_i32_2 = arith.constant 0 : i32
    return %c0_i32, %c0_i32_0, %c0_i32_1 : i32, i32, i32
  }
  func.func @transform_1(%arg0: i32, %arg1: i32, %arg2: memref<512xi32, #tpu.memory_space<smem>>) -> (i32, i32) {
    %c0_i32 = arith.constant 0 : i32
    %c0_i32_0 = arith.constant 0 : i32
    %c0_i32_1 = arith.constant 0 : i32
    return %c0_i32, %c0_i32_0 : i32, i32
  }
  func.func @transform_2(%arg0: i32, %arg1: i32, %arg2: memref<512xi32, #tpu.memory_space<smem>>) -> (i32, i32) {
    %c0_i32 = arith.constant 0 : i32
    %c0_i32_0 = arith.constant 0 : i32
    %c0_i32_1 = arith.constant 0 : i32
    return %c0_i32, %c0_i32_0 : i32, i32
  }
  func.func @transform_3(%arg0: i32, %arg1: i32, %arg2: memref<512xi32, #tpu.memory_space<smem>>) -> (i32, i32) {
    %c0_i32 = arith.constant 0 : i32
    %c0_i32_0 = arith.constant 0 : i32
    %c0_i32_1 = arith.constant 0 : i32
    return %c0_i32, %c0_i32_0 : i32, i32
  }
  func.func @transform_4(%arg0: i32, %arg1: i32, %arg2: memref<512xi32, #tpu.memory_space<smem>>) -> (i32, i32) {
    %c0_i32 = arith.constant 0 : i32
    %c0_i32_0 = arith.constant 0 : i32
    %c0_i32_1 = arith.constant 0 : i32
    return %c0_i32, %c0_i32_0 : i32, i32
  }
  func.func @transform_5(%arg0: i32, %arg1: i32, %arg2: memref<512xi32, #tpu.memory_space<smem>>) -> (i32, i32) {
    %c0_i32 = arith.constant 0 : i32
    return %arg0, %arg1 : i32, i32
  }
}

</mosaic_0001>

<bundles_post_ra>
// kernel: simple_text_encoder.1
= control target key start
LH: loop header
LB: loop body
LE: loop exit
PB: predicated region body
PF: predicated region fallthrough
CT: control target
= control target key end

     0   :  { %s3942_s24 = smov [#allocation6]   ;;  %s5870_s0 = inlined_call_operand.vmem [shape: s32[512], index: 0, kind: input, shape index: {}]   ;;  %s5871_s1 = inlined_call_operand.vmem [shape: f32[64,1,384], index: 1, kind: input, shape index: {}]   ;;  %s5872_s2 = inlined_call_operand.vmem [shape: bf16[128,384], index: 2, kind: input, shape index: {}]   ;;  %s5873_s3 = inlined_call_operand.vmem [shape: f32[1,128], index: 3, kind: input, shape index: {}]   ;;  %s5874_s4 = inlined_call_operand.vmem [shape: bf16[128,128], index: 4, kind: input, shape index: {}]   ;;  %s5875_s5 = inlined_call_operand.vmem [shape: f32[1,128], index: 5, kind: input, shape index: {}]   ;;  %s5876_s6 = inlined_call_operand.vmem [shape: f32[16,4096], index: 6, kind: output, shape index: {}]  }
   0x1   :  { %5880 = sst [smem:[#allocation13_spill]] %s5872_s2  ;;  %s12_s23 = sshll.u32 %s5870_s0, 4  ;;  %s13_s23 = int_to_ptr.vmem [resolvable:$true] %s12_s23 }
   0x2   :  { %5881 = sst [smem:[#allocation14_spill]] %s5875_s5 }
   0x3   :  { %5882 = sst [smem:[#allocation15_spill]] %s5876_s6 }
   0x4   :  { %15 = dma.vmem_to_smem %s13_s23, 64, %s3942_s24, [#allocation5] }
   0x5   :  { %3920 = dma.done.wait [#allocation5], 64 }
   0x6   :  { %3921 = vsyncadd [#allocation5], 4294967232 }
   0x7   :  { %18 = sfence }
   0x8   :  { %s3982_s25 = smov 0   ;;  %s3984_s26 = smov 0  }
   0x9   :  { %s3986_s27 = smov 0   ;;  %s3988_s28 = smov 0  }
   0xa   :  { %s3990_s29 = smov 0  }
   0xb LB: > { %5883 = sst [smem:[#allocation8_spill]] %s3932_s27  ;;  %s33_s0 = sadd.s32 1, %s3932_s27  ;;  %s3940_s29 = sphi %s3990_s29, %s24_s29   ;;  %s3936_s28 = sphi %s3988_s28, %s5899_s28   ;;  %s3932_s27 = sphi %s3986_s27, %s5898_s27   ;;  %s3928_s26 = sphi %s3984_s26, %s5897_s26   ;;  %s3924_s25 = sphi %s3982_s25, %s5896_s25  }
   0xc   : > { %5884 = sst [smem:[#allocation9_spill]] %s3936_s28  ;;  %s36_s30 = sadd.s32 1, %s3936_s28 }
   0xd   : > { %5885 = sst [smem:[#allocation10_spill]] %s3940_s29  ;;  %p34_p0 = scmp.ge.s32.totalorder %s33_s0, 2 }
   0xe   : > { %p3439_p1 = scmp.ge.s32.totalorder %s3940_s29, 1  ;;  %p200_p2 = scmp.lt.s32.totalorder %s3940_s29, 5 }
   0xf   : > { %s5901_s0 = smov (%p34_p0, %s33_s0), 0  ;;  %s5903_s30 = smov (!%p34_p0, %s36_s30), %s3936_s28 }
  0x10   : > { %5886 = sst [smem:[#allocation11_spill]] %s5901_s0  ;;  %p201_p3 = pnand %p3439_p1, %p200_p2 }
  0x11   : > { %p38_p4 = scmp.ge.s32.totalorder %s5903_s30, 2  ;;  %s4014_s7 = sshll.u32 (!%p201_p3), %s3924_s25, 4 }
  0x12   : > { %204 = sbr.rel (%p201_p3) target bundleno = 3056 (0xbf0), region = 40  ;;  %p228_p5 = scmp.lt.s32.totalorder (!%p201_p3), %s3928_s26, 1 }
  0x13   : > { %s5905_s30 = smov (%p38_p4, %s5903_s30), 0  ;;  %p230_p6 = scmp.lt.s32.totalorder (!%p201_p3), %s4014_s7, 31 }
  0x14   : > { %5887 = sst [smem:[#allocation12_spill]] %s5905_s30  ;;  %p3443_p7 = scmp.ne.s32.totalorder (!%p201_p3), %s3924_s25, 0 }
  0x15   : > { %s5888_s6 = sld [smem:[#allocation15_spill]] (!%p201_p3) }
  0x17   : > { %s229_s8 = scalar_select %p228_p5, %s3928_s26, 1 }
  0x18   : > { %s231_s9 = scalar_select %p230_p6, %s4014_s7, 31 }
  0x19   : > { %s3441_s10 = sshll.u32 %s229_s8, 5  ;;  %240 = sbr.rel (%p3443_p7) target bundleno = 32 (0x20), region = 44 }
  0x1a   : > { %s233_s11 = sadd.s32 %s3441_s10, %s231_s9 }
  0x1b   : > { %s3442_s12 = sshll.u32 %s233_s11, 3 }
  0x1c   : > { %s4023_s15 = scalar_lea.vmem %s5888_s6, %s3442_s12 }
  0x1e   : > { %v3943_v0 = vmov 0.0  }
  0x1f   : > { %241 = vst [vmem:[#allocation2] sm:$0xff] %v3943_v0 }
  0x20 PF: > { %s5889_s2 = sld [smem:[#allocation13_spill]]  ;;  %s3444_s9 = sshll.u32 %s3928_s26, 5  ;;  %v250_v57 = vlaneseq }
  0x21   : > { %s244_s10 = sadd.s32 %s3444_s9, %s4014_s7 }
  0x22   : > { %s4106_s18 = sshll.u32 %s244_s10, 3  ;;  %vm4262_vm0 = vcmp.lt.s32.totalorder %v250_v57, 384 }
  0x23   : > { %s256_s19 = sadd.s32 1, %s4106_s18  ;;  %s264_s24 = sadd.s32 2, %s4106_s18 }
  0x24   : > { %s4129_s11 = sld [smem:[#allocation6 + %s4106_s18]]  ;;  %s272_s12 = sadd.s32 3, %s4106_s18 }
  0x25   : > { %s4134_s13 = sld [smem:[#allocation6 + %s256_s19]]  ;;  %s280_s14 = sadd.s32 4, %s4106_s18 }
  0x26   : > { %v3533_v1 = vld [vmem:[%s5889_s2 + $0xa8] sm:$0xf]  ;;  %v3663_v2 = vld [vmem:[%s5889_s2 + $0xb0] sm:$0xf0]  ;;  %v3521_v3 = vld [vmem:[%s5889_s2 + $0x90] sm:$0xf] }
  0x27   : > { %v4034_v4 = vor.u32 %v3663_v2, %v3533_v1  ;;  %v3660_v5 = vld [vmem:[%s5889_s2 + $0x98] sm:$0xf0]  ;;  %v3509_v7 = vld [vmem:[%s5889_s2 + $0x78] sm:$0xf]  ;;  %v3657_v8 = vld [vmem:[%s5889_s2 + $0x80] sm:$0xf0] }
  0x28   : > { %v4040_v6 = vor.u32 %v3660_v5, %v3521_v3  ;;  %v3541_v9 = vld [vmem:[%s5889_s2 + $0xb0] sm:$0xf]  ;;  %v3664_v10 = vld [vmem:[%s5889_s2 + $0xb8] sm:$0xf0]  ;;  %v3529_v12 = vld [vmem:[%s5889_s2 + $0x98] sm:$0xf]  ;;  %v4065_v14 = vor.u32 %v3657_v8, %v3509_v7 }
  0x29   : > { %1438 = vmatpush.bf16.msra.mxu1 %v4034_v4  ;;  %1533 = vmatpush.bf16.msra.mxu3 %v4034_v4  ;;  %v4056_v11 = vor.u32 %v3664_v10, %v3541_v9  ;;  %v3661_v13 = vld [vmem:[%s5889_s2 + $0xa0] sm:$0xf0]  ;;  %v3497_v15 = vld [vmem:[%s5889_s2 + $0x60] sm:$0xf]  ;;  %v3654_v16 = vld [vmem:[%s5889_s2 + $0x68] sm:$0xf0] }
  0x2a   : > { %1809 = vmatpush.bf16.msra.mxu0 %v4034_v4  ;;  %v4074_v17 = vor.u32 %v3661_v13, %v3529_v12  ;;  %v3517_v18 = vld [vmem:[%s5889_s2 + $0x80] sm:$0xf]  ;;  %v3658_v19 = vld [vmem:[%s5889_s2 + $0x88] sm:$0xf0]  ;;  %v4087_v20 = vor.u32 %v3654_v16, %v3497_v15  ;;  %v3485_v21 = vld [vmem:[%s5889_s2 + $0x48] sm:$0xf] }
  0x2b   : > { %1464 = vmatpush.bf16.msra.mxu2 %v4056_v11  ;;  %v4093_v22 = vor.u32 %v3658_v19, %v3517_v18  ;;  %v3651_v23 = vld [vmem:[%s5889_s2 + $0x50] sm:$0xf0]  ;;  %v3505_v24 = vld [vmem:[%s5889_s2 + $0x68] sm:$0xf]  ;;  %v3473_v27 = vld [vmem:[%s5889_s2 + $0x30] sm:$0xf] }
  0x2c   : > { %v3655_v25 = vld [vmem:[%s5889_s2 + $0x70] sm:$0xf0]  ;;  %v4110_v26 = vor.u32 %v3651_v23, %v3485_v21  ;;  %v3648_v28 = vld [vmem:[%s5889_s2 + $0x38] sm:$0xf0]  ;;  %v3493_v30 = vld [vmem:[%s5889_s2 + $0x50] sm:$0xf] }
  0x2d   : > { %1439 = vmatpush.bf16.msra.mxu1 %v4040_v6  ;;  %1534 = vmatpush.bf16.msra.mxu3 %v4040_v6  ;;  %v4119_v29 = vor.u32 %v3655_v25, %v3505_v24  ;;  %v3652_v31 = vld [vmem:[%s5889_s2 + $0x58] sm:$0xf0]  ;;  %s4137_s26 = sld [smem:[#allocation6 + %s264_s24]]  ;;  %s288_s16 = sadd.s32 5, %s4106_s18  ;;  %v4141_v32 = vor.u32 %v3648_v28, %v3473_v27  ;;  %v3461_v33 = vld [vmem:[%s5889_s2 + $0x18] sm:$0xf] }
  0x2e   : > { %1810 = vmatpush.bf16.msra.mxu0 %v4040_v6  ;;  %v3645_v34 = vld [vmem:[%s5889_s2 + $0x20] sm:$0xf0]  ;;  %v4150_v35 = vor.u32 %v3652_v31, %v3493_v30  ;;  %s4152_s19 = sld [smem:[#allocation6 + %s272_s12]]  ;;  %s296_s22 = sadd.s32 6, %s4106_s18  ;;  %v3481_v36 = vld [vmem:[%s5889_s2 + $0x38] sm:$0xf] }
  0x2f   : > { %1465 = vmatpush.bf16.msra.mxu2 %v4074_v17  ;;  %v3649_v37 = vld [vmem:[%s5889_s2 + $0x40] sm:$0xf0]  ;;  %s4161_s9 = sld [smem:[#allocation6 + %s280_s14]]  ;;  %v4170_v38 = vor.u32 %v3645_v34, %v3461_v33  ;;  %v3449_v39 = vld [vmem:[%s5889_s2] sm:$0xf]  ;;  %s247_s24 = smul.u32 3, %s4129_s11 }
  0x30   : > { %s4165_s10 = sld [smem:[#allocation6 + %s288_s16]]  ;;  %v3642_v40 = vld [vmem:[%s5889_s2 + $0x8] sm:$0xf0]  ;;  %v4179_v41 = vor.u32 %v3649_v37, %v3481_v36  ;;  %v3469_v42 = vld [vmem:[%s5889_s2 + $0x20] sm:$0xf]  ;;  %s304_s25 = sadd.s32 7, %s4106_s18 }
  0x31   : > { %1440 = vmatpush.bf16.msra.mxu1 %v4065_v14  ;;  %1535 = vmatpush.bf16.msra.mxu3 %v4065_v14  ;;  %s4167_s12 = sld [smem:[#allocation6 + %s296_s22]]  ;;  %v3646_v43 = vld [vmem:[%s5889_s2 + $0x28] sm:$0xf0]  ;;  %v3535_v45 = vld [vmem:[%s5889_s2 + $0xb4] sm:$0xf0]  ;;  %s258_s20 = smul.u32 3, %s4134_s13  ;;  %v4200_v46 = vor.u32 %v3642_v40, %v3449_v39 }
  0x32   : > { %1811 = vmatpush.bf16.msra.mxu0 %v4065_v14  ;;  %v3662_v44 = vld [vmem:[%s5889_s2 + $0xac] sm:$0xf]  ;;  %v4202_v47 = vld [vmem:[#allocation2] sm:$0xff]  ;;  %v4205_v48 = vor.u32 %v3646_v43, %v3469_v42  ;;  %s4208_s21 = sld [smem:[#allocation6 + %s304_s25]]  ;;  %v3457_v50 = vld [vmem:[%s5889_s2 + $0x8] sm:$0xf]  ;;  %s248_s17 = scalar_lea.vmem %s5871_s1, %s247_s24 }
  0x33   : > { %1466 = vmatpush.bf16.msra.mxu2 %v4093_v22  ;;  %s266_s16 = smul.u32 3, %s4137_s26  ;;  %v4210_v49 = vor.u32 %v3662_v44, %v3535_v45  ;;  %v3643_v51 = vld [vmem:[%s5889_s2 + $0x10] sm:$0xf0]  ;;  %v3523_v53 = vld [vmem:[%s5889_s2 + $0x9c] sm:$0xf0]  ;;  %s259_s23 = scalar_lea.vmem %s5871_s1, %s258_s20  ;;  %v4236_v54 = vpack.c.bf16 %v4202_v47, %v4202_v47 }
  0x34   : > { %s274_s11 = smul.u32 3, %s4152_s19  ;;  %v3659_v52 = vld [vmem:[%s5889_s2 + $0x94] sm:$0xf]  ;;  %v4244_v55 = vor.u32 %v3643_v51, %v3457_v50  ;;  %v249_v56 = vld [vmem:[%s248_s17] sm:$0x7]  ;;  %s312_s19 = sadd.s32 8, %s4106_s18 }
  0x35   : > { %1441 = vmatpush.bf16.msra.mxu1 %v4087_v20  ;;  %1536 = vmatpush.bf16.msra.mxu3 %v4087_v20  ;;  %s282_s14 = smul.u32 3, %s4161_s9  ;;  %s267_s8 = scalar_lea.vmem %s5871_s1, %s266_s16  ;;  %v4250_v58 = vor.u32 %v3659_v52, %v3523_v53  ;;  %v3656_v59 = vld [vmem:[%s5889_s2 + $0x7c] sm:$0xf]  ;;  %v260_v60 = vld [vmem:[%s259_s23] sm:$0x7] }
  0x36   : > { %1812 = vmatpush.bf16.msra.mxu0 %v4087_v20  ;;  %s290_s30 = smul.u32 3, %s4165_s10  ;;  %s275_s20 = scalar_lea.vmem %s5871_s1, %s274_s11  ;;  %v3511_v61 = vld [vmem:[%s5889_s2 + $0x84] sm:$0xf0]  ;;  %v268_v63 = vld [vmem:[%s267_s8] sm:$0x7] }
  0x37   : > { %1467 = vmatpush.bf16.msra.mxu2 %v4119_v29  ;;  %s298_s7 = smul.u32 3, %s4167_s12  ;;  %s283_s22 = scalar_lea.vmem %s5871_s1, %s282_s14  ;;  %254 = vst.msk [vmem:[#allocation3] ss:$8 sm:$0x7] %vm4262_vm0, %v249_v56  ;;  %v276_v0 = vld [vmem:[%s275_s20] sm:$0x7]  ;;  %v4292_v5 = vor.u32 %v3656_v59, %v3511_v61 }
  0x38   : > { %s291_s9 = scalar_lea.vmem %s5871_s1, %s290_s30  ;;  %s306_s23 = smul.u32 3, %s4208_s21  ;;  %v3653_v1 = vld [vmem:[%s5889_s2 + $0x64] sm:$0xf]  ;;  %v3499_v2 = vld [vmem:[%s5889_s2 + $0x6c] sm:$0xf0] }
  0x39   : > { %1442 = vmatpush.bf16.msra.mxu1 %v4110_v26  ;;  %1537 = vmatpush.bf16.msra.mxu3 %v4110_v26  ;;  %s299_s6 = scalar_lea.vmem %s5871_s1, %s298_s7  ;;  %262 = vst.msk [vmem:[#allocation3 + $0x1] ss:$8 sm:$0x7] %vm4262_vm0, %v260_v60  ;;  %v284_v3 = vld [vmem:[%s283_s22] sm:$0x7]  ;;  %v4307_v10 = vor.u32 %v3653_v1, %v3499_v2  ;;  %s328_s16 = sadd.s32 10, %s4106_s18 }
  0x3a   : > { %1813 = vmatpush.bf16.msra.mxu0 %v4110_v26  ;;  %s307_s7 = scalar_lea.vmem %s5871_s1, %s306_s23  ;;  %270 = vst.msk [vmem:[#allocation3 + $0x2] ss:$8 sm:$0x7] %vm4262_vm0, %v268_v63  ;;  %v292_v7 = vld [vmem:[%s291_s9] sm:$0x7]  ;;  %s313_s12 = sld [smem:[#allocation6 + %s312_s19]] }
  0x3b   : > { %1468 = vmatpush.bf16.msra.mxu2 %v4150_v35  ;;  %278 = vst.msk [vmem:[#allocation3 + $0x3] ss:$8 sm:$0x7] %vm4262_vm0, %v276_v0  ;;  %v300_v8 = vld [vmem:[%s299_s6] sm:$0x7]  ;;  %s336_s25 = sadd.s32 11, %s4106_s18 }
  0x3c   : > { %286 = vst.msk [vmem:[#allocation3 + $0x4] ss:$8 sm:$0x7] %vm4262_vm0, %v284_v3  ;;  %v308_v9 = vld [vmem:[%s307_s7] sm:$0x7]  ;;  %s320_s7 = sadd.s32 9, %s4106_s18 }
  0x3d   : > { %1443 = vmatpush.bf16.msra.mxu1 %v4141_v32  ;;  %1538 = vmatpush.bf16.msra.mxu3 %v4141_v32  ;;  %294 = vst.msk [vmem:[#allocation3 + $0x5] ss:$8 sm:$0x7] %vm4262_vm0, %v292_v7  ;;  %v3650_v12 = vld [vmem:[%s5889_s2 + $0x4c] sm:$0xf]  ;;  %s321_s22 = sld [smem:[#allocation6 + %s320_s7]] }
  0x3e   : > { %1814 = vmatpush.bf16.msra.mxu0 %v4141_v32  ;;  %302 = vst.msk [vmem:[#allocation3 + $0x6] ss:$8 sm:$0x7] %vm4262_vm0, %v300_v8  ;;  %v3487_v13 = vld [vmem:[%s5889_s2 + $0x54] sm:$0xf0]  ;;  %s344_s17 = sadd.s32 12, %s4106_s18 }
  0x3f   : > { %1469 = vmatpush.bf16.msra.mxu2 %v4179_v41  ;;  %310 = vst.msk [vmem:[#allocation3 + $0x7] ss:$8 sm:$0x7] %vm4262_vm0, %v308_v9  ;;  %v4323_v15 = vor.u32 %v3650_v12, %v3487_v13  ;;  %v3647_v16 = vld [vmem:[%s5889_s2 + $0x34] sm:$0xf]  ;;  %s329_s13 = sld [smem:[#allocation6 + %s328_s16]] }
  0x40   : > { %v3475_v18 = vld [vmem:[%s5889_s2 + $0x3c] sm:$0xf0]  ;;  %v3644_v21 = vld [vmem:[%s5889_s2 + $0x1c] sm:$0xf]  ;;  %v3463_v23 = vld [vmem:[%s5889_s2 + $0x24] sm:$0xf0] }
  0x41   : > { %1444 = vmatpush.bf16.msra.mxu1 %v4170_v38  ;;  %1539 = vmatpush.bf16.msra.mxu3 %v4170_v38  ;;  %v4335_v19 = vor.u32 %v3647_v16, %v3475_v18  ;;  %v4347_v24 = vor.u32 %v3644_v21, %v3463_v23  ;;  %v3641_v25 = vld [vmem:[%s5889_s2 + $0x4] sm:$0xf]  ;;  %v3451_v27 = vld [vmem:[%s5889_s2 + $0xc] sm:$0xf0]  ;;  %v4397_v61 = vld [vmem:[%s5873_s3] ss:$0 sm:$0xff] }
  0x42   : > { %1815 = vmatpush.bf16.msra.mxu0 %v4170_v38  ;;  %v4359_v28 = vor.u32 %v3641_v25, %v3451_v27  ;;  %s352_s11 = sadd.s32 13, %s4106_s18  ;;  %s337_s26 = sld [smem:[#allocation6 + %s336_s25]] }
  0x43   : > { %1470 = vmatpush.bf16.msra.mxu2 %v4205_v48  ;;  %s360_s9 = sadd.s32 14, %s4106_s18  ;;  %s345_s23 = sld [smem:[#allocation6 + %s344_s17]] }
  0x44   : > { %s368_s14 = sadd.s32 15, %s4106_s18  ;;  %s353_s24 = sld [smem:[#allocation6 + %s352_s11]] }
  0x45   : > { %1445 = vmatpush.bf16.msra.mxu1 %v4200_v46  ;;  %1540 = vmatpush.bf16.msra.mxu3 %v4200_v46  ;;  %s361_s6 = sld [smem:[#allocation6 + %s360_s9]]  ;;  %s314_s10 = smul.u32 3, %s313_s12 }
  0x46   : > { %1816 = vmatpush.bf16.msra.mxu0 %v4200_v46  ;;  %v1306_v30 = vld [vmem:[#allocation3] sm:$0xff]  ;;  %v1307_v45 = vld [vmem:[#allocation3 + $0x8] sm:$0xff]  ;;  %v1308_v9 = vld [vmem:[#allocation3 + $0x10] sm:$0xff]  ;;  %s369_s8 = sld [smem:[#allocation6 + %s368_s14]]  ;;  %s322_s30 = smul.u32 3, %s321_s22 }
  0x47   : > { %1471 = vmatpush.bf16.msra.mxu2 %v4244_v55  ;;  %s330_s21 = smul.u32 3, %s329_s13  ;;  %s315_s19 = scalar_lea.vmem %s5871_s1, %s314_s10 }
  0x48   : > { %1446 = vmatmul.bf16.vlgmr.msra.gmra.mxu1 %v4236_v54  ;;  %s338_s20 = smul.u32 3, %s337_s26  ;;  %s323_s16 = scalar_lea.vmem %s5871_s1, %s322_s30 }
  0x49   : > { %1451 = vmatpush.bf16.msrb.mxu1 %v4210_v49  ;;  %1638 = vmatpush.bf16.msrb.mxu3 %v4210_v49  ;;  %s346_s28 = smul.u32 3, %s345_s23  ;;  %s331_s11 = scalar_lea.vmem %s5871_s1, %s330_s21 }
  0x4a   : > { %1914 = vmatpush.bf16.msrb.mxu0 %v4210_v49  ;;  %1472 = vmatmul.bf16.vlgmr.msra.gmra.mxu2 %v4236_v54  ;;  %s354_s25 = smul.u32 3, %s353_s24  ;;  %s339_s22 = scalar_lea.vmem %s5871_s1, %s338_s20 }
  0x4b   : > { %1546 = vmatpush.bf16.msrb.mxu2 %v4210_v49  ;;  %s362_s9 = smul.u32 3, %s361_s6  ;;  %s347_s2 = scalar_lea.vmem %s5871_s1, %s346_s28 }
  0x4c   : > { %s370_s13 = smul.u32 3, %s369_s8  ;;  %s355_s23 = scalar_lea.vmem %s5871_s1, %s354_s25 }
  0x4d   : > { %1452 = vmatpush.bf16.msrb.mxu1 %v4250_v58  ;;  %1639 = vmatpush.bf16.msrb.mxu3 %v4250_v58  ;;  %s363_s6 = scalar_lea.vmem %s5871_s1, %s362_s9  ;;  %s376_s10 = sadd.s32 16, %s4106_s18 }
  0x4e   : > { %1915 = vmatpush.bf16.msrb.mxu0 %v4250_v58  ;;  %s371_s8 = scalar_lea.vmem %s5871_s1, %s370_s13  ;;  %s384_s30 = sadd.s32 17, %s4106_s18 }
  0x4f   : > { %1547 = vmatpush.bf16.msrb.mxu2 %v4250_v58  ;;  %s392_s21 = sadd.s32 18, %s4106_s18  ;;  %s4483_s20 = sld [smem:[#allocation6 + %s376_s10]] }
  0x50   : > { %s4486_s7 = sld [smem:[#allocation6 + %s384_s30]]  ;;  %s416_s17 = sadd.s32 21, %s4106_s18 }
  0x51   : > { %1453 = vmatpush.bf16.msrb.mxu1 %v4292_v5  ;;  %1640 = vmatpush.bf16.msrb.mxu3 %v4292_v5  ;;  %s4489_s25 = sld [smem:[#allocation6 + %s392_s21]]  ;;  %s424_s9 = sadd.s32 22, %s4106_s18 }
  0x52   : > { %1916 = vmatpush.bf16.msrb.mxu0 %v4292_v5  ;;  %s432_s12 = sadd.s32 23, %s4106_s18  ;;  %s4501_s13 = sld [smem:[#allocation6 + %s424_s9]] }
  0x53   : > { %1548 = vmatpush.bf16.msrb.mxu2 %v4292_v5  ;;  %s4503_s26 = sld [smem:[#allocation6 + %s432_s12]]  ;;  %s456_s28 = sadd.s32 26, %s4106_s18 }
  0x54   : > { %s472_s21 = sadd.s32 28, %s4106_s18  ;;  %s520_s29 = sadd.s32 34, %s4106_s18 }
  0x55   : > { %1454 = vmatpush.bf16.msrb.mxu1 %v4307_v10  ;;  %1641 = vmatpush.bf16.msrb.mxu3 %v4307_v10 }
  0x56   : > { %1917 = vmatpush.bf16.msrb.mxu0 %v4307_v10  ;;  %s386_s27 = smul.u32 3, %s4486_s7 }
  0x57   : > { %1549 = vmatpush.bf16.msrb.mxu2 %v4307_v10  ;;  %s394_s0 = smul.u32 3, %s4489_s25  ;;  %s4603_s25 = sld [smem:[#allocation6 + %s472_s21]] }
  0x58   : > { %s387_s10 = scalar_lea.vmem %s5871_s1, %s386_s27  ;;  %s426_s7 = smul.u32 3, %s4501_s13 }
  0x59   : > { %1455 = vmatpush.bf16.msrb.mxu1 %v4323_v15  ;;  %1642 = vmatpush.bf16.msrb.mxu3 %v4323_v15 }
  0x5a   : > { %1918 = vmatpush.bf16.msrb.mxu0 %v4323_v15 }
  0x5b   : > { %1550 = vmatpush.bf16.msrb.mxu2 %v4323_v15 }
  0x5d   : > { %1456 = vmatpush.bf16.msrb.mxu1 %v4335_v19  ;;  %1643 = vmatpush.bf16.msrb.mxu3 %v4335_v19 }
  0x5e   : > { %1919 = vmatpush.bf16.msrb.mxu0 %v4335_v19 }
  0x5f   : > { %1551 = vmatpush.bf16.msrb.mxu2 %v4335_v19 }
  0x61   : > { %1457 = vmatpush.bf16.msrb.mxu1 %v4347_v24  ;;  %1644 = vmatpush.bf16.msrb.mxu3 %v4347_v24 }
  0x62   : > { %1920 = vmatpush.bf16.msrb.mxu0 %v4347_v24 }
  0x63   : > { %1552 = vmatpush.bf16.msrb.mxu2 %v4347_v24 }
  0x65   : > { %1458 = vmatpush.bf16.msrb.mxu1 %v4359_v28  ;;  %1645 = vmatpush.bf16.msrb.mxu3 %v4359_v28 }
  0x66   : > { %1921 = vmatpush.bf16.msrb.mxu0 %v4359_v28 }
  0x67   : > { %1553 = vmatpush.bf16.msrb.mxu2 %v4359_v28 }
  0x68   : > { %1459 = vmatmul.bf16.vlgmr.msrb.gmra.mxu1 %v4236_v54 }
  0x69   : > { %1559 = vmatpush.bf16.msra.mxu1 %v4056_v11 }
  0x6b   : > { %1625 = vmatpush.bf16.msra.mxu2 %v4034_v4 }
  0x6d   : > { %1560 = vmatpush.bf16.msra.mxu1 %v4074_v17 }
  0x6f   : > { %1626 = vmatpush.bf16.msra.mxu2 %v4040_v6 }
  0x71   : > { %1561 = vmatpush.bf16.msra.mxu1 %v4093_v22 }
  0x73   : > { %1627 = vmatpush.bf16.msra.mxu2 %v4065_v14 }
  0x75   : > { %1562 = vmatpush.bf16.msra.mxu1 %v4119_v29 }
  0x77   : > { %1628 = vmatpush.bf16.msra.mxu2 %v4087_v20 }
  0x79   : > { %1563 = vmatpush.bf16.msra.mxu1 %v4150_v35 }
  0x7b   : > { %1629 = vmatpush.bf16.msra.mxu2 %v4110_v26 }
  0x7d   : > { %1564 = vmatpush.bf16.msra.mxu1 %v4179_v41 }
  0x7f   : > { %1630 = vmatpush.bf16.msra.mxu2 %v4141_v32 }
  0x81   : > { %1565 = vmatpush.bf16.msra.mxu1 %v4205_v48 }
  0x83   : > { %1631 = vmatpush.bf16.msra.mxu2 %v4170_v38 }
  0x85   : > { %1566 = vmatpush.bf16.msra.mxu1 %v4244_v55 }
  0x87   : > { %1632 = vmatpush.bf16.msra.mxu2 %v4200_v46 }
  0x89   : > { %1717 = vmatpush.bf16.msrb.mxu1 %v4034_v4 }
  0x8d   : > { %1718 = vmatpush.bf16.msrb.mxu1 %v4040_v6 }
  0x91   : > { %1719 = vmatpush.bf16.msrb.mxu1 %v4065_v14 }
  0x95   : > { %1720 = vmatpush.bf16.msrb.mxu1 %v4087_v20 }
  0x99   : > { %1721 = vmatpush.bf16.msrb.mxu1 %v4110_v26 }
  0x9d   : > { %1722 = vmatpush.bf16.msrb.mxu1 %v4141_v32 }
  0xa1   : > { %1723 = vmatpush.bf16.msrb.mxu1 %v4170_v38 }
  0xa5   : > { %1724 = vmatpush.bf16.msrb.mxu1 %v4200_v46 }
  0xc5   : > { %v1447_v31 = vpop.f32.mrf.mxu1 }
  0xc6   : > { %v1477_v33 = vadd.f32 %v1447_v31, %v1306_v30 }
  0xc8   : > { %v3543_v34 = vmul.f32 -1.442695, %v1477_v33 }
  0xca   : > { %3725 = vpow2.f32 %v3543_v34 }
  0xcd   : > { %v1449_v36 = vpop.f32.mrf.mxu1  ;;  %v1473_v37 = vpop.f32.mrf.mxu2 }
  0xce   : > { %v1520_v3 = vadd.f32 %v4397_v61, %v1473_v37 }
  0xd0   : > { %v3726_v39 = vpop.eup %3725 }
  0xd1   : > { %v1481_v40 = vadd.f32 1.0, %v3726_v39 }
  0xd3   : > { %3727 = vrcp.f32 %v1481_v40  ;;  %vm1487_vm1 = vweird.f32 %v1481_v40  ;;  %v1493_v56 = vand.u32 2147483648, %v1481_v40  ;;  %v1491_v59 = vand.u32 2147483647, %v1481_v40 }
  0xd5   : > { %v1475_v42 = vpop.f32.mrf.mxu2  ;;  %v1494_v0 = vor.u32 1.1754944e-38, %v1493_v56  ;;  %vm1492_vm4 = vcmp.eq.f32.partialorder %v1491_v59, 8.507059e+37 }
  0xd9   : > { %v3728_v43 = vpop.eup %3727 }
  0xda   : > { %v1483_v44 = vmul.f32 %v3728_v43, %v1481_v40  ;;  %vm1488_vm2 = vweird.f32 %v3728_v43 }
  0xdb   : > { %vm1489_vm3 = vmor %vm1487_vm1, %vm1488_vm2 }
  0xdc   : > { %v1484_v50 = vsub.f32 1.0, %v1483_v44  ;;  %v332_v44 = vld [vmem:[%s331_s11] sm:$0x7] }
  0xdd   : > { %334 = vst.msk [vmem:[#allocation3 + $0x1a] ss:$8 sm:$0x7] %vm4262_vm0, %v332_v44 }
  0xde   : > { %v1485_v54 = vmul.f32 %v3728_v43, %v1484_v50  ;;  %v348_v50 = vld [vmem:[%s347_s2] sm:$0x7]  ;;  %s378_s2 = smul.u32 3, %s4483_s20  ;;  %s457_s20 = sld [smem:[#allocation6 + %s456_s28]] }
  0xdf   : > { %350 = vst.msk [vmem:[#allocation3 + $0x1c] ss:$8 sm:$0x7] %vm4262_vm0, %v348_v50  ;;  %s536_s28 = sadd.s32 36, %s4106_s18 }
  0xe0   : > { %v1486_v57 = vadd.f32 %v3728_v43, %v1485_v54  ;;  %s4709_s21 = sld [smem:[#allocation6 + %s536_s28]]  ;;  %s616_s28 = sadd.s32 46, %s4106_s18 }
  0xe2   : > { %v1490_v1 = vsel %vm1489_vm3, %v3728_v43, %v1486_v57  ;;  %v324_v43 = vld [vmem:[%s323_s16] sm:$0x7]  ;;  %s408_s16 = sadd.s32 20, %s4106_s18 }
  0xe3   : > { %v1495_v7 = vsel %vm1492_vm4, %v1494_v0, %v1490_v1  ;;  %326 = vst.msk [vmem:[#allocation3 + $0x19] ss:$8 sm:$0x7] %vm4262_vm0, %v324_v43  ;;  %s4495_s14 = sld [smem:[#allocation6 + %s408_s16]]  ;;  %s488_s16 = sadd.s32 30, %s4106_s18 }
  0xe4   : > { %v1521_v8 = vmul.f32 %v1520_v3, %v1495_v7  ;;  %s4608_s9 = sld [smem:[#allocation6 + %s488_s16]]  ;;  %s458_s13 = smul.u32 3, %s457_s20 }
  0xe5   : > { %v1460_v51 = vpop.f32.mrf.mxu1  ;;  %s552_s20 = sadd.s32 38, %s4106_s18 }
  0xe6   : > { %v1497_v52 = vadd.f32 %v1460_v51, %v1307_v45  ;;  %v1522_v16 = vadd.f32 %v1521_v8, %v1308_v9  ;;  %v340_v45 = vld [vmem:[%s339_s22] sm:$0x7]  ;;  %s4498_s22 = sld [smem:[#allocation6 + %s416_s17]] }
  0xe7   : > { %v356_v51 = vld [vmem:[%s355_s23] sm:$0x7]  ;;  %342 = vst.msk [vmem:[#allocation3 + $0x1b] ss:$8 sm:$0x7] %vm4262_vm0, %v340_v45  ;;  %s4715_s16 = sld [smem:[#allocation6 + %s552_s20]] }
  0xe8   : > { %v3544_v53 = vmul.f32 -1.442695, %v1497_v52  ;;  %v364_v52 = vld [vmem:[%s363_s6] sm:$0x7]  ;;  %s379_s6 = scalar_lea.vmem %s5871_s1, %s378_s2  ;;  %s584_s2 = sadd.s32 42, %s4106_s18 }
  0xe9   : > { %358 = vst.msk [vmem:[#allocation3 + $0x1d] ss:$8 sm:$0x7] %vm4262_vm0, %v356_v51  ;;  %s410_s5 = smul.u32 3, %s4495_s14 }
  0xea   : > { %3729 = vpow2.f32 %v3544_v53  ;;  %v372_v53 = vld [vmem:[%s371_s8] sm:$0x7]  ;;  %366 = vst.msk [vmem:[#allocation3 + $0x1e] ss:$8 sm:$0x7] %vm4262_vm0, %v364_v52 }
  0xeb   : > { %374 = vst.msk [vmem:[#allocation3 + $0x1f] ss:$8 sm:$0x7] %vm4262_vm0, %v372_v53  ;;  %v380_v53 = vld [vmem:[%s379_s6] sm:$0x7]  ;;  %s411_s12 = scalar_lea.vmem %s5871_s1, %s410_s5  ;;  %s440_s6 = sadd.s32 24, %s4106_s18 }
  0xec   : > { %s418_s30 = smul.u32 3, %s4498_s22  ;;  %382 = vst.msk [vmem:[#allocation3 + $0x30] ss:$8 sm:$0x7] %vm4262_vm0, %v380_v53  ;;  %s448_s5 = sadd.s32 25, %s4106_s18 }
  0xed   : > { %v1462_v60 = vpop.f32.mrf.mxu1  ;;  %s441_s8 = sld [smem:[#allocation6 + %s440_s6]] }
  0xf0   : > { %v3730_v63 = vpop.eup %3729 }
  0xf1   : > { %v1501_v2 = vadd.f32 1.0, %v3730_v63 }
  0xf3   : > { %3731 = vrcp.f32 %v1501_v2  ;;  %v1513_v21 = vand.u32 2147483648, %v1501_v2  ;;  %v1511_v25 = vand.u32 2147483647, %v1501_v2  ;;  %vm1507_vm6 = vweird.f32 %v1501_v2 }
  0xf4   : > { %3733 = vtanh.f32 %v1522_v16 }
  0xf5   : > { %v1514_v30 = vor.u32 1.1754944e-38, %v1513_v21  ;;  %vm1512_vm8 = vcmp.eq.f32.partialorder %v1511_v25, 8.507059e+37 }
  0xf9   : > { %v3732_v12 = vpop.eup %3731 }
  0xfa   : > { %v1503_v13 = vmul.f32 %v3732_v12, %v1501_v2  ;;  %vm1508_vm5 = vweird.f32 %v3732_v12  ;;  %v3734_v36 = vpop.eup %3733 }
  0xfb   : > { %vm1509_vm7 = vmor %vm1507_vm6, %vm1508_vm5 }
  0xfc   : > { %v1504_v18 = vsub.f32 1.0, %v1503_v13 }
  0xfe   : > { %v1505_v23 = vmul.f32 %v3732_v12, %v1504_v18 }
 0x100   : > { %v1506_v27 = vadd.f32 %v3732_v12, %v1505_v23 }
 0x102   : > { %v1510_v31 = vsel %vm1509_vm7, %v3732_v12, %v1506_v27 }
 0x103   : > { %v1515_v33 = vsel %vm1512_vm8, %v1514_v30, %v1510_v31 }
 0x104   : > { %v1524_v34 = vsub.f32 1.0, %v1515_v33  ;;  %v1526_v39 = vmul.f32 %v1515_v33, %v4202_v47  ;;  %v316_v47 = vld [vmem:[%s315_s19] sm:$0x7]  ;;  %s400_s19 = sadd.s32 19, %s4106_s18 }
 0x105   : > { %318 = vst.msk [vmem:[#allocation3 + $0x18] ss:$8 sm:$0x7] %vm4262_vm0, %v316_v47  ;;  %s4492_s11 = sld [smem:[#allocation6 + %s400_s19]]  ;;  %s395_s19 = scalar_lea.vmem %s5871_s1, %s394_s0 }
 0x106   : > { %v1525_v37 = vmul.f32 %v3734_v36, %v1524_v34  ;;  %s427_s0 = scalar_lea.vmem %s5871_s1, %s426_s7 }
 0x108   : > { %v4401_v40 = vadd.f32 %v1526_v39, %v1525_v37 }
 0x10a   : > { %v1528_v42 = vpack.c.bf16 %v4401_v40, %v4401_v40 }
 0x10b   : > { %s402_s23 = smul.u32 3, %s4492_s11 }
 0x10c   : > { %1529 = vst [vmem:[#allocation4] sm:$0xf] %v1528_v42  ;;  %1541 = vmatmul.bf16.vlgmr.msra.gmra.mxu3 %v1528_v42  ;;  %1554 = vmatmul.bf16.vlgmr.msrb.gmra.mxu2 %v1528_v42  ;;  %v1530_v56 = vld [vmem:[#allocation3 + $0x18] sm:$0xff]  ;;  %v1531_v57 = vld [vmem:[#allocation3 + $0x20] sm:$0xff]  ;;  %v1532_v44 = vld [vmem:[#allocation3 + $0x28] sm:$0xff]  ;;  %s434_s11 = smul.u32 3, %s4503_s26  ;;  %s419_s26 = scalar_lea.vmem %s5871_s1, %s418_s30 }
 0x10d   : > { %1567 = vmatmul.bf16.vlgmr.msra.gmra.mxu1 %v1528_v42  ;;  %1651 = vmatpush.bf16.msra.mxu3 %v4056_v11  ;;  %s403_s17 = scalar_lea.vmem %s5871_s1, %s402_s23  ;;  %s4596_s30 = sld [smem:[#allocation6 + %s448_s5]] }
 0x10e   : > { %1730 = vmatpush.bf16.msrb.mxu2 %v4210_v49  ;;  %1822 = vmatpush.bf16.msra.mxu1 %v4210_v49  ;;  %s435_s24 = scalar_lea.vmem %s5871_s1, %s434_s11  ;;  %s474_s23 = smul.u32 3, %s4603_s25 }
 0x111   : > { %1652 = vmatpush.bf16.msra.mxu3 %v4074_v17 }
 0x112   : > { %1731 = vmatpush.bf16.msrb.mxu2 %v4250_v58  ;;  %1823 = vmatpush.bf16.msra.mxu1 %v4250_v58 }
 0x113   : > { %s450_s22 = smul.u32 3, %s4596_s30 }
 0x114   : > { %s490_s30 = smul.u32 3, %s4608_s9 }
 0x115   : > { %1653 = vmatpush.bf16.msra.mxu3 %v4093_v22  ;;  %s451_s6 = scalar_lea.vmem %s5871_s1, %s450_s22  ;;  %s538_s22 = smul.u32 3, %s4709_s21 }
 0x116   : > { %1732 = vmatpush.bf16.msrb.mxu2 %v4292_v5  ;;  %1824 = vmatpush.bf16.msra.mxu1 %v4292_v5  ;;  %s4817_s21 = sld [smem:[#allocation6 + %s616_s28]]  ;;  %s688_s28 = sadd.s32 55, %s4106_s18 }
 0x117   : > { %s539_s20 = scalar_lea.vmem %s5871_s1, %s538_s22  ;;  %s632_s22 = sadd.s32 48, %s4106_s18 }
 0x119   : > { %1654 = vmatpush.bf16.msra.mxu3 %v4119_v29 }
 0x11a   : > { %1733 = vmatpush.bf16.msrb.mxu2 %v4307_v10  ;;  %1825 = vmatpush.bf16.msra.mxu1 %v4307_v10 }
 0x11d   : > { %1655 = vmatpush.bf16.msra.mxu3 %v4150_v35 }
 0x11e   : > { %1734 = vmatpush.bf16.msrb.mxu2 %v4323_v15  ;;  %1826 = vmatpush.bf16.msra.mxu1 %v4323_v15 }
 0x121   : > { %1656 = vmatpush.bf16.msra.mxu3 %v4179_v41 }
 0x122   : > { %1735 = vmatpush.bf16.msrb.mxu2 %v4335_v19  ;;  %1827 = vmatpush.bf16.msra.mxu1 %v4335_v19 }
 0x125   : > { %1657 = vmatpush.bf16.msra.mxu3 %v4205_v48 }
 0x126   : > { %1736 = vmatpush.bf16.msrb.mxu2 %v4347_v24  ;;  %1828 = vmatpush.bf16.msra.mxu1 %v4347_v24 }
 0x129   : > { %1658 = vmatpush.bf16.msra.mxu3 %v4244_v55 }
 0x12a   : > { %1737 = vmatpush.bf16.msrb.mxu2 %v4359_v28  ;;  %1829 = vmatpush.bf16.msra.mxu1 %v4359_v28 }
 0x18a   : > { %v1568_v54 = vpop.f32.mrf.mxu1 }
 0x18b   : > { %v1612_v42 = vadd.f32 %v4397_v61, %v1568_v54  ;;  %v388_v54 = vld [vmem:[%s387_s10] sm:$0x7]  ;;  %s464_s10 = sadd.s32 27, %s4106_s18 }
 0x18c   : > { %390 = vst.msk [vmem:[#allocation3 + $0x31] ss:$8 sm:$0x7] %vm4262_vm0, %v388_v54  ;;  %s4600_s7 = sld [smem:[#allocation6 + %s464_s10]]  ;;  %s459_s10 = scalar_lea.vmem %s5871_s1, %s458_s13 }
 0x18d   : > { %s491_s13 = scalar_lea.vmem %s5871_s1, %s490_s30  ;;  %s544_s30 = sadd.s32 37, %s4106_s18 }
 0x18f   : > { %v1542_v59 = vpop.f32.mrf.mxu3  ;;  %v1555_v60 = vpop.f32.mrf.mxu2 }
 0x190   : > { %v1572_v63 = vadd.f32 %v1542_v59, %v1530_v56  ;;  %v1592_v0 = vadd.f32 %v1555_v60, %v1531_v57  ;;  %v396_v59 = vld [vmem:[%s395_s19] sm:$0x7]  ;;  %s480_s19 = sadd.s32 29, %s4106_s18 }
 0x191   : > { %398 = vst.msk [vmem:[#allocation3 + $0x32] ss:$8 sm:$0x7] %vm4262_vm0, %v396_v59  ;;  %s4606_s11 = sld [smem:[#allocation6 + %s480_s19]] }
 0x192   : > { %v3545_v1 = vmul.f32 -1.442695, %v1572_v63  ;;  %v3546_v2 = vmul.f32 -1.442695, %v1592_v0  ;;  %v1570_v3 = vpop.f32.mrf.mxu1  ;;  %v404_v63 = vld [vmem:[%s403_s17] sm:$0x7] }
 0x193   : > { %406 = vst.msk [vmem:[#allocation3 + $0x33] ss:$8 sm:$0x7] %vm4262_vm0, %v404_v63  ;;  %s496_s17 = sadd.s32 31, %s4106_s18  ;;  %v492_v63 = vld [vmem:[%s491_s13] sm:$0x7] }
 0x194   : > { %3735 = vpow2.f32 %v3545_v1  ;;  %v412_v1 = vld [vmem:[%s411_s12] sm:$0x7]  ;;  %s4610_s14 = sld [smem:[#allocation6 + %s496_s17]]  ;;  %s442_s12 = smul.u32 3, %s441_s8 }
 0x195   : > { %3737 = vpow2.f32 %v3546_v2  ;;  %v420_v2 = vld [vmem:[%s419_s26] sm:$0x7]  ;;  %414 = vst.msk [vmem:[#allocation3 + $0x34] ss:$8 sm:$0x7] %vm4262_vm0, %v412_v1  ;;  %s466_s26 = smul.u32 3, %s4600_s7  ;;  %s475_s17 = scalar_lea.vmem %s5871_s1, %s474_s23 }
 0x196   : > { %422 = vst.msk [vmem:[#allocation3 + $0x35] ss:$8 sm:$0x7] %vm4262_vm0, %v420_v2  ;;  %v476_v54 = vld [vmem:[%s475_s17] sm:$0x7]  ;;  %s512_s23 = sadd.s32 33, %s4106_s18 }
 0x197   : > { %v1544_v7 = vpop.f32.mrf.mxu3  ;;  %v1557_v8 = vpop.f32.mrf.mxu2  ;;  %s482_s5 = smul.u32 3, %s4606_s11  ;;  %s467_s19 = scalar_lea.vmem %s5871_s1, %s466_s26  ;;  %478 = vst.msk [vmem:[#allocation3 + $0x4c] ss:$8 sm:$0x7] %vm4262_vm0, %v476_v54 }
 0x198   : > { %v428_v7 = vld [vmem:[%s427_s0] sm:$0x7]  ;;  %s443_s0 = scalar_lea.vmem %s5871_s1, %s442_s12  ;;  %494 = vst.msk [vmem:[#allocation3 + $0x4e] ss:$8 sm:$0x7] %vm4262_vm0, %v492_v63  ;;  %s4704_s8 = sld [smem:[#allocation6 + %s520_s29]] }
 0x199   : > { %v436_v8 = vld [vmem:[%s435_s24] sm:$0x7]  ;;  %430 = vst.msk [vmem:[#allocation3 + $0x36] ss:$8 sm:$0x7] %vm4262_vm0, %v428_v7  ;;  %s483_s9 = scalar_lea.vmem %s5871_s1, %s482_s5  ;;  %s4701_s5 = sld [smem:[#allocation6 + %s512_s23]] }
 0x19a   : > { %v3736_v9 = vpop.eup %3735  ;;  %438 = vst.msk [vmem:[#allocation3 + $0x37] ss:$8 sm:$0x7] %vm4262_vm0, %v436_v8  ;;  %s498_s7 = smul.u32 3, %s4610_s14  ;;  %v484_v59 = vld [vmem:[%s483_s9] sm:$0x7] }
 0x19b   : > { %v3738_v12 = vpop.eup %3737  ;;  %v1576_v13 = vadd.f32 1.0, %v3736_v9  ;;  %486 = vst.msk [vmem:[#allocation3 + $0x4d] ss:$8 sm:$0x7] %vm4262_vm0, %v484_v59  ;;  %s568_s13 = sadd.s32 40, %s4106_s18  ;;  %s600_s29 = sadd.s32 44, %s4106_s18 }
 0x19c   : > { %v4477_v16 = vadd.f32 1.0, %v3738_v12  ;;  %s499_s27 = scalar_lea.vmem %s5871_s1, %s498_s7  ;;  %s4713_s7 = sld [smem:[#allocation6 + %s544_s30]] }
 0x19d   : > { %3739 = vrcp.f32 %v1576_v13  ;;  %v1588_v30 = vand.u32 2147483648, %v1576_v13  ;;  %v1586_v34 = vand.u32 2147483647, %v1576_v13  ;;  %vm1582_vm10 = vweird.f32 %v1576_v13  ;;  %v500_v1 = vld [vmem:[%s499_s27] sm:$0x7]  ;;  %s4800_s27 = sld [smem:[#allocation6 + %s568_s13]] }
 0x19e   : > { %3741 = vrcp.f32 %v4477_v16  ;;  %v1608_v51 = vand.u32 2147483648, %v4477_v16  ;;  %vm1602_vm14 = vweird.f32 %v4477_v16  ;;  %v1606_v52 = vand.u32 2147483647, %v4477_v16  ;;  %502 = vst.msk [vmem:[#allocation3 + $0x4f] ss:$8 sm:$0x7] %vm4262_vm0, %v500_v1 }
 0x19f   : > { %v1589_v39 = vor.u32 1.1754944e-38, %v1588_v30  ;;  %vm1587_vm12 = vcmp.eq.f32.partialorder %v1586_v34, 8.507059e+37  ;;  %s514_s11 = smul.u32 3, %s4701_s5 }
 0x1a0   : > { %v1609_v0 = vor.u32 1.1754944e-38, %v1608_v51  ;;  %vm1607_vm1 = vcmp.eq.f32.partialorder %v1606_v52, 8.507059e+37  ;;  %v460_v51 = vld [vmem:[%s459_s10] sm:$0x7]  ;;  %s522_s12 = smul.u32 3, %s4704_s8 }
 0x1a1   : > { %v468_v52 = vld [vmem:[%s467_s19] sm:$0x7]  ;;  %462 = vst.msk [vmem:[#allocation3 + $0x4a] ss:$8 sm:$0x7] %vm4262_vm0, %v460_v51  ;;  %s560_s19 = sadd.s32 39, %s4106_s18 }
 0x1a2   : > { %470 = vst.msk [vmem:[#allocation3 + $0x4b] ss:$8 sm:$0x7] %vm4262_vm0, %v468_v52  ;;  %s4718_s17 = sld [smem:[#allocation6 + %s560_s19]] }
 0x1a3   : > { %v3740_v18 = vpop.eup %3739 }
 0x1a4   : > { %v3742_v21 = vpop.eup %3741  ;;  %v1578_v23 = vmul.f32 %v3740_v18, %v1576_v13  ;;  %vm1583_vm9 = vweird.f32 %v3740_v18 }
 0x1a5   : > { %v1598_v25 = vmul.f32 %v3742_v21, %v4477_v16  ;;  %vm1584_vm11 = vmor %vm1582_vm10, %vm1583_vm9  ;;  %vm1603_vm13 = vweird.f32 %v3742_v21 }
 0x1a6   : > { %v1579_v27 = vsub.f32 1.0, %v1578_v23  ;;  %vm4532_vm15 = vmor %vm1602_vm14, %vm1603_vm13  ;;  %v1623_v23 = vld [vmem:[#allocation3 + $0x38] sm:$0xff] }
 0x1a7   : > { %v1599_v31 = vsub.f32 1.0, %v1598_v25 }
 0x1a8   : > { %v1580_v33 = vmul.f32 %v3740_v18, %v1579_v27  ;;  %s562_s19 = smul.u32 3, %s4718_s17 }
 0x1a9   : > { %v1600_v36 = vmul.f32 %v3742_v21, %v1599_v31 }
 0x1aa   : > { %v1581_v37 = vadd.f32 %v3740_v18, %v1580_v33  ;;  %s563_s14 = scalar_lea.vmem %s5871_s1, %s562_s19  ;;  %s570_s19 = smul.u32 3, %s4800_s27 }
 0x1ab   : > { %v1601_v45 = vadd.f32 %v3742_v21, %v1600_v36 }
 0x1ac   : > { %v1585_v47 = vsel %vm1584_vm11, %v3740_v18, %v1581_v37 }
 0x1ad   : > { %v1590_v43 = vsel %vm1587_vm12, %v1589_v39, %v1585_v47  ;;  %v1605_v60 = vsel %vm4532_vm15, %v3742_v21, %v1601_v45  ;;  %v444_v45 = vld [vmem:[%s443_s0] sm:$0x7]  ;;  %s504_s0 = sadd.s32 32, %s4106_s18 }
 0x1ae   : > { %v1613_v50 = vmul.f32 %v1612_v42, %v1590_v43  ;;  %v1610_v3 = vsel %vm1607_vm1, %v1609_v0, %v1605_v60  ;;  %446 = vst.msk [vmem:[#allocation3 + $0x48] ss:$8 sm:$0x7] %vm4262_vm0, %v444_v45  ;;  %s4698_s24 = sld [smem:[#allocation6 + %s504_s0]]  ;;  %s515_s0 = scalar_lea.vmem %s5871_s1, %s514_s11 }
 0x1af   : > { %v1616_v9 = vsub.f32 1.0, %v1610_v3  ;;  %v1618_v16 = vmul.f32 %v1610_v3, %v4401_v40  ;;  %v1622_v40 = vld [vmem:[#allocation3 + $0x30] sm:$0xff] }
 0x1b0   : > { %v1614_v57 = vadd.f32 %v1613_v50, %v1532_v44  ;;  %v452_v50 = vld [vmem:[%s451_s6] sm:$0x7]  ;;  %s528_s6 = sadd.s32 35, %s4106_s18 }
 0x1b1   : > { %454 = vst.msk [vmem:[#allocation3 + $0x49] ss:$8 sm:$0x7] %vm4262_vm0, %v452_v50  ;;  %s4706_s10 = sld [smem:[#allocation6 + %s528_s6]]  ;;  %s546_s6 = smul.u32 3, %s4713_s7 }
 0x1b2   : > { %3743 = vtanh.f32 %v1614_v57 }
 0x1b3   : > { %s547_s11 = scalar_lea.vmem %s5871_s1, %s546_s6  ;;  %s608_s6 = sadd.s32 45, %s4106_s18 }
 0x1b4   : > { %s506_s25 = smul.u32 3, %s4698_s24  ;;  %s523_s24 = scalar_lea.vmem %s5871_s1, %s522_s12 }
 0x1b5   : > { %s4815_s30 = sld [smem:[#allocation6 + %s608_s6]] }
 0x1b6   : > { %s507_s26 = scalar_lea.vmem %s5871_s1, %s506_s25 }
 0x1b7   : > { %s530_s9 = smul.u32 3, %s4706_s10 }
 0x1b8   : > { %v3744_v12 = vpop.eup %3743  ;;  %v1715_v54 = vld [vmem:[#allocation3 + $0x50] sm:$0xff]  ;;  %s554_s10 = smul.u32 3, %s4715_s16 }
 0x1b9   : > { %v1617_v13 = vmul.f32 %v3744_v12, %v1616_v9  ;;  %s531_s8 = scalar_lea.vmem %s5871_s1, %s530_s9 }
 0x1ba   : > { %s555_s12 = scalar_lea.vmem %s5871_s1, %s554_s10  ;;  %s624_s10 = sadd.s32 47, %s4106_s18 }
 0x1bb   : > { %v4564_v18 = vadd.f32 %v1618_v16, %v1617_v13 }
 0x1bd   : > { %v1620_v21 = vpack.c.bf16 %v4564_v18, %v4564_v18 }
 0x1bf   : > { %1621 = vst [vmem:[#allocation4 + $0x4] sm:$0xf] %v1620_v21  ;;  %1633 = vmatmul.bf16.vlgmr.msra.gmra.mxu2 %v1620_v21  ;;  %1646 = vmatmul.bf16.vlgmr.msrb.gmra.mxu3 %v1620_v21 }
 0x1c0   : > { %1743 = vmatpush.bf16.msrb.mxu3 %v4056_v11  ;;  %1835 = vmatpush.bf16.msra.mxu2 %v4056_v11 }
 0x1c4   : > { %1744 = vmatpush.bf16.msrb.mxu3 %v4074_v17  ;;  %1836 = vmatpush.bf16.msra.mxu2 %v4074_v17 }
 0x1c8   : > { %1745 = vmatpush.bf16.msrb.mxu3 %v4093_v22  ;;  %1837 = vmatpush.bf16.msra.mxu2 %v4093_v22 }
 0x1cc   : > { %1746 = vmatpush.bf16.msrb.mxu3 %v4119_v29  ;;  %1838 = vmatpush.bf16.msra.mxu2 %v4119_v29 }
 0x1cf   : > { %1659 = vmatmul.bf16.vlgmr.msra.gmra.mxu3 %v1620_v21 }
 0x1d0   : > { %1747 = vmatpush.bf16.msrb.mxu3 %v4150_v35  ;;  %1839 = vmatpush.bf16.msra.mxu2 %v4150_v35 }
 0x1d4   : > { %1748 = vmatpush.bf16.msrb.mxu3 %v4179_v41  ;;  %1840 = vmatpush.bf16.msra.mxu2 %v4179_v41 }
 0x1d8   : > { %1749 = vmatpush.bf16.msrb.mxu3 %v4205_v48  ;;  %1841 = vmatpush.bf16.msra.mxu2 %v4205_v48 }
 0x1dc   : > { %1750 = vmatpush.bf16.msrb.mxu3 %v4244_v55  ;;  %1842 = vmatpush.bf16.msra.mxu2 %v4244_v55 }
 0x1e0   : > { %1901 = vmatpush.bf16.msra.mxu3 %v4034_v4 }
 0x1e4   : > { %1902 = vmatpush.bf16.msra.mxu3 %v4040_v6 }
 0x1e8   : > { %1903 = vmatpush.bf16.msra.mxu3 %v4065_v14 }
 0x1ec   : > { %1904 = vmatpush.bf16.msra.mxu3 %v4087_v20 }
 0x1f0   : > { %1905 = vmatpush.bf16.msra.mxu3 %v4110_v26 }
 0x1f4   : > { %1906 = vmatpush.bf16.msra.mxu3 %v4141_v32 }
 0x1f8   : > { %1907 = vmatpush.bf16.msra.mxu3 %v4170_v38 }
 0x1fc   : > { %1908 = vmatpush.bf16.msra.mxu3 %v4200_v46 }
 0x242   : > { %v1634_v25 = vpop.f32.mrf.mxu2  ;;  %v1647_v27 = vpop.f32.mrf.mxu3 }
 0x243   : > { %v1664_v30 = vadd.f32 %v1634_v25, %v1622_v40  ;;  %v1684_v31 = vadd.f32 %v1647_v27, %v1623_v23  ;;  %v1624_v23 = vld [vmem:[#allocation3 + $0x40] sm:$0xff] }
 0x245   : > { %v3547_v33 = vmul.f32 -1.442695, %v1664_v30  ;;  %v3548_v34 = vmul.f32 -1.442695, %v1684_v31 }
 0x247   : > { %3745 = vpow2.f32 %v3547_v33 }
 0x248   : > { %3747 = vpow2.f32 %v3548_v34 }
 0x24a   : > { %v1636_v36 = vpop.f32.mrf.mxu2  ;;  %v1649_v37 = vpop.f32.mrf.mxu3 }
 0x24d   : > { %v3746_v39 = vpop.eup %3745 }
 0x24e   : > { %v3748_v42 = vpop.eup %3747  ;;  %v1668_v47 = vadd.f32 1.0, %v3746_v39 }
 0x24f   : > { %v4614_v43 = vadd.f32 1.0, %v3748_v42 }
 0x250   : > { %3749 = vrcp.f32 %v1668_v47  ;;  %v1680_v3 = vand.u32 2147483648, %v1668_v47  ;;  %v1678_v9 = vand.u32 2147483647, %v1668_v47  ;;  %vm1674_vm3 = vweird.f32 %v1668_v47 }
 0x251   : > { %3751 = vrcp.f32 %v4614_v43  ;;  %v1700_v30 = vand.u32 2147483648, %v4614_v43  ;;  %vm1694_vm7 = vweird.f32 %v4614_v43  ;;  %v1698_v33 = vand.u32 2147483647, %v4614_v43 }
 0x252   : > { %v1660_v44 = vpop.f32.mrf.mxu3  ;;  %v1681_v16 = vor.u32 1.1754944e-38, %v1680_v3  ;;  %vm1679_vm5 = vcmp.eq.f32.partialorder %v1678_v9, 8.507059e+37  ;;  %v516_v9 = vld [vmem:[%s515_s0] sm:$0x7]  ;;  %s592_s0 = sadd.s32 43, %s4106_s18 }
 0x253   : > { %v1704_v40 = vadd.f32 %v4397_v61, %v1660_v44  ;;  %v1701_v37 = vor.u32 1.1754944e-38, %v1700_v30  ;;  %vm1699_vm9 = vcmp.eq.f32.partialorder %v1698_v33, 8.507059e+37  ;;  %518 = vst.msk [vmem:[#allocation3 + $0x61] ss:$8 sm:$0x7] %vm4262_vm0, %v516_v9  ;;  %s4809_s5 = sld [smem:[#allocation6 + %s592_s0]] }
 0x254   : > { %v556_v30 = vld [vmem:[%s555_s12] sm:$0x7]  ;;  %s571_s12 = scalar_lea.vmem %s5871_s1, %s570_s19 }
 0x255   : > { %558 = vst.msk [vmem:[#allocation3 + $0x66] ss:$8 sm:$0x7] %vm4262_vm0, %v556_v30  ;;  %v564_v33 = vld [vmem:[%s563_s14] sm:$0x7]  ;;  %s640_s14 = sadd.s32 49, %s4106_s18 }
 0x256   : > { %v3750_v53 = vpop.eup %3749  ;;  %566 = vst.msk [vmem:[#allocation3 + $0x67] ss:$8 sm:$0x7] %vm4262_vm0, %v564_v33  ;;  %s641_s27 = sld [smem:[#allocation6 + %s640_s14]] }
 0x257   : > { %v3752_v56 = vpop.eup %3751  ;;  %v1670_v57 = vmul.f32 %v3750_v53, %v1668_v47  ;;  %vm1675_vm2 = vweird.f32 %v3750_v53 }
 0x258   : > { %v1690_v60 = vmul.f32 %v3752_v56, %v4614_v43  ;;  %vm1676_vm4 = vmor %vm1674_vm3, %vm1675_vm2  ;;  %vm1695_vm6 = vweird.f32 %v3752_v56 }
 0x259   : > { %v1671_v0 = vsub.f32 1.0, %v1670_v57  ;;  %vm1696_vm8 = vmor %vm1694_vm7, %vm1695_vm6 }
 0x25a   : > { %v1691_v2 = vsub.f32 1.0, %v1690_v60  ;;  %v1662_v7 = vpop.f32.mrf.mxu3 }
 0x25b   : > { %v1672_v8 = vmul.f32 %v3750_v53, %v1671_v0 }
 0x25c   : > { %v1692_v12 = vmul.f32 %v3752_v56, %v1691_v2 }
 0x25d   : > { %v1673_v13 = vadd.f32 %v3750_v53, %v1672_v8  ;;  %v508_v8 = vld [vmem:[%s507_s26] sm:$0x7]  ;;  %s576_s26 = sadd.s32 41, %s4106_s18 }
 0x25e   : > { %v1693_v27 = vadd.f32 %v3752_v56, %v1692_v12  ;;  %v524_v12 = vld [vmem:[%s523_s24] sm:$0x7]  ;;  %510 = vst.msk [vmem:[#allocation3 + $0x60] ss:$8 sm:$0x7] %vm4262_vm0, %v508_v8  ;;  %s4803_s23 = sld [smem:[#allocation6 + %s576_s26]] }
 0x25f   : > { %v1677_v21 = vsel %vm1676_vm4, %v3750_v53, %v1673_v13  ;;  %526 = vst.msk [vmem:[#allocation3 + $0x62] ss:$8 sm:$0x7] %vm4262_vm0, %v524_v12  ;;  %s4806_s24 = sld [smem:[#allocation6 + %s584_s2]]  ;;  %s610_s26 = smul.u32 3, %s4815_s30 }
 0x260   : > { %v1682_v25 = vsel %vm1679_vm5, %v1681_v16, %v1677_v21  ;;  %v1697_v36 = vsel %vm1696_vm8, %v3752_v56, %v1693_v27  ;;  %v532_v16 = vld [vmem:[%s531_s8] sm:$0x7]  ;;  %s4812_s8 = sld [smem:[#allocation6 + %s600_s29]]  ;;  %s656_s2 = sadd.s32 51, %s4106_s18 }
 0x261   : > { %v1705_v31 = vmul.f32 %v1704_v40, %v1682_v25  ;;  %v1702_v39 = vsel %vm1699_vm9, %v1701_v37, %v1697_v36  ;;  %v540_v21 = vld [vmem:[%s539_s20] sm:$0x7]  ;;  %534 = vst.msk [vmem:[#allocation3 + $0x63] ss:$8 sm:$0x7] %vm4262_vm0, %v532_v16  ;;  %s4819_s20 = sld [smem:[#allocation6 + %s624_s10]] }
 0x262   : > { %v1708_v42 = vsub.f32 1.0, %v1702_v39  ;;  %v1710_v45 = vmul.f32 %v1702_v39, %v4564_v18  ;;  %v1714_v18 = vld [vmem:[#allocation3 + $0x48] sm:$0xff]  ;;  %v548_v25 = vld [vmem:[%s547_s11] sm:$0x7]  ;;  %s594_s11 = smul.u32 3, %s4809_s5  ;;  %s672_s29 = sadd.s32 53, %s4106_s18 }
 0x263   : > { %v1706_v34 = vadd.f32 %v1705_v31, %v1624_v23  ;;  %542 = vst.msk [vmem:[#allocation3 + $0x64] ss:$8 sm:$0x7] %vm4262_vm0, %v540_v21  ;;  %s689_s30 = sld [smem:[#allocation6 + %s688_s28]] }
 0x264   : > { %550 = vst.msk [vmem:[#allocation3 + $0x65] ss:$8 sm:$0x7] %vm4262_vm0, %v548_v25  ;;  %s578_s7 = smul.u32 3, %s4803_s23  ;;  %s595_s6 = scalar_lea.vmem %s5871_s1, %s594_s11 }
 0x265   : > { %3753 = vtanh.f32 %v1706_v34  ;;  %s586_s25 = smul.u32 3, %s4806_s24  ;;  %s657_s24 = sld [smem:[#allocation6 + %s656_s2]] }
 0x266   : > { %s602_s9 = smul.u32 3, %s4812_s8  ;;  %s579_s13 = scalar_lea.vmem %s5871_s1, %s578_s7 }
 0x267   : > { %s587_s0 = scalar_lea.vmem %s5871_s1, %s586_s25  ;;  %s618_s23 = smul.u32 3, %s4817_s21 }
 0x268   : > { %s626_s5 = smul.u32 3, %s4819_s20  ;;  %s603_s10 = scalar_lea.vmem %s5871_s1, %s602_s9 }
 0x269   : > { %s611_s7 = scalar_lea.vmem %s5871_s1, %s610_s26  ;;  %s619_s25 = scalar_lea.vmem %s5871_s1, %s618_s23 }
 0x26a   : > { %s627_s17 = scalar_lea.vmem %s5871_s1, %s626_s5  ;;  %s633_s26 = sld [smem:[#allocation6 + %s632_s22]] }
 0x26b   : > { %v3754_v47 = vpop.eup %3753  ;;  %v1807_v9 = vld [vmem:[#allocation3 + $0x68] sm:$0xff]  ;;  %s673_s8 = sld [smem:[#allocation6 + %s672_s29]]  ;;  %s658_s20 = smul.u32 3, %s657_s24 }
 0x26c   : > { %v1709_v44 = vmul.f32 %v3754_v47, %v1708_v42 }
 0x26e   : > { %v4667_v50 = vadd.f32 %v1710_v45, %v1709_v44 }
 0x270   : > { %v1712_v51 = vpack.c.bf16 %v4667_v50, %v4667_v50  ;;  %s634_s19 = smul.u32 3, %s633_s26 }
 0x271   : > { %s674_s14 = smul.u32 3, %s673_s8 }
 0x272   : > { %1713 = vst [vmem:[#allocation4 + $0x8] sm:$0xf] %v1712_v51  ;;  %1725 = vmatmul.bf16.vlgmr.msrb.gmra.mxu1 %v1712_v51  ;;  %1738 = vmatmul.bf16.vlgmr.msrb.gmra.mxu2 %v1712_v51  ;;  %s635_s16 = scalar_lea.vmem %s5871_s1, %s634_s19 }
 0x273   : > { %1751 = vmatmul.bf16.vlgmr.msrb.gmra.mxu3 %v1712_v51  ;;  %1927 = vmatpush.bf16.msrb.mxu1 %v4056_v11  ;;  %s675_s8 = scalar_lea.vmem %s5871_s1, %s674_s14 }
 0x274   : > { %1993 = vmatpush.bf16.msrb.mxu2 %v4034_v4  ;;  %2006 = vmatpush.bf16.msrb.mxu3 %v4210_v49 }
 0x277   : > { %1928 = vmatpush.bf16.msrb.mxu1 %v4074_v17 }
 0x278   : > { %1994 = vmatpush.bf16.msrb.mxu2 %v4040_v6  ;;  %2007 = vmatpush.bf16.msrb.mxu3 %v4250_v58 }
 0x27b   : > { %1929 = vmatpush.bf16.msrb.mxu1 %v4093_v22 }
 0x27c   : > { %1995 = vmatpush.bf16.msrb.mxu2 %v4065_v14  ;;  %2008 = vmatpush.bf16.msrb.mxu3 %v4292_v5 }
 0x27f   : > { %1930 = vmatpush.bf16.msrb.mxu1 %v4119_v29 }
 0x280   : > { %1996 = vmatpush.bf16.msrb.mxu2 %v4087_v20  ;;  %2009 = vmatpush.bf16.msrb.mxu3 %v4307_v10 }
 0x283   : > { %1931 = vmatpush.bf16.msrb.mxu1 %v4150_v35 }
 0x284   : > { %1997 = vmatpush.bf16.msrb.mxu2 %v4110_v26  ;;  %2010 = vmatpush.bf16.msrb.mxu3 %v4323_v15 }
 0x287   : > { %1932 = vmatpush.bf16.msrb.mxu1 %v4179_v41 }
 0x288   : > { %1998 = vmatpush.bf16.msrb.mxu2 %v4141_v32  ;;  %2011 = vmatpush.bf16.msrb.mxu3 %v4335_v19 }
 0x28b   : > { %1933 = vmatpush.bf16.msrb.mxu1 %v4205_v48 }
 0x28c   : > { %1999 = vmatpush.bf16.msrb.mxu2 %v4170_v38  ;;  %2012 = vmatpush.bf16.msrb.mxu3 %v4347_v24 }
 0x28f   : > { %1934 = vmatpush.bf16.msrb.mxu1 %v4244_v55 }
 0x290   : > { %2000 = vmatpush.bf16.msrb.mxu2 %v4200_v46  ;;  %2013 = vmatpush.bf16.msrb.mxu3 %v4359_v28 }
 0x2ef   : > { %v1726_v43 = vpop.f32.mrf.mxu1 }
 0x2f0   : > { %v1756_v52 = vadd.f32 %v1726_v43, %v1714_v18  ;;  %v1716_v18 = vld [vmem:[#allocation3 + $0x58] sm:$0xff] }
 0x2f2   : > { %v3549_v53 = vmul.f32 -1.442695, %v1756_v52 }
 0x2f4   : > { %3755 = vpow2.f32 %v3549_v53 }
 0x2f5   : > { %v1739_v56 = vpop.f32.mrf.mxu2 }
 0x2f6   : > { %v1776_v57 = vadd.f32 %v1739_v56, %v1715_v54  ;;  %v1752_v59 = vpop.f32.mrf.mxu3 }
 0x2f7   : > { %v1728_v60 = vpop.f32.mrf.mxu1  ;;  %v1796_v51 = vadd.f32 %v4397_v61, %v1752_v59 }
 0x2f8   : > { %v3550_v63 = vmul.f32 -1.442695, %v1776_v57 }
 0x2fa   : > { %v3756_v0 = vpop.eup %3755  ;;  %3757 = vpow2.f32 %v3550_v63 }
 0x2fb   : > { %v1760_v1 = vadd.f32 1.0, %v3756_v0 }
 0x2fd   : > { %3759 = vrcp.f32 %v1760_v1  ;;  %v1741_v2 = vpop.f32.mrf.mxu2  ;;  %v1772_v31 = vand.u32 2147483648, %v1760_v1  ;;  %v1770_v36 = vand.u32 2147483647, %v1760_v1  ;;  %vm1766_vm11 = vweird.f32 %v1760_v1 }
 0x2fe   : > { %v1754_v3 = vpop.f32.mrf.mxu3 }
 0x2ff   : > { %v1773_v47 = vor.u32 1.1754944e-38, %v1772_v31  ;;  %vm1771_vm13 = vcmp.eq.f32.partialorder %v1770_v36, 8.507059e+37 }
 0x300   : > { %v3758_v7 = vpop.eup %3757 }
 0x301   : > { %v1780_v13 = vadd.f32 1.0, %v3758_v7 }
 0x303   : > { %v3760_v40 = vpop.eup %3759  ;;  %3761 = vrcp.f32 %v1780_v13  ;;  %v1792_v53 = vand.u32 2147483648, %v1780_v13  ;;  %v1790_v56 = vand.u32 2147483647, %v1780_v13  ;;  %vm1786_vm15 = vweird.f32 %v1780_v13 }
 0x304   : > { %v1762_v23 = vmul.f32 %v3760_v40, %v1760_v1  ;;  %vm1767_vm10 = vweird.f32 %v3760_v40 }
 0x305   : > { %vm1768_vm12 = vmor %vm1766_vm11, %vm1767_vm10  ;;  %v1793_v63 = vor.u32 1.1754944e-38, %v1792_v53  ;;  %vm1791_vm2 = vcmp.eq.f32.partialorder %v1790_v56, 8.507059e+37 }
 0x306   : > { %v1763_v27 = vsub.f32 1.0, %v1762_v23 }
 0x308   : > { %v1764_v34 = vmul.f32 %v3760_v40, %v1763_v27 }
 0x309   : > { %v3762_v37 = vpop.eup %3761 }
 0x30a   : > { %v1782_v39 = vmul.f32 %v3762_v37, %v1780_v13  ;;  %v1765_v42 = vadd.f32 %v3760_v40, %v1764_v34  ;;  %vm1787_vm14 = vweird.f32 %v3762_v37 }
 0x30b   : > { %vm1788_vm1 = vmor %vm1786_vm15, %vm1787_vm14 }
 0x30c   : > { %v1783_v44 = vsub.f32 1.0, %v1782_v39  ;;  %v1769_v45 = vsel %vm1768_vm12, %v3760_v40, %v1765_v42  ;;  %v572_v39 = vld [vmem:[%s571_s12] sm:$0x7]  ;;  %s712_s12 = sadd.s32 58, %s4106_s18 }
 0x30d   : > { %v1774_v43 = vsel %vm1771_vm13, %v1773_v47, %v1769_v45  ;;  %v580_v42 = vld [vmem:[%s579_s13] sm:$0x7]  ;;  %574 = vst.msk [vmem:[#allocation3 + $0x78] ss:$8 sm:$0x7] %vm4262_vm0, %v572_v39  ;;  %s648_s13 = sadd.s32 50, %s4106_s18 }
 0x30e   : > { %v1784_v52 = vmul.f32 %v3762_v37, %v1783_v44  ;;  %v1797_v54 = vmul.f32 %v1796_v51, %v1774_v43  ;;  %v588_v47 = vld [vmem:[%s587_s0] sm:$0x7]  ;;  %582 = vst.msk [vmem:[#allocation3 + $0x79] ss:$8 sm:$0x7] %vm4262_vm0, %v580_v42  ;;  %s664_s0 = sadd.s32 52, %s4106_s18 }
 0x30f   : > { %v596_v44 = vld [vmem:[%s595_s6] sm:$0x7]  ;;  %590 = vst.msk [vmem:[#allocation3 + $0x7a] ss:$8 sm:$0x7] %vm4262_vm0, %v588_v47  ;;  %s649_s23 = sld [smem:[#allocation6 + %s648_s13]] }
 0x310   : > { %v1798_v57 = vadd.f32 %v1797_v54, %v1716_v18  ;;  %v1785_v60 = vadd.f32 %v3762_v37, %v1784_v52  ;;  %v604_v51 = vld [vmem:[%s603_s10] sm:$0x7]  ;;  %598 = vst.msk [vmem:[#allocation3 + $0x7b] ss:$8 sm:$0x7] %vm4262_vm0, %v596_v44  ;;  %s680_s6 = sadd.s32 54, %s4106_s18 }
 0x311   : > { %v612_v52 = vld [vmem:[%s611_s7] sm:$0x7]  ;;  %606 = vst.msk [vmem:[#allocation3 + $0x7c] ss:$8 sm:$0x7] %vm4262_vm0, %v604_v51  ;;  %s665_s5 = sld [smem:[#allocation6 + %s664_s0]] }
 0x312   : > { %3763 = vtanh.f32 %v1798_v57  ;;  %v1789_v0 = vsel %vm1788_vm1, %v3762_v37, %v1785_v60  ;;  %v620_v54 = vld [vmem:[%s619_s25] sm:$0x7]  ;;  %614 = vst.msk [vmem:[#allocation3 + $0x7d] ss:$8 sm:$0x7] %vm4262_vm0, %v612_v52  ;;  %s681_s10 = sld [smem:[#allocation6 + %s680_s6]] }
 0x313   : > { %v1794_v1 = vsel %vm1791_vm2, %v1793_v63, %v1789_v0  ;;  %v628_v57 = vld [vmem:[%s627_s17] sm:$0x7]  ;;  %622 = vst.msk [vmem:[#allocation3 + $0x7e] ss:$8 sm:$0x7] %vm4262_vm0, %v620_v54  ;;  %s642_s7 = smul.u32 3, %s641_s27  ;;  %s659_s27 = scalar_lea.vmem %s5871_s1, %s658_s20 }
 0x314   : > { %v1800_v2 = vsub.f32 1.0, %v1794_v1  ;;  %v1802_v61 = vmul.f32 %v1794_v1, %v4667_v50  ;;  %v1806_v50 = vld [vmem:[#allocation3 + $0x60] sm:$0xff]  ;;  %630 = vst.msk [vmem:[#allocation3 + $0x7f] ss:$8 sm:$0x7] %vm4262_vm0, %v628_v57  ;;  %s728_s13 = sadd.s32 60, %s4106_s18 }
 0x315   : > { %s650_s21 = smul.u32 3, %s649_s23  ;;  %s643_s22 = scalar_lea.vmem %s5871_s1, %s642_s7 }
 0x316   : > { %s690_s23 = smul.u32 3, %s689_s30  ;;  %s713_s2 = sld [smem:[#allocation6 + %s712_s12]] }
 0x317   : > { %s666_s17 = smul.u32 3, %s665_s5  ;;  %s651_s0 = scalar_lea.vmem %s5871_s1, %s650_s21 }
 0x318   : > { %v3764_v3 = vpop.eup %3763  ;;  %s682_s29 = smul.u32 3, %s681_s10  ;;  %s691_s11 = scalar_lea.vmem %s5871_s1, %s690_s23 }
 0x319   : > { %v1801_v7 = vmul.f32 %v3764_v3, %v1800_v2  ;;  %s667_s19 = scalar_lea.vmem %s5871_s1, %s666_s17  ;;  %s704_s17 = sadd.s32 57, %s4106_s18 }
 0x31a   : > { %s683_s20 = scalar_lea.vmem %s5871_s1, %s682_s29  ;;  %s4997_s14 = sld [smem:[#allocation6 + %s704_s17]] }
 0x31b   : > { %v4769_v59 = vadd.f32 %v1802_v61, %v1801_v7  ;;  %v1898_v51 = vld [vmem:[#allocation3 + $0x78] sm:$0xff]  ;;  %s744_s6 = sadd.s32 62, %s4106_s18  ;;  %s5002_s26 = sld [smem:[#allocation6 + %s728_s13]] }
 0x31c   : > { %s5007_s24 = sld [smem:[#allocation6 + %s744_s6]]  ;;  %s714_s7 = smul.u32 3, %s713_s2 }
 0x31d   : > { %v1804_v8 = vpack.c.bf16 %v4769_v59, %v4769_v59  ;;  %s776_s25 = sadd.s32 66, %s4106_s18  ;;  %s792_s12 = sadd.s32 68, %s4106_s18 }
 0x31e   : > { %s5102_s13 = sld [smem:[#allocation6 + %s792_s12]]  ;;  %s808_s2 = sadd.s32 70, %s4106_s18 }
 0x31f   : > { %1805 = vst [vmem:[#allocation4 + $0xc] sm:$0xf] %v1804_v8  ;;  %1817 = vmatmul.bf16.vlgmr.msra.gmra.mxu0 %v1804_v8  ;;  %1830 = vmatmul.bf16.vlgmr.msra.gmra.mxu1 %v1804_v8  ;;  %s5108_s6 = sld [smem:[#allocation6 + %s808_s2]]  ;;  %s840_s10 = sadd.s32 74, %s4106_s18 }
 0x320   : > { %1843 = vmatmul.bf16.vlgmr.msra.gmra.mxu2 %v1804_v8  ;;  %2019 = vmatpush.bf16.msra.mxu0 %v4056_v11  ;;  %v4876_v8 = vld [vmem:[%s5873_s3] ss:$0 sm:$0xff]  ;;  %s706_s5 = smul.u32 3, %s4997_s14  ;;  %s872_s12 = sadd.s32 78, %s4106_s18 }
 0x321   : > { %2085 = vmatpush.bf16.msra.mxu1 %v4034_v4  ;;  %2098 = vmatpush.bf16.msra.mxu2 %v4210_v49  ;;  %s730_s30 = smul.u32 3, %s5002_s26 }
 0x322   : > { %s746_s14 = smul.u32 3, %s5007_s24 }
 0x324   : > { %2020 = vmatpush.bf16.msra.mxu0 %v4074_v17  ;;  %s794_s24 = smul.u32 3, %s5102_s13  ;;  %s5210_s13 = sld [smem:[#allocation6 + %s872_s12]] }
 0x325   : > { %2086 = vmatpush.bf16.msra.mxu1 %v4040_v6  ;;  %2099 = vmatpush.bf16.msra.mxu2 %v4250_v58  ;;  %s944_s12 = sadd.s32 87, %s4106_s18 }
 0x326   : > { %s795_s2 = scalar_lea.vmem %s5871_s1, %s794_s24  ;;  %s888_s24 = sadd.s32 80, %s4106_s18 }
 0x328   : > { %2021 = vmatpush.bf16.msra.mxu0 %v4093_v22 }
 0x329   : > { %2087 = vmatpush.bf16.msra.mxu1 %v4065_v14  ;;  %2100 = vmatpush.bf16.msra.mxu2 %v4292_v5 }
 0x32c   : > { %2022 = vmatpush.bf16.msra.mxu0 %v4119_v29 }
 0x32d   : > { %2088 = vmatpush.bf16.msra.mxu1 %v4087_v20  ;;  %2101 = vmatpush.bf16.msra.mxu2 %v4307_v10 }
 0x330   : > { %2023 = vmatpush.bf16.msra.mxu0 %v4150_v35 }
 0x331   : > { %2089 = vmatpush.bf16.msra.mxu1 %v4110_v26  ;;  %2102 = vmatpush.bf16.msra.mxu2 %v4323_v15 }
 0x334   : > { %2024 = vmatpush.bf16.msra.mxu0 %v4179_v41 }
 0x335   : > { %2090 = vmatpush.bf16.msra.mxu1 %v4141_v32  ;;  %2103 = vmatpush.bf16.msra.mxu2 %v4335_v19 }
 0x338   : > { %2025 = vmatpush.bf16.msra.mxu0 %v4205_v48 }
 0x339   : > { %2091 = vmatpush.bf16.msra.mxu1 %v4170_v38  ;;  %2104 = vmatpush.bf16.msra.mxu2 %v4347_v24 }
 0x33c   : > { %2026 = vmatpush.bf16.msra.mxu0 %v4244_v55 }
 0x33d   : > { %2092 = vmatpush.bf16.msra.mxu1 %v4200_v46  ;;  %2105 = vmatpush.bf16.msra.mxu2 %v4359_v28 }
 0x39c   : > { %v1818_v12 = vpop.f32.mrf.mxu0  ;;  %v1831_v13 = vpop.f32.mrf.mxu1 }
 0x39d   : > { %v1848_v16 = vadd.f32 %v1818_v12, %v1806_v50  ;;  %v1868_v21 = vadd.f32 %v1831_v13, %v1807_v9  ;;  %v1808_v9 = vld [vmem:[#allocation3 + $0x70] sm:$0xff] }
 0x39f   : > { %v3551_v40 = vmul.f32 -1.442695, %v1848_v16  ;;  %v3552_v23 = vmul.f32 -1.442695, %v1868_v21 }
 0x3a1   : > { %3765 = vpow2.f32 %v3551_v40 }
 0x3a2   : > { %3767 = vpow2.f32 %v3552_v23 }
 0x3a3   : > { %v1844_v25 = vpop.f32.mrf.mxu2 }
 0x3a4   : > { %v1820_v27 = vpop.f32.mrf.mxu0  ;;  %v1833_v30 = vpop.f32.mrf.mxu1  ;;  %v1888_v50 = vadd.f32 %v4876_v8, %v1844_v25 }
 0x3a7   : > { %v3766_v31 = vpop.eup %3765 }
 0x3a8   : > { %v3768_v33 = vpop.eup %3767  ;;  %v1852_v34 = vadd.f32 1.0, %v3766_v31 }
 0x3a9   : > { %v4825_v36 = vadd.f32 1.0, %v3768_v33 }
 0x3aa   : > { %3769 = vrcp.f32 %v1852_v34  ;;  %v1864_v63 = vand.u32 2147483648, %v1852_v34  ;;  %v1862_v1 = vand.u32 2147483647, %v1852_v34  ;;  %vm1858_vm4 = vweird.f32 %v1852_v34 }
 0x3ab   : > { %3771 = vrcp.f32 %v4825_v36  ;;  %v1846_v37 = vpop.f32.mrf.mxu2  ;;  %v1884_v16 = vand.u32 2147483648, %v4825_v36  ;;  %vm1878_vm8 = vweird.f32 %v4825_v36  ;;  %v1882_v40 = vand.u32 2147483647, %v4825_v36 }
 0x3ac   : > { %v1865_v7 = vor.u32 1.1754944e-38, %v1864_v63  ;;  %vm1863_vm6 = vcmp.eq.f32.partialorder %v1862_v1, 8.507059e+37 }
 0x3ad   : > { %v1885_v30 = vor.u32 1.1754944e-38, %v1884_v16  ;;  %vm1883_vm10 = vcmp.eq.f32.partialorder %v1882_v40, 8.507059e+37 }
 0x3b0   : > { %v3770_v45 = vpop.eup %3769 }
 0x3b1   : > { %v3772_v18 = vpop.eup %3771  ;;  %v1854_v43 = vmul.f32 %v3770_v45, %v1852_v34  ;;  %vm1859_vm3 = vweird.f32 %v3770_v45 }
 0x3b2   : > { %v1874_v53 = vmul.f32 %v3772_v18, %v4825_v36  ;;  %vm1860_vm5 = vmor %vm1858_vm4, %vm1859_vm3  ;;  %vm1879_vm7 = vweird.f32 %v3772_v18 }
 0x3b3   : > { %v1855_v56 = vsub.f32 1.0, %v1854_v43  ;;  %vm1880_vm9 = vmor %vm1878_vm8, %vm1879_vm7 }
 0x3b4   : > { %v1875_v60 = vsub.f32 1.0, %v1874_v53 }
 0x3b5   : > { %v1856_v0 = vmul.f32 %v3770_v45, %v1855_v56 }
 0x3b6   : > { %v1876_v2 = vmul.f32 %v3772_v18, %v1875_v60 }
 0x3b7   : > { %v1857_v3 = vadd.f32 %v3770_v45, %v1856_v0 }
 0x3b8   : > { %v1877_v13 = vadd.f32 %v3772_v18, %v1876_v2 }
 0x3b9   : > { %v1861_v61 = vsel %vm1860_vm5, %v3770_v45, %v1857_v3 }
 0x3ba   : > { %v1866_v12 = vsel %vm1863_vm6, %v1865_v7, %v1861_v61  ;;  %v1881_v27 = vsel %vm1880_vm9, %v3772_v18, %v1877_v13 }
 0x3bb   : > { %v1889_v21 = vmul.f32 %v1888_v50, %v1866_v12  ;;  %v1886_v31 = vsel %vm1883_vm10, %v1885_v30, %v1881_v27 }
 0x3bc   : > { %v1892_v33 = vsub.f32 1.0, %v1886_v31  ;;  %v1894_v37 = vmul.f32 %v1886_v31, %v4769_v59  ;;  %v1899_v59 = vld [vmem:[#allocation3 + $0x80] sm:$0xff]  ;;  %v1900_v31 = vld [vmem:[#allocation3 + $0x88] sm:$0xff] }
 0x3bd   : > { %v1890_v23 = vadd.f32 %v1889_v21, %v1808_v9 }
 0x3bf   : > { %3773 = vtanh.f32 %v1890_v23 }
 0x3c5   : > { %v3774_v25 = vpop.eup %3773 }
 0x3c6   : > { %v1893_v34 = vmul.f32 %v3774_v25, %v1892_v33 }
 0x3c8   : > { %v4883_v39 = vadd.f32 %v1894_v37, %v1893_v34 }
 0x3ca   : > { %v1896_v42 = vpack.c.bf16 %v4883_v39, %v4883_v39 }
 0x3cc   : > { %1897 = vst [vmem:[#allocation4 + $0x10] sm:$0xf] %v1896_v42  ;;  %1909 = vmatmul.bf16.vlgmr.msra.gmra.mxu3 %v1896_v42  ;;  %1922 = vmatmul.bf16.vlgmr.msrb.gmra.mxu0 %v1896_v42 }
 0x3cd   : > { %1935 = vmatmul.bf16.vlgmr.msrb.gmra.mxu1 %v1896_v42  ;;  %2111 = vmatpush.bf16.msra.mxu3 %v4056_v11 }
 0x3ce   : > { %2177 = vmatpush.bf16.msrb.mxu0 %v4034_v4  ;;  %2190 = vmatpush.bf16.msrb.mxu1 %v4210_v49 }
 0x3d1   : > { %2112 = vmatpush.bf16.msra.mxu3 %v4074_v17 }
 0x3d2   : > { %2178 = vmatpush.bf16.msrb.mxu0 %v4040_v6  ;;  %2191 = vmatpush.bf16.msrb.mxu1 %v4250_v58 }
 0x3d5   : > { %2113 = vmatpush.bf16.msra.mxu3 %v4093_v22 }
 0x3d6   : > { %2179 = vmatpush.bf16.msrb.mxu0 %v4065_v14  ;;  %2192 = vmatpush.bf16.msrb.mxu1 %v4292_v5 }
 0x3d9   : > { %2114 = vmatpush.bf16.msra.mxu3 %v4119_v29 }
 0x3da   : > { %2180 = vmatpush.bf16.msrb.mxu0 %v4087_v20  ;;  %2193 = vmatpush.bf16.msrb.mxu1 %v4307_v10 }
 0x3dd   : > { %2115 = vmatpush.bf16.msra.mxu3 %v4150_v35 }
 0x3de   : > { %2181 = vmatpush.bf16.msrb.mxu0 %v4110_v26  ;;  %2194 = vmatpush.bf16.msrb.mxu1 %v4323_v15 }
 0x3e1   : > { %2116 = vmatpush.bf16.msra.mxu3 %v4179_v41 }
 0x3e2   : > { %2182 = vmatpush.bf16.msrb.mxu0 %v4141_v32  ;;  %2195 = vmatpush.bf16.msrb.mxu1 %v4335_v19 }
 0x3e5   : > { %2117 = vmatpush.bf16.msra.mxu3 %v4205_v48 }
 0x3e6   : > { %2183 = vmatpush.bf16.msrb.mxu0 %v4170_v38  ;;  %2196 = vmatpush.bf16.msrb.mxu1 %v4347_v24 }
 0x3e9   : > { %2118 = vmatpush.bf16.msra.mxu3 %v4244_v55 }
 0x3ea   : > { %2184 = vmatpush.bf16.msrb.mxu0 %v4200_v46  ;;  %2197 = vmatpush.bf16.msrb.mxu1 %v4359_v28 }
 0x449   : > { %v1923_v36 = vpop.f32.mrf.mxu0 }
 0x44a   : > { %v1960_v47 = vadd.f32 %v1923_v36, %v1899_v59  ;;  %v1936_v44 = vpop.f32.mrf.mxu1 }
 0x44b   : > { %v1980_v23 = vadd.f32 %v4876_v8, %v1936_v44 }
 0x44c   : > { %v3554_v45 = vmul.f32 -1.442695, %v1960_v47 }
 0x44e   : > { %3775 = vpow2.f32 %v3554_v45 }
 0x44f   : > { %v1910_v18 = vpop.f32.mrf.mxu3 }
 0x450   : > { %v1940_v43 = vadd.f32 %v1910_v18, %v1898_v51 }
 0x451   : > { %v1925_v52 = vpop.f32.mrf.mxu0 }
 0x452   : > { %v3553_v53 = vmul.f32 -1.442695, %v1940_v43  ;;  %v1938_v54 = vpop.f32.mrf.mxu1 }
 0x453   : > { %v652_v54 = vld [vmem:[%s651_s0] sm:$0x7]  ;;  %s736_s0 = sadd.s32 61, %s4106_s18 }
 0x454   : > { %v3776_v56 = vpop.eup %3775  ;;  %3777 = vpow2.f32 %v3553_v53  ;;  %v644_v53 = vld [vmem:[%s643_s22] sm:$0x7]  ;;  %654 = vst.msk [vmem:[#allocation3 + $0x92] ss:$8 sm:$0x7] %vm4262_vm0, %v652_v54  ;;  %s720_s22 = sadd.s32 59, %s4106_s18 }
 0x455   : > { %v1964_v57 = vadd.f32 1.0, %v3776_v56  ;;  %v660_v56 = vld [vmem:[%s659_s27] sm:$0x7]  ;;  %646 = vst.msk [vmem:[#allocation3 + $0x91] ss:$8 sm:$0x7] %vm4262_vm0, %v644_v53 }
 0x456   : > { %662 = vst.msk [vmem:[#allocation3 + $0x93] ss:$8 sm:$0x7] %vm4262_vm0, %v660_v56  ;;  %s721_s29 = sld [smem:[#allocation6 + %s720_s22]]  ;;  %s752_s27 = sadd.s32 63, %s4106_s18 }
 0x457   : > { %v1912_v60 = vpop.f32.mrf.mxu3  ;;  %3779 = vrcp.f32 %v1964_v57  ;;  %v1976_v25 = vand.u32 2147483648, %v1964_v57  ;;  %vm1970_vm1 = vweird.f32 %v1964_v57  ;;  %v1974_v37 = vand.u32 2147483647, %v1964_v57  ;;  %s5005_s23 = sld [smem:[#allocation6 + %s736_s0]]  ;;  %s715_s22 = scalar_lea.vmem %s5871_s1, %s714_s7 }
 0x458   : > { %v676_v60 = vld [vmem:[%s675_s8] sm:$0x7]  ;;  %s5009_s28 = sld [smem:[#allocation6 + %s752_s27]]  ;;  %s731_s27 = scalar_lea.vmem %s5871_s1, %s730_s30 }
 0x459   : > { %v1977_v36 = vor.u32 1.1754944e-38, %v1976_v25  ;;  %vm1975_vm3 = vcmp.eq.f32.partialorder %v1974_v37, 8.507059e+37  ;;  %678 = vst.msk [vmem:[#allocation3 + $0x95] ss:$8 sm:$0x7] %vm4262_vm0, %v676_v60  ;;  %s747_s7 = scalar_lea.vmem %s5871_s1, %s746_s14  ;;  %s768_s30 = sadd.s32 65, %s4106_s18 }
 0x45a   : > { %v3778_v63 = vpop.eup %3777  ;;  %s800_s14 = sadd.s32 69, %s4106_s18 }
 0x45b   : > { %v1944_v0 = vadd.f32 1.0, %v3778_v63  ;;  %v684_v63 = vld [vmem:[%s683_s20] sm:$0x7] }
 0x45c   : > { %686 = vst.msk [vmem:[#allocation3 + $0x96] ss:$8 sm:$0x7] %vm4262_vm0, %v684_v63  ;;  %s722_s8 = smul.u32 3, %s721_s29 }
 0x45d   : > { %3781 = vrcp.f32 %v1944_v0  ;;  %v3780_v1 = vpop.eup %3779  ;;  %v1956_v9 = vand.u32 2147483648, %v1944_v0  ;;  %v1954_v13 = vand.u32 2147483647, %v1944_v0  ;;  %vm1950_vm12 = vweird.f32 %v1944_v0  ;;  %s738_s17 = smul.u32 3, %s5005_s23 }
 0x45e   : > { %v1966_v2 = vmul.f32 %v3780_v1, %v1964_v57  ;;  %vm1971_vm15 = vweird.f32 %v3780_v1  ;;  %v668_v57 = vld [vmem:[%s667_s19] sm:$0x7]  ;;  %s723_s0 = scalar_lea.vmem %s5871_s1, %s722_s8  ;;  %s754_s29 = smul.u32 3, %s5009_s28 }
 0x45f   : > { %v1957_v40 = vor.u32 1.1754944e-38, %v1956_v9  ;;  %vm1955_vm14 = vcmp.eq.f32.partialorder %v1954_v13, 8.507059e+37  ;;  %vm1972_vm2 = vmor %vm1970_vm1, %vm1971_vm15  ;;  %670 = vst.msk [vmem:[#allocation3 + $0x94] ss:$8 sm:$0x7] %vm4262_vm0, %v668_v57 }
 0x460   : > { %v1967_v61 = vsub.f32 1.0, %v1966_v2  ;;  %v724_v37 = vld [vmem:[%s723_s0] sm:$0x7]  ;;  %s755_s21 = scalar_lea.vmem %s5871_s1, %s754_s29  ;;  %s816_s0 = sadd.s32 71, %s4106_s18 }
 0x461   : > { %726 = vst.msk [vmem:[#allocation3 + $0xab] ss:$8 sm:$0x7] %vm4262_vm0, %v724_v37  ;;  %s5106_s29 = sld [smem:[#allocation6 + %s800_s14]] }
 0x462   : > { %v1968_v16 = vmul.f32 %v3780_v1, %v1967_v61 }
 0x463   : > { %v3782_v3 = vpop.eup %3781 }
 0x464   : > { %v1946_v7 = vmul.f32 %v3782_v3, %v1944_v0  ;;  %vm1951_vm11 = vweird.f32 %v3782_v3  ;;  %v1969_v33 = vadd.f32 %v3780_v1, %v1968_v16  ;;  %v692_v0 = vld [vmem:[%s691_s11] sm:$0x7] }
 0x465   : > { %vm1952_vm13 = vmor %vm1950_vm12, %vm1951_vm11  ;;  %694 = vst.msk [vmem:[#allocation3 + $0x97] ss:$8 sm:$0x7] %vm4262_vm0, %v692_v0 }
 0x466   : > { %v1947_v50 = vsub.f32 1.0, %v1946_v7  ;;  %v1973_v59 = vsel %vm1972_vm2, %v3780_v1, %v1969_v33 }
 0x467   : > { %v1978_v47 = vsel %vm1975_vm3, %v1977_v36, %v1973_v59  ;;  %v732_v59 = vld [vmem:[%s731_s27] sm:$0x7]  ;;  %s5111_s27 = sld [smem:[#allocation6 + %s816_s0]] }
 0x468   : > { %v1948_v12 = vmul.f32 %v3782_v3, %v1947_v50  ;;  %v1984_v45 = vsub.f32 1.0, %v1978_v47  ;;  %v1986_v18 = vmul.f32 %v1978_v47, %v4883_v39  ;;  %v636_v39 = vld [vmem:[%s635_s16] sm:$0x7]  ;;  %s696_s16 = sadd.s32 56, %s4106_s18 }
 0x469   : > { %638 = vst.msk [vmem:[#allocation3 + $0x90] ss:$8 sm:$0x7] %vm4262_vm0, %v636_v39  ;;  %s4994_s9 = sld [smem:[#allocation6 + %s696_s16]]  ;;  %s707_s16 = scalar_lea.vmem %s5871_s1, %s706_s5 }
 0x46a   : > { %v1949_v21 = vadd.f32 %v3782_v3, %v1948_v12  ;;  %v708_v25 = vld [vmem:[%s707_s16] sm:$0x7]  ;;  %s739_s5 = scalar_lea.vmem %s5871_s1, %s738_s17  ;;  %734 = vst.msk [vmem:[#allocation3 + $0xac] ss:$8 sm:$0x7] %vm4262_vm0, %v732_v59  ;;  %s784_s16 = sadd.s32 67, %s4106_s18 }
 0x46b   : > { %710 = vst.msk [vmem:[#allocation3 + $0xa9] ss:$8 sm:$0x7] %vm4262_vm0, %v708_v25  ;;  %s5094_s17 = sld [smem:[#allocation6 + %s768_s30]] }
 0x46c   : > { %v1953_v27 = vsel %vm1952_vm13, %v3782_v3, %v1949_v21 }
 0x46d   : > { %v1958_v30 = vsel %vm1955_vm14, %v1957_v40, %v1953_v27  ;;  %s818_s0 = smul.u32 3, %s5111_s27 }
 0x46e   : > { %v1981_v34 = vmul.f32 %v1980_v23, %v1958_v30 }
 0x46f   : > { %s698_s19 = smul.u32 3, %s4994_s9  ;;  %s5097_s9 = sld [smem:[#allocation6 + %s776_s25]] }
 0x470   : > { %v1982_v42 = vadd.f32 %v1981_v34, %v1900_v31  ;;  %v1990_v2 = vld [vmem:[#allocation3 + $0x90] sm:$0xff]  ;;  %v1991_v3 = vld [vmem:[#allocation3 + $0x98] sm:$0xff]  ;;  %s819_s28 = scalar_lea.vmem %s5871_s1, %s818_s0  ;;  %s856_s25 = sadd.s32 76, %s4106_s18 }
 0x471   : > { %s699_s20 = scalar_lea.vmem %s5871_s1, %s698_s19  ;;  %v716_v34 = vld [vmem:[%s715_s22] sm:$0x7]  ;;  %s5099_s22 = sld [smem:[#allocation6 + %s784_s16]] }
 0x472   : > { %3783 = vtanh.f32 %v1982_v42  ;;  %v700_v33 = vld [vmem:[%s699_s20] sm:$0x7]  ;;  %718 = vst.msk [vmem:[#allocation3 + $0xaa] ss:$8 sm:$0x7] %vm4262_vm0, %v716_v34  ;;  %s760_s20 = sadd.s32 64, %s4106_s18 }
 0x473   : > { %702 = vst.msk [vmem:[#allocation3 + $0xa8] ss:$8 sm:$0x7] %vm4262_vm0, %v700_v33  ;;  %s5091_s11 = sld [smem:[#allocation6 + %s760_s20]]  ;;  %s770_s23 = smul.u32 3, %s5094_s17 }
 0x474   : > { %s802_s16 = smul.u32 3, %s5106_s29 }
 0x475   : > { %s778_s19 = smul.u32 3, %s5097_s9  ;;  %s771_s20 = scalar_lea.vmem %s5871_s1, %s770_s23 }
 0x476   : > { %s803_s23 = scalar_lea.vmem %s5871_s1, %s802_s16  ;;  %s864_s16 = sadd.s32 77, %s4106_s18 }
 0x477   : > { %s5208_s14 = sld [smem:[#allocation6 + %s864_s16]] }
 0x478   : > { %v3784_v51 = vpop.eup %3783 }
 0x479   : > { %v1985_v44 = vmul.f32 %v3784_v51, %v1984_v45  ;;  %v740_v45 = vld [vmem:[%s739_s5] sm:$0x7]  ;;  %s762_s26 = smul.u32 3, %s5091_s11  ;;  %s779_s11 = scalar_lea.vmem %s5871_s1, %s778_s19 }
 0x47a   : > { %742 = vst.msk [vmem:[#allocation3 + $0xad] ss:$8 sm:$0x7] %vm4262_vm0, %v740_v45  ;;  %s786_s5 = smul.u32 3, %s5099_s22 }
 0x47b   : > { %v4913_v43 = vadd.f32 %v1986_v18, %v1985_v44  ;;  %v748_v44 = vld [vmem:[%s747_s7] sm:$0x7]  ;;  %s763_s8 = scalar_lea.vmem %s5871_s1, %s762_s26  ;;  %s810_s22 = smul.u32 3, %s5108_s6 }
 0x47c   : > { %750 = vst.msk [vmem:[#allocation3 + $0xae] ss:$8 sm:$0x7] %vm4262_vm0, %v748_v44  ;;  %s787_s9 = scalar_lea.vmem %s5871_s1, %s786_s5  ;;  %s824_s7 = sadd.s32 72, %s4106_s18 }
 0x47d   : > { %v1988_v52 = vpack.c.bf16 %v4913_v43, %v4913_v43  ;;  %s811_s19 = scalar_lea.vmem %s5871_s1, %s810_s22  ;;  %s880_s22 = sadd.s32 79, %s4106_s18 }
 0x47f   : > { %1989 = vst [vmem:[#allocation4 + $0x14] sm:$0xf] %v1988_v52  ;;  %2001 = vmatmul.bf16.vlgmr.msrb.gmra.mxu2 %v1988_v52  ;;  %2014 = vmatmul.bf16.vlgmr.msrb.gmra.mxu3 %v1988_v52 }
 0x480   : > { %2027 = vmatmul.bf16.vlgmr.msra.gmra.mxu0 %v1988_v52  ;;  %2203 = vmatpush.bf16.msrb.mxu2 %v4056_v11  ;;  %v756_v52 = vld [vmem:[%s755_s21] sm:$0x7]  ;;  %s5193_s21 = sld [smem:[#allocation6 + %s824_s7]] }
 0x481   : > { %2269 = vmatpush.bf16.msrb.mxu3 %v4034_v4  ;;  %2282 = vmatpush.bf16.msra.mxu0 %v4210_v49  ;;  %758 = vst.msk [vmem:[#allocation3 + $0xaf] ss:$8 sm:$0x7] %vm4262_vm0, %v756_v52 }
 0x484   : > { %2204 = vmatpush.bf16.msrb.mxu2 %v4074_v17 }
 0x485   : > { %2270 = vmatpush.bf16.msrb.mxu3 %v4040_v6  ;;  %2283 = vmatpush.bf16.msra.mxu0 %v4250_v58 }
 0x486   : > { %s826_s0 = smul.u32 3, %s5193_s21 }
 0x488   : > { %2205 = vmatpush.bf16.msrb.mxu2 %v4093_v22 }
 0x489   : > { %2271 = vmatpush.bf16.msrb.mxu3 %v4065_v14  ;;  %2284 = vmatpush.bf16.msra.mxu0 %v4292_v5 }
 0x48c   : > { %2206 = vmatpush.bf16.msrb.mxu2 %v4119_v29 }
 0x48d   : > { %2272 = vmatpush.bf16.msrb.mxu3 %v4087_v20  ;;  %2285 = vmatpush.bf16.msra.mxu0 %v4307_v10 }
 0x490   : > { %2207 = vmatpush.bf16.msrb.mxu2 %v4150_v35 }
 0x491   : > { %2273 = vmatpush.bf16.msrb.mxu3 %v4110_v26  ;;  %2286 = vmatpush.bf16.msra.mxu0 %v4323_v15 }
 0x494   : > { %2208 = vmatpush.bf16.msrb.mxu2 %v4179_v41 }
 0x495   : > { %2274 = vmatpush.bf16.msrb.mxu3 %v4141_v32  ;;  %2287 = vmatpush.bf16.msra.mxu0 %v4335_v19 }
 0x498   : > { %2209 = vmatpush.bf16.msrb.mxu2 %v4205_v48 }
 0x499   : > { %2275 = vmatpush.bf16.msrb.mxu3 %v4170_v38  ;;  %2288 = vmatpush.bf16.msra.mxu0 %v4347_v24 }
 0x49c   : > { %2210 = vmatpush.bf16.msrb.mxu2 %v4244_v55 }
 0x49d   : > { %2276 = vmatpush.bf16.msrb.mxu3 %v4200_v46  ;;  %2289 = vmatpush.bf16.msra.mxu0 %v4359_v28 }
 0x4fd   : > { %v4989_v1 = vpop.f32.mrf.mxu0 }
 0x4fe   : > { %v2072_v0 = vadd.f32 %v4876_v8, %v4989_v1 }
 0x502   : > { %v2002_v7 = vpop.f32.mrf.mxu2  ;;  %v2015_v61 = vpop.f32.mrf.mxu3 }
 0x503   : > { %v2032_v50 = vadd.f32 %v2002_v7, %v1990_v2  ;;  %v2052_v9 = vadd.f32 %v2015_v61, %v1991_v3  ;;  %v1992_v7 = vld [vmem:[#allocation3 + $0xa0] sm:$0xff] }
 0x505   : > { %v3555_v12 = vmul.f32 -1.442695, %v2032_v50  ;;  %v3556_v13 = vmul.f32 -1.442695, %v2052_v9  ;;  %v2030_v16 = vpop.f32.mrf.mxu0 }
 0x507   : > { %3785 = vpow2.f32 %v3555_v12 }
 0x508   : > { %3787 = vpow2.f32 %v3556_v13 }
 0x50a   : > { %v2004_v21 = vpop.f32.mrf.mxu2  ;;  %v2017_v40 = vpop.f32.mrf.mxu3 }
 0x50d   : > { %v3786_v23 = vpop.eup %3785 }
 0x50e   : > { %v3788_v27 = vpop.eup %3787  ;;  %v2036_v30 = vadd.f32 1.0, %v3786_v23 }
 0x50f   : > { %v2056_v31 = vadd.f32 1.0, %v3788_v27 }
 0x510   : > { %3789 = vrcp.f32 %v2036_v30  ;;  %v2048_v39 = vand.u32 2147483648, %v2036_v30  ;;  %v2046_v56 = vand.u32 2147483647, %v2036_v30  ;;  %vm2042_vm5 = vweird.f32 %v2036_v30 }
 0x511   : > { %3791 = vrcp.f32 %v2056_v31  ;;  %v2068_v9 = vand.u32 2147483648, %v2056_v31  ;;  %vm2062_vm9 = vweird.f32 %v2056_v31  ;;  %v2066_v12 = vand.u32 2147483647, %v2056_v31 }
 0x512   : > { %v2049_v63 = vor.u32 1.1754944e-38, %v2048_v39  ;;  %vm2047_vm7 = vcmp.eq.f32.partialorder %v2046_v56, 8.507059e+37  ;;  %v772_v56 = vld [vmem:[%s771_s20] sm:$0x7]  ;;  %s848_s20 = sadd.s32 75, %s4106_s18 }
 0x513   : > { %v2069_v21 = vor.u32 1.1754944e-38, %v2068_v9  ;;  %vm2067_vm11 = vcmp.eq.f32.partialorder %v2066_v12, 8.507059e+37  ;;  %774 = vst.msk [vmem:[#allocation3 + $0xc1] ss:$8 sm:$0x7] %vm4262_vm0, %v772_v56  ;;  %s5202_s17 = sld [smem:[#allocation6 + %s848_s20]] }
 0x514   : > { %v820_v12 = vld [vmem:[%s819_s28] sm:$0x7]  ;;  %s896_s28 = sadd.s32 81, %s4106_s18 }
 0x515   : > { %822 = vst.msk [vmem:[#allocation3 + $0xc7] ss:$8 sm:$0x7] %vm4262_vm0, %v820_v12  ;;  %s897_s21 = sld [smem:[#allocation6 + %s896_s28]] }
 0x516   : > { %v3790_v42 = vpop.eup %3789 }
 0x517   : > { %v3792_v36 = vpop.eup %3791  ;;  %v2038_v47 = vmul.f32 %v3790_v42, %v2036_v30  ;;  %vm2043_vm4 = vweird.f32 %v3790_v42 }
 0x518   : > { %v2058_v51 = vmul.f32 %v3792_v36, %v2056_v31  ;;  %vm2044_vm6 = vmor %vm2042_vm5, %vm2043_vm4  ;;  %vm2063_vm8 = vweird.f32 %v3792_v36 }
 0x519   : > { %v2039_v18 = vsub.f32 1.0, %v2038_v47  ;;  %vm2064_vm10 = vmor %vm2062_vm9, %vm2063_vm8 }
 0x51a   : > { %v2059_v53 = vsub.f32 1.0, %v2058_v51 }
 0x51b   : > { %v2040_v54 = vmul.f32 %v3790_v42, %v2039_v18 }
 0x51c   : > { %v2060_v57 = vmul.f32 %v3792_v36, %v2059_v53 }
 0x51d   : > { %v2041_v60 = vadd.f32 %v3790_v42, %v2040_v54  ;;  %v764_v54 = vld [vmem:[%s763_s8] sm:$0x7]  ;;  %s832_s8 = sadd.s32 73, %s4106_s18 }
 0x51e   : > { %v2061_v61 = vadd.f32 %v3792_v36, %v2060_v57  ;;  %v780_v57 = vld [vmem:[%s779_s11] sm:$0x7]  ;;  %766 = vst.msk [vmem:[#allocation3 + $0xc0] ss:$8 sm:$0x7] %vm4262_vm0, %v764_v54  ;;  %s5196_s30 = sld [smem:[#allocation6 + %s832_s8]] }
 0x51f   : > { %v2045_v2 = vsel %vm2044_vm6, %v3790_v42, %v2041_v60  ;;  %v2083_v42 = vld [vmem:[#allocation3 + $0xb0] sm:$0xff]  ;;  %782 = vst.msk [vmem:[#allocation3 + $0xc2] ss:$8 sm:$0x7] %vm4262_vm0, %v780_v57  ;;  %s5199_s11 = sld [smem:[#allocation6 + %s840_s10]]  ;;  %s866_s8 = smul.u32 3, %s5208_s14 }
 0x520   : > { %v2050_v3 = vsel %vm2047_vm7, %v2049_v63, %v2045_v2  ;;  %v2065_v16 = vsel %vm2064_vm10, %v3792_v36, %v2061_v61  ;;  %v788_v63 = vld [vmem:[%s787_s9] sm:$0x7]  ;;  %s5205_s9 = sld [smem:[#allocation6 + %s856_s25]]  ;;  %s912_s10 = sadd.s32 83, %s4106_s18 }
 0x521   : > { %v2073_v50 = vmul.f32 %v2072_v0, %v2050_v3  ;;  %v2070_v40 = vsel %vm2067_vm11, %v2069_v21, %v2065_v16  ;;  %v796_v0 = vld [vmem:[%s795_s2] sm:$0x7]  ;;  %790 = vst.msk [vmem:[#allocation3 + $0xc3] ss:$8 sm:$0x7] %vm4262_vm0, %v788_v63  ;;  %s5212_s2 = sld [smem:[#allocation6 + %s880_s22]] }
 0x522   : > { %v2076_v23 = vsub.f32 1.0, %v2070_v40  ;;  %v2078_v30 = vmul.f32 %v2070_v40, %v4913_v43  ;;  %v2082_v43 = vld [vmem:[#allocation3 + $0xa8] sm:$0xff]  ;;  %798 = vst.msk [vmem:[#allocation3 + $0xc4] ss:$8 sm:$0x7] %vm4262_vm0, %v796_v0  ;;  %s928_s25 = sadd.s32 85, %s4106_s18 }
 0x523   : > { %v2074_v13 = vadd.f32 %v2073_v50, %v1992_v7  ;;  %v804_v7 = vld [vmem:[%s803_s23] sm:$0x7]  ;;  %s850_s23 = smul.u32 3, %s5202_s17  ;;  %s945_s14 = sld [smem:[#allocation6 + %s944_s12]] }
 0x524   : > { %806 = vst.msk [vmem:[#allocation3 + $0xc5] ss:$8 sm:$0x7] %vm4262_vm0, %v804_v7  ;;  %v812_v50 = vld [vmem:[%s811_s19] sm:$0x7]  ;;  %s834_s29 = smul.u32 3, %s5196_s30  ;;  %s827_s19 = scalar_lea.vmem %s5871_s1, %s826_s0 }
 0x525   : > { %3793 = vtanh.f32 %v2074_v13  ;;  %814 = vst.msk [vmem:[#allocation3 + $0xc6] ss:$8 sm:$0x7] %vm4262_vm0, %v812_v50  ;;  %s842_s26 = smul.u32 3, %s5199_s11  ;;  %s851_s16 = scalar_lea.vmem %s5871_s1, %s850_s23 }
 0x526   : > { %s858_s5 = smul.u32 3, %s5205_s9  ;;  %s835_s7 = scalar_lea.vmem %s5871_s1, %s834_s29 }
 0x527   : > { %s843_s20 = scalar_lea.vmem %s5871_s1, %s842_s26  ;;  %s874_s30 = smul.u32 3, %s5210_s13 }
 0x528   : > { %s882_s17 = smul.u32 3, %s5212_s2  ;;  %s859_s22 = scalar_lea.vmem %s5871_s1, %s858_s5 }
 0x529   : > { %s867_s29 = scalar_lea.vmem %s5871_s1, %s866_s8  ;;  %s875_s26 = scalar_lea.vmem %s5871_s1, %s874_s30 }
 0x52a   : > { %s883_s27 = scalar_lea.vmem %s5871_s1, %s882_s17  ;;  %s889_s8 = sld [smem:[#allocation6 + %s888_s24]] }
 0x52b   : > { %v3794_v27 = vpop.eup %3793  ;;  %s913_s11 = sld [smem:[#allocation6 + %s912_s10]] }
 0x52c   : > { %v2077_v1 = vmul.f32 %v3794_v27, %v2076_v23  ;;  %v2175_v56 = vld [vmem:[#allocation3 + $0xc8] sm:$0xff]  ;;  %s929_s9 = sld [smem:[#allocation6 + %s928_s25]] }
 0x52e   : > { %v5060_v33 = vadd.f32 %v2078_v30, %v2077_v1 }
 0x530   : > { %v2080_v25 = vpack.c.bf16 %v5060_v33, %v5060_v33  ;;  %s890_s0 = smul.u32 3, %s889_s8 }
 0x531   : > { %s914_s2 = smul.u32 3, %s913_s11 }
 0x532   : > { %2081 = vst [vmem:[#allocation4 + $0x18] sm:$0xf] %v2080_v25  ;;  %2093 = vmatmul.bf16.vlgmr.msra.gmra.mxu1 %v2080_v25  ;;  %2106 = vmatmul.bf16.vlgmr.msra.gmra.mxu2 %v2080_v25  ;;  %s891_s6 = scalar_lea.vmem %s5871_s1, %s890_s0  ;;  %s930_s28 = smul.u32 3, %s929_s9 }
 0x533   : > { %2119 = vmatmul.bf16.vlgmr.msra.gmra.mxu3 %v2080_v25  ;;  %2295 = vmatpush.bf16.msra.mxu1 %v4056_v11 }
 0x534   : > { %2361 = vmatpush.bf16.msra.mxu2 %v4034_v4  ;;  %2374 = vmatpush.bf16.msra.mxu3 %v4210_v49  ;;  %s931_s9 = scalar_lea.vmem %s5871_s1, %s930_s28 }
 0x537   : > { %2296 = vmatpush.bf16.msra.mxu1 %v4074_v17 }
 0x538   : > { %2362 = vmatpush.bf16.msra.mxu2 %v4040_v6  ;;  %2375 = vmatpush.bf16.msra.mxu3 %v4250_v58 }
 0x53b   : > { %2297 = vmatpush.bf16.msra.mxu1 %v4093_v22 }
 0x53c   : > { %2363 = vmatpush.bf16.msra.mxu2 %v4065_v14  ;;  %2376 = vmatpush.bf16.msra.mxu3 %v4292_v5 }
 0x53f   : > { %2298 = vmatpush.bf16.msra.mxu1 %v4119_v29 }
 0x540   : > { %2364 = vmatpush.bf16.msra.mxu2 %v4087_v20  ;;  %2377 = vmatpush.bf16.msra.mxu3 %v4307_v10 }
 0x543   : > { %2299 = vmatpush.bf16.msra.mxu1 %v4150_v35 }
 0x544   : > { %2365 = vmatpush.bf16.msra.mxu2 %v4110_v26  ;;  %2378 = vmatpush.bf16.msra.mxu3 %v4323_v15 }
 0x547   : > { %2300 = vmatpush.bf16.msra.mxu1 %v4179_v41 }
 0x548   : > { %2366 = vmatpush.bf16.msra.mxu2 %v4141_v32  ;;  %2379 = vmatpush.bf16.msra.mxu3 %v4335_v19 }
 0x54b   : > { %2301 = vmatpush.bf16.msra.mxu1 %v4205_v48 }
 0x54c   : > { %2367 = vmatpush.bf16.msra.mxu2 %v4170_v38  ;;  %2380 = vmatpush.bf16.msra.mxu3 %v4347_v24 }
 0x54f   : > { %2302 = vmatpush.bf16.msra.mxu1 %v4244_v55 }
 0x550   : > { %2368 = vmatpush.bf16.msra.mxu2 %v4200_v46  ;;  %2381 = vmatpush.bf16.msra.mxu3 %v4359_v28 }
 0x5af   : > { %v2094_v31 = vpop.f32.mrf.mxu1 }
 0x5b0   : > { %v2124_v34 = vadd.f32 %v2094_v31, %v2082_v43  ;;  %v2084_v43 = vld [vmem:[#allocation3 + $0xb8] sm:$0xff] }
 0x5b2   : > { %v3557_v37 = vmul.f32 -1.442695, %v2124_v34 }
 0x5b4   : > { %3795 = vpow2.f32 %v3557_v37 }
 0x5b5   : > { %v2107_v59 = vpop.f32.mrf.mxu2 }
 0x5b6   : > { %v2144_v36 = vadd.f32 %v2107_v59, %v2083_v42  ;;  %v2120_v47 = vpop.f32.mrf.mxu3 }
 0x5b7   : > { %v2096_v45 = vpop.f32.mrf.mxu1  ;;  %v2164_v25 = vadd.f32 %v4876_v8, %v2120_v47 }
 0x5b8   : > { %v3558_v51 = vmul.f32 -1.442695, %v2144_v36 }
 0x5ba   : > { %v3796_v44 = vpop.eup %3795  ;;  %3797 = vpow2.f32 %v3558_v51 }
 0x5bb   : > { %v2128_v18 = vadd.f32 1.0, %v3796_v44 }
 0x5bd   : > { %3799 = vrcp.f32 %v2128_v18  ;;  %v2109_v52 = vpop.f32.mrf.mxu2  ;;  %v2140_v9 = vand.u32 2147483648, %v2128_v18  ;;  %v2138_v16 = vand.u32 2147483647, %v2128_v18  ;;  %vm2134_vm13 = vweird.f32 %v2128_v18 }
 0x5be   : > { %v2122_v39 = vpop.f32.mrf.mxu3 }
 0x5bf   : > { %v2141_v27 = vor.u32 1.1754944e-38, %v2140_v9  ;;  %vm2139_vm15 = vcmp.eq.f32.partialorder %v2138_v16, 8.507059e+37 }
 0x5c0   : > { %v3798_v53 = vpop.eup %3797 }
 0x5c1   : > { %v2148_v60 = vadd.f32 1.0, %v3798_v53 }
 0x5c3   : > { %v3800_v2 = vpop.eup %3799  ;;  %3801 = vrcp.f32 %v2148_v60  ;;  %v2160_v37 = vand.u32 2147483648, %v2148_v60  ;;  %v2158_v59 = vand.u32 2147483647, %v2148_v60  ;;  %vm2154_vm2 = vweird.f32 %v2148_v60 }
 0x5c4   : > { %v2130_v3 = vmul.f32 %v3800_v2, %v2128_v18  ;;  %vm2135_vm12 = vweird.f32 %v3800_v2 }
 0x5c5   : > { %vm2136_vm14 = vmor %vm2134_vm13, %vm2135_vm12  ;;  %v2161_v51 = vor.u32 1.1754944e-38, %v2160_v37  ;;  %vm2159_vm4 = vcmp.eq.f32.partialorder %v2158_v59, 8.507059e+37 }
 0x5c6   : > { %v2131_v61 = vsub.f32 1.0, %v2130_v3 }
 0x5c8   : > { %v2132_v13 = vmul.f32 %v3800_v2, %v2131_v61 }
 0x5c9   : > { %v3802_v21 = vpop.eup %3801 }
 0x5ca   : > { %v2150_v40 = vmul.f32 %v3802_v21, %v2148_v60  ;;  %v2133_v23 = vadd.f32 %v3800_v2, %v2132_v13  ;;  %vm2155_vm1 = vweird.f32 %v3802_v21 }
 0x5cb   : > { %vm2156_vm3 = vmor %vm2154_vm2, %vm2155_vm1 }
 0x5cc   : > { %v2151_v1 = vsub.f32 1.0, %v2150_v40  ;;  %v2137_v30 = vsel %vm2136_vm14, %v3800_v2, %v2133_v23  ;;  %v828_v40 = vld [vmem:[%s827_s19] sm:$0x7]  ;;  %s968_s19 = sadd.s32 90, %s4106_s18 }
 0x5cd   : > { %v2142_v31 = vsel %vm2139_vm15, %v2141_v27, %v2137_v30  ;;  %v836_v23 = vld [vmem:[%s835_s7] sm:$0x7]  ;;  %830 = vst.msk [vmem:[#allocation3 + $0xd8] ss:$8 sm:$0x7] %vm4262_vm0, %v828_v40  ;;  %s904_s7 = sadd.s32 82, %s4106_s18 }
 0x5ce   : > { %v2152_v34 = vmul.f32 %v3802_v21, %v2151_v1  ;;  %v2165_v42 = vmul.f32 %v2164_v25, %v2142_v31  ;;  %v844_v27 = vld [vmem:[%s843_s20] sm:$0x7]  ;;  %838 = vst.msk [vmem:[#allocation3 + $0xd9] ss:$8 sm:$0x7] %vm4262_vm0, %v836_v23  ;;  %s920_s20 = sadd.s32 84, %s4106_s18 }
 0x5cf   : > { %v852_v1 = vld [vmem:[%s851_s16] sm:$0x7]  ;;  %846 = vst.msk [vmem:[#allocation3 + $0xda] ss:$8 sm:$0x7] %vm4262_vm0, %v844_v27  ;;  %s905_s30 = sld [smem:[#allocation6 + %s904_s7]] }
 0x5d0   : > { %v2166_v36 = vadd.f32 %v2165_v42, %v2084_v43  ;;  %v2153_v45 = vadd.f32 %v3802_v21, %v2152_v34  ;;  %v860_v25 = vld [vmem:[%s859_s22] sm:$0x7]  ;;  %854 = vst.msk [vmem:[#allocation3 + $0xdb] ss:$8 sm:$0x7] %vm4262_vm0, %v852_v1  ;;  %s936_s16 = sadd.s32 86, %s4106_s18 }
 0x5d1   : > { %v868_v34 = vld [vmem:[%s867_s29] sm:$0x7]  ;;  %862 = vst.msk [vmem:[#allocation3 + $0xdc] ss:$8 sm:$0x7] %vm4262_vm0, %v860_v25  ;;  %s921_s17 = sld [smem:[#allocation6 + %s920_s20]] }
 0x5d2   : > { %3803 = vtanh.f32 %v2166_v36  ;;  %v2157_v44 = vsel %vm2156_vm3, %v3802_v21, %v2153_v45  ;;  %v876_v42 = vld [vmem:[%s875_s26] sm:$0x7]  ;;  %870 = vst.msk [vmem:[#allocation3 + $0xdd] ss:$8 sm:$0x7] %vm4262_vm0, %v868_v34  ;;  %s937_s22 = sld [smem:[#allocation6 + %s936_s16]] }
 0x5d3   : > { %v2162_v18 = vsel %vm2159_vm4, %v2161_v51, %v2157_v44  ;;  %v884_v36 = vld [vmem:[%s883_s27] sm:$0x7]  ;;  %878 = vst.msk [vmem:[#allocation3 + $0xde] ss:$8 sm:$0x7] %vm4262_vm0, %v876_v42  ;;  %s898_s29 = smul.u32 3, %s897_s21  ;;  %s915_s21 = scalar_lea.vmem %s5871_s1, %s914_s2 }
 0x5d4   : > { %v2168_v52 = vsub.f32 1.0, %v2162_v18  ;;  %v2170_v8 = vmul.f32 %v2162_v18, %v5060_v33  ;;  %v2174_v33 = vld [vmem:[#allocation3 + $0xc0] sm:$0xff]  ;;  %886 = vst.msk [vmem:[#allocation3 + $0xdf] ss:$8 sm:$0x7] %vm4262_vm0, %v884_v36  ;;  %s984_s7 = sadd.s32 92, %s4106_s18 }
 0x5d5   : > { %s906_s13 = smul.u32 3, %s905_s30  ;;  %s899_s24 = scalar_lea.vmem %s5871_s1, %s898_s29 }
 0x5d6   : > { %s946_s30 = smul.u32 3, %s945_s14  ;;  %s969_s10 = sld [smem:[#allocation6 + %s968_s19]] }
 0x5d7   : > { %s922_s27 = smul.u32 3, %s921_s17  ;;  %s907_s20 = scalar_lea.vmem %s5871_s1, %s906_s13 }
 0x5d8   : > { %v3804_v39 = vpop.eup %3803  ;;  %s938_s25 = smul.u32 3, %s937_s22  ;;  %s947_s23 = scalar_lea.vmem %s5871_s1, %s946_s30 }
 0x5d9   : > { %v2169_v53 = vmul.f32 %v3804_v39, %v2168_v52  ;;  %s923_s0 = scalar_lea.vmem %s5871_s1, %s922_s27  ;;  %s960_s27 = sadd.s32 89, %s4106_s18 }
 0x5da   : > { %s939_s2 = scalar_lea.vmem %s5871_s1, %s938_s25  ;;  %s5390_s28 = sld [smem:[#allocation6 + %s960_s27]] }
 0x5db   : > { %v5162_v47 = vadd.f32 %v2170_v8, %v2169_v53  ;;  %v2266_v25 = vld [vmem:[#allocation3 + $0xd8] sm:$0xff]  ;;  %s1000_s16 = sadd.s32 94, %s4106_s18  ;;  %s5395_s8 = sld [smem:[#allocation6 + %s984_s7]] }
 0x5dc   : > { %s5400_s11 = sld [smem:[#allocation6 + %s1000_s16]]  ;;  %s970_s29 = smul.u32 3, %s969_s10 }
 0x5dd   : > { %v2172_v54 = vpack.c.bf16 %v5162_v47, %v5162_v47  ;;  %s1032_s26 = sadd.s32 98, %s4106_s18  ;;  %s1048_s19 = sadd.s32 100, %s4106_s18 }
 0x5de   : > { %s5495_s7 = sld [smem:[#allocation6 + %s1048_s19]]  ;;  %s1064_s10 = sadd.s32 102, %s4106_s18 }
 0x5df   : > { %2173 = vst [vmem:[#allocation4 + $0x1c] sm:$0xf] %v2172_v54  ;;  %2185 = vmatmul.bf16.vlgmr.msrb.gmra.mxu0 %v2172_v54  ;;  %2198 = vmatmul.bf16.vlgmr.msrb.gmra.mxu1 %v2172_v54  ;;  %s5501_s16 = sld [smem:[#allocation6 + %s1064_s10]]  ;;  %s1096_s22 = sadd.s32 106, %s4106_s18 }
 0x5e0   : > { %2211 = vmatmul.bf16.vlgmr.msrb.gmra.mxu2 %v2172_v54  ;;  %2387 = vmatpush.bf16.msrb.mxu0 %v4056_v11  ;;  %v5269_v54 = vld [vmem:[%s5873_s3] ss:$0 sm:$0xff]  ;;  %s962_s17 = smul.u32 3, %s5390_s28  ;;  %s1128_s19 = sadd.s32 110, %s4106_s18 }
 0x5e1   : > { %2453 = vmatpush.bf16.msrb.mxu1 %v4034_v4  ;;  %2466 = vmatpush.bf16.msrb.mxu2 %v4210_v49  ;;  %s986_s14 = smul.u32 3, %s5395_s8 }
 0x5e2   : > { %s1002_s28 = smul.u32 3, %s5400_s11 }
 0x5e4   : > { %2388 = vmatpush.bf16.msrb.mxu0 %v4074_v17  ;;  %s1050_s11 = smul.u32 3, %s5495_s7  ;;  %s5603_s7 = sld [smem:[#allocation6 + %s1128_s19]] }
 0x5e5   : > { %2454 = vmatpush.bf16.msrb.mxu1 %v4040_v6  ;;  %2467 = vmatpush.bf16.msrb.mxu2 %v4250_v58 }
 0x5e6   : > { %s1051_s10 = scalar_lea.vmem %s5871_s1, %s1050_s11  ;;  %s1192_s11 = sadd.s32 118, %s4106_s18 }
 0x5e8   : > { %2389 = vmatpush.bf16.msrb.mxu0 %v4093_v22 }
 0x5e9   : > { %2455 = vmatpush.bf16.msrb.mxu1 %v4065_v14  ;;  %2468 = vmatpush.bf16.msrb.mxu2 %v4292_v5 }
 0x5ec   : > { %2390 = vmatpush.bf16.msrb.mxu0 %v4119_v29 }
 0x5ed   : > { %2456 = vmatpush.bf16.msrb.mxu1 %v4087_v20  ;;  %2469 = vmatpush.bf16.msrb.mxu2 %v4307_v10 }
 0x5f0   : > { %2391 = vmatpush.bf16.msrb.mxu0 %v4150_v35 }
 0x5f1   : > { %2457 = vmatpush.bf16.msrb.mxu1 %v4110_v26  ;;  %2470 = vmatpush.bf16.msrb.mxu2 %v4323_v15 }
 0x5f4   : > { %2392 = vmatpush.bf16.msrb.mxu0 %v4179_v41 }
 0x5f5   : > { %2458 = vmatpush.bf16.msrb.mxu1 %v4141_v32  ;;  %2471 = vmatpush.bf16.msrb.mxu2 %v4335_v19 }
 0x5f8   : > { %2393 = vmatpush.bf16.msrb.mxu0 %v4205_v48 }
 0x5f9   : > { %2459 = vmatpush.bf16.msrb.mxu1 %v4170_v38  ;;  %2472 = vmatpush.bf16.msrb.mxu2 %v4347_v24 }
 0x5fc   : > { %2394 = vmatpush.bf16.msrb.mxu0 %v4244_v55 }
 0x5fd   : > { %2460 = vmatpush.bf16.msrb.mxu1 %v4200_v46  ;;  %2473 = vmatpush.bf16.msrb.mxu2 %v4359_v28 }
 0x65c   : > { %v2186_v57 = vpop.f32.mrf.mxu0  ;;  %v2199_v60 = vpop.f32.mrf.mxu1 }
 0x65d   : > { %v2216_v63 = vadd.f32 %v2186_v57, %v2174_v33  ;;  %v2236_v0 = vadd.f32 %v2199_v60, %v2175_v56  ;;  %v2176_v56 = vld [vmem:[#allocation3 + $0xd0] sm:$0xff] }
 0x65f   : > { %v3559_v2 = vmul.f32 -1.442695, %v2216_v63  ;;  %v3560_v3 = vmul.f32 -1.442695, %v2236_v0 }
 0x661   : > { %3805 = vpow2.f32 %v3559_v2 }
 0x662   : > { %3807 = vpow2.f32 %v3560_v3 }
 0x663   : > { %v2212_v7 = vpop.f32.mrf.mxu2 }
 0x664   : > { %v2188_v61 = vpop.f32.mrf.mxu0  ;;  %v2201_v50 = vpop.f32.mrf.mxu1  ;;  %v2256_v33 = vadd.f32 %v5269_v54, %v2212_v7 }
 0x667   : > { %v3806_v9 = vpop.eup %3805 }
 0x668   : > { %v3808_v12 = vpop.eup %3807  ;;  %v2220_v13 = vadd.f32 1.0, %v3806_v9 }
 0x669   : > { %v5218_v16 = vadd.f32 1.0, %v3808_v12 }
 0x66a   : > { %3809 = vrcp.f32 %v2220_v13  ;;  %v2232_v51 = vand.u32 2147483648, %v2220_v13  ;;  %v2230_v18 = vand.u32 2147483647, %v2220_v13  ;;  %vm2226_vm6 = vweird.f32 %v2220_v13 }
 0x66b   : > { %3811 = vrcp.f32 %v5218_v16  ;;  %v2214_v21 = vpop.f32.mrf.mxu2  ;;  %v2252_v63 = vand.u32 2147483648, %v5218_v16  ;;  %vm2246_vm10 = vweird.f32 %v5218_v16  ;;  %v2250_v2 = vand.u32 2147483647, %v5218_v16 }
 0x66c   : > { %v2233_v53 = vor.u32 1.1754944e-38, %v2232_v51  ;;  %vm2231_vm8 = vcmp.eq.f32.partialorder %v2230_v18, 8.507059e+37 }
 0x66d   : > { %v2253_v50 = vor.u32 1.1754944e-38, %v2252_v63  ;;  %vm2251_vm12 = vcmp.eq.f32.partialorder %v2250_v2, 8.507059e+37 }
 0x670   : > { %v3810_v30 = vpop.eup %3809 }
 0x671   : > { %v3812_v43 = vpop.eup %3811  ;;  %v2222_v31 = vmul.f32 %v3810_v30, %v2220_v13  ;;  %vm2227_vm5 = vweird.f32 %v3810_v30 }
 0x672   : > { %v2242_v37 = vmul.f32 %v3812_v43, %v5218_v16  ;;  %vm2228_vm7 = vmor %vm2226_vm6, %vm2227_vm5  ;;  %vm2247_vm9 = vweird.f32 %v3812_v43 }
 0x673   : > { %v2223_v59 = vsub.f32 1.0, %v2222_v31  ;;  %vm2248_vm11 = vmor %vm2246_vm10, %vm2247_vm9 }
 0x674   : > { %v2243_v45 = vsub.f32 1.0, %v2242_v37 }
 0x675   : > { %v2224_v44 = vmul.f32 %v3810_v30, %v2223_v59 }
 0x676   : > { %v2244_v52 = vmul.f32 %v3812_v43, %v2243_v45 }
 0x677   : > { %v2225_v39 = vadd.f32 %v3810_v30, %v2224_v44 }
 0x678   : > { %v2245_v60 = vadd.f32 %v3812_v43, %v2244_v52 }
 0x679   : > { %v2229_v8 = vsel %vm2228_vm7, %v3810_v30, %v2225_v39 }
 0x67a   : > { %v2234_v57 = vsel %vm2231_vm8, %v2233_v53, %v2229_v8  ;;  %v2249_v61 = vsel %vm2248_vm11, %v3812_v43, %v2245_v60 }
 0x67b   : > { %v2257_v0 = vmul.f32 %v2256_v33, %v2234_v57  ;;  %v2254_v9 = vsel %vm2251_vm12, %v2253_v50, %v2249_v61 }
 0x67c   : > { %v2260_v12 = vsub.f32 1.0, %v2254_v9  ;;  %v2262_v21 = vmul.f32 %v2254_v9, %v5162_v47  ;;  %v2267_v47 = vld [vmem:[#allocation3 + $0xe0] sm:$0xff]  ;;  %v2268_v9 = vld [vmem:[#allocation3 + $0xe8] sm:$0xff] }
 0x67d   : > { %v2258_v3 = vadd.f32 %v2257_v0, %v2176_v56 }
 0x67f   : > { %3813 = vtanh.f32 %v2258_v3 }
 0x685   : > { %v3814_v7 = vpop.eup %3813 }
 0x686   : > { %v2261_v13 = vmul.f32 %v3814_v7, %v2260_v12 }
 0x688   : > { %v5276_v40 = vadd.f32 %v2262_v21, %v2261_v13 }
 0x68a   : > { %v2264_v23 = vpack.c.bf16 %v5276_v40, %v5276_v40 }
 0x68c   : > { %2265 = vst [vmem:[#allocation4 + $0x20] sm:$0xf] %v2264_v23  ;;  %2277 = vmatmul.bf16.vlgmr.msrb.gmra.mxu3 %v2264_v23  ;;  %2290 = vmatmul.bf16.vlgmr.msra.gmra.mxu0 %v2264_v23 }
 0x68d   : > { %2303 = vmatmul.bf16.vlgmr.msra.gmra.mxu1 %v2264_v23  ;;  %2479 = vmatpush.bf16.msrb.mxu3 %v4056_v11 }
 0x68e   : > { %2545 = vmatpush.bf16.msra.mxu0 %v4034_v4  ;;  %2558 = vmatpush.bf16.msra.mxu1 %v4210_v49 }
 0x691   : > { %2480 = vmatpush.bf16.msrb.mxu3 %v4074_v17 }
 0x692   : > { %2546 = vmatpush.bf16.msra.mxu0 %v4040_v6  ;;  %2559 = vmatpush.bf16.msra.mxu1 %v4250_v58 }
 0x695   : > { %2481 = vmatpush.bf16.msrb.mxu3 %v4093_v22 }
 0x696   : > { %2547 = vmatpush.bf16.msra.mxu0 %v4065_v14  ;;  %2560 = vmatpush.bf16.msra.mxu1 %v4292_v5 }
 0x699   : > { %2482 = vmatpush.bf16.msrb.mxu3 %v4119_v29 }
 0x69a   : > { %2548 = vmatpush.bf16.msra.mxu0 %v4087_v20  ;;  %2561 = vmatpush.bf16.msra.mxu1 %v4307_v10 }
 0x69d   : > { %2483 = vmatpush.bf16.msrb.mxu3 %v4150_v35 }
 0x69e   : > { %2549 = vmatpush.bf16.msra.mxu0 %v4110_v26  ;;  %2562 = vmatpush.bf16.msra.mxu1 %v4323_v15 }
 0x6a1   : > { %2484 = vmatpush.bf16.msrb.mxu3 %v4179_v41 }
 0x6a2   : > { %2550 = vmatpush.bf16.msra.mxu0 %v4141_v32  ;;  %2563 = vmatpush.bf16.msra.mxu1 %v4335_v19 }
 0x6a5   : > { %2485 = vmatpush.bf16.msrb.mxu3 %v4205_v48 }
 0x6a6   : > { %2551 = vmatpush.bf16.msra.mxu0 %v4170_v38  ;;  %2564 = vmatpush.bf16.msra.mxu1 %v4347_v24 }
 0x6a9   : > { %2486 = vmatpush.bf16.msrb.mxu3 %v4244_v55 }
 0x6aa   : > { %2552 = vmatpush.bf16.msra.mxu0 %v4200_v46  ;;  %2565 = vmatpush.bf16.msra.mxu1 %v4359_v28 }
 0x709   : > { %v2291_v16 = vpop.f32.mrf.mxu0 }
 0x70a   : > { %v2328_v27 = vadd.f32 %v2291_v16, %v2267_v47  ;;  %v2304_v1 = vpop.f32.mrf.mxu1 }
 0x70b   : > { %v2348_v3 = vadd.f32 %v5269_v54, %v2304_v1 }
 0x70c   : > { %v3562_v30 = vmul.f32 -1.442695, %v2328_v27 }
 0x70e   : > { %3815 = vpow2.f32 %v3562_v30 }
 0x70f   : > { %v2278_v43 = vpop.f32.mrf.mxu3 }
 0x710   : > { %v2308_v31 = vadd.f32 %v2278_v43, %v2266_v25 }
 0x711   : > { %v2293_v34 = vpop.f32.mrf.mxu0 }
 0x712   : > { %v3561_v37 = vmul.f32 -1.442695, %v2308_v31  ;;  %v2306_v42 = vpop.f32.mrf.mxu1 }
 0x713   : > { %v908_v42 = vld [vmem:[%s907_s20] sm:$0x7]  ;;  %s992_s20 = sadd.s32 93, %s4106_s18 }
 0x714   : > { %v3816_v59 = vpop.eup %3815  ;;  %3817 = vpow2.f32 %v3561_v37  ;;  %v900_v37 = vld [vmem:[%s899_s24] sm:$0x7]  ;;  %910 = vst.msk [vmem:[#allocation3 + $0xf2] ss:$8 sm:$0x7] %vm4262_vm0, %v908_v42  ;;  %s976_s24 = sadd.s32 91, %s4106_s18 }
 0x715   : > { %v2332_v36 = vadd.f32 1.0, %v3816_v59  ;;  %v916_v59 = vld [vmem:[%s915_s21] sm:$0x7]  ;;  %902 = vst.msk [vmem:[#allocation3 + $0xf1] ss:$8 sm:$0x7] %vm4262_vm0, %v900_v37 }
 0x716   : > { %918 = vst.msk [vmem:[#allocation3 + $0xf3] ss:$8 sm:$0x7] %vm4262_vm0, %v916_v59  ;;  %s977_s25 = sld [smem:[#allocation6 + %s976_s24]]  ;;  %s1008_s21 = sadd.s32 95, %s4106_s18 }
 0x717   : > { %v2280_v45 = vpop.f32.mrf.mxu3  ;;  %3819 = vrcp.f32 %v2332_v36  ;;  %v2344_v7 = vand.u32 2147483648, %v2332_v36  ;;  %vm2338_vm3 = vweird.f32 %v2332_v36  ;;  %v2342_v21 = vand.u32 2147483647, %v2332_v36  ;;  %s5398_s30 = sld [smem:[#allocation6 + %s992_s20]]  ;;  %s971_s24 = scalar_lea.vmem %s5871_s1, %s970_s29 }
 0x718   : > { %v932_v45 = vld [vmem:[%s931_s9] sm:$0x7]  ;;  %s5402_s12 = sld [smem:[#allocation6 + %s1008_s21]]  ;;  %s987_s21 = scalar_lea.vmem %s5871_s1, %s986_s14 }
 0x719   : > { %v2345_v16 = vor.u32 1.1754944e-38, %v2344_v7  ;;  %vm2343_vm5 = vcmp.eq.f32.partialorder %v2342_v21, 8.507059e+37  ;;  %934 = vst.msk [vmem:[#allocation3 + $0xf5] ss:$8 sm:$0x7] %vm4262_vm0, %v932_v45  ;;  %s1003_s29 = scalar_lea.vmem %s5871_s1, %s1002_s28  ;;  %s1024_s14 = sadd.s32 97, %s4106_s18 }
 0x71a   : > { %v3818_v51 = vpop.eup %3817  ;;  %s1056_s28 = sadd.s32 101, %s4106_s18 }
 0x71b   : > { %v2312_v44 = vadd.f32 1.0, %v3818_v51  ;;  %v940_v51 = vld [vmem:[%s939_s2] sm:$0x7] }
 0x71c   : > { %942 = vst.msk [vmem:[#allocation3 + $0xf6] ss:$8 sm:$0x7] %vm4262_vm0, %v940_v51  ;;  %s978_s9 = smul.u32 3, %s977_s25 }
 0x71d   : > { %3821 = vrcp.f32 %v2312_v44  ;;  %v3820_v18 = vpop.eup %3819  ;;  %v2324_v56 = vand.u32 2147483648, %v2312_v44  ;;  %v2322_v60 = vand.u32 2147483647, %v2312_v44  ;;  %vm2318_vm14 = vweird.f32 %v2312_v44  ;;  %s994_s27 = smul.u32 3, %s5398_s30 }
 0x71e   : > { %v2334_v52 = vmul.f32 %v3820_v18, %v2332_v36  ;;  %vm2339_vm2 = vweird.f32 %v3820_v18  ;;  %v924_v36 = vld [vmem:[%s923_s0] sm:$0x7]  ;;  %s979_s20 = scalar_lea.vmem %s5871_s1, %s978_s9  ;;  %s1010_s25 = smul.u32 3, %s5402_s12 }
 0x71f   : > { %v2325_v2 = vor.u32 1.1754944e-38, %v2324_v56  ;;  %vm2323_vm1 = vcmp.eq.f32.partialorder %v2322_v60, 8.507059e+37  ;;  %vm2340_vm4 = vmor %vm2338_vm3, %vm2339_vm2  ;;  %926 = vst.msk [vmem:[#allocation3 + $0xf4] ss:$8 sm:$0x7] %vm4262_vm0, %v924_v36 }
 0x720   : > { %v2335_v8 = vsub.f32 1.0, %v2334_v52  ;;  %v980_v21 = vld [vmem:[%s979_s20] sm:$0x7]  ;;  %s1011_s13 = scalar_lea.vmem %s5871_s1, %s1010_s25  ;;  %s1072_s20 = sadd.s32 103, %s4106_s18 }
 0x721   : > { %982 = vst.msk [vmem:[#allocation3 + $0x10b] ss:$8 sm:$0x7] %vm4262_vm0, %v980_v21  ;;  %s5499_s25 = sld [smem:[#allocation6 + %s1056_s28]] }
 0x722   : > { %v2336_v63 = vmul.f32 %v3820_v18, %v2335_v8 }
 0x723   : > { %v3822_v39 = vpop.eup %3821 }
 0x724   : > { %v2314_v53 = vmul.f32 %v3822_v39, %v2312_v44  ;;  %vm2319_vm13 = vweird.f32 %v3822_v39  ;;  %v2337_v12 = vadd.f32 %v3820_v18, %v2336_v63  ;;  %v948_v44 = vld [vmem:[%s947_s23] sm:$0x7] }
 0x725   : > { %vm2320_vm15 = vmor %vm2318_vm14, %vm2319_vm13  ;;  %950 = vst.msk [vmem:[#allocation3 + $0xf7] ss:$8 sm:$0x7] %vm4262_vm0, %v948_v44 }
 0x726   : > { %v2315_v33 = vsub.f32 1.0, %v2314_v53  ;;  %v2341_v47 = vsel %vm2340_vm4, %v3820_v18, %v2337_v12 }
 0x727   : > { %v2346_v27 = vsel %vm2343_vm5, %v2345_v16, %v2341_v47  ;;  %v988_v47 = vld [vmem:[%s987_s21] sm:$0x7]  ;;  %s5504_s21 = sld [smem:[#allocation6 + %s1072_s20]] }
 0x728   : > { %v2316_v57 = vmul.f32 %v3822_v39, %v2315_v33  ;;  %v2352_v30 = vsub.f32 1.0, %v2346_v27  ;;  %v2354_v43 = vmul.f32 %v2346_v27, %v5276_v40  ;;  %v892_v40 = vld [vmem:[%s891_s6] sm:$0x7]  ;;  %s952_s6 = sadd.s32 88, %s4106_s18 }
 0x729   : > { %894 = vst.msk [vmem:[#allocation3 + $0xf0] ss:$8 sm:$0x7] %vm4262_vm0, %v892_v40  ;;  %s5387_s5 = sld [smem:[#allocation6 + %s952_s6]]  ;;  %s963_s6 = scalar_lea.vmem %s5871_s1, %s962_s17 }
 0x72a   : > { %v2317_v0 = vadd.f32 %v3822_v39, %v2316_v57  ;;  %v964_v7 = vld [vmem:[%s963_s6] sm:$0x7]  ;;  %s995_s17 = scalar_lea.vmem %s5871_s1, %s994_s27  ;;  %990 = vst.msk [vmem:[#allocation3 + $0x10c] ss:$8 sm:$0x7] %vm4262_vm0, %v988_v47  ;;  %s1040_s6 = sadd.s32 99, %s4106_s18 }
 0x72b   : > { %966 = vst.msk [vmem:[#allocation3 + $0x109] ss:$8 sm:$0x7] %vm4262_vm0, %v964_v7  ;;  %s5487_s27 = sld [smem:[#allocation6 + %s1024_s14]] }
 0x72c   : > { %v2321_v61 = vsel %vm2320_vm15, %v3822_v39, %v2317_v0 }
 0x72d   : > { %v2326_v50 = vsel %vm2323_vm1, %v2325_v2, %v2321_v61  ;;  %s1074_s20 = smul.u32 3, %s5504_s21 }
 0x72e   : > { %v2349_v13 = vmul.f32 %v2348_v3, %v2326_v50 }
 0x72f   : > { %s954_s0 = smul.u32 3, %s5387_s5  ;;  %s5490_s5 = sld [smem:[#allocation6 + %s1032_s26]] }
 0x730   : > { %v2350_v23 = vadd.f32 %v2349_v13, %v2268_v9  ;;  %v2358_v52 = vld [vmem:[#allocation3 + $0xf0] sm:$0xff]  ;;  %v2359_v39 = vld [vmem:[#allocation3 + $0xf8] sm:$0xff]  ;;  %s1075_s12 = scalar_lea.vmem %s5871_s1, %s1074_s20  ;;  %s1112_s26 = sadd.s32 108, %s4106_s18 }
 0x731   : > { %s955_s2 = scalar_lea.vmem %s5871_s1, %s954_s0  ;;  %v972_v13 = vld [vmem:[%s971_s24] sm:$0x7]  ;;  %s5492_s24 = sld [smem:[#allocation6 + %s1040_s6]] }
 0x732   : > { %3823 = vtanh.f32 %v2350_v23  ;;  %v956_v12 = vld [vmem:[%s955_s2] sm:$0x7]  ;;  %974 = vst.msk [vmem:[#allocation3 + $0x10a] ss:$8 sm:$0x7] %vm4262_vm0, %v972_v13  ;;  %s1016_s2 = sadd.s32 96, %s4106_s18 }
 0x733   : > { %958 = vst.msk [vmem:[#allocation3 + $0x108] ss:$8 sm:$0x7] %vm4262_vm0, %v956_v12  ;;  %s5484_s23 = sld [smem:[#allocation6 + %s1016_s2]]  ;;  %s1026_s30 = smul.u32 3, %s5487_s27 }
 0x734   : > { %s1058_s6 = smul.u32 3, %s5499_s25 }
 0x735   : > { %s1034_s0 = smul.u32 3, %s5490_s5  ;;  %s1027_s2 = scalar_lea.vmem %s5871_s1, %s1026_s30 }
 0x736   : > { %s1059_s30 = scalar_lea.vmem %s5871_s1, %s1058_s6  ;;  %s1120_s6 = sadd.s32 109, %s4106_s18 }
 0x737   : > { %s5601_s28 = sld [smem:[#allocation6 + %s1120_s6]] }
 0x738   : > { %v3824_v25 = vpop.eup %3823 }
 0x739   : > { %v2353_v1 = vmul.f32 %v3824_v25, %v2352_v30  ;;  %v996_v30 = vld [vmem:[%s995_s17] sm:$0x7]  ;;  %s1018_s8 = smul.u32 3, %s5484_s23  ;;  %s1035_s23 = scalar_lea.vmem %s5871_s1, %s1034_s0 }
 0x73a   : > { %998 = vst.msk [vmem:[#allocation3 + $0x10d] ss:$8 sm:$0x7] %vm4262_vm0, %v996_v30  ;;  %s1042_s17 = smul.u32 3, %s5492_s24 }
 0x73b   : > { %v5306_v31 = vadd.f32 %v2354_v43, %v2353_v1  ;;  %v1004_v1 = vld [vmem:[%s1003_s29] sm:$0x7]  ;;  %s1019_s9 = scalar_lea.vmem %s5871_s1, %s1018_s8  ;;  %s1066_s24 = smul.u32 3, %s5501_s16 }
 0x73c   : > { %1006 = vst.msk [vmem:[#allocation3 + $0x10e] ss:$8 sm:$0x7] %vm4262_vm0, %v1004_v1  ;;  %s1043_s5 = scalar_lea.vmem %s5871_s1, %s1042_s17  ;;  %s1080_s29 = sadd.s32 104, %s4106_s18 }
 0x73d   : > { %v2356_v34 = vpack.c.bf16 %v5306_v31, %v5306_v31  ;;  %s1067_s0 = scalar_lea.vmem %s5871_s1, %s1066_s24  ;;  %s1136_s24 = sadd.s32 111, %s4106_s18 }
 0x73e   : > { %s1176_s16 = sadd.s32 116, %s4106_s18 }
 0x73f   : > { %2357 = vst [vmem:[#allocation4 + $0x24] sm:$0xf] %v2356_v34  ;;  %2369 = vmatmul.bf16.vlgmr.msra.gmra.mxu2 %v2356_v34  ;;  %2382 = vmatmul.bf16.vlgmr.msra.gmra.mxu3 %v2356_v34 }
 0x740   : > { %2395 = vmatmul.bf16.vlgmr.msrb.gmra.mxu0 %v2356_v34  ;;  %2571 = vmatpush.bf16.msra.mxu2 %v4056_v11  ;;  %v1012_v34 = vld [vmem:[%s1011_s13] sm:$0x7]  ;;  %s5586_s13 = sld [smem:[#allocation6 + %s1080_s29]] }
 0x741   : > { %2637 = vmatpush.bf16.msra.mxu3 %v4034_v4  ;;  %2650 = vmatpush.bf16.msrb.mxu0 %v4210_v49  ;;  %1014 = vst.msk [vmem:[#allocation3 + $0x10f] ss:$8 sm:$0x7] %vm4262_vm0, %v1012_v34 }
 0x744   : > { %2572 = vmatpush.bf16.msra.mxu2 %v4074_v17 }
 0x745   : > { %2638 = vmatpush.bf16.msra.mxu3 %v4040_v6  ;;  %2651 = vmatpush.bf16.msrb.mxu0 %v4250_v58 }
 0x746   : > { %s1082_s20 = smul.u32 3, %s5586_s13 }
 0x748   : > { %2573 = vmatpush.bf16.msra.mxu2 %v4093_v22 }
 0x749   : > { %2639 = vmatpush.bf16.msra.mxu3 %v4065_v14  ;;  %2652 = vmatpush.bf16.msrb.mxu0 %v4292_v5 }
 0x74c   : > { %2574 = vmatpush.bf16.msra.mxu2 %v4119_v29 }
 0x74d   : > { %2640 = vmatpush.bf16.msra.mxu3 %v4087_v20  ;;  %2653 = vmatpush.bf16.msrb.mxu0 %v4307_v10 }
 0x750   : > { %2575 = vmatpush.bf16.msra.mxu2 %v4150_v35 }
 0x751   : > { %2641 = vmatpush.bf16.msra.mxu3 %v4110_v26  ;;  %2654 = vmatpush.bf16.msrb.mxu0 %v4323_v15 }
 0x754   : > { %2576 = vmatpush.bf16.msra.mxu2 %v4179_v41 }
 0x755   : > { %2642 = vmatpush.bf16.msra.mxu3 %v4141_v32  ;;  %2655 = vmatpush.bf16.msrb.mxu0 %v4335_v19 }
 0x758   : > { %2577 = vmatpush.bf16.msra.mxu2 %v4205_v48 }
 0x759   : > { %2643 = vmatpush.bf16.msra.mxu3 %v4170_v38  ;;  %2656 = vmatpush.bf16.msrb.mxu0 %v4347_v24 }
 0x75c   : > { %2578 = vmatpush.bf16.msra.mxu2 %v4244_v55 }
 0x75d   : > { %2644 = vmatpush.bf16.msra.mxu3 %v4200_v46  ;;  %2657 = vmatpush.bf16.msrb.mxu0 %v4359_v28 }
 0x7bd   : > { %v5382_v18 = vpop.f32.mrf.mxu0 }
 0x7be   : > { %v2440_v44 = vadd.f32 %v5269_v54, %v5382_v18 }
 0x7c2   : > { %v2370_v53 = vpop.f32.mrf.mxu2  ;;  %v2383_v8 = vpop.f32.mrf.mxu3 }
 0x7c3   : > { %v2400_v33 = vadd.f32 %v2370_v53, %v2358_v52  ;;  %v2420_v56 = vadd.f32 %v2383_v8, %v2359_v39  ;;  %v2360_v53 = vld [vmem:[#allocation3 + $0x100] sm:$0xff] }
 0x7c5   : > { %v3563_v57 = vmul.f32 -1.442695, %v2400_v33  ;;  %v3564_v60 = vmul.f32 -1.442695, %v2420_v56  ;;  %v2398_v63 = vpop.f32.mrf.mxu0 }
 0x7c7   : > { %3825 = vpow2.f32 %v3563_v57 }
 0x7c8   : > { %3827 = vpow2.f32 %v3564_v60 }
 0x7ca   : > { %v2372_v0 = vpop.f32.mrf.mxu2  ;;  %v2385_v2 = vpop.f32.mrf.mxu3 }
 0x7cd   : > { %v3826_v3 = vpop.eup %3825 }
 0x7ce   : > { %v3828_v61 = vpop.eup %3827  ;;  %v2404_v50 = vadd.f32 1.0, %v3826_v3 }
 0x7cf   : > { %v2424_v9 = vadd.f32 1.0, %v3828_v61 }
 0x7d0   : > { %3829 = vrcp.f32 %v2404_v50  ;;  %v2416_v40 = vand.u32 2147483648, %v2404_v50  ;;  %v2414_v59 = vand.u32 2147483647, %v2404_v50  ;;  %vm2410_vm7 = vweird.f32 %v2404_v50 }
 0x7d1   : > { %3831 = vrcp.f32 %v2424_v9  ;;  %v2436_v56 = vand.u32 2147483648, %v2424_v9  ;;  %vm2430_vm11 = vweird.f32 %v2424_v9  ;;  %v2434_v57 = vand.u32 2147483647, %v2424_v9 }
 0x7d2   : > { %v2417_v51 = vor.u32 1.1754944e-38, %v2416_v40  ;;  %vm2415_vm9 = vcmp.eq.f32.partialorder %v2414_v59, 8.507059e+37  ;;  %v1028_v59 = vld [vmem:[%s1027_s2] sm:$0x7]  ;;  %s1104_s2 = sadd.s32 107, %s4106_s18 }
 0x7d3   : > { %v2437_v0 = vor.u32 1.1754944e-38, %v2436_v56  ;;  %vm2435_vm13 = vcmp.eq.f32.partialorder %v2434_v57, 8.507059e+37  ;;  %1030 = vst.msk [vmem:[#allocation3 + $0x121] ss:$8 sm:$0x7] %vm4262_vm0, %v1028_v59  ;;  %s5595_s27 = sld [smem:[#allocation6 + %s1104_s2]] }
 0x7d4   : > { %v1076_v57 = vld [vmem:[%s1075_s12] sm:$0x7]  ;;  %s1177_s12 = sld [smem:[#allocation6 + %s1176_s16]] }
 0x7d5   : > { %1078 = vst.msk [vmem:[#allocation3 + $0x127] ss:$8 sm:$0x7] %vm4262_vm0, %v1076_v57 }
 0x7d6   : > { %v3830_v23 = vpop.eup %3829 }
 0x7d7   : > { %v3832_v16 = vpop.eup %3831  ;;  %v2406_v27 = vmul.f32 %v3830_v23, %v2404_v50  ;;  %vm2411_vm6 = vweird.f32 %v3830_v23 }
 0x7d8   : > { %v2426_v25 = vmul.f32 %v3832_v16, %v2424_v9  ;;  %vm2412_vm8 = vmor %vm2410_vm7, %vm2411_vm6  ;;  %vm2431_vm10 = vweird.f32 %v3832_v16 }
 0x7d9   : > { %v2407_v43 = vsub.f32 1.0, %v2406_v27  ;;  %vm2432_vm12 = vmor %vm2430_vm11, %vm2431_vm10 }
 0x7da   : > { %v2427_v37 = vsub.f32 1.0, %v2426_v25 }
 0x7db   : > { %v2408_v42 = vmul.f32 %v3830_v23, %v2407_v43 }
 0x7dc   : > { %v2428_v36 = vmul.f32 %v3832_v16, %v2427_v37 }
 0x7dd   : > { %v2409_v45 = vadd.f32 %v3830_v23, %v2408_v42  ;;  %v1020_v42 = vld [vmem:[%s1019_s9] sm:$0x7]  ;;  %s1088_s9 = sadd.s32 105, %s4106_s18 }
 0x7de   : > { %v2429_v8 = vadd.f32 %v3832_v16, %v2428_v36  ;;  %v1036_v36 = vld [vmem:[%s1035_s23] sm:$0x7]  ;;  %1022 = vst.msk [vmem:[#allocation3 + $0x120] ss:$8 sm:$0x7] %vm4262_vm0, %v1020_v42  ;;  %s5589_s14 = sld [smem:[#allocation6 + %s1088_s9]] }
 0x7df   : > { %v2413_v52 = vsel %vm2412_vm8, %v3830_v23, %v2409_v45  ;;  %v2451_v23 = vld [vmem:[#allocation3 + $0x110] sm:$0xff]  ;;  %1038 = vst.msk [vmem:[#allocation3 + $0x122] ss:$8 sm:$0x7] %vm4262_vm0, %v1036_v36  ;;  %s5592_s23 = sld [smem:[#allocation6 + %s1096_s22]]  ;;  %s1122_s9 = smul.u32 3, %s5601_s28 }
 0x7e0   : > { %v2418_v39 = vsel %vm2415_vm9, %v2417_v51, %v2413_v52  ;;  %v2433_v63 = vsel %vm2432_vm12, %v3832_v16, %v2429_v8  ;;  %v1044_v51 = vld [vmem:[%s1043_s5] sm:$0x7]  ;;  %s5598_s5 = sld [smem:[#allocation6 + %s1112_s26]]  ;;  %s1208_s28 = sadd.s32 120, %s4106_s18 }
 0x7e1   : > { %v2441_v33 = vmul.f32 %v2440_v44, %v2418_v39  ;;  %v2438_v2 = vsel %vm2435_vm13, %v2437_v0, %v2433_v63  ;;  %v1052_v44 = vld [vmem:[%s1051_s10] sm:$0x7]  ;;  %1046 = vst.msk [vmem:[#allocation3 + $0x123] ss:$8 sm:$0x7] %vm4262_vm0, %v1044_v51  ;;  %s5605_s10 = sld [smem:[#allocation6 + %s1136_s24]] }
 0x7e2   : > { %v2444_v3 = vsub.f32 1.0, %v2438_v2  ;;  %v2446_v50 = vmul.f32 %v2438_v2, %v5306_v31  ;;  %v2450_v31 = vld [vmem:[#allocation3 + $0x108] sm:$0xff]  ;;  %1054 = vst.msk [vmem:[#allocation3 + $0x124] ss:$8 sm:$0x7] %vm4262_vm0, %v1052_v44  ;;  %s1193_s22 = sld [smem:[#allocation6 + %s1192_s11]] }
 0x7e3   : > { %v2442_v60 = vadd.f32 %v2441_v33, %v2360_v53  ;;  %v1060_v53 = vld [vmem:[%s1059_s30] sm:$0x7]  ;;  %s1106_s30 = smul.u32 3, %s5595_s27 }
 0x7e4   : > { %1062 = vst.msk [vmem:[#allocation3 + $0x125] ss:$8 sm:$0x7] %vm4262_vm0, %v1060_v53  ;;  %v1068_v33 = vld [vmem:[%s1067_s0] sm:$0x7]  ;;  %s1090_s25 = smul.u32 3, %s5589_s14  ;;  %s1083_s0 = scalar_lea.vmem %s5871_s1, %s1082_s20 }
 0x7e5   : > { %3833 = vtanh.f32 %v2442_v60  ;;  %1070 = vst.msk [vmem:[#allocation3 + $0x126] ss:$8 sm:$0x7] %vm4262_vm0, %v1068_v33  ;;  %s1098_s8 = smul.u32 3, %s5592_s23  ;;  %s1107_s6 = scalar_lea.vmem %s5871_s1, %s1106_s30 }
 0x7e6   : > { %s1114_s17 = smul.u32 3, %s5598_s5  ;;  %s1091_s29 = scalar_lea.vmem %s5871_s1, %s1090_s25 }
 0x7e7   : > { %s1099_s2 = scalar_lea.vmem %s5871_s1, %s1098_s8  ;;  %s1130_s14 = smul.u32 3, %s5603_s7  ;;  %v1092_v59 = vld [vmem:[%s1091_s29] sm:$0x7] }
 0x7e8   : > { %s1138_s27 = smul.u32 3, %s5605_s10  ;;  %s1115_s24 = scalar_lea.vmem %s5871_s1, %s1114_s17  ;;  %v1100_v36 = vld [vmem:[%s1099_s2] sm:$0x7]  ;;  %1094 = vst.msk [vmem:[#allocation3 + $0x139] ss:$8 sm:$0x7] %vm4262_vm0, %v1092_v59 }
 0x7e9   : > { %s1123_s25 = scalar_lea.vmem %s5871_s1, %s1122_s9  ;;  %s1131_s8 = scalar_lea.vmem %s5871_s1, %s1130_s14  ;;  %1102 = vst.msk [vmem:[#allocation3 + $0x13a] ss:$8 sm:$0x7] %vm4262_vm0, %v1100_v36  ;;  %v1116_v44 = vld [vmem:[%s1115_s24] sm:$0x7] }
 0x7ea   : > { %s1139_s21 = scalar_lea.vmem %s5871_s1, %s1138_s27  ;;  %v1124_v53 = vld [vmem:[%s1123_s25] sm:$0x7]  ;;  %1118 = vst.msk [vmem:[#allocation3 + $0x13c] ss:$8 sm:$0x7] %vm4262_vm0, %v1116_v44  ;;  %s1144_s20 = sadd.s32 112, %s4106_s18 }
 0x7eb   : > { %v3834_v61 = vpop.eup %3833  ;;  %v1132_v33 = vld [vmem:[%s1131_s8] sm:$0x7]  ;;  %1126 = vst.msk [vmem:[#allocation3 + $0x13d] ss:$8 sm:$0x7] %vm4262_vm0, %v1124_v53  ;;  %s1152_s25 = sadd.s32 113, %s4106_s18 }
 0x7ec   : > { %v2445_v18 = vmul.f32 %v3834_v61, %v2444_v3  ;;  %v1140_v57 = vld [vmem:[%s1139_s21] sm:$0x7]  ;;  %1134 = vst.msk [vmem:[#allocation3 + $0x13e] ss:$8 sm:$0x7] %vm4262_vm0, %v1132_v33  ;;  %s1160_s7 = sadd.s32 114, %s4106_s18 }
 0x7ed   : > { %1142 = vst.msk [vmem:[#allocation3 + $0x13f] ss:$8 sm:$0x7] %vm4262_vm0, %v1140_v57  ;;  %s1145_s10 = sld [smem:[#allocation6 + %s1144_s20]]  ;;  %s1168_s8 = sadd.s32 115, %s4106_s18 }
 0x7ee   : > { %v5453_v12 = vadd.f32 %v2446_v50, %v2445_v18  ;;  %s1153_s30 = sld [smem:[#allocation6 + %s1152_s25]]  ;;  %s1200_s29 = sadd.s32 119, %s4106_s18 }
 0x7ef   : > { %s1161_s21 = sld [smem:[#allocation6 + %s1160_s7]]  ;;  %s1178_s5 = smul.u32 3, %s1177_s12 }
 0x7f0   : > { %v2448_v7 = vpack.c.bf16 %v5453_v12, %v5453_v12  ;;  %s1169_s17 = sld [smem:[#allocation6 + %s1168_s8]]  ;;  %s1232_s8 = sadd.s32 123, %s4106_s18 }
 0x7f1   : > { %s1201_s13 = sld [smem:[#allocation6 + %s1200_s29]]  ;;  %s1264_s29 = sadd.s32 127, %s4106_s18 }
 0x7f2   : > { %2449 = vst [vmem:[#allocation4 + $0x28] sm:$0xf] %v2448_v7  ;;  %2461 = vmatmul.bf16.vlgmr.msrb.gmra.mxu1 %v2448_v7  ;;  %2474 = vmatmul.bf16.vlgmr.msrb.gmra.mxu2 %v2448_v7  ;;  %s5894_s24 = sld [smem:[#allocation14_spill]] }
 0x7f3   : > { %2487 = vmatmul.bf16.vlgmr.msrb.gmra.mxu3 %v2448_v7  ;;  %2663 = vmatpush.bf16.msrb.mxu1 %v4056_v11  ;;  %s1146_s2 = smul.u32 3, %s1145_s10  ;;  %s1209_s7 = sld [smem:[#allocation6 + %s1208_s28]] }
 0x7f4   : > { %2729 = vmatpush.bf16.msrb.mxu2 %v4034_v4  ;;  %2742 = vmatpush.bf16.msrb.mxu3 %v4210_v49  ;;  %s1154_s14 = smul.u32 3, %s1153_s30  ;;  %s1248_s10 = sadd.s32 125, %s4106_s18 }
 0x7f5   : > { %s1162_s26 = smul.u32 3, %s1161_s21  ;;  %s1147_s19 = scalar_lea.vmem %s5871_s1, %s1146_s2 }
 0x7f6   : > { %s1170_s23 = smul.u32 3, %s1169_s17  ;;  %s1155_s20 = scalar_lea.vmem %s5871_s1, %s1154_s14 }
 0x7f7   : > { %2664 = vmatpush.bf16.msrb.mxu1 %v4074_v17  ;;  %s1163_s16 = scalar_lea.vmem %s5871_s1, %s1162_s26  ;;  %s1202_s21 = smul.u32 3, %s1201_s13 }
 0x7f8   : > { %2730 = vmatpush.bf16.msrb.mxu2 %v4040_v6  ;;  %2743 = vmatpush.bf16.msrb.mxu3 %v4250_v58  ;;  %s1171_s30 = scalar_lea.vmem %s5871_s1, %s1170_s23  ;;  %s1179_s2 = scalar_lea.vmem %s5871_s1, %s1178_s5 }
 0x7f9   : > { %s1203_s27 = scalar_lea.vmem %s5871_s1, %s1202_s21  ;;  %s1256_s21 = sadd.s32 126, %s4106_s18 }
 0x7fa   : > { %s1257_s12 = sld [smem:[#allocation6 + %s1256_s21]] }
 0x7fb   : > { %2665 = vmatpush.bf16.msrb.mxu1 %v4093_v22  ;;  %s5795_s14 = sld [smem:[#allocation6 + %s1264_s29]] }
 0x7fc   : > { %2731 = vmatpush.bf16.msrb.mxu2 %v4065_v14  ;;  %2744 = vmatpush.bf16.msrb.mxu3 %v4292_v5 }
 0x7ff   : > { %2666 = vmatpush.bf16.msrb.mxu1 %v4119_v29 }
 0x800   : > { %2732 = vmatpush.bf16.msrb.mxu2 %v4087_v20  ;;  %2745 = vmatpush.bf16.msrb.mxu3 %v4307_v10 }
 0x803   : > { %2667 = vmatpush.bf16.msrb.mxu1 %v4150_v35 }
 0x804   : > { %2733 = vmatpush.bf16.msrb.mxu2 %v4110_v26  ;;  %2746 = vmatpush.bf16.msrb.mxu3 %v4323_v15 }
 0x807   : > { %2668 = vmatpush.bf16.msrb.mxu1 %v4179_v41 }
 0x808   : > { %2734 = vmatpush.bf16.msrb.mxu2 %v4141_v32  ;;  %2747 = vmatpush.bf16.msrb.mxu3 %v4335_v19 }
 0x80b   : > { %2669 = vmatpush.bf16.msrb.mxu1 %v4205_v48 }
 0x80c   : > { %2735 = vmatpush.bf16.msrb.mxu2 %v4170_v38  ;;  %2748 = vmatpush.bf16.msrb.mxu3 %v4347_v24 }
 0x80f   : > { %2670 = vmatpush.bf16.msrb.mxu1 %v4244_v55 }
 0x810   : > { %2736 = vmatpush.bf16.msrb.mxu2 %v4200_v46  ;;  %2749 = vmatpush.bf16.msrb.mxu3 %v4359_v28 }
 0x86f   : > { %v2462_v9 = vpop.f32.mrf.mxu1 }
 0x870   : > { %v2492_v13 = vadd.f32 %v2462_v9, %v2450_v31  ;;  %v2452_v31 = vld [vmem:[#allocation3 + $0x118] sm:$0xff] }
 0x872   : > { %v3565_v21 = vmul.f32 -1.442695, %v2492_v13 }
 0x874   : > { %3835 = vpow2.f32 %v3565_v21 }
 0x875   : > { %v2475_v47 = vpop.f32.mrf.mxu2 }
 0x876   : > { %v2512_v16 = vadd.f32 %v2475_v47, %v2451_v23  ;;  %v2488_v27 = vpop.f32.mrf.mxu3 }
 0x877   : > { %v2464_v30 = vpop.f32.mrf.mxu1  ;;  %v2532_v7 = vadd.f32 %v5269_v54, %v2488_v27 }
 0x878   : > { %v3566_v25 = vmul.f32 -1.442695, %v2512_v16 }
 0x87a   : > { %v3836_v1 = vpop.eup %3835  ;;  %3837 = vpow2.f32 %v3566_v25 }
 0x87b   : > { %v2496_v43 = vadd.f32 1.0, %v3836_v1 }
 0x87d   : > { %3839 = vrcp.f32 %v2496_v43  ;;  %v2477_v34 = vpop.f32.mrf.mxu2  ;;  %v2508_v56 = vand.u32 2147483648, %v2496_v43  ;;  %v2506_v63 = vand.u32 2147483647, %v2496_v43  ;;  %vm2502_vm15 = vweird.f32 %v2496_v43 }
 0x87e   : > { %v2490_v40 = vpop.f32.mrf.mxu3 }
 0x87f   : > { %v2509_v61 = vor.u32 1.1754944e-38, %v2508_v56  ;;  %vm2507_vm2 = vcmp.eq.f32.partialorder %v2506_v63, 8.507059e+37 }
 0x880   : > { %v3838_v37 = vpop.eup %3837 }
 0x881   : > { %v2516_v45 = vadd.f32 1.0, %v3838_v37 }
 0x883   : > { %v3840_v52 = vpop.eup %3839  ;;  %3841 = vrcp.f32 %v2516_v45  ;;  %v2528_v21 = vand.u32 2147483648, %v2516_v45  ;;  %v2526_v47 = vand.u32 2147483647, %v2516_v45  ;;  %vm2522_vm4 = vweird.f32 %v2516_v45 }
 0x884   : > { %v2498_v39 = vmul.f32 %v3840_v52, %v2496_v43  ;;  %vm2503_vm14 = vweird.f32 %v3840_v52 }
 0x885   : > { %vm2504_vm1 = vmor %vm2502_vm15, %vm2503_vm14  ;;  %v2529_v25 = vor.u32 1.1754944e-38, %v2528_v21  ;;  %vm2527_vm6 = vcmp.eq.f32.partialorder %v2526_v47, 8.507059e+37 }
 0x886   : > { %v2499_v8 = vsub.f32 1.0, %v2498_v39 }
 0x888   : > { %v2500_v60 = vmul.f32 %v3840_v52, %v2499_v8 }
 0x889   : > { %v3842_v0 = vpop.eup %3841 }
 0x88a   : > { %v2518_v2 = vmul.f32 %v3842_v0, %v2516_v45  ;;  %v2501_v3 = vadd.f32 %v3840_v52, %v2500_v60  ;;  %vm2523_vm3 = vweird.f32 %v3842_v0  ;;  %v1108_v45 = vld [vmem:[%s1107_s6] sm:$0x7] }
 0x88b   : > { %vm2524_vm5 = vmor %vm2522_vm4, %vm2523_vm3  ;;  %1110 = vst.msk [vmem:[#allocation3 + $0x13b] ss:$8 sm:$0x7] %vm4262_vm0, %v1108_v45  ;;  %v3674_v45 = vld [vmem:[%s5874_s4 + $0x8] sm:$0xff] }
 0x88c   : > { %v2519_v18 = vsub.f32 1.0, %v2518_v2  ;;  %v2505_v50 = vsel %vm2504_vm1, %v3840_v52, %v2501_v3 }
 0x88d   : > { %v2510_v9 = vsel %vm2507_vm2, %v2509_v61, %v2505_v50 }
 0x88e   : > { %v2520_v13 = vmul.f32 %v3842_v0, %v2519_v18  ;;  %v2533_v23 = vmul.f32 %v2532_v7, %v2510_v9  ;;  %v5662_v7 = vld [vmem:[%s5873_s3] ss:$0 sm:$0xff]  ;;  %v2544_v9 = vld [vmem:[#allocation3 + $0x130] sm:$0xff] }
 0x890   : > { %v2534_v16 = vadd.f32 %v2533_v23, %v2452_v31  ;;  %v2521_v30 = vadd.f32 %v3842_v0, %v2520_v13 }
 0x892   : > { %3843 = vtanh.f32 %v2534_v16  ;;  %v2525_v1 = vsel %vm2524_vm5, %v3842_v0, %v2521_v30 }
 0x893   : > { %v2530_v43 = vsel %vm2527_vm6, %v2529_v25, %v2525_v1 }
 0x894   : > { %v2536_v34 = vsub.f32 1.0, %v2530_v43  ;;  %v2538_v54 = vmul.f32 %v2530_v43, %v5453_v12  ;;  %v1084_v12 = vld [vmem:[%s1083_s0] sm:$0x7]  ;;  %s1184_s0 = sadd.s32 117, %s4106_s18 }
 0x895   : > { %1086 = vst.msk [vmem:[#allocation3 + $0x138] ss:$8 sm:$0x7] %vm4262_vm0, %v1084_v12  ;;  %s1185_s9 = sld [smem:[#allocation6 + %s1184_s0]]  ;;  %s1194_s0 = smul.u32 3, %s1193_s22 }
 0x897   : > { %s1195_s23 = scalar_lea.vmem %s5871_s1, %s1194_s0  ;;  %s1240_s0 = sadd.s32 124, %s4106_s18 }
 0x898   : > { %v3844_v40 = vpop.eup %3843  ;;  %s1241_s17 = sld [smem:[#allocation6 + %s1240_s0]] }
 0x899   : > { %v2537_v37 = vmul.f32 %v3844_v40, %v2536_v34 }
 0x89b   : > { %v5555_v27 = vadd.f32 %v2538_v54, %v2537_v37  ;;  %s1186_s25 = smul.u32 3, %s1185_s9 }
 0x89d   : > { %v2540_v42 = vpack.c.bf16 %v5555_v27, %v5555_v27  ;;  %s1187_s9 = scalar_lea.vmem %s5871_s1, %s1186_s25  ;;  %s1224_s25 = sadd.s32 122, %s4106_s18 }
 0x89e   : > { %s1225_s11 = sld [smem:[#allocation6 + %s1224_s25]] }
 0x89f   : > { %2541 = vst [vmem:[#allocation4 + $0x2c] sm:$0xf] %v2540_v42  ;;  %2553 = vmatmul.bf16.vlgmr.msra.gmra.mxu0 %v2540_v42  ;;  %2566 = vmatmul.bf16.vlgmr.msra.gmra.mxu1 %v2540_v42 }
 0x8a0   : > { %2579 = vmatmul.bf16.vlgmr.msra.gmra.mxu2 %v2540_v42  ;;  %2755 = vmatpush.bf16.msra.mxu0 %v4056_v11 }
 0x8a1   : > { %2821 = vmatpush.bf16.msra.mxu1 %v4034_v4  ;;  %2834 = vmatpush.bf16.msra.mxu2 %v4210_v49  ;;  %v2542_v4 = vld [vmem:[#allocation3 + $0x120] sm:$0xff] }
 0x8a4   : > { %2756 = vmatpush.bf16.msra.mxu0 %v4074_v17  ;;  %s1226_s26 = smul.u32 3, %s1225_s11 }
 0x8a5   : > { %2822 = vmatpush.bf16.msra.mxu1 %v4040_v6  ;;  %2835 = vmatpush.bf16.msra.mxu2 %v4250_v58  ;;  %v2543_v6 = vld [vmem:[#allocation3 + $0x128] sm:$0xff] }
 0x8a8   : > { %2757 = vmatpush.bf16.msra.mxu0 %v4093_v22 }
 0x8a9   : > { %2823 = vmatpush.bf16.msra.mxu1 %v4065_v14  ;;  %2836 = vmatpush.bf16.msra.mxu2 %v4292_v5 }
 0x8ac   : > { %2758 = vmatpush.bf16.msra.mxu0 %v4119_v29 }
 0x8ad   : > { %2824 = vmatpush.bf16.msra.mxu1 %v4087_v20  ;;  %2837 = vmatpush.bf16.msra.mxu2 %v4307_v10 }
 0x8b0   : > { %2759 = vmatpush.bf16.msra.mxu0 %v4150_v35 }
 0x8b1   : > { %2825 = vmatpush.bf16.msra.mxu1 %v4110_v26  ;;  %2838 = vmatpush.bf16.msra.mxu2 %v4323_v15 }
 0x8b4   : > { %2760 = vmatpush.bf16.msra.mxu0 %v4179_v41 }
 0x8b5   : > { %2826 = vmatpush.bf16.msra.mxu1 %v4141_v32  ;;  %2839 = vmatpush.bf16.msra.mxu2 %v4335_v19 }
 0x8b8   : > { %2761 = vmatpush.bf16.msra.mxu0 %v4205_v48 }
 0x8b9   : > { %2827 = vmatpush.bf16.msra.mxu1 %v4170_v38  ;;  %2840 = vmatpush.bf16.msra.mxu2 %v4347_v24 }
 0x8bc   : > { %2762 = vmatpush.bf16.msra.mxu0 %v4244_v55 }
 0x8bd   : > { %2828 = vmatpush.bf16.msra.mxu1 %v4200_v46  ;;  %2841 = vmatpush.bf16.msra.mxu2 %v4359_v28 }
 0x91c   : > { %v2554_v14 = vpop.f32.mrf.mxu0  ;;  %v2567_v20 = vpop.f32.mrf.mxu1 }
 0x91d   : > { %v2584_v26 = vadd.f32 %v2554_v14, %v2542_v4  ;;  %v2604_v32 = vadd.f32 %v2567_v20, %v2543_v6 }
 0x91f   : > { %v3567_v38 = vmul.f32 -1.442695, %v2584_v26  ;;  %v3568_v46 = vmul.f32 -1.442695, %v2604_v32 }
 0x921   : > { %3845 = vpow2.f32 %v3567_v38  ;;  %v3678_v38 = vld [vmem:[%s5874_s4 + $0x28] sm:$0xff] }
 0x922   : > { %3847 = vpow2.f32 %v3568_v46 }
 0x923   : > { %v2580_v49 = vpop.f32.mrf.mxu2 }
 0x924   : > { %v2556_v58 = vpop.f32.mrf.mxu0  ;;  %v2569_v5 = vpop.f32.mrf.mxu1  ;;  %v2624_v31 = vadd.f32 %v5662_v7, %v2580_v49 }
 0x925   : > { %v3677_v58 = vld [vmem:[%s5874_s4 + $0x20] sm:$0xff] }
 0x927   : > { %v3846_v10 = vpop.eup %3845 }
 0x928   : > { %v3848_v15 = vpop.eup %3847  ;;  %v2588_v19 = vadd.f32 1.0, %v3846_v10 }
 0x929   : > { %v5611_v24 = vadd.f32 1.0, %v3848_v15 }
 0x92a   : > { %3849 = vrcp.f32 %v2588_v19  ;;  %v2600_v63 = vand.u32 2147483648, %v2588_v19  ;;  %v2598_v2 = vand.u32 2147483647, %v2588_v19  ;;  %vm2594_vm8 = vweird.f32 %v2588_v19 }
 0x92b   : > { %3851 = vrcp.f32 %v5611_v24  ;;  %v2582_v28 = vpop.f32.mrf.mxu2  ;;  %v2620_v23 = vand.u32 2147483648, %v5611_v24  ;;  %vm2614_vm12 = vweird.f32 %v5611_v24  ;;  %v2618_v16 = vand.u32 2147483647, %v5611_v24 }
 0x92c   : > { %v2601_v18 = vor.u32 1.1754944e-38, %v2600_v63  ;;  %vm2599_vm10 = vcmp.eq.f32.partialorder %v2598_v2, 8.507059e+37  ;;  %v3675_v28 = vld [vmem:[%s5874_s4 + $0x10] sm:$0xff] }
 0x92d   : > { %v2621_v1 = vor.u32 1.1754944e-38, %v2620_v23  ;;  %vm2619_vm14 = vcmp.eq.f32.partialorder %v2618_v16, 8.507059e+37 }
 0x930   : > { %v3850_v51 = vpop.eup %3849 }
 0x931   : > { %v3852_v52 = vpop.eup %3851  ;;  %v2590_v39 = vmul.f32 %v3850_v51, %v2588_v19  ;;  %vm2595_vm7 = vweird.f32 %v3850_v51  ;;  %v3676_v19 = vld [vmem:[%s5874_s4 + $0x18] sm:$0xff] }
 0x932   : > { %v2610_v8 = vmul.f32 %v3852_v52, %v5611_v24  ;;  %vm2596_vm9 = vmor %vm2594_vm8, %vm2595_vm7  ;;  %vm2615_vm11 = vweird.f32 %v3852_v52 }
 0x933   : > { %v2591_v56 = vsub.f32 1.0, %v2590_v39  ;;  %vm2616_vm13 = vmor %vm2614_vm12, %vm2615_vm11 }
 0x934   : > { %v2611_v60 = vsub.f32 1.0, %v2610_v8  ;;  %v3673_v8 = vld [vmem:[%s5874_s4] sm:$0xff] }
 0x935   : > { %v2592_v0 = vmul.f32 %v3850_v51, %v2591_v56 }
 0x936   : > { %v2612_v3 = vmul.f32 %v3852_v52, %v2611_v60 }
 0x937   : > { %v2593_v61 = vadd.f32 %v3850_v51, %v2592_v0  ;;  %v2636_v0 = vld [vmem:[#allocation3 + $0x148] sm:$0xff] }
 0x938   : > { %v2613_v21 = vadd.f32 %v3852_v52, %v2612_v3 }
 0x939   : > { %v2597_v50 = vsel %vm2596_vm9, %v3850_v51, %v2593_v61 }
 0x93a   : > { %v2602_v13 = vsel %vm2599_vm10, %v2601_v18, %v2597_v50  ;;  %v2617_v25 = vsel %vm2616_vm13, %v3852_v52, %v2613_v21 }
 0x93b   : > { %v2625_v47 = vmul.f32 %v2624_v31, %v2602_v13  ;;  %v2622_v43 = vsel %vm2619_vm14, %v2621_v1, %v2617_v25  ;;  %v3665_v1 = vld [vmem:[#allocation4] sm:$0xff] }
 0x93c   : > { %v2628_v34 = vsub.f32 1.0, %v2622_v43  ;;  %v2630_v54 = vmul.f32 %v2622_v43, %v5555_v27  ;;  %v2635_v27 = vld [vmem:[#allocation3 + $0x140] sm:$0xff]  ;;  %v3666_v43 = vld [vmem:[#allocation4 + $0x8] sm:$0xff] }
 0x93d   : > { %v2626_v30 = vadd.f32 %v2625_v47, %v2544_v9 }
 0x93f   : > { %3853 = vtanh.f32 %v2626_v30 }
 0x945   : > { %v3854_v40 = vpop.eup %3853 }
 0x946   : > { %v2629_v37 = vmul.f32 %v3854_v40, %v2628_v34  ;;  %v3667_v34 = vld [vmem:[#allocation4 + $0x10] sm:$0xff]  ;;  %v3668_v40 = vld [vmem:[#allocation4 + $0x18] sm:$0xff] }
 0x948   : > { %v5669_v42 = vadd.f32 %v2630_v54, %v2629_v37  ;;  %v3669_v37 = vld [vmem:[#allocation4 + $0x20] sm:$0xff]  ;;  %v1148_v54 = vld [vmem:[%s1147_s19] sm:$0x7]  ;;  %s1242_s19 = smul.u32 3, %s1241_s17 }
 0x949   : > { %1150 = vst.msk [vmem:[#allocation3 + $0x150] ss:$8 sm:$0x7] %vm4262_vm0, %v1148_v54 }
 0x94a   : > { %v2632_v4 = vpack.c.bf16 %v5669_v42, %v5669_v42  ;;  %s1243_s17 = scalar_lea.vmem %s5871_s1, %s1242_s19 }
 0x94c   : > { %2633 = vst [vmem:[#allocation4 + $0x30] sm:$0xf] %v2632_v4  ;;  %2645 = vmatmul.bf16.vlgmr.msra.gmra.mxu3 %v2632_v4  ;;  %2658 = vmatmul.bf16.vlgmr.msrb.gmra.mxu0 %v2632_v4 }
 0x94d   : > { %2671 = vmatmul.bf16.vlgmr.msrb.gmra.mxu1 %v2632_v4  ;;  %2847 = vmatpush.bf16.msra.mxu3 %v4056_v11  ;;  %v2634_v11 = vld [vmem:[#allocation3 + $0x138] sm:$0xff] }
 0x94e   : > { %v1164_v4 = vld [vmem:[%s1163_s16] sm:$0x7] }
 0x94f   : > { %1166 = vst.msk [vmem:[#allocation3 + $0x152] ss:$8 sm:$0x7] %vm4262_vm0, %v1164_v4 }
 0x951   : > { %2848 = vmatpush.bf16.msra.mxu3 %v4074_v17  ;;  %v3680_v17 = vld [vmem:[%s5874_s4 + $0x38] sm:$0xff] }
 0x952   : > { %3043 = vmatpush.bf16.msrb.mxu0 %v3680_v17 }
 0x955   : > { %2849 = vmatpush.bf16.msra.mxu3 %v4093_v22 }
 0x959   : > { %2850 = vmatpush.bf16.msra.mxu3 %v4119_v29 }
 0x95d   : > { %2851 = vmatpush.bf16.msra.mxu3 %v4150_v35  ;;  %v3679_v35 = vld [vmem:[%s5874_s4 + $0x30] sm:$0xff] }
 0x95e   : > { %3044 = vmatpush.bf16.msrb.mxu0 %v3679_v35 }
 0x961   : > { %2852 = vmatpush.bf16.msra.mxu3 %v4179_v41 }
 0x962   : > { %3045 = vmatpush.bf16.msrb.mxu0 %v3678_v38 }
 0x965   : > { %2853 = vmatpush.bf16.msra.mxu3 %v4205_v48 }
 0x966   : > { %3046 = vmatpush.bf16.msrb.mxu0 %v3677_v58 }
 0x969   : > { %2854 = vmatpush.bf16.msra.mxu3 %v4244_v55 }
 0x96a   : > { %3047 = vmatpush.bf16.msrb.mxu0 %v3676_v19 }
 0x96e   : > { %3048 = vmatpush.bf16.msrb.mxu0 %v3675_v28 }
 0x972   : > { %3049 = vmatpush.bf16.msrb.mxu0 %v3674_v45 }
 0x976   : > { %3050 = vmatpush.bf16.msrb.mxu0 %v3673_v8 }
 0x9c9   : > { %v2659_v6 = vpop.f32.mrf.mxu0 }
 0x9ca   : > { %v2696_v14 = vadd.f32 %v2659_v6, %v2635_v27  ;;  %v2672_v20 = vpop.f32.mrf.mxu1  ;;  %v1172_v27 = vld [vmem:[%s1171_s30] sm:$0x7]  ;;  %s1233_s30 = sld [smem:[#allocation6 + %s1232_s8]]  ;;  %s1258_s8 = smul.u32 3, %s1257_s12 }
 0x9cb   : > { %v2716_v57 = vadd.f32 %v5662_v7, %v2672_v20  ;;  %v1180_v6 = vld [vmem:[%s1179_s2] sm:$0x7]  ;;  %1174 = vst.msk [vmem:[#allocation3 + $0x153] ss:$8 sm:$0x7] %vm4262_vm0, %v1172_v27  ;;  %s1249_s2 = sld [smem:[#allocation6 + %s1248_s10]] }
 0x9cc   : > { %v3570_v26 = vmul.f32 -1.442695, %v2696_v14  ;;  %v3670_v14 = vld [vmem:[#allocation4 + $0x28] sm:$0xff]  ;;  %v1188_v20 = vld [vmem:[%s1187_s9] sm:$0x7]  ;;  %s1210_s9 = smul.u32 3, %s1209_s7  ;;  %s1227_s7 = scalar_lea.vmem %s5871_s1, %s1226_s26 }
 0x9cd   : > { %1182 = vst.msk [vmem:[#allocation3 + $0x154] ss:$8 sm:$0x7] %vm4262_vm0, %v1180_v6  ;;  %s1266_s10 = smul.u32 3, %s5795_s14 }
 0x9ce   : > { %3855 = vpow2.f32 %v3570_v26  ;;  %v1196_v26 = vld [vmem:[%s1195_s23] sm:$0x7]  ;;  %1190 = vst.msk [vmem:[#allocation3 + $0x155] ss:$8 sm:$0x7] %vm4262_vm0, %v1188_v20 }
 0x9cf   : > { %v2646_v22 = vpop.f32.mrf.mxu3  ;;  %1198 = vst.msk [vmem:[#allocation3 + $0x156] ss:$8 sm:$0x7] %vm4262_vm0, %v1196_v26  ;;  %s1267_s13 = scalar_lea.vmem %s5871_s1, %s1266_s10 }
 0x9d0   : > { %v2676_v29 = vadd.f32 %v2646_v22, %v2634_v11  ;;  %v1204_v11 = vld [vmem:[%s1203_s27] sm:$0x7]  ;;  %s1234_s23 = smul.u32 3, %s1233_s30  ;;  %s1211_s27 = scalar_lea.vmem %s5871_s1, %s1210_s9 }
 0x9d1   : > { %v2661_v41 = vpop.f32.mrf.mxu0  ;;  %1206 = vst.msk [vmem:[#allocation3 + $0x157] ss:$8 sm:$0x7] %vm4262_vm0, %v1204_v11  ;;  %s1250_s28 = smul.u32 3, %s1249_s2 }
 0x9d2   : > { %v3569_v48 = vmul.f32 -1.442695, %v2676_v29  ;;  %v2674_v55 = vpop.f32.mrf.mxu1  ;;  %s1235_s11 = scalar_lea.vmem %s5871_s1, %s1234_s23 }
 0x9d3   : > { %s1251_s12 = scalar_lea.vmem %s5871_s1, %s1250_s28 }
 0x9d4   : > { %v3856_v32 = vpop.eup %3855  ;;  %3857 = vpow2.f32 %v3569_v48 }
 0x9d5   : > { %v2700_v46 = vadd.f32 1.0, %v3856_v32 }
 0x9d7   : > { %v2648_v49 = vpop.f32.mrf.mxu3  ;;  %3859 = vrcp.f32 %v2700_v46  ;;  %v2712_v3 = vand.u32 2147483648, %v2700_v46  ;;  %vm2706_vm5 = vweird.f32 %v2700_v46  ;;  %v2710_v18 = vand.u32 2147483647, %v2700_v46 }
 0x9d9   : > { %v2713_v9 = vor.u32 1.1754944e-38, %v2712_v3  ;;  %vm2711_vm7 = vcmp.eq.f32.partialorder %v2710_v18, 8.507059e+37 }
 0x9da   : > { %v3858_v5 = vpop.eup %3857 }
 0x9db   : > { %v2680_v10 = vadd.f32 1.0, %v3858_v5 }
 0x9dd   : > { %3861 = vrcp.f32 %v2680_v10  ;;  %v3860_v15 = vpop.eup %3859  ;;  %v2692_v44 = vand.u32 2147483648, %v2680_v10  ;;  %v2690_v39 = vand.u32 2147483647, %v2680_v10  ;;  %vm2686_vm1 = vweird.f32 %v2680_v10 }
 0x9de   : > { %v2702_v24 = vmul.f32 %v3860_v15, %v2700_v46  ;;  %vm2707_vm4 = vweird.f32 %v3860_v15 }
 0x9df   : > { %v2693_v56 = vor.u32 1.1754944e-38, %v2692_v44  ;;  %vm2691_vm3 = vcmp.eq.f32.partialorder %v2690_v39, 8.507059e+37  ;;  %vm2708_vm6 = vmor %vm2706_vm5, %vm2707_vm4 }
 0x9e0   : > { %v2703_v36 = vsub.f32 1.0, %v2702_v24 }
 0x9e2   : > { %v2704_v53 = vmul.f32 %v3860_v15, %v2703_v36 }
 0x9e3   : > { %v3862_v12 = vpop.eup %3861 }
 0x9e4   : > { %v2682_v59 = vmul.f32 %v3862_v12, %v2680_v10  ;;  %vm2687_vm15 = vweird.f32 %v3862_v12  ;;  %v2705_v2 = vadd.f32 %v3860_v15, %v2704_v53  ;;  %v5762_v10 = vld [vmem:[%s5894_s24] ss:$0 sm:$0xff] }
 0x9e5   : > { %vm2688_vm2 = vmor %vm2686_vm1, %vm2687_vm15 }
 0x9e6   : > { %v2683_v51 = vsub.f32 1.0, %v2682_v59  ;;  %v2709_v31 = vsel %vm2708_vm6, %v3860_v15, %v2705_v2 }
 0x9e7   : > { %v2714_v13 = vsel %vm2711_vm7, %v2713_v9, %v2709_v31 }
 0x9e8   : > { %v2684_v52 = vmul.f32 %v3862_v12, %v2683_v51  ;;  %v2720_v21 = vsub.f32 1.0, %v2714_v13  ;;  %v2722_v16 = vmul.f32 %v2714_v13, %v5669_v42  ;;  %v1156_v42 = vld [vmem:[%s1155_s20] sm:$0x7]  ;;  %s1216_s20 = sadd.s32 121, %s4106_s18 }
 0x9e9   : > { %1158 = vst.msk [vmem:[#allocation3 + $0x151] ss:$8 sm:$0x7] %vm4262_vm0, %v1156_v42  ;;  %s1217_s16 = sld [smem:[#allocation6 + %s1216_s20]] }
 0x9ea   : > { %v2685_v33 = vadd.f32 %v3862_v12, %v2684_v52 }
 0x9ec   : > { %v2689_v60 = vsel %vm2688_vm2, %v3862_v12, %v2685_v33 }
 0x9ed   : > { %v2694_v63 = vsel %vm2691_vm3, %v2693_v56, %v2689_v60 }
 0x9ee   : > { %v2717_v61 = vmul.f32 %v2716_v57, %v2694_v63 }
 0x9ef   : > { %s1218_s22 = smul.u32 3, %s1217_s16 }
 0x9f0   : > { %v2718_v50 = vadd.f32 %v2717_v61, %v2636_v0  ;;  %v2726_v29 = vld [vmem:[#allocation3 + $0x150] sm:$0xff]  ;;  %v2727_v35 = vld [vmem:[#allocation3 + $0x158] sm:$0xff] }
 0x9f1   : > { %s1219_s24 = scalar_lea.vmem %s5871_s1, %s1218_s22  ;;  %s1259_s22 = scalar_lea.vmem %s5871_s1, %s1258_s8 }
 0x9f2   : > { %3863 = vtanh.f32 %v2718_v50  ;;  %v2728_v50 = vld [vmem:[#allocation3 + $0x160] sm:$0xff] }
 0x9f8   : > { %v3864_v23 = vpop.eup %3863 }
 0x9f9   : > { %v2721_v47 = vmul.f32 %v3864_v23, %v2720_v21 }
 0x9fb   : > { %v5707_v30 = vadd.f32 %v2722_v16, %v2721_v47 }
 0x9fd   : > { %v2724_v25 = vpack.c.bf16 %v5707_v30, %v5707_v30 }
 0x9ff   : > { %2725 = vst [vmem:[#allocation4 + $0x34] sm:$0xf] %v2724_v25  ;;  %2737 = vmatmul.bf16.vlgmr.msrb.gmra.mxu2 %v2724_v25  ;;  %2750 = vmatmul.bf16.vlgmr.msrb.gmra.mxu3 %v2724_v25 }
 0xa00   : > { %2763 = vmatmul.bf16.vlgmr.msra.gmra.mxu0 %v2724_v25 }
 0xa06   : > { %v3671_v17 = vld [vmem:[#allocation4 + $0x30] sm:$0xff] }
 0xa10   : > { %3051 = vmatmul.bf16.vlgmr.msrb.gmra.mxu0 %v3665_v1 }
 0xa20   : > { %3056 = vmatmul.bf16.gmra.mxu0 %v3666_v43 }
 0xa30   : > { %3061 = vmatmul.bf16.gmra.mxu0 %v3667_v34 }
 0xa40   : > { %3066 = vmatmul.bf16.gmra.mxu0 %v3668_v40 }
 0xa50   : > { %3071 = vmatmul.bf16.gmra.mxu0 %v3669_v37 }
 0xa60   : > { %3076 = vmatmul.bf16.gmra.mxu0 %v3670_v14 }
 0xa70   : > { %3081 = vmatmul.bf16.gmra.mxu0 %v3671_v17 }
 0xa7d   : > { %v2764_v22 = vpop.f32.mrf.mxu0 }
 0xa7e   : > { %v2808_v61 = vadd.f32 %v5662_v7, %v2764_v22 }
 0xa82   : > { %v2738_v41 = vpop.f32.mrf.mxu2  ;;  %v2751_v48 = vpop.f32.mrf.mxu3 }
 0xa83   : > { %v2768_v55 = vadd.f32 %v2738_v41, %v2726_v29  ;;  %v2788_v32 = vadd.f32 %v2751_v48, %v2727_v35 }
 0xa85   : > { %v3571_v38 = vmul.f32 -1.442695, %v2768_v55  ;;  %v3572_v46 = vmul.f32 -1.442695, %v2788_v32  ;;  %v2766_v49 = vpop.f32.mrf.mxu0  ;;  %v1212_v55 = vld [vmem:[%s1211_s27] sm:$0x7] }
 0xa86   : > { %v1220_v32 = vld [vmem:[%s1219_s24] sm:$0x7]  ;;  %1214 = vst.msk [vmem:[#allocation3 + $0x168] ss:$8 sm:$0x7] %vm4262_vm0, %v1212_v55 }
 0xa87   : > { %3865 = vpow2.f32 %v3571_v38  ;;  %v1228_v38 = vld [vmem:[%s1227_s7] sm:$0x7]  ;;  %1222 = vst.msk [vmem:[#allocation3 + $0x169] ss:$8 sm:$0x7] %vm4262_vm0, %v1220_v32 }
 0xa88   : > { %3867 = vpow2.f32 %v3572_v46  ;;  %v1236_v46 = vld [vmem:[%s1235_s11] sm:$0x7]  ;;  %1230 = vst.msk [vmem:[#allocation3 + $0x16a] ss:$8 sm:$0x7] %vm4262_vm0, %v1228_v38 }
 0xa89   : > { %v1244_v49 = vld [vmem:[%s1243_s17] sm:$0x7]  ;;  %1238 = vst.msk [vmem:[#allocation3 + $0x16b] ss:$8 sm:$0x7] %vm4262_vm0, %v1236_v46 }
 0xa8a   : > { %v2740_v58 = vpop.f32.mrf.mxu2  ;;  %v2753_v5 = vpop.f32.mrf.mxu3  ;;  %1246 = vst.msk [vmem:[#allocation3 + $0x16c] ss:$8 sm:$0x7] %vm4262_vm0, %v1244_v49 }
 0xa8b   : > { %v1252_v58 = vld [vmem:[%s1251_s12] sm:$0x7] }
 0xa8c   : > { %1254 = vst.msk [vmem:[#allocation3 + $0x16d] ss:$8 sm:$0x7] %vm4262_vm0, %v1252_v58 }
 0xa8d   : > { %v3866_v15 = vpop.eup %3865  ;;  %v3052_v19 = vpop.f32.mrf.mxu0 }
 0xa8e   : > { %v3868_v24 = vpop.eup %3867  ;;  %v2772_v28 = vadd.f32 1.0, %v3866_v15  ;;  %v3053_v12 = vadd.f32 %v5762_v10, %v3052_v19  ;;  %v1260_v15 = vld [vmem:[%s1259_s22] sm:$0x7] }
 0xa8f   : > { %v2792_v59 = vadd.f32 1.0, %v3868_v24  ;;  %v1268_v24 = vld [vmem:[%s1267_s13] sm:$0x7]  ;;  %1262 = vst.msk [vmem:[#allocation3 + $0x16e] ss:$8 sm:$0x7] %vm4262_vm0, %v1260_v15 }
 0xa90   : > { %3869 = vrcp.f32 %v2772_v28  ;;  %3092 = vst [vmem:[%s4023_s15] sm:$0xff] %v3053_v12  ;;  %v2784_v8 = vand.u32 2147483648, %v2772_v28  ;;  %v2782_v57 = vand.u32 2147483647, %v2772_v28  ;;  %vm2778_vm9 = vweird.f32 %v2772_v28 }
 0xa91   : > { %3871 = vrcp.f32 %v2792_v59  ;;  %v2804_v21 = vand.u32 2147483648, %v2792_v59  ;;  %vm2798_vm13 = vweird.f32 %v2792_v59  ;;  %v2802_v23 = vand.u32 2147483647, %v2792_v59  ;;  %1270 = vst.msk [vmem:[#allocation3 + $0x16f] ss:$8 sm:$0x7] %vm4262_vm0, %v1268_v24 }
 0xa92   : > { %v2785_v2 = vor.u32 1.1754944e-38, %v2784_v8  ;;  %vm2783_vm11 = vcmp.eq.f32.partialorder %v2782_v57, 8.507059e+37 }
 0xa93   : > { %v2805_v25 = vor.u32 1.1754944e-38, %v2804_v21  ;;  %vm2803_vm15 = vcmp.eq.f32.partialorder %v2802_v23, 8.507059e+37 }
 0xa95   : > { %v3054_v36 = vpop.f32.mrf.mxu0 }
 0xa96   : > { %v3870_v45 = vpop.eup %3869  ;;  %v3055_v51 = vadd.f32 %v5762_v10, %v3054_v36 }
 0xa97   : > { %v3872_v44 = vpop.eup %3871  ;;  %v2774_v52 = vmul.f32 %v3870_v45, %v2772_v28  ;;  %vm2779_vm8 = vweird.f32 %v3870_v45 }
 0xa98   : > { %v2794_v39 = vmul.f32 %v3872_v44, %v2792_v59  ;;  %3093 = vst [vmem:[%s4023_s15 + $0x8] sm:$0xff] %v3055_v51  ;;  %vm2780_vm10 = vmor %vm2778_vm9, %vm2779_vm8  ;;  %vm2799_vm12 = vweird.f32 %v3872_v44  ;;  %v2819_v8 = vld [vmem:[#allocation3 + $0x170] sm:$0xff] }
 0xa99   : > { %v2775_v53 = vsub.f32 1.0, %v2774_v52  ;;  %vm2800_vm14 = vmor %vm2798_vm13, %vm2799_vm12 }
 0xa9a   : > { %v2795_v33 = vsub.f32 1.0, %v2794_v39 }
 0xa9b   : > { %v2776_v56 = vmul.f32 %v3870_v45, %v2775_v53 }
 0xa9c   : > { %v2796_v60 = vmul.f32 %v3872_v44, %v2795_v33 }
 0xa9d   : > { %v2777_v63 = vadd.f32 %v3870_v45, %v2776_v56  ;;  %v3057_v0 = vpop.f32.mrf.mxu0 }
 0xa9e   : > { %v3058_v3 = vadd.f32 %v5762_v10, %v3057_v0  ;;  %v2797_v9 = vadd.f32 %v3872_v44, %v2796_v60 }
 0xa9f   : > { %v2781_v18 = vsel %vm2780_vm10, %v3870_v45, %v2777_v63 }
 0xaa0   : > { %v2786_v31 = vsel %vm2783_vm11, %v2785_v2, %v2781_v18  ;;  %3094 = vst [vmem:[%s4023_s15 + $0x10] sm:$0xff] %v3058_v3  ;;  %v2801_v16 = vsel %vm2800_vm14, %v3872_v44, %v2797_v9  ;;  %v2818_v44 = vld [vmem:[#allocation3 + $0x168] sm:$0xff] }
 0xaa1   : > { %v2809_v13 = vmul.f32 %v2808_v61, %v2786_v31  ;;  %v2806_v34 = vsel %vm2803_vm15, %v2805_v25, %v2801_v16 }
 0xaa2   : > { %v2812_v40 = vsub.f32 1.0, %v2806_v34  ;;  %v2814_v42 = vmul.f32 %v2806_v34, %v5707_v30 }
 0xaa3   : > { %v2810_v47 = vadd.f32 %v2809_v13, %v2728_v50 }
 0xaa5   : > { %3873 = vtanh.f32 %v2810_v47  ;;  %v3059_v1 = vpop.f32.mrf.mxu0 }
 0xaa6   : > { %v3060_v43 = vadd.f32 %v5762_v10, %v3059_v1 }
 0xaa8   : > { %3095 = vst [vmem:[%s4023_s15 + $0x18] sm:$0xff] %v3060_v43 }
 0xaab   : > { %v3874_v37 = vpop.eup %3873 }
 0xaac   : > { %v2813_v54 = vmul.f32 %v3874_v37, %v2812_v40  ;;  %v2820_v37 = vld [vmem:[#allocation3 + $0x178] sm:$0xff] }
 0xaad   : > { %v3062_v4 = vpop.f32.mrf.mxu0 }
 0xaae   : > { %v3063_v27 = vadd.f32 %v5762_v10, %v3062_v4  ;;  %v5775_v6 = vadd.f32 %v2814_v42, %v2813_v54 }
 0xab0   : > { %3096 = vst [vmem:[%s4023_s15 + $0x20] sm:$0xff] %v3063_v27  ;;  %v2816_v14 = vpack.c.bf16 %v5775_v6, %v5775_v6 }
 0xab2   : > { %2817 = vst [vmem:[#allocation4 + $0x38] sm:$0xf] %v2816_v14  ;;  %2829 = vmatmul.bf16.vlgmr.msra.gmra.mxu1 %v2816_v14  ;;  %2842 = vmatmul.bf16.vlgmr.msra.gmra.mxu2 %v2816_v14 }
 0xab3   : > { %2855 = vmatmul.bf16.vlgmr.msra.gmra.mxu3 %v2816_v14 }
 0xab5   : > { %v3064_v30 = vpop.f32.mrf.mxu0 }
 0xab6   : > { %v3065_v20 = vadd.f32 %v5762_v10, %v3064_v30 }
 0xab8   : > { %3097 = vst [vmem:[%s4023_s15 + $0x28] sm:$0xff] %v3065_v20 }
 0xabd   : > { %v3067_v26 = vpop.f32.mrf.mxu0 }
 0xabe   : > { %v3068_v11 = vadd.f32 %v5762_v10, %v3067_v26 }
 0xac0   : > { %3098 = vst [vmem:[%s4023_s15 + $0x30] sm:$0xff] %v3068_v11 }
 0xac5   : > { %v3069_v17 = vpop.f32.mrf.mxu0 }
 0xac6   : > { %v3070_v22 = vadd.f32 %v5762_v10, %v3069_v17 }
 0xac8   : > { %3099 = vst [vmem:[%s4023_s15 + $0x38] sm:$0xff] %v3070_v22 }
 0xacd   : > { %v3072_v29 = vpop.f32.mrf.mxu0 }
 0xace   : > { %v3073_v35 = vadd.f32 %v5762_v10, %v3072_v29 }
 0xad0   : > { %3100 = vst [vmem:[%s4023_s15 + $0x40] sm:$0xff] %v3073_v35 }
 0xad5   : > { %v3074_v41 = vpop.f32.mrf.mxu0 }
 0xad6   : > { %v3075_v48 = vadd.f32 %v5762_v10, %v3074_v41 }
 0xad8   : > { %3101 = vst [vmem:[%s4023_s15 + $0x48] sm:$0xff] %v3075_v48 }
 0xadd   : > { %v3077_v5 = vpop.f32.mrf.mxu0 }
 0xade   : > { %v3078_v19 = vadd.f32 %v5762_v10, %v3077_v5 }
 0xae0   : > { %3102 = vst [vmem:[%s4023_s15 + $0x50] sm:$0xff] %v3078_v19 }
 0xae5   : > { %v3079_v28 = vpop.f32.mrf.mxu0 }
 0xae6   : > { %v3080_v12 = vadd.f32 %v5762_v10, %v3079_v28 }
 0xae8   : > { %3103 = vst [vmem:[%s4023_s15 + $0x58] sm:$0xff] %v3080_v12 }
 0xaed   : > { %v3082_v59 = vpop.f32.mrf.mxu0 }
 0xaee   : > { %v3083_v36 = vadd.f32 %v5762_v10, %v3082_v59 }
 0xaf0   : > { %3104 = vst [vmem:[%s4023_s15 + $0x60] sm:$0xff] %v3083_v36 }
 0xaf5   : > { %v3084_v45 = vpop.f32.mrf.mxu0 }
 0xaf6   : > { %v3085_v51 = vadd.f32 %v5762_v10, %v3084_v45 }
 0xaf8   : > { %3105 = vst [vmem:[%s4023_s15 + $0x68] sm:$0xff] %v3085_v51 }
 0xb2f   : > { %v2830_v52 = vpop.f32.mrf.mxu1 }
 0xb30   : > { %v2860_v39 = vadd.f32 %v2830_v52, %v2818_v44 }
 0xb32   : > { %v3573_v53 = vmul.f32 -1.442695, %v2860_v39 }
 0xb34   : > { %3875 = vpow2.f32 %v3573_v53 }
 0xb35   : > { %v2843_v62 = vpop.f32.mrf.mxu2 }
 0xb36   : > { %v2880_v33 = vadd.f32 %v2843_v62, %v2819_v8  ;;  %v2856_v56 = vpop.f32.mrf.mxu3 }
 0xb37   : > { %v2832_v57 = vpop.f32.mrf.mxu1  ;;  %v2900_v40 = vadd.f32 %v5662_v7, %v2856_v56 }
 0xb38   : > { %v3574_v60 = vmul.f32 -1.442695, %v2880_v33 }
 0xb3a   : > { %v3876_v63 = vpop.eup %3875  ;;  %3877 = vpow2.f32 %v3574_v60 }
 0xb3b   : > { %v2864_v0 = vadd.f32 1.0, %v3876_v63 }
 0xb3d   : > { %3879 = vrcp.f32 %v2864_v0  ;;  %v2845_v2 = vpop.f32.mrf.mxu2  ;;  %v2876_v13 = vand.u32 2147483648, %v2864_v0  ;;  %v2874_v23 = vand.u32 2147483647, %v2864_v0  ;;  %vm2870_vm1 = vweird.f32 %v2864_v0 }
 0xb3e   : > { %v2858_v3 = vpop.f32.mrf.mxu3 }
 0xb3f   : > { %v2877_v1 = vor.u32 1.1754944e-38, %v2876_v13  ;;  %vm2875_vm3 = vcmp.eq.f32.partialorder %v2874_v23, 8.507059e+37 }
 0xb40   : > { %v3878_v61 = vpop.eup %3877 }
 0xb41   : > { %v2884_v18 = vadd.f32 1.0, %v3878_v61 }
 0xb43   : > { %v3880_v50 = vpop.eup %3879  ;;  %3881 = vrcp.f32 %v2884_v18  ;;  %v2896_v4 = vand.u32 2147483648, %v2884_v18  ;;  %v2894_v14 = vand.u32 2147483647, %v2884_v18  ;;  %vm2890_vm5 = vweird.f32 %v2884_v18 }
 0xb44   : > { %v2866_v31 = vmul.f32 %v3880_v50, %v2864_v0  ;;  %vm2871_vm0 = vweird.f32 %v3880_v50 }
 0xb45   : > { %vm2872_vm2 = vmor %vm2870_vm1, %vm2871_vm0  ;;  %v2897_v26 = vor.u32 1.1754944e-38, %v2896_v4  ;;  %vm2895_vm7 = vcmp.eq.f32.partialorder %v2894_v14, 8.507059e+37 }
 0xb46   : > { %v2867_v9 = vsub.f32 1.0, %v2866_v31 }
 0xb48   : > { %v2868_v21 = vmul.f32 %v3880_v50, %v2867_v9 }
 0xb49   : > { %v3882_v47 = vpop.eup %3881 }
 0xb4a   : > { %v2886_v16 = vmul.f32 %v3882_v47, %v2884_v18  ;;  %v2869_v25 = vadd.f32 %v3880_v50, %v2868_v21  ;;  %vm2891_vm4 = vweird.f32 %v3882_v47 }
 0xb4b   : > { %vm2892_vm6 = vmor %vm2890_vm5, %vm2891_vm4 }
 0xb4c   : > { %v2887_v43 = vsub.f32 1.0, %v2886_v16  ;;  %v2873_v34 = vsel %vm2872_vm2, %v3880_v50, %v2869_v25 }
 0xb4d   : > { %v2878_v54 = vsel %vm2875_vm3, %v2877_v1, %v2873_v34 }
 0xb4e   : > { %v2888_v42 = vmul.f32 %v3882_v47, %v2887_v43  ;;  %v2901_v27 = vmul.f32 %v2900_v40, %v2878_v54 }
 0xb50   : > { %v2889_v30 = vadd.f32 %v3882_v47, %v2888_v42  ;;  %v2902_v20 = vadd.f32 %v2901_v27, %v2820_v37 }
 0xb52   : > { %v2893_v11 = vsel %vm2892_vm6, %v3882_v47, %v2889_v30  ;;  %3883 = vtanh.f32 %v2902_v20 }
 0xb53   : > { %v2898_v17 = vsel %vm2895_vm7, %v2897_v26, %v2893_v11 }
 0xb54   : > { %v2904_v22 = vsub.f32 1.0, %v2898_v17  ;;  %v2906_v35 = vmul.f32 %v2898_v17, %v5775_v6 }
 0xb58   : > { %v3884_v7 = vpop.eup %3883 }
 0xb59   : > { %v2905_v29 = vmul.f32 %v3884_v7, %v2904_v22 }
 0xb5b   : > { %v2907_v41 = vadd.f32 %v2906_v35, %v2905_v29 }
 0xb5d   : > { %v2908_v48 = vpack.c.bf16 %v2907_v41, %v2907_v41  ;;  %2910 = vst [vmem:[#allocation2] sm:$0xff] %v2907_v41 }
 0xb5f   : > { %2909 = vst [vmem:[#allocation4 + $0x3c] sm:$0xf] %v2908_v48 }
 0xb66   : > { %v3672_v55 = vld [vmem:[#allocation4 + $0x38] sm:$0xff] }
 0xb67   : > { %3086 = vmatmul.bf16.gmra.mxu0 %v3672_v55 }
 0xbe4   : > { %v3087_v32 = vpop.f32.mrf.mxu0 }
 0xbe5   : > { %v3088_v38 = vadd.f32 %v5762_v10, %v3087_v32 }
 0xbe7   : > { %3106 = vst [vmem:[%s4023_s15 + $0x70] sm:$0xff] %v3088_v38 }
 0xbec   : > { %v3089_v46 = vpop.f32.mrf.mxu0 }
 0xbed   : > { %v3090_v49 = vadd.f32 %v5762_v10, %v3089_v46 }
 0xbef   : > { %3107 = vst [vmem:[%s4023_s15 + $0x78] sm:$0xff] %v3090_v49 }
 0xbf0 PF: > { %s5895_s6 = sld [smem:[#allocation10_spill]] }
 0xbf1   : > { %s5896_s25 = sld [smem:[#allocation8_spill]] }
 0xbf2   : > { %s5897_s26 = sld [smem:[#allocation9_spill]] }
 0xbf3   : > { %s5898_s27 = sld [smem:[#allocation11_spill]] }
 0xbf4   : > { %s5899_s28 = sld [smem:[#allocation12_spill]] }
 0xbf6   : > { %s24_s29 = sadd.s32 1, %s5895_s6  }
 0xbf7   : > { %p21_p8 = scmp.ge.s32.totalorder %s24_s29, 6  }
 0xbf9   :  { %23 = sbr.rel (!%p21_p8) target bundleno = 11 (0xb), region = 326 }

</bundles_post_ra>
